<compile_context>
chip_gen: v7x
topology: tpu7x:2x2x1
jax: 0.10.0
libtpu: 0.0.40
codegen_flags: <defaults>
</compile_context>

<pallas_src>
import jax
import jax.numpy as jnp
from jax.experimental import pallas as pl
from jax.experimental.pallas import tpu as pltpu


def _make_fused_kernel(N, H, W, C, n_res):
    """Whole-module kernel: activations resident, one MXU matmul per conv."""
    M = N * H * W

    def reflect_pad1(x4):
        # ReflectionPad2d(1): row/col -1 mirrors row/col 1; row/col S mirrors S-2.
        xp = jnp.concatenate([x4[:, 1:2], x4, x4[:, H - 2:H - 1]], axis=1)
        xp = jnp.concatenate([xp[:, :, 1:2], xp, xp[:, :, W - 2:W - 1]], axis=2)
        return xp                                        # (N, H+2, W+2, Cin)

    def im2col(x2d):
        cin = x2d.shape[-1]
        x4 = x2d.reshape(N, H, W, cin)                   # tile-aligned reshape (W=8)
        xp = reflect_pad1(x4)
        cols = [xp[:, dy:dy + H, dx:dx + W, :].reshape(M, cin)
                for dy in range(3) for dx in range(3)]
        return jnp.concatenate(cols, axis=-1)            # (M, 9*Cin)

    def conv3x3(x2d, w_bf16, b_f32, apply_relu):
        pm = im2col(x2d).astype(jnp.bfloat16)            # bf16 operands, f32 acc
        acc = jnp.dot(pm, w_bf16, preferred_element_type=jnp.float32)
        acc = acc + b_f32                                # (1, Cout) broadcast, f32
        if apply_relu:
            acc = jnp.maximum(acc, 0.0)
        return acc                                       # (M, Cout) f32

    def kernel(x_ref, w1_ref, b1_ref, w2_ref, b2_ref, wu_ref, bu_ref, o_ref):
        x = x_ref[...]                                   # (M, C) f32, stays resident
        for i in range(n_res):                           # residual chain, all in VMEM
            y = conv3x3(x, w1_ref[i], b1_ref[i], apply_relu=True)
            x = conv3x3(y, w2_ref[i], b2_ref[i], apply_relu=False) + x
        u = conv3x3(x, wu_ref[...], bu_ref[...], apply_relu=True)   # (M, 4C)
        o_ref[...] = u.astype(o_ref.dtype)

    return kernel


def late_upsampling_block_no_bn(x_nchw, params):
    """Forward pass of LateUpsamplingBlockNoBN. Input / output are NCHW."""
    N, C, H, W = x_nchw.shape
    res_blocks = params["res_blocks"]
    n_res = len(res_blocks)
    M = N * H * W
    C4 = 4 * C

    # NCHW -> NHWC -> (M, C): contiguous reshape; batch folded into matmul M.
    x2d = jnp.transpose(x_nchw, (0, 2, 3, 1)).reshape(M, C)

    # Pack weights: (3,3,Cin,Cout) HWIO -> (9*Cin, Cout), bf16 operands.
    # Row order (ky, kx, cin) matches the im2col tap/channel concat order.
    w1 = jnp.stack([rb["w1"].reshape(9 * C, C) for rb in res_blocks]).astype(jnp.bfloat16)
    w2 = jnp.stack([rb["w2"].reshape(9 * C, C) for rb in res_blocks]).astype(jnp.bfloat16)
    b1 = jnp.stack([rb["b1"].reshape(1, C) for rb in res_blocks])             # f32
    b2 = jnp.stack([rb["b2"].reshape(1, C) for rb in res_blocks])             # f32
    wu = params["up_w"].reshape(9 * C, C4).astype(jnp.bfloat16)
    bu = params["up_b"].reshape(1, C4)

    kernel = _make_fused_kernel(N, H, W, C, n_res)

    out2d = pl.pallas_call(
        kernel,
        out_shape=jax.ShapeDtypeStruct((M, C4), jnp.float32),
        grid=(1,),
        in_specs=[
            pl.BlockSpec((M, C), lambda i: (0, 0)),
            pl.BlockSpec((n_res, 9 * C, C), lambda i: (0, 0, 0)),
            pl.BlockSpec((n_res, 1, C), lambda i: (0, 0, 0)),
            pl.BlockSpec((n_res, 9 * C, C), lambda i: (0, 0, 0)),
            pl.BlockSpec((n_res, 1, C), lambda i: (0, 0, 0)),
            pl.BlockSpec((9 * C, C4), lambda i: (0, 0)),
            pl.BlockSpec((1, C4), lambda i: (0, 0)),
        ],
        out_specs=pl.BlockSpec((M, C4), lambda i: (0, 0)),
        compiler_params=pltpu.CompilerParams(
            dimension_semantics=("arbitrary",)),
    )(x2d, w1, b1, w2, b2, wu, bu)

    # PixelShuffle(2): out[n, h*2+i, w*2+j, c] = z[n, h, w, c*4 + i*2 + j].
    z = out2d.reshape(N, H, W, C, 2, 2)                  # last dims: (c, i, j)
    z = jnp.transpose(z, (0, 1, 4, 2, 5, 3))             # N, H, i, W, j, C
    z = z.reshape(N, 2 * H, 2 * W, C)
    return jnp.transpose(z, (0, 3, 1, 2))                # NHWC -> NCHW


def init_params(key, features, n_res_block):
    """Deterministic synthetic weights (HWIO layout), matching module shapes."""
    params = {"res_blocks": []}
    scale = 0.05
    for _ in range(n_res_block):
        key, k1, k2, k3, k4 = jax.random.split(key, 5)
        params["res_blocks"].append(dict(
            w1=scale * jax.random.normal(k1, (3, 3, features, features), jnp.float32),
            b1=scale * jax.random.normal(k2, (features,), jnp.float32),
            w2=scale * jax.random.normal(k3, (3, 3, features, features), jnp.float32),
            b2=scale * jax.random.normal(k4, (features,), jnp.float32),
        ))
    key, k5, k6 = jax.random.split(key, 3)
    params["up_w"] = scale * jax.random.normal(
        k5, (3, 3, features, 4 * features), jnp.float32)
    params["up_b"] = scale * jax.random.normal(
        k6, (4 * features,), jnp.float32)
    return params


if __name__ == "__main__":
    FEATURES = 16
    N_RES = 3
    N, H, W = 2, 8, 8

    key = jax.random.PRNGKey(0)
    key, pkey, xkey = jax.random.split(key, 3)
    params = init_params(pkey, FEATURES, N_RES)
    x = jax.random.normal(xkey, (N, FEATURES, H, W), jnp.float32)   # NCHW

    fwd = jax.jit(late_upsampling_block_no_bn)
    out = jax.block_until_ready(fwd(x, params))

    assert out.shape == (N, FEATURES, 2 * H, 2 * W), out.shape
    assert out.dtype == jnp.float32
    assert bool(jnp.all(jnp.isfinite(out)))
    print("KERNEL_OK")
</pallas_src>

<mosaic_0001>
module attributes {stable_mosaic.version = 11 : i64} {
  func.func @kernel(%arg0: i32, %arg1: memref<128x16xf32, #tpu.memory_space<vmem>>, %arg2: memref<3x144x16xbf16, #tpu.memory_space<vmem>>, %arg3: memref<3x1x16xf32, #tpu.memory_space<vmem>>, %arg4: memref<3x144x16xbf16, #tpu.memory_space<vmem>>, %arg5: memref<3x1x16xf32, #tpu.memory_space<vmem>>, %arg6: memref<144x64xbf16, #tpu.memory_space<vmem>>, %arg7: memref<1x64xf32, #tpu.memory_space<vmem>>, %arg8: memref<128x64xf32, #tpu.memory_space<vmem>>) attributes {dimension_semantics = [#tpu.dimension_semantics<arbitrary>], iteration_bounds = array<i64: 1>, scalar_prefetch = 0 : i64, scratch_operands = 0 : i64, tpu.core_type = #tpu.core_type<tc>, window_params = [{pipeline_mode = #tpu.pipeline_mode<synchronous>, transform_indices = @transform_0, window_bounds = array<i64: 128, 16>}, {pipeline_mode = #tpu.pipeline_mode<synchronous>, transform_indices = @transform_1, window_bounds = array<i64: 3, 144, 16>}, {pipeline_mode = #tpu.pipeline_mode<synchronous>, transform_indices = @transform_2, window_bounds = array<i64: 3, 1, 16>}, {pipeline_mode = #tpu.pipeline_mode<synchronous>, transform_indices = @transform_3, window_bounds = array<i64: 3, 144, 16>}, {pipeline_mode = #tpu.pipeline_mode<synchronous>, transform_indices = @transform_4, window_bounds = array<i64: 3, 1, 16>}, {pipeline_mode = #tpu.pipeline_mode<synchronous>, transform_indices = @transform_5, window_bounds = array<i64: 144, 64>}, {pipeline_mode = #tpu.pipeline_mode<synchronous>, transform_indices = @transform_6, window_bounds = array<i64: 1, 64>}, {pipeline_mode = #tpu.pipeline_mode<synchronous>, transform_indices = @transform_7, window_bounds = array<i64: 128, 64>}]} {
    %c0 = arith.constant 0 : index
    %c0_0 = arith.constant 0 : index
    %0 = vector.load %arg1[%c0, %c0_0] : memref<128x16xf32, #tpu.memory_space<vmem>>, vector<128x16xf32>
    %c0_1 = arith.constant 0 : index
    %c0_2 = arith.constant 0 : index
    %c0_3 = arith.constant 0 : index
    %1 = vector.load %arg2[%c0_1, %c0_2, %c0_3] : memref<3x144x16xbf16, #tpu.memory_space<vmem>>, vector<1x144x16xbf16>
    %2 = vector.shape_cast %1 : vector<1x144x16xbf16> to vector<144x16xbf16>
    %c0_4 = arith.constant 0 : index
    %c0_5 = arith.constant 0 : index
    %c0_6 = arith.constant 0 : index
    %3 = vector.load %arg3[%c0_4, %c0_5, %c0_6] : memref<3x1x16xf32, #tpu.memory_space<vmem>>, vector<1x1x16xf32>
    %4 = vector.shape_cast %3 : vector<1x1x16xf32> to vector<1x16xf32>
    %5 = vector.shape_cast %0 : vector<128x16xf32> to vector<2x8x8x16xf32>
    %6 = vector.extract_strided_slice %5 {offsets = [0, 1, 0, 0], sizes = [2, 1, 8, 16], strides = [1, 1, 1, 1]} : vector<2x8x8x16xf32> to vector<2x1x8x16xf32>
    %7 = vector.extract_strided_slice %5 {offsets = [0, 6, 0, 0], sizes = [2, 1, 8, 16], strides = [1, 1, 1, 1]} : vector<2x8x8x16xf32> to vector<2x1x8x16xf32>
    %8 = tpu.concatenate %6, %5, %7 in 1 : vector<2x1x8x16xf32>, vector<2x8x8x16xf32>, vector<2x1x8x16xf32> -> vector<2x10x8x16xf32>
    %9 = vector.extract_strided_slice %8 {offsets = [0, 0, 1, 0], sizes = [2, 10, 1, 16], strides = [1, 1, 1, 1]} : vector<2x10x8x16xf32> to vector<2x10x1x16xf32>
    %10 = vector.extract_strided_slice %8 {offsets = [0, 0, 6, 0], sizes = [2, 10, 1, 16], strides = [1, 1, 1, 1]} : vector<2x10x8x16xf32> to vector<2x10x1x16xf32>
    %11 = tpu.concatenate %9, %8, %10 in 2 : vector<2x10x1x16xf32>, vector<2x10x8x16xf32>, vector<2x10x1x16xf32> -> vector<2x10x10x16xf32>
    %12 = vector.extract_strided_slice %11 {offsets = [0, 0, 0, 0], sizes = [2, 8, 8, 16], strides = [1, 1, 1, 1]} : vector<2x10x10x16xf32> to vector<2x8x8x16xf32>
    %13 = vector.shape_cast %12 : vector<2x8x8x16xf32> to vector<128x16xf32>
    %14 = vector.extract_strided_slice %11 {offsets = [0, 0, 1, 0], sizes = [2, 8, 8, 16], strides = [1, 1, 1, 1]} : vector<2x10x10x16xf32> to vector<2x8x8x16xf32>
    %15 = vector.shape_cast %14 : vector<2x8x8x16xf32> to vector<128x16xf32>
    %16 = vector.extract_strided_slice %11 {offsets = [0, 0, 2, 0], sizes = [2, 8, 8, 16], strides = [1, 1, 1, 1]} : vector<2x10x10x16xf32> to vector<2x8x8x16xf32>
    %17 = vector.shape_cast %16 : vector<2x8x8x16xf32> to vector<128x16xf32>
    %18 = vector.extract_strided_slice %11 {offsets = [0, 1, 0, 0], sizes = [2, 8, 8, 16], strides = [1, 1, 1, 1]} : vector<2x10x10x16xf32> to vector<2x8x8x16xf32>
    %19 = vector.shape_cast %18 : vector<2x8x8x16xf32> to vector<128x16xf32>
    %20 = vector.extract_strided_slice %11 {offsets = [0, 1, 1, 0], sizes = [2, 8, 8, 16], strides = [1, 1, 1, 1]} : vector<2x10x10x16xf32> to vector<2x8x8x16xf32>
    %21 = vector.shape_cast %20 : vector<2x8x8x16xf32> to vector<128x16xf32>
    %22 = vector.extract_strided_slice %11 {offsets = [0, 1, 2, 0], sizes = [2, 8, 8, 16], strides = [1, 1, 1, 1]} : vector<2x10x10x16xf32> to vector<2x8x8x16xf32>
    %23 = vector.shape_cast %22 : vector<2x8x8x16xf32> to vector<128x16xf32>
    %24 = vector.extract_strided_slice %11 {offsets = [0, 2, 0, 0], sizes = [2, 8, 8, 16], strides = [1, 1, 1, 1]} : vector<2x10x10x16xf32> to vector<2x8x8x16xf32>
    %25 = vector.shape_cast %24 : vector<2x8x8x16xf32> to vector<128x16xf32>
    %26 = vector.extract_strided_slice %11 {offsets = [0, 2, 1, 0], sizes = [2, 8, 8, 16], strides = [1, 1, 1, 1]} : vector<2x10x10x16xf32> to vector<2x8x8x16xf32>
    %27 = vector.shape_cast %26 : vector<2x8x8x16xf32> to vector<128x16xf32>
    %28 = vector.extract_strided_slice %11 {offsets = [0, 2, 2, 0], sizes = [2, 8, 8, 16], strides = [1, 1, 1, 1]} : vector<2x10x10x16xf32> to vector<2x8x8x16xf32>
    %29 = vector.shape_cast %28 : vector<2x8x8x16xf32> to vector<128x16xf32>
    %30 = tpu.concatenate %13, %15, %17, %19, %21, %23, %25, %27, %29 in 1 : vector<128x16xf32>, vector<128x16xf32>, vector<128x16xf32>, vector<128x16xf32>, vector<128x16xf32>, vector<128x16xf32>, vector<128x16xf32>, vector<128x16xf32>, vector<128x16xf32> -> vector<128x144xf32>
    %31 = arith.truncf %30 : vector<128x144xf32> to vector<128x144xbf16>
    %cst = arith.constant dense<0.000000e+00> : vector<128x16xf32>
    %32 = tpu.matmul %31, %2, %cst {dimension_numbers = #tpu.dot_dimension_numbers<[1], [0], [0], [1], [0, 0, 1, 1], [], []>} : vector<128x144xbf16>, vector<144x16xbf16>, vector<128x16xf32> -> vector<128x16xf32>
    %33 = vector.broadcast %4 : vector<1x16xf32> to vector<128x16xf32>
    %34 = arith.addf %32, %33 : vector<128x16xf32>
    %cst_7 = arith.constant 0.000000e+00 : f32
    %35 = vector.broadcast %cst_7 : f32 to vector<128x16xf32>
    %36 = arith.maximumf %34, %35 : vector<128x16xf32>
    %c0_8 = arith.constant 0 : index
    %c0_9 = arith.constant 0 : index
    %c0_10 = arith.constant 0 : index
    %37 = vector.load %arg4[%c0_8, %c0_9, %c0_10] : memref<3x144x16xbf16, #tpu.memory_space<vmem>>, vector<1x144x16xbf16>
    %38 = vector.shape_cast %37 : vector<1x144x16xbf16> to vector<144x16xbf16>
    %c0_11 = arith.constant 0 : index
    %c0_12 = arith.constant 0 : index
    %c0_13 = arith.constant 0 : index
    %39 = vector.load %arg5[%c0_11, %c0_12, %c0_13] : memref<3x1x16xf32, #tpu.memory_space<vmem>>, vector<1x1x16xf32>
    %40 = vector.shape_cast %39 : vector<1x1x16xf32> to vector<1x16xf32>
    %41 = vector.shape_cast %36 : vector<128x16xf32> to vector<2x8x8x16xf32>
    %42 = vector.extract_strided_slice %41 {offsets = [0, 1, 0, 0], sizes = [2, 1, 8, 16], strides = [1, 1, 1, 1]} : vector<2x8x8x16xf32> to vector<2x1x8x16xf32>
    %43 = vector.extract_strided_slice %41 {offsets = [0, 6, 0, 0], sizes = [2, 1, 8, 16], strides = [1, 1, 1, 1]} : vector<2x8x8x16xf32> to vector<2x1x8x16xf32>
    %44 = tpu.concatenate %42, %41, %43 in 1 : vector<2x1x8x16xf32>, vector<2x8x8x16xf32>, vector<2x1x8x16xf32> -> vector<2x10x8x16xf32>
    %45 = vector.extract_strided_slice %44 {offsets = [0, 0, 1, 0], sizes = [2, 10, 1, 16], strides = [1, 1, 1, 1]} : vector<2x10x8x16xf32> to vector<2x10x1x16xf32>
    %46 = vector.extract_strided_slice %44 {offsets = [0, 0, 6, 0], sizes = [2, 10, 1, 16], strides = [1, 1, 1, 1]} : vector<2x10x8x16xf32> to vector<2x10x1x16xf32>
    %47 = tpu.concatenate %45, %44, %46 in 2 : vector<2x10x1x16xf32>, vector<2x10x8x16xf32>, vector<2x10x1x16xf32> -> vector<2x10x10x16xf32>
    %48 = vector.extract_strided_slice %47 {offsets = [0, 0, 0, 0], sizes = [2, 8, 8, 16], strides = [1, 1, 1, 1]} : vector<2x10x10x16xf32> to vector<2x8x8x16xf32>
    %49 = vector.shape_cast %48 : vector<2x8x8x16xf32> to vector<128x16xf32>
    %50 = vector.extract_strided_slice %47 {offsets = [0, 0, 1, 0], sizes = [2, 8, 8, 16], strides = [1, 1, 1, 1]} : vector<2x10x10x16xf32> to vector<2x8x8x16xf32>
    %51 = vector.shape_cast %50 : vector<2x8x8x16xf32> to vector<128x16xf32>
    %52 = vector.extract_strided_slice %47 {offsets = [0, 0, 2, 0], sizes = [2, 8, 8, 16], strides = [1, 1, 1, 1]} : vector<2x10x10x16xf32> to vector<2x8x8x16xf32>
    %53 = vector.shape_cast %52 : vector<2x8x8x16xf32> to vector<128x16xf32>
    %54 = vector.extract_strided_slice %47 {offsets = [0, 1, 0, 0], sizes = [2, 8, 8, 16], strides = [1, 1, 1, 1]} : vector<2x10x10x16xf32> to vector<2x8x8x16xf32>
    %55 = vector.shape_cast %54 : vector<2x8x8x16xf32> to vector<128x16xf32>
    %56 = vector.extract_strided_slice %47 {offsets = [0, 1, 1, 0], sizes = [2, 8, 8, 16], strides = [1, 1, 1, 1]} : vector<2x10x10x16xf32> to vector<2x8x8x16xf32>
    %57 = vector.shape_cast %56 : vector<2x8x8x16xf32> to vector<128x16xf32>
    %58 = vector.extract_strided_slice %47 {offsets = [0, 1, 2, 0], sizes = [2, 8, 8, 16], strides = [1, 1, 1, 1]} : vector<2x10x10x16xf32> to vector<2x8x8x16xf32>
    %59 = vector.shape_cast %58 : vector<2x8x8x16xf32> to vector<128x16xf32>
    %60 = vector.extract_strided_slice %47 {offsets = [0, 2, 0, 0], sizes = [2, 8, 8, 16], strides = [1, 1, 1, 1]} : vector<2x10x10x16xf32> to vector<2x8x8x16xf32>
    %61 = vector.shape_cast %60 : vector<2x8x8x16xf32> to vector<128x16xf32>
    %62 = vector.extract_strided_slice %47 {offsets = [0, 2, 1, 0], sizes = [2, 8, 8, 16], strides = [1, 1, 1, 1]} : vector<2x10x10x16xf32> to vector<2x8x8x16xf32>
    %63 = vector.shape_cast %62 : vector<2x8x8x16xf32> to vector<128x16xf32>
    %64 = vector.extract_strided_slice %47 {offsets = [0, 2, 2, 0], sizes = [2, 8, 8, 16], strides = [1, 1, 1, 1]} : vector<2x10x10x16xf32> to vector<2x8x8x16xf32>
    %65 = vector.shape_cast %64 : vector<2x8x8x16xf32> to vector<128x16xf32>
    %66 = tpu.concatenate %49, %51, %53, %55, %57, %59, %61, %63, %65 in 1 : vector<128x16xf32>, vector<128x16xf32>, vector<128x16xf32>, vector<128x16xf32>, vector<128x16xf32>, vector<128x16xf32>, vector<128x16xf32>, vector<128x16xf32>, vector<128x16xf32> -> vector<128x144xf32>
    %67 = arith.truncf %66 : vector<128x144xf32> to vector<128x144xbf16>
    %cst_14 = arith.constant dense<0.000000e+00> : vector<128x16xf32>
    %68 = tpu.matmul %67, %38, %cst_14 {dimension_numbers = #tpu.dot_dimension_numbers<[1], [0], [0], [1], [0, 0, 1, 1], [], []>} : vector<128x144xbf16>, vector<144x16xbf16>, vector<128x16xf32> -> vector<128x16xf32>
    %69 = vector.broadcast %40 : vector<1x16xf32> to vector<128x16xf32>
    %70 = arith.addf %68, %69 : vector<128x16xf32>
    %71 = arith.addf %70, %0 : vector<128x16xf32>
    %c1 = arith.constant 1 : index
    %c0_15 = arith.constant 0 : index
    %c0_16 = arith.constant 0 : index
    %72 = vector.load %arg2[%c1, %c0_15, %c0_16] : memref<3x144x16xbf16, #tpu.memory_space<vmem>>, vector<1x144x16xbf16>
    %73 = vector.shape_cast %72 : vector<1x144x16xbf16> to vector<144x16xbf16>
    %c1_17 = arith.constant 1 : index
    %c0_18 = arith.constant 0 : index
    %c0_19 = arith.constant 0 : index
    %74 = vector.load %arg3[%c1_17, %c0_18, %c0_19] : memref<3x1x16xf32, #tpu.memory_space<vmem>>, vector<1x1x16xf32>
    %75 = vector.shape_cast %74 : vector<1x1x16xf32> to vector<1x16xf32>
    %76 = vector.shape_cast %71 : vector<128x16xf32> to vector<2x8x8x16xf32>
    %77 = vector.extract_strided_slice %76 {offsets = [0, 1, 0, 0], sizes = [2, 1, 8, 16], strides = [1, 1, 1, 1]} : vector<2x8x8x16xf32> to vector<2x1x8x16xf32>
    %78 = vector.extract_strided_slice %76 {offsets = [0, 6, 0, 0], sizes = [2, 1, 8, 16], strides = [1, 1, 1, 1]} : vector<2x8x8x16xf32> to vector<2x1x8x16xf32>
    %79 = tpu.concatenate %77, %76, %78 in 1 : vector<2x1x8x16xf32>, vector<2x8x8x16xf32>, vector<2x1x8x16xf32> -> vector<2x10x8x16xf32>
    %80 = vector.extract_strided_slice %79 {offsets = [0, 0, 1, 0], sizes = [2, 10, 1, 16], strides = [1, 1, 1, 1]} : vector<2x10x8x16xf32> to vector<2x10x1x16xf32>
    %81 = vector.extract_strided_slice %79 {offsets = [0, 0, 6, 0], sizes = [2, 10, 1, 16], strides = [1, 1, 1, 1]} : vector<2x10x8x16xf32> to vector<2x10x1x16xf32>
    %82 = tpu.concatenate %80, %79, %81 in 2 : vector<2x10x1x16xf32>, vector<2x10x8x16xf32>, vector<2x10x1x16xf32> -> vector<2x10x10x16xf32>
    %83 = vector.extract_strided_slice %82 {offsets = [0, 0, 0, 0], sizes = [2, 8, 8, 16], strides = [1, 1, 1, 1]} : vector<2x10x10x16xf32> to vector<2x8x8x16xf32>
    %84 = vector.shape_cast %83 : vector<2x8x8x16xf32> to vector<128x16xf32>
    %85 = vector.extract_strided_slice %82 {offsets = [0, 0, 1, 0], sizes = [2, 8, 8, 16], strides = [1, 1, 1, 1]} : vector<2x10x10x16xf32> to vector<2x8x8x16xf32>
    %86 = vector.shape_cast %85 : vector<2x8x8x16xf32> to vector<128x16xf32>
    %87 = vector.extract_strided_slice %82 {offsets = [0, 0, 2, 0], sizes = [2, 8, 8, 16], strides = [1, 1, 1, 1]} : vector<2x10x10x16xf32> to vector<2x8x8x16xf32>
    %88 = vector.shape_cast %87 : vector<2x8x8x16xf32> to vector<128x16xf32>
    %89 = vector.extract_strided_slice %82 {offsets = [0, 1, 0, 0], sizes = [2, 8, 8, 16], strides = [1, 1, 1, 1]} : vector<2x10x10x16xf32> to vector<2x8x8x16xf32>
    %90 = vector.shape_cast %89 : vector<2x8x8x16xf32> to vector<128x16xf32>
    %91 = vector.extract_strided_slice %82 {offsets = [0, 1, 1, 0], sizes = [2, 8, 8, 16], strides = [1, 1, 1, 1]} : vector<2x10x10x16xf32> to vector<2x8x8x16xf32>
    %92 = vector.shape_cast %91 : vector<2x8x8x16xf32> to vector<128x16xf32>
    %93 = vector.extract_strided_slice %82 {offsets = [0, 1, 2, 0], sizes = [2, 8, 8, 16], strides = [1, 1, 1, 1]} : vector<2x10x10x16xf32> to vector<2x8x8x16xf32>
    %94 = vector.shape_cast %93 : vector<2x8x8x16xf32> to vector<128x16xf32>
    %95 = vector.extract_strided_slice %82 {offsets = [0, 2, 0, 0], sizes = [2, 8, 8, 16], strides = [1, 1, 1, 1]} : vector<2x10x10x16xf32> to vector<2x8x8x16xf32>
    %96 = vector.shape_cast %95 : vector<2x8x8x16xf32> to vector<128x16xf32>
    %97 = vector.extract_strided_slice %82 {offsets = [0, 2, 1, 0], sizes = [2, 8, 8, 16], strides = [1, 1, 1, 1]} : vector<2x10x10x16xf32> to vector<2x8x8x16xf32>
    %98 = vector.shape_cast %97 : vector<2x8x8x16xf32> to vector<128x16xf32>
    %99 = vector.extract_strided_slice %82 {offsets = [0, 2, 2, 0], sizes = [2, 8, 8, 16], strides = [1, 1, 1, 1]} : vector<2x10x10x16xf32> to vector<2x8x8x16xf32>
    %100 = vector.shape_cast %99 : vector<2x8x8x16xf32> to vector<128x16xf32>
    %101 = tpu.concatenate %84, %86, %88, %90, %92, %94, %96, %98, %100 in 1 : vector<128x16xf32>, vector<128x16xf32>, vector<128x16xf32>, vector<128x16xf32>, vector<128x16xf32>, vector<128x16xf32>, vector<128x16xf32>, vector<128x16xf32>, vector<128x16xf32> -> vector<128x144xf32>
    %102 = arith.truncf %101 : vector<128x144xf32> to vector<128x144xbf16>
    %cst_20 = arith.constant dense<0.000000e+00> : vector<128x16xf32>
    %103 = tpu.matmul %102, %73, %cst_20 {dimension_numbers = #tpu.dot_dimension_numbers<[1], [0], [0], [1], [0, 0, 1, 1], [], []>} : vector<128x144xbf16>, vector<144x16xbf16>, vector<128x16xf32> -> vector<128x16xf32>
    %104 = vector.broadcast %75 : vector<1x16xf32> to vector<128x16xf32>
    %105 = arith.addf %103, %104 : vector<128x16xf32>
    %cst_21 = arith.constant 0.000000e+00 : f32
    %106 = vector.broadcast %cst_21 : f32 to vector<128x16xf32>
    %107 = arith.maximumf %105, %106 : vector<128x16xf32>
    %c1_22 = arith.constant 1 : index
    %c0_23 = arith.constant 0 : index
    %c0_24 = arith.constant 0 : index
    %108 = vector.load %arg4[%c1_22, %c0_23, %c0_24] : memref<3x144x16xbf16, #tpu.memory_space<vmem>>, vector<1x144x16xbf16>
    %109 = vector.shape_cast %108 : vector<1x144x16xbf16> to vector<144x16xbf16>
    %c1_25 = arith.constant 1 : index
    %c0_26 = arith.constant 0 : index
    %c0_27 = arith.constant 0 : index
    %110 = vector.load %arg5[%c1_25, %c0_26, %c0_27] : memref<3x1x16xf32, #tpu.memory_space<vmem>>, vector<1x1x16xf32>
    %111 = vector.shape_cast %110 : vector<1x1x16xf32> to vector<1x16xf32>
    %112 = vector.shape_cast %107 : vector<128x16xf32> to vector<2x8x8x16xf32>
    %113 = vector.extract_strided_slice %112 {offsets = [0, 1, 0, 0], sizes = [2, 1, 8, 16], strides = [1, 1, 1, 1]} : vector<2x8x8x16xf32> to vector<2x1x8x16xf32>
    %114 = vector.extract_strided_slice %112 {offsets = [0, 6, 0, 0], sizes = [2, 1, 8, 16], strides = [1, 1, 1, 1]} : vector<2x8x8x16xf32> to vector<2x1x8x16xf32>
    %115 = tpu.concatenate %113, %112, %114 in 1 : vector<2x1x8x16xf32>, vector<2x8x8x16xf32>, vector<2x1x8x16xf32> -> vector<2x10x8x16xf32>
    %116 = vector.extract_strided_slice %115 {offsets = [0, 0, 1, 0], sizes = [2, 10, 1, 16], strides = [1, 1, 1, 1]} : vector<2x10x8x16xf32> to vector<2x10x1x16xf32>
    %117 = vector.extract_strided_slice %115 {offsets = [0, 0, 6, 0], sizes = [2, 10, 1, 16], strides = [1, 1, 1, 1]} : vector<2x10x8x16xf32> to vector<2x10x1x16xf32>
    %118 = tpu.concatenate %116, %115, %117 in 2 : vector<2x10x1x16xf32>, vector<2x10x8x16xf32>, vector<2x10x1x16xf32> -> vector<2x10x10x16xf32>
    %119 = vector.extract_strided_slice %118 {offsets = [0, 0, 0, 0], sizes = [2, 8, 8, 16], strides = [1, 1, 1, 1]} : vector<2x10x10x16xf32> to vector<2x8x8x16xf32>
    %120 = vector.shape_cast %119 : vector<2x8x8x16xf32> to vector<128x16xf32>
    %121 = vector.extract_strided_slice %118 {offsets = [0, 0, 1, 0], sizes = [2, 8, 8, 16], strides = [1, 1, 1, 1]} : vector<2x10x10x16xf32> to vector<2x8x8x16xf32>
    %122 = vector.shape_cast %121 : vector<2x8x8x16xf32> to vector<128x16xf32>
    %123 = vector.extract_strided_slice %118 {offsets = [0, 0, 2, 0], sizes = [2, 8, 8, 16], strides = [1, 1, 1, 1]} : vector<2x10x10x16xf32> to vector<2x8x8x16xf32>
    %124 = vector.shape_cast %123 : vector<2x8x8x16xf32> to vector<128x16xf32>
    %125 = vector.extract_strided_slice %118 {offsets = [0, 1, 0, 0], sizes = [2, 8, 8, 16], strides = [1, 1, 1, 1]} : vector<2x10x10x16xf32> to vector<2x8x8x16xf32>
    %126 = vector.shape_cast %125 : vector<2x8x8x16xf32> to vector<128x16xf32>
    %127 = vector.extract_strided_slice %118 {offsets = [0, 1, 1, 0], sizes = [2, 8, 8, 16], strides = [1, 1, 1, 1]} : vector<2x10x10x16xf32> to vector<2x8x8x16xf32>
    %128 = vector.shape_cast %127 : vector<2x8x8x16xf32> to vector<128x16xf32>
    %129 = vector.extract_strided_slice %118 {offsets = [0, 1, 2, 0], sizes = [2, 8, 8, 16], strides = [1, 1, 1, 1]} : vector<2x10x10x16xf32> to vector<2x8x8x16xf32>
    %130 = vector.shape_cast %129 : vector<2x8x8x16xf32> to vector<128x16xf32>
    %131 = vector.extract_strided_slice %118 {offsets = [0, 2, 0, 0], sizes = [2, 8, 8, 16], strides = [1, 1, 1, 1]} : vector<2x10x10x16xf32> to vector<2x8x8x16xf32>
    %132 = vector.shape_cast %131 : vector<2x8x8x16xf32> to vector<128x16xf32>
    %133 = vector.extract_strided_slice %118 {offsets = [0, 2, 1, 0], sizes = [2, 8, 8, 16], strides = [1, 1, 1, 1]} : vector<2x10x10x16xf32> to vector<2x8x8x16xf32>
    %134 = vector.shape_cast %133 : vector<2x8x8x16xf32> to vector<128x16xf32>
    %135 = vector.extract_strided_slice %118 {offsets = [0, 2, 2, 0], sizes = [2, 8, 8, 16], strides = [1, 1, 1, 1]} : vector<2x10x10x16xf32> to vector<2x8x8x16xf32>
    %136 = vector.shape_cast %135 : vector<2x8x8x16xf32> to vector<128x16xf32>
    %137 = tpu.concatenate %120, %122, %124, %126, %128, %130, %132, %134, %136 in 1 : vector<128x16xf32>, vector<128x16xf32>, vector<128x16xf32>, vector<128x16xf32>, vector<128x16xf32>, vector<128x16xf32>, vector<128x16xf32>, vector<128x16xf32>, vector<128x16xf32> -> vector<128x144xf32>
    %138 = arith.truncf %137 : vector<128x144xf32> to vector<128x144xbf16>
    %cst_28 = arith.constant dense<0.000000e+00> : vector<128x16xf32>
    %139 = tpu.matmul %138, %109, %cst_28 {dimension_numbers = #tpu.dot_dimension_numbers<[1], [0], [0], [1], [0, 0, 1, 1], [], []>} : vector<128x144xbf16>, vector<144x16xbf16>, vector<128x16xf32> -> vector<128x16xf32>
    %140 = vector.broadcast %111 : vector<1x16xf32> to vector<128x16xf32>
    %141 = arith.addf %139, %140 : vector<128x16xf32>
    %142 = arith.addf %141, %71 : vector<128x16xf32>
    %c2 = arith.constant 2 : index
    %c0_29 = arith.constant 0 : index
    %c0_30 = arith.constant 0 : index
    %143 = vector.load %arg2[%c2, %c0_29, %c0_30] : memref<3x144x16xbf16, #tpu.memory_space<vmem>>, vector<1x144x16xbf16>
    %144 = vector.shape_cast %143 : vector<1x144x16xbf16> to vector<144x16xbf16>
    %c2_31 = arith.constant 2 : index
    %c0_32 = arith.constant 0 : index
    %c0_33 = arith.constant 0 : index
    %145 = vector.load %arg3[%c2_31, %c0_32, %c0_33] : memref<3x1x16xf32, #tpu.memory_space<vmem>>, vector<1x1x16xf32>
    %146 = vector.shape_cast %145 : vector<1x1x16xf32> to vector<1x16xf32>
    %147 = vector.shape_cast %142 : vector<128x16xf32> to vector<2x8x8x16xf32>
    %148 = vector.extract_strided_slice %147 {offsets = [0, 1, 0, 0], sizes = [2, 1, 8, 16], strides = [1, 1, 1, 1]} : vector<2x8x8x16xf32> to vector<2x1x8x16xf32>
    %149 = vector.extract_strided_slice %147 {offsets = [0, 6, 0, 0], sizes = [2, 1, 8, 16], strides = [1, 1, 1, 1]} : vector<2x8x8x16xf32> to vector<2x1x8x16xf32>
    %150 = tpu.concatenate %148, %147, %149 in 1 : vector<2x1x8x16xf32>, vector<2x8x8x16xf32>, vector<2x1x8x16xf32> -> vector<2x10x8x16xf32>
    %151 = vector.extract_strided_slice %150 {offsets = [0, 0, 1, 0], sizes = [2, 10, 1, 16], strides = [1, 1, 1, 1]} : vector<2x10x8x16xf32> to vector<2x10x1x16xf32>
    %152 = vector.extract_strided_slice %150 {offsets = [0, 0, 6, 0], sizes = [2, 10, 1, 16], strides = [1, 1, 1, 1]} : vector<2x10x8x16xf32> to vector<2x10x1x16xf32>
    %153 = tpu.concatenate %151, %150, %152 in 2 : vector<2x10x1x16xf32>, vector<2x10x8x16xf32>, vector<2x10x1x16xf32> -> vector<2x10x10x16xf32>
    %154 = vector.extract_strided_slice %153 {offsets = [0, 0, 0, 0], sizes = [2, 8, 8, 16], strides = [1, 1, 1, 1]} : vector<2x10x10x16xf32> to vector<2x8x8x16xf32>
    %155 = vector.shape_cast %154 : vector<2x8x8x16xf32> to vector<128x16xf32>
    %156 = vector.extract_strided_slice %153 {offsets = [0, 0, 1, 0], sizes = [2, 8, 8, 16], strides = [1, 1, 1, 1]} : vector<2x10x10x16xf32> to vector<2x8x8x16xf32>
    %157 = vector.shape_cast %156 : vector<2x8x8x16xf32> to vector<128x16xf32>
    %158 = vector.extract_strided_slice %153 {offsets = [0, 0, 2, 0], sizes = [2, 8, 8, 16], strides = [1, 1, 1, 1]} : vector<2x10x10x16xf32> to vector<2x8x8x16xf32>
    %159 = vector.shape_cast %158 : vector<2x8x8x16xf32> to vector<128x16xf32>
    %160 = vector.extract_strided_slice %153 {offsets = [0, 1, 0, 0], sizes = [2, 8, 8, 16], strides = [1, 1, 1, 1]} : vector<2x10x10x16xf32> to vector<2x8x8x16xf32>
    %161 = vector.shape_cast %160 : vector<2x8x8x16xf32> to vector<128x16xf32>
    %162 = vector.extract_strided_slice %153 {offsets = [0, 1, 1, 0], sizes = [2, 8, 8, 16], strides = [1, 1, 1, 1]} : vector<2x10x10x16xf32> to vector<2x8x8x16xf32>
    %163 = vector.shape_cast %162 : vector<2x8x8x16xf32> to vector<128x16xf32>
    %164 = vector.extract_strided_slice %153 {offsets = [0, 1, 2, 0], sizes = [2, 8, 8, 16], strides = [1, 1, 1, 1]} : vector<2x10x10x16xf32> to vector<2x8x8x16xf32>
    %165 = vector.shape_cast %164 : vector<2x8x8x16xf32> to vector<128x16xf32>
    %166 = vector.extract_strided_slice %153 {offsets = [0, 2, 0, 0], sizes = [2, 8, 8, 16], strides = [1, 1, 1, 1]} : vector<2x10x10x16xf32> to vector<2x8x8x16xf32>
    %167 = vector.shape_cast %166 : vector<2x8x8x16xf32> to vector<128x16xf32>
    %168 = vector.extract_strided_slice %153 {offsets = [0, 2, 1, 0], sizes = [2, 8, 8, 16], strides = [1, 1, 1, 1]} : vector<2x10x10x16xf32> to vector<2x8x8x16xf32>
    %169 = vector.shape_cast %168 : vector<2x8x8x16xf32> to vector<128x16xf32>
    %170 = vector.extract_strided_slice %153 {offsets = [0, 2, 2, 0], sizes = [2, 8, 8, 16], strides = [1, 1, 1, 1]} : vector<2x10x10x16xf32> to vector<2x8x8x16xf32>
    %171 = vector.shape_cast %170 : vector<2x8x8x16xf32> to vector<128x16xf32>
    %172 = tpu.concatenate %155, %157, %159, %161, %163, %165, %167, %169, %171 in 1 : vector<128x16xf32>, vector<128x16xf32>, vector<128x16xf32>, vector<128x16xf32>, vector<128x16xf32>, vector<128x16xf32>, vector<128x16xf32>, vector<128x16xf32>, vector<128x16xf32> -> vector<128x144xf32>
    %173 = arith.truncf %172 : vector<128x144xf32> to vector<128x144xbf16>
    %cst_34 = arith.constant dense<0.000000e+00> : vector<128x16xf32>
    %174 = tpu.matmul %173, %144, %cst_34 {dimension_numbers = #tpu.dot_dimension_numbers<[1], [0], [0], [1], [0, 0, 1, 1], [], []>} : vector<128x144xbf16>, vector<144x16xbf16>, vector<128x16xf32> -> vector<128x16xf32>
    %175 = vector.broadcast %146 : vector<1x16xf32> to vector<128x16xf32>
    %176 = arith.addf %174, %175 : vector<128x16xf32>
    %cst_35 = arith.constant 0.000000e+00 : f32
    %177 = vector.broadcast %cst_35 : f32 to vector<128x16xf32>
    %178 = arith.maximumf %176, %177 : vector<128x16xf32>
    %c2_36 = arith.constant 2 : index
    %c0_37 = arith.constant 0 : index
    %c0_38 = arith.constant 0 : index
    %179 = vector.load %arg4[%c2_36, %c0_37, %c0_38] : memref<3x144x16xbf16, #tpu.memory_space<vmem>>, vector<1x144x16xbf16>
    %180 = vector.shape_cast %179 : vector<1x144x16xbf16> to vector<144x16xbf16>
    %c2_39 = arith.constant 2 : index
    %c0_40 = arith.constant 0 : index
    %c0_41 = arith.constant 0 : index
    %181 = vector.load %arg5[%c2_39, %c0_40, %c0_41] : memref<3x1x16xf32, #tpu.memory_space<vmem>>, vector<1x1x16xf32>
    %182 = vector.shape_cast %181 : vector<1x1x16xf32> to vector<1x16xf32>
    %183 = vector.shape_cast %178 : vector<128x16xf32> to vector<2x8x8x16xf32>
    %184 = vector.extract_strided_slice %183 {offsets = [0, 1, 0, 0], sizes = [2, 1, 8, 16], strides = [1, 1, 1, 1]} : vector<2x8x8x16xf32> to vector<2x1x8x16xf32>
    %185 = vector.extract_strided_slice %183 {offsets = [0, 6, 0, 0], sizes = [2, 1, 8, 16], strides = [1, 1, 1, 1]} : vector<2x8x8x16xf32> to vector<2x1x8x16xf32>
    %186 = tpu.concatenate %184, %183, %185 in 1 : vector<2x1x8x16xf32>, vector<2x8x8x16xf32>, vector<2x1x8x16xf32> -> vector<2x10x8x16xf32>
    %187 = vector.extract_strided_slice %186 {offsets = [0, 0, 1, 0], sizes = [2, 10, 1, 16], strides = [1, 1, 1, 1]} : vector<2x10x8x16xf32> to vector<2x10x1x16xf32>
    %188 = vector.extract_strided_slice %186 {offsets = [0, 0, 6, 0], sizes = [2, 10, 1, 16], strides = [1, 1, 1, 1]} : vector<2x10x8x16xf32> to vector<2x10x1x16xf32>
    %189 = tpu.concatenate %187, %186, %188 in 2 : vector<2x10x1x16xf32>, vector<2x10x8x16xf32>, vector<2x10x1x16xf32> -> vector<2x10x10x16xf32>
    %190 = vector.extract_strided_slice %189 {offsets = [0, 0, 0, 0], sizes = [2, 8, 8, 16], strides = [1, 1, 1, 1]} : vector<2x10x10x16xf32> to vector<2x8x8x16xf32>
    %191 = vector.shape_cast %190 : vector<2x8x8x16xf32> to vector<128x16xf32>
    %192 = vector.extract_strided_slice %189 {offsets = [0, 0, 1, 0], sizes = [2, 8, 8, 16], strides = [1, 1, 1, 1]} : vector<2x10x10x16xf32> to vector<2x8x8x16xf32>
    %193 = vector.shape_cast %192 : vector<2x8x8x16xf32> to vector<128x16xf32>
    %194 = vector.extract_strided_slice %189 {offsets = [0, 0, 2, 0], sizes = [2, 8, 8, 16], strides = [1, 1, 1, 1]} : vector<2x10x10x16xf32> to vector<2x8x8x16xf32>
    %195 = vector.shape_cast %194 : vector<2x8x8x16xf32> to vector<128x16xf32>
    %196 = vector.extract_strided_slice %189 {offsets = [0, 1, 0, 0], sizes = [2, 8, 8, 16], strides = [1, 1, 1, 1]} : vector<2x10x10x16xf32> to vector<2x8x8x16xf32>
    %197 = vector.shape_cast %196 : vector<2x8x8x16xf32> to vector<128x16xf32>
    %198 = vector.extract_strided_slice %189 {offsets = [0, 1, 1, 0], sizes = [2, 8, 8, 16], strides = [1, 1, 1, 1]} : vector<2x10x10x16xf32> to vector<2x8x8x16xf32>
    %199 = vector.shape_cast %198 : vector<2x8x8x16xf32> to vector<128x16xf32>
    %200 = vector.extract_strided_slice %189 {offsets = [0, 1, 2, 0], sizes = [2, 8, 8, 16], strides = [1, 1, 1, 1]} : vector<2x10x10x16xf32> to vector<2x8x8x16xf32>
    %201 = vector.shape_cast %200 : vector<2x8x8x16xf32> to vector<128x16xf32>
    %202 = vector.extract_strided_slice %189 {offsets = [0, 2, 0, 0], sizes = [2, 8, 8, 16], strides = [1, 1, 1, 1]} : vector<2x10x10x16xf32> to vector<2x8x8x16xf32>
    %203 = vector.shape_cast %202 : vector<2x8x8x16xf32> to vector<128x16xf32>
    %204 = vector.extract_strided_slice %189 {offsets = [0, 2, 1, 0], sizes = [2, 8, 8, 16], strides = [1, 1, 1, 1]} : vector<2x10x10x16xf32> to vector<2x8x8x16xf32>
    %205 = vector.shape_cast %204 : vector<2x8x8x16xf32> to vector<128x16xf32>
    %206 = vector.extract_strided_slice %189 {offsets = [0, 2, 2, 0], sizes = [2, 8, 8, 16], strides = [1, 1, 1, 1]} : vector<2x10x10x16xf32> to vector<2x8x8x16xf32>
    %207 = vector.shape_cast %206 : vector<2x8x8x16xf32> to vector<128x16xf32>
    %208 = tpu.concatenate %191, %193, %195, %197, %199, %201, %203, %205, %207 in 1 : vector<128x16xf32>, vector<128x16xf32>, vector<128x16xf32>, vector<128x16xf32>, vector<128x16xf32>, vector<128x16xf32>, vector<128x16xf32>, vector<128x16xf32>, vector<128x16xf32> -> vector<128x144xf32>
    %209 = arith.truncf %208 : vector<128x144xf32> to vector<128x144xbf16>
    %cst_42 = arith.constant dense<0.000000e+00> : vector<128x16xf32>
    %210 = tpu.matmul %209, %180, %cst_42 {dimension_numbers = #tpu.dot_dimension_numbers<[1], [0], [0], [1], [0, 0, 1, 1], [], []>} : vector<128x144xbf16>, vector<144x16xbf16>, vector<128x16xf32> -> vector<128x16xf32>
    %211 = vector.broadcast %182 : vector<1x16xf32> to vector<128x16xf32>
    %212 = arith.addf %210, %211 : vector<128x16xf32>
    %213 = arith.addf %212, %142 : vector<128x16xf32>
    %c0_43 = arith.constant 0 : index
    %c0_44 = arith.constant 0 : index
    %214 = vector.load %arg6[%c0_43, %c0_44] : memref<144x64xbf16, #tpu.memory_space<vmem>>, vector<144x64xbf16>
    %c0_45 = arith.constant 0 : index
    %c0_46 = arith.constant 0 : index
    %215 = vector.load %arg7[%c0_45, %c0_46] : memref<1x64xf32, #tpu.memory_space<vmem>>, vector<1x64xf32>
    %216 = vector.shape_cast %213 : vector<128x16xf32> to vector<2x8x8x16xf32>
    %217 = vector.extract_strided_slice %216 {offsets = [0, 1, 0, 0], sizes = [2, 1, 8, 16], strides = [1, 1, 1, 1]} : vector<2x8x8x16xf32> to vector<2x1x8x16xf32>
    %218 = vector.extract_strided_slice %216 {offsets = [0, 6, 0, 0], sizes = [2, 1, 8, 16], strides = [1, 1, 1, 1]} : vector<2x8x8x16xf32> to vector<2x1x8x16xf32>
    %219 = tpu.concatenate %217, %216, %218 in 1 : vector<2x1x8x16xf32>, vector<2x8x8x16xf32>, vector<2x1x8x16xf32> -> vector<2x10x8x16xf32>
    %220 = vector.extract_strided_slice %219 {offsets = [0, 0, 1, 0], sizes = [2, 10, 1, 16], strides = [1, 1, 1, 1]} : vector<2x10x8x16xf32> to vector<2x10x1x16xf32>
    %221 = vector.extract_strided_slice %219 {offsets = [0, 0, 6, 0], sizes = [2, 10, 1, 16], strides = [1, 1, 1, 1]} : vector<2x10x8x16xf32> to vector<2x10x1x16xf32>
    %222 = tpu.concatenate %220, %219, %221 in 2 : vector<2x10x1x16xf32>, vector<2x10x8x16xf32>, vector<2x10x1x16xf32> -> vector<2x10x10x16xf32>
    %223 = vector.extract_strided_slice %222 {offsets = [0, 0, 0, 0], sizes = [2, 8, 8, 16], strides = [1, 1, 1, 1]} : vector<2x10x10x16xf32> to vector<2x8x8x16xf32>
    %224 = vector.shape_cast %223 : vector<2x8x8x16xf32> to vector<128x16xf32>
    %225 = vector.extract_strided_slice %222 {offsets = [0, 0, 1, 0], sizes = [2, 8, 8, 16], strides = [1, 1, 1, 1]} : vector<2x10x10x16xf32> to vector<2x8x8x16xf32>
    %226 = vector.shape_cast %225 : vector<2x8x8x16xf32> to vector<128x16xf32>
    %227 = vector.extract_strided_slice %222 {offsets = [0, 0, 2, 0], sizes = [2, 8, 8, 16], strides = [1, 1, 1, 1]} : vector<2x10x10x16xf32> to vector<2x8x8x16xf32>
    %228 = vector.shape_cast %227 : vector<2x8x8x16xf32> to vector<128x16xf32>
    %229 = vector.extract_strided_slice %222 {offsets = [0, 1, 0, 0], sizes = [2, 8, 8, 16], strides = [1, 1, 1, 1]} : vector<2x10x10x16xf32> to vector<2x8x8x16xf32>
    %230 = vector.shape_cast %229 : vector<2x8x8x16xf32> to vector<128x16xf32>
    %231 = vector.extract_strided_slice %222 {offsets = [0, 1, 1, 0], sizes = [2, 8, 8, 16], strides = [1, 1, 1, 1]} : vector<2x10x10x16xf32> to vector<2x8x8x16xf32>
    %232 = vector.shape_cast %231 : vector<2x8x8x16xf32> to vector<128x16xf32>
    %233 = vector.extract_strided_slice %222 {offsets = [0, 1, 2, 0], sizes = [2, 8, 8, 16], strides = [1, 1, 1, 1]} : vector<2x10x10x16xf32> to vector<2x8x8x16xf32>
    %234 = vector.shape_cast %233 : vector<2x8x8x16xf32> to vector<128x16xf32>
    %235 = vector.extract_strided_slice %222 {offsets = [0, 2, 0, 0], sizes = [2, 8, 8, 16], strides = [1, 1, 1, 1]} : vector<2x10x10x16xf32> to vector<2x8x8x16xf32>
    %236 = vector.shape_cast %235 : vector<2x8x8x16xf32> to vector<128x16xf32>
    %237 = vector.extract_strided_slice %222 {offsets = [0, 2, 1, 0], sizes = [2, 8, 8, 16], strides = [1, 1, 1, 1]} : vector<2x10x10x16xf32> to vector<2x8x8x16xf32>
    %238 = vector.shape_cast %237 : vector<2x8x8x16xf32> to vector<128x16xf32>
    %239 = vector.extract_strided_slice %222 {offsets = [0, 2, 2, 0], sizes = [2, 8, 8, 16], strides = [1, 1, 1, 1]} : vector<2x10x10x16xf32> to vector<2x8x8x16xf32>
    %240 = vector.shape_cast %239 : vector<2x8x8x16xf32> to vector<128x16xf32>
    %241 = tpu.concatenate %224, %226, %228, %230, %232, %234, %236, %238, %240 in 1 : vector<128x16xf32>, vector<128x16xf32>, vector<128x16xf32>, vector<128x16xf32>, vector<128x16xf32>, vector<128x16xf32>, vector<128x16xf32>, vector<128x16xf32>, vector<128x16xf32> -> vector<128x144xf32>
    %242 = arith.truncf %241 : vector<128x144xf32> to vector<128x144xbf16>
    %cst_47 = arith.constant dense<0.000000e+00> : vector<128x64xf32>
    %243 = tpu.matmul %242, %214, %cst_47 {dimension_numbers = #tpu.dot_dimension_numbers<[1], [0], [0], [1], [0, 0, 1, 1], [], []>} : vector<128x144xbf16>, vector<144x64xbf16>, vector<128x64xf32> -> vector<128x64xf32>
    %244 = vector.broadcast %215 : vector<1x64xf32> to vector<128x64xf32>
    %245 = arith.addf %243, %244 : vector<128x64xf32>
    %cst_48 = arith.constant 0.000000e+00 : f32
    %246 = vector.broadcast %cst_48 : f32 to vector<128x64xf32>
    %247 = arith.maximumf %245, %246 : vector<128x64xf32>
    %c0_49 = arith.constant 0 : index
    %c0_50 = arith.constant 0 : index
    %248 = vector.load %arg8[%c0_49, %c0_50] : memref<128x64xf32, #tpu.memory_space<vmem>>, vector<128x64xf32>
    tpu.vector_store %arg8[%c0_49, %c0_50], %247 {strides = array<i32>} : memref<128x64xf32, #tpu.memory_space<vmem>>, vector<128x64xf32>,
    return
  }
  func.func @transform_0(%arg0: i32) -> (i32, i32) {
    %c0_i32 = arith.constant 0 : i32
    %c0_i32_0 = arith.constant 0 : i32
    %c0_i32_1 = arith.constant 0 : i32
    return %c0_i32, %c0_i32_0 : i32, i32
  }
  func.func @transform_1(%arg0: i32) -> (i32, i32, i32) {
    %c0_i32 = arith.constant 0 : i32
    %c0_i32_0 = arith.constant 0 : i32
    %c0_i32_1 = arith.constant 0 : i32
    %c0_i32_2 = arith.constant 0 : i32
    return %c0_i32, %c0_i32_0, %c0_i32_1 : i32, i32, i32
  }
  func.func @transform_2(%arg0: i32) -> (i32, i32, i32) {
    %c0_i32 = arith.constant 0 : i32
    %c0_i32_0 = arith.constant 0 : i32
    %c0_i32_1 = arith.constant 0 : i32
    %c0_i32_2 = arith.constant 0 : i32
    return %c0_i32, %c0_i32_0, %c0_i32_1 : i32, i32, i32
  }
  func.func @transform_3(%arg0: i32) -> (i32, i32, i32) {
    %c0_i32 = arith.constant 0 : i32
    %c0_i32_0 = arith.constant 0 : i32
    %c0_i32_1 = arith.constant 0 : i32
    %c0_i32_2 = arith.constant 0 : i32
    return %c0_i32, %c0_i32_0, %c0_i32_1 : i32, i32, i32
  }
  func.func @transform_4(%arg0: i32) -> (i32, i32, i32) {
    %c0_i32 = arith.constant 0 : i32
    %c0_i32_0 = arith.constant 0 : i32
    %c0_i32_1 = arith.constant 0 : i32
    %c0_i32_2 = arith.constant 0 : i32
    return %c0_i32, %c0_i32_0, %c0_i32_1 : i32, i32, i32
  }
  func.func @transform_5(%arg0: i32) -> (i32, i32) {
    %c0_i32 = arith.constant 0 : i32
    %c0_i32_0 = arith.constant 0 : i32
    %c0_i32_1 = arith.constant 0 : i32
    return %c0_i32, %c0_i32_0 : i32, i32
  }
  func.func @transform_6(%arg0: i32) -> (i32, i32) {
    %c0_i32 = arith.constant 0 : i32
    %c0_i32_0 = arith.constant 0 : i32
    %c0_i32_1 = arith.constant 0 : i32
    return %c0_i32, %c0_i32_0 : i32, i32
  }
  func.func @transform_7(%arg0: i32) -> (i32, i32) {
    %c0_i32 = arith.constant 0 : i32
    %c0_i32_0 = arith.constant 0 : i32
    %c0_i32_1 = arith.constant 0 : i32
    return %c0_i32, %c0_i32_0 : i32, i32
  }
}

</mosaic_0001>

<bundles_post_ra>
// kernel: late_upsampling_block_no_bn.1
= control target key start
LH: loop header
LB: loop body
LE: loop exit
PB: predicated region body
PF: predicated region fallthrough
CT: control target
= control target key end

     0   :  { %vm174_vm0 = vcmask 1040384   ;;  %vm235_vm1 = vcmask 1046528   ;;  %vm278_vm2 = vcmask 1045504   ;;  %v12921_v3 = vmov 0   ;;  %s8715_s9 = smov 48   ;;  %s8716_s16 = smov 16   ;;  %s12913_s0 = inlined_call_operand.vmem [shape: f32[128,16], index: 0, kind: input, shape index: {}]   ;;  %s12914_s1 = inlined_call_operand.vmem [shape: bf16[3,144,16], index: 1, kind: input, shape index: {}]   ;;  %s12915_s3 = inlined_call_operand.vmem [shape: bf16[3,144,16], index: 3, kind: input, shape index: {}]   ;;  %s12916_s2 = inlined_call_operand.vmem [shape: f32[3,1,16], index: 2, kind: input, shape index: {}]   ;;  %s12917_s4 = inlined_call_operand.vmem [shape: f32[3,1,16], index: 4, kind: input, shape index: {}]   ;;  %s12918_s5 = inlined_call_operand.vmem [shape: bf16[144,64], index: 5, kind: input, shape index: {}]   ;;  %s12919_s6 = inlined_call_operand.vmem [shape: f32[1,64], index: 6, kind: input, shape index: {}]   ;;  %s12920_s7 = inlined_call_operand.vmem [shape: f32[128,64], index: 7, kind: output, shape index: {}]  }
   0x1   :  { %v27_v0 = vld [vmem:[%s12913_s0] sm:$0xff]  ;;  %v28_v1 = vld [vmem:[%s12913_s0 + $0x8] sm:$0xff]  ;;  %v29_v2 = vld [vmem:[%s12913_s0 + $0x10] sm:$0xff]  ;;  %878 = vmatprep.subr.bf16.mxu0 %v12921_v3  ;;  %1816 = vmatprep.subr.bf16.mxu1 %v12921_v3  ;;  %s8717_s17 = smov 96   ;;  %s8718_s22 = smov 32   ;;  %vm663_vm3 = vcmask 130048  }
   0x2   :  { %v78_v4 = vrot.slane %v28_v1, 1  ;;  %v79_v5 = vrot.slane %v27_v0, 1  ;;  %v110_v6 = vrot.slane %v28_v1, 7  ;;  %v111_v7 = vrot.slane %v27_v0, 7  ;;  %v30_v12 = vld [vmem:[%s12913_s0 + $0x18] sm:$0xff]  ;;  %v8635_v33 = vld [vmem:[%s12914_s1] sm:$0xff]  }
   0x3   :  { %v142_v8 = vrot.slane %v28_v1, 5  ;;  %v143_v9 = vrot.slane %v27_v0, 5  ;;  %v80_v10 = vrot.slane %v29_v2, 1  ;;  %v112_v11 = vrot.slane %v29_v2, 7  ;;  %v31_v37 = vld [vmem:[%s12913_s0 + $0x20] sm:$0xff]  ;;  %879 = vmatpush1.bf16.msra.mxu0 %v8635_v33  ;;  %v8636_v41 = vld [vmem:[%s12914_s1 + $0x8] sm:$0xff]  }
   0x4   :  { %v8777_v13 = vsel %vm174_vm0, %v78_v4, %v110_v6  ;;  %v8780_v14 = vsel %vm174_vm0, %v79_v5, %v111_v7  ;;  %v81_v15 = vrot.slane %v30_v12, 1  ;;  %v113_v16 = vrot.slane %v30_v12, 7  ;;  %v32_v48 = vld [vmem:[%s12913_s0 + $0x28] sm:$0xff]  ;;  %880 = vmatprep.subr.bf16.mxu0 %v12921_v3  ;;  %v8637_v55 = vld [vmem:[%s12914_s1 + $0x10] sm:$0xff]   ;;  %s8719_s23 = smov 64   ;;  %s8720_s26 = smov 80  }
   0x5   :  { %v6875_v17 = vpack.i.bf16 %v8777_v13, %v8780_v14  ;;  %v191_v18 = vsel %vm174_vm0, %v110_v6, %v142_v8  ;;  %v192_v19 = vsel %vm174_vm0, %v111_v7, %v143_v9  ;;  %v236_v20 = vrot.slane %v8777_v13, 1  ;;  %v8638_v7 = vld [vmem:[%s12914_s1 + $0x18] sm:$0xff]   ;;  %s8721_s13 = smov 112  }
   0x6   :  { %v237_v21 = vrot.slane %v191_v18, 1  ;;  %v239_v22 = vrot.slane %v8780_v14, 1  ;;  %v240_v23 = vrot.slane %v192_v19, 1  ;;  %v280_v24 = vrot.slane %v191_v18, 2  ;;  %v36_v18 = vld [vmem:[%s12913_s0 + $0x48] sm:$0xff] }
   0x7   :  { %6876 = vrot.lane.b32.xlu1 %v6875_v17, %s8715_s9  ;;  %v283_v25 = vrot.slane %v192_v19, 2  ;;  %v8790_v26 = vsel %vm174_vm0, %v80_v10, %v112_v11  ;;  %v279_v27 = vrot.slane %v8777_v13, 2  ;;  %v282_v28 = vrot.slane %v8780_v14, 2  ;;  %881 = vmatpush1.bf16.msra.mxu0 %v8636_v41  ;;  %v34_v19 = vld [vmem:[%s12913_s0 + $0x38] sm:$0xff] }
   0x8   :  { %v8795_v29 = vsel %vm235_vm1, %v236_v20, %v237_v21  ;;  %v241_v30 = vsel %vm235_vm1, %v239_v22, %v240_v23  ;;  %v6880_v31 = vpack.i.bf16 %v8790_v26, %v8777_v13  ;;  %v144_v32 = vrot.slane %v29_v2, 5  ;;  %882 = vmatprep.subr.bf16.mxu0 %v12921_v3 }
   0x9   :  { %v6885_v34 = vpack.i.bf16 %v241_v30, %v8795_v29  ;;  %v8805_v35 = vsel %vm278_vm2, %v279_v27, %v280_v24  ;;  %v284_v36 = vsel %vm278_vm2, %v282_v28, %v283_v25  ;;  %v6895_v38 = vpack.i.bf16 %v8795_v29, %v241_v30  ;;  %v8639_v24 = vld [vmem:[%s12914_s1 + $0x20] sm:$0xff]  }
   0xa   :  { %v145_v39 = vrot.slane %v30_v12, 5  ;;  %v8813_v40 = vsel %vm174_vm0, %v81_v15, %v113_v16  ;;  %v6890_v42 = vpack.i.bf16 %v284_v36, %v8805_v35  ;;  %v193_v43 = vsel %vm174_vm0, %v112_v11, %v144_v32  ;;  %v33_v11 = vld [vmem:[%s12913_s0 + $0x30] sm:$0xff] }
   0xb   :  { %6886 = vrot.lane.b32.xlu0 %v6885_v34, %s8716_s16  ;;  %6881 = vrot.lane.b32.xlu1 %v6880_v31, %s8717_s17  ;;  %v242_v44 = vrot.slane %v8790_v26, 1  ;;  %v245_v45 = vrot.slane %v8813_v40, 1  ;;  %v243_v47 = vrot.slane %v193_v43, 1  ;;  %v82_v50 = vrot.slane %v31_v37, 1 }
   0xc   :  { %v194_v46 = vsel %vm174_vm0, %v113_v16, %v145_v39  ;;  %v285_v52 = vrot.slane %v8790_v26, 2  ;;  %v114_v53 = vrot.slane %v31_v37, 7  ;;  %v146_v54 = vrot.slane %v31_v37, 5  ;;  %883 = vmatpush1.bf16.msra.mxu0 %v8637_v55  ;;  %v8640_v37 = vld [vmem:[%s12914_s1 + $0x28] sm:$0xff]  }
   0xd   :  { %v246_v49 = vrot.slane %v194_v46, 1  ;;  %v244_v51 = vsel %vm235_vm1, %v242_v44, %v243_v47  ;;  %v6900_v56 = vpack.i.bf16 %v8805_v35, %v284_v36  ;;  %v286_v58 = vrot.slane %v193_v43, 2  ;;  %884 = vmatprep.subr.bf16.mxu0 %v12921_v3  ;;  %v8641_v47 = vld [vmem:[%s12914_s1 + $0x30] sm:$0xff]  }
   0xe   :  { %v83_v59 = vrot.slane %v32_v48, 1  ;;  %v288_v61 = vrot.slane %v8813_v40, 2  ;;  %v289_v62 = vrot.slane %v194_v46, 2  ;;  %v8846_v63 = vsel %vm174_vm0, %v82_v50, %v114_v53 }
   0xf   :  { %6891 = vrot.lane.b32.xlu0 %v6890_v42, %s8718_s22  ;;  %6896 = vrot.lane.b32.xlu1 %v6895_v38, %s8719_s23  ;;  %v8838_v57 = vsel %vm235_vm1, %v245_v45, %v246_v49  ;;  %v195_v0 = vsel %vm174_vm0, %v114_v53, %v146_v54  ;;  %v115_v1 = vrot.slane %v32_v48, 7  ;;  %v147_v2 = vrot.slane %v32_v48, 5 }
  0x10   :  { %v8841_v60 = vpack.i.bf16 %v8838_v57, %v244_v51  ;;  %v6920_v4 = vpack.i.bf16 %v8813_v40, %v8790_v26  ;;  %v248_v5 = vrot.slane %v8846_v63, 1  ;;  %v249_v6 = vrot.slane %v195_v0, 1  ;;  %885 = vmatpush1.bf16.msra.mxu0 %v8638_v7 }
  0x11   :  { %v6905_v8 = vpack.i.bf16 %v244_v51, %v8795_v29  ;;  %v8860_v9 = vsel %vm174_vm0, %v83_v59, %v115_v1  ;;  %v196_v10 = vsel %vm174_vm0, %v115_v1, %v147_v2  ;;  %v8867_v12 = vsel %vm278_vm2, %v285_v52, %v286_v58  ;;  %886 = vmatprep.subr.bf16.mxu0 %v12921_v3 }
  0x12   :  { %v8870_v15 = vsel %vm278_vm2, %v288_v61, %v289_v62  ;;  %v291_v16 = vrot.slane %v8846_v63, 2  ;;  %v292_v17 = vrot.slane %v195_v0, 2  ;;  %v250_v20 = vsel %vm235_vm1, %v248_v5, %v249_v6  ;;  %v8643_v5 = vld [vmem:[%s12914_s1 + $0x40] sm:$0xff]  }
  0x13   :  { %6901 = vrot.lane.b32.xlu0 %v6900_v56, %s8720_s26  ;;  %6911 = vrot.lane.b32.xlu1 %v8841_v60, %s8716_s16  ;;  %v294_v21 = vrot.slane %v8860_v9, 2  ;;  %v295_v22 = vrot.slane %v196_v10, 2  ;;  %v84_v23 = vrot.slane %v33_v11, 1  ;;  %v6915_v25 = vpack.i.bf16 %v8870_v15, %v8867_v12 }
  0x14   :  { %v116_v27 = vrot.slane %v33_v11, 7  ;;  %v148_v28 = vrot.slane %v33_v11, 5  ;;  %v6940_v29 = vpack.i.bf16 %v250_v20, %v8838_v57  ;;  %v8892_v30 = vsel %vm278_vm2, %v291_v16, %v292_v17  ;;  %887 = vmatpush1.bf16.msra.mxu0 %v8639_v24  ;;  %v37_v11 = vld [vmem:[%s12913_s0 + $0x50] sm:$0xff] }
  0x15   :  { %v251_v31 = vrot.slane %v8860_v9, 1  ;;  %v8896_v32 = vsel %vm278_vm2, %v294_v21, %v295_v22  ;;  %v252_v33 = vrot.slane %v196_v10, 1  ;;  %v86_v34 = vrot.slane %v36_v18, 1  ;;  %888 = vmatprep.subr.bf16.mxu0 %v12921_v3 }
  0x16   :  { %v85_v36 = vrot.slane %v34_v19, 1  ;;  %v8904_v38 = vsel %vm174_vm0, %v84_v23, %v116_v27  ;;  %v118_v39 = vrot.slane %v36_v18, 7  ;;  %v197_v41 = vsel %vm174_vm0, %v116_v27, %v148_v28 }
  0x17   :  { %6906 = vrot.lane.b32.xlu0 %v6905_v8, %s8721_s13  ;;  %6921 = vrot.lane.b32.xlu1 %v6920_v4, %s8715_s9  ;;  %v117_v42 = vrot.slane %v34_v19, 7  ;;  %v150_v43 = vrot.slane %v36_v18, 5  ;;  %v297_v44 = vrot.slane %v8904_v38, 2  ;;  %v298_v45 = vrot.slane %v197_v41, 2  ;;  %v35_v4 = vld [vmem:[%s12913_s0 + $0x40] sm:$0xff] }
  0x18   :  { %v149_v46 = vrot.slane %v34_v19, 5  ;;  %889 = vmatpush1.bf16.msra.mxu0 %v8640_v37  ;;  %v6935_v50 = vpack.i.bf16 %v8846_v63, %v8813_v40  ;;  %v6950_v51 = vpack.i.bf16 %v8896_v32, %v8892_v30  ;;  %v253_v54 = vsel %vm235_vm1, %v251_v31, %v252_v33 }
  0x19   :  { %v8913_v48 = vsel %vm174_vm0, %v85_v36, %v117_v42  ;;  %890 = vmatprep.subr.bf16.mxu0 %v12921_v3  ;;  %v8927_v55 = vsel %vm174_vm0, %v86_v34, %v118_v39  ;;  %v199_v56 = vsel %vm174_vm0, %v118_v39, %v150_v43  ;;  %v8931_v57 = vsel %vm278_vm2, %v297_v44, %v298_v45  ;;  %v41_v34 = vld [vmem:[%s12913_s0 + $0x70] sm:$0xff] }
  0x1a   :  { %v198_v49 = vsel %vm174_vm0, %v117_v42, %v149_v46  ;;  %v331_v52 = vrot.slane %v8913_v48, 2  ;;  %v6945_v61 = vpack.i.bf16 %v253_v54, %v250_v20  ;;  %v254_v62 = vrot.slane %v8904_v38, 1  ;;  %v42_v42 = vld [vmem:[%s12913_s0 + $0x78] sm:$0xff] }
  0x1b   :  { %6916 = vrot.lane.b32.xlu0 %v6915_v25, %s8718_s22  ;;  %6931 = vrot.lane.b32.xlu1 %v6915_v25, %s8720_s26  ;;  %v332_v53 = vrot.slane %v198_v49, 2  ;;  %v255_v0 = vrot.slane %v197_v41, 1  ;;  %v257_v1 = vrot.slane %v8927_v55, 1  ;;  %v258_v2 = vrot.slane %v199_v56, 1 }
  0x1c   :  { %891 = vmatpush1.bf16.msra.mxu0 %v8641_v47  ;;  %v6955_v6 = vpack.i.bf16 %v8860_v9, %v8846_v63  ;;  %v6970_v7 = vpack.i.bf16 %v8904_v38, %v8860_v9  ;;  %v300_v16 = vrot.slane %v8927_v55, 2  ;;  %v301_v17 = vrot.slane %v199_v56, 2 }
  0x1d   :  { %v8934_v58 = vsel %vm278_vm2, %v331_v52, %v332_v53  ;;  %892 = vmatprep.subr.bf16.mxu0 %v12921_v3  ;;  %v8959_v8 = vsel %vm235_vm1, %v254_v62, %v255_v0  ;;  %v8962_v10 = vsel %vm235_vm1, %v257_v1, %v258_v2  ;;  %v325_v19 = vrot.slane %v8913_v48, 1 }
  0x1e   :  { %v785_v59 = vpack.c.bf16 %v8931_v57, %v8934_v58  ;;  %v6980_v18 = vpack.i.bf16 %v8962_v10, %v8959_v8  ;;  %v326_v20 = vrot.slane %v198_v49, 1  ;;  %v87_v21 = vrot.slane %v35_v4, 1 }
  0x1f   :  { %6926 = vrot.lane.b32.xlu0 %v8841_v60, %s8719_s23  ;;  %6941 = vrot.lane.b32.xlu1 %v6940_v29, %s8721_s13  ;;  %v8642_v60 = vld [vmem:[%s12914_s1 + $0x38] sm:$0xff]   ;;  %v88_v22 = vrot.slane %v37_v11, 1  ;;  %v119_v23 = vrot.slane %v35_v4, 7  ;;  %v120_v24 = vrot.slane %v37_v11, 7  ;;  %v151_v25 = vrot.slane %v35_v4, 5 }
  0x20   :  { %893 = vmatpush1.bf16.msra.mxu0 %v8642_v60  ;;  %v152_v27 = vrot.slane %v37_v11, 5  ;;  %v6975_v28 = vpack.i.bf16 %v8959_v8, %v253_v54  ;;  %v6990_v29 = vpack.i.bf16 %v8913_v48, %v8904_v38  ;;  %v8981_v31 = vsel %vm278_vm2, %v300_v16, %v301_v17 }
  0x21   :  { %894 = vmatprep.subr.bf16.mxu0 %v12921_v3  ;;  %v327_v33 = vsel %vm235_vm1, %v325_v19, %v326_v20  ;;  %v8988_v36 = vsel %vm174_vm0, %v87_v21, %v119_v23  ;;  %v8991_v37 = vsel %vm174_vm0, %v88_v22, %v120_v24  ;;  %v200_v39 = vsel %vm174_vm0, %v119_v23, %v151_v25 }
  0x22   :  { %v201_v41 = vsel %vm174_vm0, %v120_v24, %v152_v27  ;;  %v6985_v43 = vpack.i.bf16 %v8981_v31, %v8931_v57  ;;  %v7000_v44 = vpack.i.bf16 %v8934_v58, %v8931_v57  ;;  %v6995_v45 = vpack.i.bf16 %v327_v33, %v8959_v8  ;;  %v38_v8 = vld [vmem:[%s12913_s0 + $0x58] sm:$0xff] }
  0x23   :  { %6936 = vrot.lane.b32.xlu0 %v6935_v50, %s8717_s17  ;;  %6951 = vrot.lane.b32.xlu1 %v6950_v51, %s8718_s22  ;;  %v92_v46 = vrot.slane %v41_v34, 1  ;;  %v303_v47 = vrot.slane %v8988_v36, 2  ;;  %v304_v49 = vrot.slane %v200_v39, 2  ;;  %v306_v50 = vrot.slane %v8991_v37, 2 }
  0x24   :  { %895 = vmatpush1.bf16.msra.mxu0 %v8643_v5  ;;  %v307_v52 = vrot.slane %v201_v41, 2  ;;  %v156_v53 = vrot.slane %v41_v34, 5  ;;  %v93_v54 = vrot.slane %v42_v42, 1  ;;  %v125_v56 = vrot.slane %v42_v42, 7 }
  0x25   :  { %2756 = vmatprep.subr.bf16.mxu0 %v12921_v3  ;;  %v7010_v60 = vpack.i.bf16 %v8962_v10, %v327_v33  ;;  %v157_v0 = vrot.slane %v42_v42, 5  ;;  %v261_v1 = vrot.slane %v200_v39, 1  ;;  %v305_v17 = vsel %vm278_vm2, %v303_v47, %v304_v49 }
  0x26   :  { %v9017_v5 = vsel %vm174_vm0, %v93_v54, %v125_v56  ;;  %v7005_v21 = vpack.i.bf16 %v8927_v55, %v8913_v48  ;;  %v89_v22 = vrot.slane %v38_v8, 1  ;;  %v121_v27 = vrot.slane %v38_v8, 7 }
  0x27   :  { %6946 = vrot.lane.b32.xlu0 %v6945_v61, %s8716_s16  ;;  %6961 = vrot.lane.b32.xlu1 %v6945_v61, %s8719_s23  ;;  %v260_v61 = vrot.slane %v8988_v36, 1  ;;  %v9027_v16 = vsel %vm174_vm0, %v125_v56, %v157_v0  ;;  %v334_v19 = vrot.slane %v9017_v5, 2  ;;  %v781_v39 = vpack.c.bf16 %v8892_v30, %v8870_v15 }
  0x28   :  { %v335_v20 = vrot.slane %v9027_v16, 2  ;;  %v783_v42 = vpack.c.bf16 %v8931_v57, %v8896_v32  ;;  %vm678_vm4 = vcmask 261120   ;;  %vm693_vm5 = vcmask 392192  }
  0x29   :  { %v262_v48 = vsel %vm235_vm1, %v260_v61, %v261_v1  ;;  %vm710_vm6 = vcmask 523264   ;;  %vm727_vm7 = vcmask 654336   ;;  %vm744_vm8 = vcmask 785408  }
  0x2a   :  { %v9041_v24 = vsel %vm278_vm2, %v334_v19, %v335_v20  ;;  %vm761_vm9 = vcmask 916480  }
  0x2b   :  { %6956 = vrot.lane.b32.xlu0 %v6955_v6, %s8715_s9  ;;  %6971 = vrot.lane.b32.xlu1 %v6970_v7, %s8717_s17  ;;  %v263_v6 = vrot.slane %v8991_v37, 1  ;;  %v264_v7 = vrot.slane %v201_v41, 1  ;;  %v39_v41 = vld [vmem:[%s12913_s0 + $0x60] sm:$0xff] }
  0x2c   :  { %v122_v47 = vrot.slane %v39_v41, 7 }
  0x2d   :  { %v265_v33 = vsel %vm235_vm1, %v263_v6, %v264_v7 }
  0x2f   :  { %6966 = vrot.lane.b32.xlu0 %v6950_v51, %s8720_s26  ;;  %6981 = vrot.lane.b32.xlu1 %v6980_v18, %s8716_s16  ;;  %v124_v51 = vrot.slane %v41_v34, 7  ;;  %v9031_v18 = vsel %vm278_vm2, %v306_v50, %v307_v52  ;;  %v779_v34 = vpack.c.bf16 %v8867_v12, %v8805_v35  ;;  %v7015_v35 = vpack.i.bf16 %v265_v33, %v262_v48 }
  0x30   :  { %v7020_v25 = vpack.i.bf16 %v9031_v18, %v305_v17  ;;  %v7030_v12 = vpack.i.bf16 %v8962_v10, %v262_v48  ;;  %v787_v7 = vpack.c.bf16 %v9031_v18, %v8981_v31 }
  0x31   :  { %v9010_v62 = vsel %vm174_vm0, %v92_v46, %v124_v51  ;;  %v9014_v4 = vsel %vm174_vm0, %v124_v51, %v156_v53  ;;  %6657 = vmatprep.mubr.msk.bf16.mxu0 %vm663_vm3, %v779_v34  ;;  %v90_v46 = vrot.slane %v39_v41, 1  ;;  %v154_v51 = vrot.slane %v39_v41, 5 }
  0x32   :  { %v318_v2 = vrot.slane %v9010_v62, 2  ;;  %v319_v11 = vrot.slane %v9014_v4, 2  ;;  %v7025_v53 = vpack.i.bf16 %v8927_v55, %v8988_v36 }
  0x33   :  { %6976 = vrot.lane.b32.xlu0 %v6975_v28, %s8721_s13  ;;  %6991 = vrot.lane.b32.xlu1 %v6990_v29, %s8715_s9  ;;  %v153_v28 = vrot.slane %v38_v8, 5  ;;  %v9079_v0 = vsel %vm174_vm0, %v90_v46, %v122_v47  ;;  %v7035_v8 = vpack.i.bf16 %v8981_v31, %v305_v17 }
  0x34   :  { %v9038_v23 = vsel %vm278_vm2, %v318_v2, %v319_v11  ;;  %v203_v2 = vsel %vm174_vm0, %v122_v47, %v154_v51  ;;  %v269_v20 = vrot.slane %v9079_v0, 1  ;;  %v276_v51 = vrot.slane %v9014_v4, 1 }
  0x35   :  { %v793_v29 = vpack.c.bf16 %v9038_v23, %v9041_v24 }
  0x37   :  { %6986 = vrot.lane.b32.xlu0 %v6985_v43, %s8718_s22  ;;  %7001 = vrot.lane.b32.xlu1 %v7000_v44, %s8720_s26  ;;  %v40_v43 = vld [vmem:[%s12913_s0 + $0x68] sm:$0xff]  ;;  %v9067_v44 = vsel %vm174_vm0, %v89_v22, %v121_v27 }
  0x38   :  { %v91_v49 = vrot.slane %v40_v43, 1  ;;  %v123_v50 = vrot.slane %v40_v43, 7  ;;  %v155_v52 = vrot.slane %v40_v43, 5  ;;  %v7040_v54 = vpack.i.bf16 %v9067_v44, %v8991_v37 }
  0x39   :  { %v266_v10 = vrot.slane %v9067_v44, 1 }
  0x3a   :  { %v9082_v1 = vsel %vm174_vm0, %v91_v49, %v123_v50  ;;  %v204_v6 = vsel %vm174_vm0, %v123_v50, %v155_v52  ;;  %v275_v50 = vrot.slane %v9010_v62, 1 }
  0x3b   :  { %6996 = vrot.lane.b32.xlu0 %v6995_v45, %s8719_s23  ;;  %7011 = vrot.lane.b32.xlu1 %v7010_v60, %s8721_s13  ;;  %v202_v45 = vsel %vm174_vm0, %v121_v27, %v153_v28  ;;  %v309_v60 = vrot.slane %v9067_v44, 2  ;;  %v272_v22 = vrot.slane %v9082_v1, 1  ;;  %v312_v27 = vrot.slane %v9079_v0, 2 }
  0x3c   :  { %v267_v56 = vrot.slane %v202_v45, 1  ;;  %v310_v61 = vrot.slane %v202_v45, 2  ;;  %v313_v28 = vrot.slane %v203_v2, 2  ;;  %v315_v46 = vrot.slane %v9082_v1, 2 }
  0x3d   :  { %v316_v47 = vrot.slane %v204_v6, 2 }
  0x3e   :  { %v268_v11 = vsel %vm235_vm1, %v266_v10, %v267_v56  ;;  %v9093_v19 = vsel %vm278_vm2, %v309_v60, %v310_v61  ;;  %v9105_v43 = vsel %vm278_vm2, %v312_v27, %v313_v28  ;;  %v7110_v56 = vpack.i.bf16 %v9017_v5, %v9010_v62 }
  0x3f   :  { %7006 = vrot.lane.b32.xlu0 %v7005_v21, %s8717_s17  ;;  %7021 = vrot.lane.b32.xlu1 %v7020_v25, %s8718_s22  ;;  %v270_v21 = vrot.slane %v203_v2, 1  ;;  %v273_v25 = vrot.slane %v204_v6, 1  ;;  %v7045_v17 = vpack.i.bf16 %v268_v11, %v265_v33  ;;  %v7060_v48 = vpack.i.bf16 %v9093_v19, %v9031_v18 }
  0x40   :  { %v7065_v33 = vpack.i.bf16 %v9082_v1, %v9079_v0  ;;  %v7080_v45 = vpack.i.bf16 %v9105_v43, %v9093_v19  ;;  %v9123_v52 = vsel %vm278_vm2, %v315_v46, %v316_v47  ;;  %v328_v60 = vrot.slane %v9017_v5, 1 }
  0x41   :  { %v271_v34 = vsel %vm235_vm1, %v269_v20, %v270_v21  ;;  %v274_v41 = vsel %vm235_vm1, %v272_v22, %v273_v25  ;;  %v7095_v10 = vpack.i.bf16 %v9123_v52, %v9105_v43  ;;  %v329_v61 = vrot.slane %v9027_v16, 1 }
  0x42   :  { %v7075_v49 = vpack.i.bf16 %v271_v34, %v268_v11  ;;  %v7105_v2 = vpack.i.bf16 %v9038_v23, %v9123_v52  ;;  %v7120_v6 = vpack.i.bf16 %v9041_v24, %v9038_v23 }
  0x43   :  { %7016 = vrot.lane.b32.xlu0 %v7015_v35, %s8716_s16  ;;  %7031 = vrot.lane.b32.xlu1 %v7030_v12, %s8719_s23  ;;  %v789_v35 = vpack.c.bf16 %v9105_v43, %v9093_v19  ;;  %v7070_v12 = vpack.i.bf16 %v274_v41, %v271_v34 }
  0x47   :  { %7026 = vrot.lane.b32.xlu0 %v7025_v53, %s8715_s9  ;;  %7041 = vrot.lane.b32.xlu1 %v7040_v54, %s8717_s17  ;;  %v791_v53 = vpack.c.bf16 %v9038_v23, %v9123_v52 }
  0x4b   :  { %7036 = vrot.lane.b32.xlu0 %v7035_v8, %s8720_s26  ;;  %7051 = vrot.lane.b32.xlu1 %v7040_v54, %s8715_s9  ;;  %v277_v54 = vsel %vm235_vm1, %v275_v50, %v276_v51  ;;  %v330_v8 = vsel %vm235_vm1, %v328_v60, %v329_v61 }
  0x4c   :  { %v7100_v4 = vpack.i.bf16 %v277_v54, %v274_v41  ;;  %v7115_v11 = vpack.i.bf16 %v330_v8, %v277_v54 }
  0x4f   :  { %7046 = vrot.lane.b32.xlu0 %v7045_v17, %s8721_s13  ;;  %7061 = vrot.lane.b32.xlu1 %v7060_v48, %s8720_s26 }
  0x53   :  { %7056 = vrot.lane.b32.xlu0 %v7045_v17, %s8719_s23  ;;  %7071 = vrot.lane.b32.xlu1 %v7070_v12, %s8721_s13 }
  0x57   :  { %7066 = vrot.lane.b32.xlu0 %v7065_v33, %s8717_s17  ;;  %7081 = vrot.lane.b32.xlu1 %v7080_v45, %s8718_s22 }
  0x5b   :  { %7076 = vrot.lane.b32.xlu0 %v7075_v49, %s8716_s16  ;;  %7091 = vrot.lane.b32.xlu1 %v7070_v12, %s8719_s23 }
  0x5f   :  { %7086 = vrot.lane.b32.xlu0 %v7065_v33, %s8715_s9  ;;  %603 = vrot.lane.b32.xlu1 %v9010_v62, %s8717_s17 }
  0x63   :  { %7096 = vrot.lane.b32.xlu0 %v7095_v10, %s8720_s26  ;;  %7101 = vrot.lane.b32.xlu1 %v7100_v4, %s8716_s16 }
  0x67   :  { %645 = vrot.lane.b32.xlu0 %v277_v54, %s8721_s13  ;;  %7111 = vrot.lane.b32.xlu1 %v7110_v56, %s8715_s9 }
  0x6b   :  { %7106 = vrot.lane.b32.xlu0 %v7105_v2, %s8718_s22  ;;  %7121 = vrot.lane.b32.xlu1 %v7120_v6, %s8720_s26 }
  0x6f   :  { %7116 = vrot.lane.b32.xlu0 %v7115_v11, %s8719_s23  ;;  %647 = vrot.lane.b32.xlu1 %v330_v8, %s8721_s13 }
  0x73   :  { %605 = vrot.lane.b32.xlu0 %v9017_v5, %s8717_s17 }
  0x79   :  { %v6877_v16 = vpop.permute.xlu1 %6876 }
  0x7a   :  { %v6879_v12 = vunpack.i.h.bf16 %v6877_v16  ;;  %v6878_v33 = vunpack.i.l.bf16 %v6877_v16 }
  0x7d   :  { %v6887_v20 = vpop.permute.xlu0 %6886  ;;  %v6882_v21 = vpop.permute.xlu1 %6881 }
  0x7e   :  { %v6889_v22 = vunpack.i.h.bf16 %v6887_v20  ;;  %v6888_v25 = vunpack.i.l.bf16 %v6887_v20  ;;  %v6884_v61 = vunpack.i.h.bf16 %v6882_v21  ;;  %v6883_v2 = vunpack.i.l.bf16 %v6882_v21 }
  0x80   :  { %v665_v45 = vsel %vm663_vm3, %v8780_v14, %v6889_v22  ;;  %v664_v5 = vsel %vm663_vm3, %v8777_v13, %v6888_v25 }
  0x81   :  { %v6892_v27 = vpop.permute.xlu0 %6891  ;;  %v6897_v28 = vpop.permute.xlu1 %6896 }
  0x82   :  { %v6894_v17 = vunpack.i.h.bf16 %v6892_v27  ;;  %v6893_v48 = vunpack.i.l.bf16 %v6892_v27  ;;  %v6899_v34 = vunpack.i.h.bf16 %v6897_v28  ;;  %v6898_v41 = vunpack.i.l.bf16 %v6897_v28 }
  0x84   :  { %v679_v46 = vsel %vm678_vm4, %v664_v5, %v6893_v48  ;;  %v680_v47 = vsel %vm678_vm4, %v665_v45, %v6894_v17 }
  0x85   :  { %v694_v49 = vsel %vm693_vm5, %v679_v46, %v6878_v33  ;;  %v695_v50 = vsel %vm693_vm5, %v680_v47, %v6879_v12  ;;  %v6902_v51 = vpop.permute.xlu0 %6901  ;;  %v6912_v54 = vpop.permute.xlu1 %6911 }
  0x86   :  { %v711_v10 = vsel %vm710_vm6, %v694_v49, %v6898_v41  ;;  %v712_v4 = vsel %vm710_vm6, %v695_v50, %v6899_v34  ;;  %v6904_v56 = vunpack.i.h.bf16 %v6902_v51  ;;  %v6903_v14 = vunpack.i.l.bf16 %v6902_v51 }
  0x87   :  { %v6913_v6 = vunpack.i.l.bf16 %v6912_v54 }
  0x88   :  { %v728_v60 = vsel %vm727_vm7, %v711_v10, %v6903_v14  ;;  %v729_v13 = vsel %vm727_vm7, %v712_v4, %v6904_v56 }
  0x89   :  { %v6907_v8 = vpop.permute.xlu0 %6906  ;;  %v6922_v11 = vpop.permute.xlu1 %6921  ;;  %v745_v22 = vsel %vm744_vm8, %v728_v60, %v6883_v2  ;;  %v746_v25 = vsel %vm744_vm8, %v729_v13, %v6884_v61  ;;  %v666_v17 = vsel %vm663_vm3, %v8790_v26, %v6913_v6 }
  0x8a   :  { %v6909_v16 = vunpack.i.h.bf16 %v6907_v8  ;;  %v6908_v20 = vunpack.i.l.bf16 %v6907_v8  ;;  %v6924_v12 = vunpack.i.h.bf16 %v6922_v11  ;;  %v6923_v33 = vunpack.i.l.bf16 %v6922_v11 }
  0x8c   :  { %v762_v27 = vsel %vm761_vm9, %v745_v22, %v6908_v20  ;;  %v763_v28 = vsel %vm761_vm9, %v746_v25, %v6909_v16  ;;  %v696_v26 = vsel %vm693_vm5, %v679_v46, %v6923_v33  ;;  %v6914_v46 = vunpack.i.h.bf16 %v6912_v54 }
  0x8d   :  { %v6917_v48 = vpop.permute.xlu0 %6916  ;;  %v6932_v34 = vpop.permute.xlu1 %6931  ;;  %v778_v21 = vpack.c.bf16 %v763_v28, %v762_v27 }
  0x8e   :  { %v6918_v41 = vunpack.i.l.bf16 %v6917_v48  ;;  %v6934_v51 = vunpack.i.h.bf16 %v6932_v34  ;;  %v6933_v10 = vunpack.i.l.bf16 %v6932_v34  ;;  %v6919_v28 = vunpack.i.h.bf16 %v6917_v48 }
  0x8f   :  { %911 = vmatmul.mubr.bf16.vlgmr.msra.gmra.mrb[0].mxu0 %v778_v21  ;;  %v667_v21 = vsel %vm663_vm3, %v8813_v40, %v6914_v46 }
  0x90   :  { %v681_v45 = vsel %vm678_vm4, %v666_v17, %v6918_v41  ;;  %6658 = vmatprep.mubr.msk.bf16.mxu0 %vm663_vm3, %v781_v39  ;;  %v682_v48 = vsel %vm678_vm4, %v667_v21, %v6919_v28 }
  0x91   :  { %v6927_v5 = vpop.permute.xlu0 %6926  ;;  %v6942_v47 = vpop.permute.xlu1 %6941  ;;  %v697_v4 = vsel %vm693_vm5, %v681_v45, %v6924_v12 }
  0x92   :  { %v6929_v49 = vunpack.i.h.bf16 %v6927_v5  ;;  %v6928_v50 = vunpack.i.l.bf16 %v6927_v5  ;;  %v6944_v60 = vunpack.i.h.bf16 %v6942_v47  ;;  %v6943_v13 = vunpack.i.l.bf16 %v6942_v47 }
  0x94   :  { %v713_v56 = vsel %vm710_vm6, %v696_v26, %v6928_v50  ;;  %v714_v14 = vsel %vm710_vm6, %v697_v4, %v6929_v49 }
  0x95   :  { %v6937_v61 = vpop.permute.xlu0 %6936  ;;  %v9181_v15 = vpop.permute.xlu1 %6951  ;;  %v730_v2 = vsel %vm727_vm7, %v713_v56, %v6933_v10  ;;  %v731_v6 = vsel %vm727_vm7, %v714_v14, %v6934_v51 }
  0x96   :  { %v6939_v30 = vunpack.i.h.bf16 %v6937_v61  ;;  %v6938_v39 = vunpack.i.l.bf16 %v6937_v61  ;;  %v6953_v17 = vunpack.i.l.bf16 %v9181_v15 }
  0x98   :  { %v747_v8 = vsel %vm744_vm8, %v730_v2, %v6938_v39  ;;  %v748_v11 = vsel %vm744_vm8, %v731_v6, %v6939_v30 }
  0x99   :  { %v6947_v16 = vpop.permute.xlu0 %6946  ;;  %v6962_v20 = vpop.permute.xlu1 %6961  ;;  %v764_v22 = vsel %vm761_vm9, %v747_v8, %v6943_v13  ;;  %v765_v25 = vsel %vm761_vm9, %v748_v11, %v6944_v60 }
  0x9a   :  { %v6948_v27 = vunpack.i.l.bf16 %v6947_v16  ;;  %v780_v34 = vpack.c.bf16 %v765_v25, %v764_v22  ;;  %v6964_v5 = vunpack.i.h.bf16 %v6962_v20  ;;  %v6963_v47 = vunpack.i.l.bf16 %v6962_v20 }
  0x9b   :  { %v6949_v6 = vunpack.i.h.bf16 %v6947_v16 }
  0x9c   :  { %v668_v54 = vsel %vm663_vm3, %v8846_v63, %v6948_v27  ;;  %919 = vmatmul.mubr.bf16.gmra.mrb[4].mxu0 %v780_v34 }
  0x9d   :  { %v6957_v41 = vpop.permute.xlu0 %6956  ;;  %v6972_v12 = vpop.permute.xlu1 %6971  ;;  %6659 = vmatprep.mubr.msk.bf16.mxu0 %vm663_vm3, %v783_v42  ;;  %v683_v49 = vsel %vm678_vm4, %v668_v54, %v6953_v17  ;;  %v6954_v17 = vunpack.i.h.bf16 %v9181_v15  ;;  %v669_v16 = vsel %vm663_vm3, %v8860_v9, %v6949_v6 }
  0x9e   :  { %v6959_v33 = vunpack.i.h.bf16 %v6957_v41  ;;  %v6958_v45 = vunpack.i.l.bf16 %v6957_v41  ;;  %v6974_v4 = vunpack.i.h.bf16 %v6972_v12  ;;  %v6973_v56 = vunpack.i.l.bf16 %v6972_v12 }
  0x9f   :  { %v684_v15 = vsel %vm678_vm4, %v669_v16, %v6954_v17 }
  0xa0   :  { %v698_v40 = vsel %vm693_vm5, %v682_v48, %v6958_v45  ;;  %v699_v63 = vsel %vm693_vm5, %v683_v49, %v6959_v33 }
  0xa1   :  { %v6967_v50 = vpop.permute.xlu0 %6966  ;;  %v6982_v26 = vpop.permute.xlu1 %6981  ;;  %v715_v32 = vsel %vm710_vm6, %v698_v40, %v6963_v47  ;;  %v716_v42 = vsel %vm710_vm6, %v699_v63, %v6964_v5 }
  0xa2   :  { %v6969_v51 = vunpack.i.h.bf16 %v6967_v50  ;;  %v6968_v10 = vunpack.i.l.bf16 %v6967_v50  ;;  %v6983_v13 = vunpack.i.l.bf16 %v6982_v26 }
  0xa4   :  { %v732_v14 = vsel %vm727_vm7, %v715_v32, %v6968_v10  ;;  %v733_v60 = vsel %vm727_vm7, %v716_v42, %v6969_v51  ;;  %v670_v22 = vsel %vm663_vm3, %v8904_v38, %v6983_v13 }
  0xa5   :  { %v6977_v61 = vpop.permute.xlu0 %6976  ;;  %v6992_v30 = vpop.permute.xlu1 %6991  ;;  %v749_v46 = vsel %vm744_vm8, %v732_v14, %v6973_v56  ;;  %v750_v8 = vsel %vm744_vm8, %v733_v60, %v6974_v4  ;;  %v6984_v56 = vunpack.i.h.bf16 %v6982_v26 }
  0xa6   :  { %v6979_v39 = vunpack.i.h.bf16 %v6977_v61  ;;  %v6978_v2 = vunpack.i.l.bf16 %v6977_v61  ;;  %v6994_v21 = vunpack.i.h.bf16 %v6992_v30  ;;  %v6993_v54 = vunpack.i.l.bf16 %v6992_v30 }
  0xa8   :  { %v766_v11 = vsel %vm761_vm9, %v749_v46, %v6978_v2  ;;  %v767_v20 = vsel %vm761_vm9, %v750_v8, %v6979_v39  ;;  %v700_v9 = vsel %vm693_vm5, %v684_v15, %v6993_v54  ;;  %v671_v46 = vsel %vm663_vm3, %v8927_v55, %v6984_v56 }
  0xa9   :  { %v6987_v25 = vpop.permute.xlu0 %6986  ;;  %v7002_v27 = vpop.permute.xlu1 %7001  ;;  %v782_v28 = vpack.c.bf16 %v767_v20, %v766_v11 }
  0xaa   :  { %v6988_v34 = vunpack.i.l.bf16 %v6987_v25  ;;  %v7004_v38 = vunpack.i.h.bf16 %v7002_v27  ;;  %v7003_v5 = vunpack.i.l.bf16 %v7002_v27  ;;  %v6989_v30 = vunpack.i.h.bf16 %v6987_v25 }
  0xab   :  { %927 = vmatmul.mubr.bf16.gmra.mrb[8].mxu0 %v782_v28 }
  0xac   :  { %v685_v41 = vsel %vm678_vm4, %v670_v22, %v6988_v34  ;;  %6660 = vmatprep.mubr.msk.bf16.mxu0 %vm663_vm3, %v785_v59 }
  0xad   :  { %v6997_v12 = vpop.permute.xlu0 %6996  ;;  %v9220_v33 = vpop.permute.xlu1 %7011  ;;  %v701_v47 = vsel %vm693_vm5, %v685_v41, %v6994_v21 }
  0xae   :  { %v6999_v45 = vunpack.i.h.bf16 %v6997_v12  ;;  %v6998_v48 = vunpack.i.l.bf16 %v6997_v12  ;;  %v7013_v57 = vunpack.i.l.bf16 %v9220_v33 }
  0xb0   :  { %v717_v49 = vsel %vm710_vm6, %v700_v9, %v6998_v48  ;;  %v718_v40 = vsel %vm710_vm6, %v701_v47, %v6999_v45  ;;  %v7014_v48 = vunpack.i.h.bf16 %v9220_v33 }
  0xb1   :  { %v7007_v58 = vpop.permute.xlu0 %7006  ;;  %v7022_v59 = vpop.permute.xlu1 %7021  ;;  %v735_v63 = vsel %vm727_vm7, %v718_v40, %v7004_v38  ;;  %v734_v51 = vsel %vm727_vm7, %v717_v49, %v7003_v5 }
  0xb2   :  { %v7008_v50 = vunpack.i.l.bf16 %v7007_v58  ;;  %v752_v10 = vsel %vm744_vm8, %v735_v63, %v6974_v4  ;;  %v7023_v2 = vunpack.i.l.bf16 %v7022_v59  ;;  %v7009_v34 = vunpack.i.h.bf16 %v7007_v58 }
  0xb3   :  { %v769_v61 = vsel %vm761_vm9, %v752_v10, %v6979_v39  ;;  %v686_v39 = vsel %vm678_vm4, %v671_v46, %v6989_v30  ;;  %v7024_v9 = vunpack.i.h.bf16 %v7022_v59 }
  0xb4   :  { %v751_v32 = vsel %vm744_vm8, %v734_v51, %v7008_v50 }
  0xb5   :  { %v7017_v42 = vpop.permute.xlu0 %7016  ;;  %v7032_v14 = vpop.permute.xlu1 %7031  ;;  %v768_v60 = vsel %vm761_vm9, %v751_v32, %v7013_v57 }
  0xb6   :  { %v7018_v13 = vunpack.i.l.bf16 %v7017_v42  ;;  %v784_v6 = vpack.c.bf16 %v769_v61, %v768_v60  ;;  %v7034_v22 = vunpack.i.h.bf16 %v7032_v14  ;;  %v7033_v25 = vunpack.i.l.bf16 %v7032_v14 }
  0xb7   :  { %v7019_v54 = vunpack.i.h.bf16 %v7017_v42 }
  0xb8   :  { %v672_v8 = vsel %vm663_vm3, %v8988_v36, %v7018_v13  ;;  %935 = vmatmul.mubr.bf16.gmra.mrb[12].mxu0 %v784_v6 }
  0xb9   :  { %v7027_v26 = vpop.permute.xlu0 %7026  ;;  %v7042_v4 = vpop.permute.xlu1 %7041  ;;  %6661 = vmatprep.mubr.msk.bf16.mxu0 %vm663_vm3, %v787_v7  ;;  %v687_v27 = vsel %vm678_vm4, %v672_v8, %v7023_v2  ;;  %v673_v47 = vsel %vm663_vm3, %v8991_v37, %v7019_v54 }
  0xba   :  { %v7029_v11 = vunpack.i.h.bf16 %v7027_v26  ;;  %v7028_v20 = vunpack.i.l.bf16 %v7027_v26  ;;  %v7043_v41 = vunpack.i.l.bf16 %v7042_v4  ;;  %v688_v33 = vsel %vm678_vm4, %v673_v47, %v7024_v9 }
  0xbb   :  { %v7044_v61 = vunpack.i.h.bf16 %v7042_v4 }
  0xbc   :  { %v702_v55 = vsel %vm693_vm5, %v686_v39, %v7028_v20  ;;  %v703_v36 = vsel %vm693_vm5, %v687_v27, %v7029_v11 }
  0xbd   :  { %v7037_v28 = vpop.permute.xlu0 %7036  ;;  %v7052_v17 = vpop.permute.xlu1 %7051  ;;  %v719_v31 = vsel %vm710_vm6, %v702_v55, %v7033_v25  ;;  %v720_v18 = vsel %vm710_vm6, %v703_v36, %v7034_v22 }
  0xbe   :  { %v7039_v16 = vunpack.i.h.bf16 %v7037_v28  ;;  %v7038_v21 = vunpack.i.l.bf16 %v7037_v28  ;;  %v7054_v49 = vunpack.i.h.bf16 %v7052_v17  ;;  %v7053_v40 = vunpack.i.l.bf16 %v7052_v17 }
  0xc0   :  { %v736_v7 = vsel %vm727_vm7, %v719_v31, %v7038_v21  ;;  %v737_v38 = vsel %vm727_vm7, %v720_v18, %v7039_v16  ;;  %v704_v42 = vsel %vm693_vm5, %v686_v39, %v7053_v40  ;;  %v705_v37 = vsel %vm693_vm5, %v688_v33, %v7054_v49 }
  0xc1   :  { %v7047_v12 = vpop.permute.xlu0 %7046  ;;  %v7062_v15 = vpop.permute.xlu1 %7061  ;;  %v753_v45 = vsel %vm744_vm8, %v736_v7, %v7009_v34  ;;  %v754_v57 = vsel %vm744_vm8, %v737_v38, %v7043_v41 }
  0xc2   :  { %v7048_v5 = vunpack.i.l.bf16 %v7047_v12  ;;  %v770_v58 = vsel %vm761_vm9, %v753_v45, %v7014_v48  ;;  %v7063_v51 = vunpack.i.l.bf16 %v7062_v15  ;;  %v7064_v14 = vunpack.i.h.bf16 %v7062_v15 }
  0xc3   :  { %v7049_v26 = vunpack.i.h.bf16 %v7047_v12 }
  0xc4   :  { %v771_v63 = vsel %vm761_vm9, %v754_v57, %v7048_v5 }
  0xc5   :  { %v7057_v50 = vpop.permute.xlu0 %7056  ;;  %v786_v10 = vpack.c.bf16 %v771_v63, %v770_v58  ;;  %v9257_v56 = vpop.permute.xlu1 %7071 }
  0xc6   :  { %v7059_v59 = vunpack.i.h.bf16 %v7057_v50  ;;  %v7058_v32 = vunpack.i.l.bf16 %v7057_v50  ;;  %v7073_v6 = vunpack.i.l.bf16 %v9257_v56  ;;  %v7074_v47 = vunpack.i.h.bf16 %v9257_v56 }
  0xc7   :  { %943 = vmatmul.mubr.bf16.gmra.mrb[16].mxu0 %v786_v10 }
  0xc8   :  { %v721_v60 = vsel %vm710_vm6, %v704_v42, %v7058_v32  ;;  %v722_v13 = vsel %vm710_vm6, %v705_v37, %v7059_v59  ;;  %6662 = vmatprep.mubr.msk.bf16.mxu0 %vm663_vm3, %v789_v35 }
  0xc9   :  { %v738_v30 = vsel %vm727_vm7, %v721_v60, %v7063_v51  ;;  %v7067_v2 = vpop.permute.xlu0 %7066  ;;  %v7082_v46 = vpop.permute.xlu1 %7081  ;;  %v739_v11 = vsel %vm727_vm7, %v722_v13, %v7064_v14 }
  0xca   :  { %v7068_v8 = vunpack.i.l.bf16 %v7067_v2  ;;  %v755_v20 = vsel %vm744_vm8, %v738_v30, %v7044_v61  ;;  %v7084_v25 = vunpack.i.h.bf16 %v7082_v46  ;;  %v7083_v19 = vunpack.i.l.bf16 %v7082_v46 }
  0xcb   :  { %v772_v43 = vsel %vm761_vm9, %v755_v20, %v7049_v26  ;;  %v7069_v5 = vunpack.i.h.bf16 %v7067_v2 }
  0xcc   :  { %v756_v39 = vsel %vm744_vm8, %v739_v11, %v7068_v8 }
  0xcd   :  { %v7077_v22 = vpop.permute.xlu0 %7076  ;;  %v773_v35 = vsel %vm761_vm9, %v756_v39, %v7073_v6  ;;  %v7092_v4 = vpop.permute.xlu1 %7091 }
  0xce   :  { %v7079_v27 = vunpack.i.h.bf16 %v7077_v22  ;;  %v7078_v55 = vunpack.i.l.bf16 %v7077_v22  ;;  %v788_v36 = vpack.c.bf16 %v773_v35, %v772_v43  ;;  %v7094_v54 = vunpack.i.h.bf16 %v7092_v4 }
  0xcf   :  { %v7093_v41 = vunpack.i.l.bf16 %v7092_v4  ;;  %v8644_v4 = vld [vmem:[%s12915_s3] sm:$0xff]  }
  0xd0   :  { %v675_v28 = vsel %vm663_vm3, %v9079_v0, %v7079_v27  ;;  %v674_v17 = vsel %vm663_vm3, %v9067_v44, %v7078_v55  ;;  %951 = vmatmul.mubr.bf16.gmra.mrb[20].mxu0 %v788_v36  ;;  %1817 = vmatpush1.bf16.msra.mxu1 %v8644_v4  ;;  %v8645_v27 = vld [vmem:[%s12915_s3 + $0x8] sm:$0xff]   ;;  %v8646_v55 = vld [vmem:[%s12915_s3 + $0x10] sm:$0xff]   ;;  %v8647_v36 = vld [vmem:[%s12915_s3 + $0x18] sm:$0xff]  }
  0xd1   :  { %v689_v34 = vsel %vm678_vm4, %v674_v17, %v7083_v19  ;;  %v690_v16 = vsel %vm678_vm4, %v675_v28, %v7084_v25  ;;  %v7087_v21 = vpop.permute.xlu0 %7086  ;;  %v604_v31 = vpop.permute.xlu1 %603  ;;  %6663 = vmatprep.mubr.msk.bf16.mxu0 %vm663_vm3, %v791_v53  ;;  %1818 = vmatprep.subr.bf16.mxu1 %v12921_v3  ;;  %v9334_v28 = vld [vmem:[%s12916_s2] ss:$0 sm:$0xff] }
  0xd2   :  { %v7089_v18 = vunpack.i.h.bf16 %v7087_v21  ;;  %v7088_v7 = vunpack.i.l.bf16 %v7087_v21  ;;  %v8648_v17 = vld [vmem:[%s12915_s3 + $0x20] sm:$0xff]  }
  0xd4   :  { %v706_v0 = vsel %vm693_vm5, %v689_v34, %v7088_v7  ;;  %v707_v44 = vsel %vm693_vm5, %v690_v16, %v7089_v18  ;;  %1819 = vmatpush1.bf16.msra.mxu1 %v8645_v27  ;;  %v8649_v7 = vld [vmem:[%s12915_s3 + $0x28] sm:$0xff]  }
  0xd5   :  { %v723_v38 = vsel %vm710_vm6, %v706_v0, %v7093_v41  ;;  %v7097_v12 = vpop.permute.xlu0 %7096  ;;  %v724_v15 = vsel %vm710_vm6, %v707_v44, %v7094_v54  ;;  %v7102_v45 = vpop.permute.xlu1 %7101  ;;  %1820 = vmatprep.subr.bf16.mxu1 %v12921_v3 }
  0xd6   :  { %v7099_v48 = vunpack.i.h.bf16 %v7097_v12  ;;  %v7098_v9 = vunpack.i.l.bf16 %v7097_v12  ;;  %v7104_v57 = vunpack.i.h.bf16 %v7102_v45  ;;  %v7103_v58 = vunpack.i.l.bf16 %v7102_v45 }
  0xd8   :  { %v740_v52 = vsel %vm727_vm7, %v723_v38, %v7098_v9  ;;  %v741_v53 = vsel %vm727_vm7, %v724_v15, %v7099_v48  ;;  %v677_v56 = vsel %vm663_vm3, %v9010_v62, %v7104_v57  ;;  %v676_v59 = vsel %vm663_vm3, %v9082_v1, %v7103_v58  ;;  %1821 = vmatpush1.bf16.msra.mxu1 %v8646_v55 }
  0xd9   :  { %v758_v49 = vsel %vm744_vm8, %v741_v53, %v604_v31  ;;  %v646_v40 = vpop.permute.xlu0 %645  ;;  %v757_v63 = vsel %vm744_vm8, %v740_v52, %v7069_v5  ;;  %v7112_v50 = vpop.permute.xlu1 %7111  ;;  %1822 = vmatprep.subr.bf16.mxu1 %v12921_v3  ;;  %v8650_v5 = vld [vmem:[%s12915_s3 + $0x30] sm:$0xff]  }
  0xda   :  { %v775_v51 = vsel %vm761_vm9, %v758_v49, %v646_v40  ;;  %v774_v10 = vsel %vm761_vm9, %v757_v63, %v7074_v47  ;;  %v7114_v42 = vunpack.i.h.bf16 %v7112_v50  ;;  %v7113_v37 = vunpack.i.l.bf16 %v7112_v50 }
  0xdb   :  { %v790_v33 = vpack.c.bf16 %v775_v51, %v774_v10 }
  0xdc   :  { %1823 = vmatpush1.bf16.msra.mxu1 %v8647_v36 }
  0xdd   :  { %v7107_v32 = vpop.permute.xlu0 %7106  ;;  %959 = vmatmul.mubr.bf16.gmra.mrb[24].mxu0 %v790_v33  ;;  %v7122_v13 = vpop.permute.xlu1 %7121  ;;  %1824 = vmatprep.subr.bf16.mxu1 %v12921_v3 }
  0xde   :  { %v7109_v14 = vunpack.i.h.bf16 %v7107_v32  ;;  %v7108_v60 = vunpack.i.l.bf16 %v7107_v32  ;;  %6664 = vmatprep.mubr.msk.bf16.mxu0 %vm663_vm3, %v793_v29  ;;  %v7124_v6 = vunpack.i.h.bf16 %v7122_v13  ;;  %v7123_v46 = vunpack.i.l.bf16 %v7122_v13 }
  0xe0   :  { %v692_v61 = vsel %vm678_vm4, %v677_v56, %v7109_v14  ;;  %v691_v30 = vsel %vm678_vm4, %v676_v59, %v7108_v60  ;;  %1825 = vmatpush1.bf16.msra.mxu1 %v8648_v17  ;;  %v8651_v56 = vld [vmem:[%s12915_s3 + $0x38] sm:$0xff]  }
  0xe1   :  { %v708_v62 = vsel %vm693_vm5, %v691_v30, %v7113_v37  ;;  %v709_v1 = vsel %vm693_vm5, %v692_v61, %v7114_v42  ;;  %v7117_v2 = vpop.permute.xlu0 %7116  ;;  %v648_v23 = vpop.permute.xlu1 %647  ;;  %1826 = vmatprep.subr.bf16.mxu1 %v12921_v3 }
  0xe2   :  { %v7119_v8 = vunpack.i.h.bf16 %v7117_v2  ;;  %v7118_v26 = vunpack.i.l.bf16 %v7117_v2  ;;  %v8652_v2 = vld [vmem:[%s12915_s3 + $0x40] sm:$0xff]  }
  0xe4   :  { %v726_v11 = vsel %vm710_vm6, %v709_v1, %v7119_v8  ;;  %v725_v20 = vsel %vm710_vm6, %v708_v62, %v7118_v26  ;;  %1827 = vmatpush1.bf16.msra.mxu1 %v8649_v7 }
  0xe5   :  { %v743_v24 = vsel %vm727_vm7, %v726_v11, %v7124_v6  ;;  %v606_v29 = vpop.permute.xlu0 %605  ;;  %v742_v39 = vsel %vm727_vm7, %v725_v20, %v7123_v46  ;;  %1828 = vmatprep.subr.bf16.mxu1 %v12921_v3 }
  0xe6   :  { %v759_v22 = vsel %vm744_vm8, %v742_v39, %v606_v29  ;;  %v760_v25 = vsel %vm744_vm8, %v743_v24, %v604_v31 }
  0xe7   :  { %v776_v19 = vsel %vm761_vm9, %v759_v22, %v648_v23  ;;  %v777_v43 = vsel %vm761_vm9, %v760_v25, %v646_v40 }
  0xe8   :  { %v792_v35 = vpack.c.bf16 %v777_v43, %v776_v19  ;;  %1829 = vmatpush1.bf16.msra.mxu1 %v8650_v5 }
  0xe9   :  { %1830 = vmatprep.subr.bf16.mxu1 %v12921_v3 }
  0xea   :  { %967 = vmatmul.mubr.bf16.gmra.mrb[28].mxu0 %v792_v35 }
  0xec   :  { %1831 = vmatpush1.bf16.msra.mxu1 %v8651_v56 }
  0xed   :  { %1832 = vmatprep.subr.bf16.mxu1 %v12921_v3 }
  0xf0   :  { %1833 = vmatpush1.bf16.msra.mxu1 %v8652_v2 }
  0xf1   :  { %3696 = vmatprep.subr.bf16.mxu1 %v12921_v3 }
 0x162   :  { %v912_v34 = vpop.f32.mrb[0].mxu0 }
 0x163   :  { %v913_v16 = vadd.f32 %v9334_v28, %v912_v34  ;;  %v914_v21 = vpop.f32.mrb[1].mxu0 }
 0x164   :  { %v915_v54 = vpop.f32.mrb[2].mxu0 }
 0x165   :  { %v975_v41 = vmax.f32 %v913_v16, 0.0  ;;  %v916_v31 = vadd.f32 %v9334_v28, %v915_v54  ;;  %v917_v18 = vpop.f32.mrb[3].mxu0 }
 0x167   :  { %v1027_v0 = vrot.slane %v975_v41, 1  ;;  %v1059_v44 = vrot.slane %v975_v41, 7  ;;  %v1091_v38 = vrot.slane %v975_v41, 5  ;;  %v976_v12 = vmax.f32 %v916_v31, 0.0 }
 0x169   :  { %v1139_v15 = vsel %vm174_vm0, %v1059_v44, %v1091_v38  ;;  %v1026_v45 = vrot.slane %v976_v12, 1  ;;  %v1058_v48 = vrot.slane %v976_v12, 7  ;;  %v1090_v9 = vrot.slane %v976_v12, 5 }
 0x16a   :  { %v9352_v47 = vsel %vm174_vm0, %v1027_v0, %v1059_v44  ;;  %v1228_v52 = vrot.slane %v1139_v15, 2  ;;  %v1186_v53 = vrot.slane %v1139_v15, 1 }
 0x16b   :  { %v9355_v49 = vsel %vm174_vm0, %v1026_v45, %v1058_v48  ;;  %v1138_v40 = vsel %vm174_vm0, %v1058_v48, %v1090_v9  ;;  %v1227_v57 = vrot.slane %v9352_v47, 2  ;;  %v1185_v58 = vrot.slane %v9352_v47, 1 }
 0x16c   :  { %v7125_v63 = vpack.i.bf16 %v9355_v49, %v9352_v47  ;;  %v1224_v50 = vrot.slane %v9355_v49, 2  ;;  %v1225_v51 = vrot.slane %v1138_v40, 2  ;;  %v1182_v10 = vrot.slane %v9355_v49, 1 }
 0x16d   :  { %v1183_v33 = vrot.slane %v1138_v40, 1  ;;  %v1229_v32 = vsel %vm278_vm2, %v1227_v57, %v1228_v52  ;;  %v1187_v14 = vsel %vm235_vm1, %v1185_v58, %v1186_v53 }
 0x16e   :  { %7126 = vrot.lane.b32.xlu0 %v7125_v63, %s8715_s9  ;;  %v1226_v59 = vsel %vm278_vm2, %v1224_v50, %v1225_v51 }
 0x16f   :  { %v7135_v42 = vpack.i.bf16 %v1229_v32, %v1226_v59  ;;  %v1184_v37 = vsel %vm235_vm1, %v1182_v10, %v1183_v33  ;;  %v7145_v60 = vpack.i.bf16 %v1226_v59, %v1229_v32  ;;  %v920_v13 = vpop.f32.mrb[4].mxu0 }
 0x170   :  { %v7130_v61 = vpack.i.bf16 %v1187_v14, %v1184_v37  ;;  %v7140_v30 = vpack.i.bf16 %v1184_v37, %v1187_v14  ;;  %v921_v62 = vadd.f32 %v9334_v28, %v920_v13  ;;  %v922_v1 = vpop.f32.mrb[5].mxu0 }
 0x171   :  { %7136 = vrot.lane.b32.xlu1 %v7135_v42, %s8718_s22  ;;  %v923_v6 = vpop.f32.mrb[6].mxu0 }
 0x172   :  { %7131 = vrot.lane.b32.xlu0 %v7130_v61, %s8716_s16  ;;  %v977_v46 = vmax.f32 %v921_v62, 0.0  ;;  %v924_v8 = vadd.f32 %v9334_v28, %v923_v6  ;;  %v925_v26 = vpop.f32.mrb[7].mxu0 }
 0x174   :  { %v1028_v11 = vrot.slane %v977_v46, 1  ;;  %v1060_v20 = vrot.slane %v977_v46, 7  ;;  %v1092_v23 = vrot.slane %v977_v46, 5  ;;  %v978_v24 = vmax.f32 %v924_v8, 0.0 }
 0x175   :  { %7141 = vrot.lane.b32.xlu1 %v7140_v30, %s8719_s23 }
 0x176   :  { %7146 = vrot.lane.b32.xlu0 %v7145_v60, %s8720_s26  ;;  %v9385_v29 = vsel %vm174_vm0, %v1028_v11, %v1060_v20  ;;  %v1029_v39 = vrot.slane %v978_v24, 1  ;;  %v1061_v22 = vrot.slane %v978_v24, 7  ;;  %v1093_v25 = vrot.slane %v978_v24, 5 }
 0x177   :  { %v7150_v19 = vpack.i.bf16 %v9385_v29, %v9355_v49  ;;  %v1140_v43 = vsel %vm174_vm0, %v1060_v20, %v1092_v23  ;;  %v1230_v35 = vrot.slane %v9385_v29, 2  ;;  %v1188_v4 = vrot.slane %v9385_v29, 1 }
 0x178   :  { %v9393_v27 = vsel %vm174_vm0, %v1029_v39, %v1061_v22  ;;  %v1141_v55 = vsel %vm174_vm0, %v1061_v22, %v1093_v25  ;;  %v1189_v36 = vrot.slane %v1140_v43, 1  ;;  %v1231_v17 = vrot.slane %v1140_v43, 2 }
 0x179   :  { %7151 = vrot.lane.b32.xlu1 %v7150_v19, %s8717_s17  ;;  %v1233_v34 = vrot.slane %v9393_v27, 2  ;;  %v1234_v16 = vrot.slane %v1141_v55, 2  ;;  %v1191_v21 = vrot.slane %v9393_v27, 1  ;;  %v1192_v31 = vrot.slane %v1141_v55, 1 }
 0x17a   :  { %v1232_v54 = vsel %vm278_vm2, %v1230_v35, %v1231_v17  ;;  %v1190_v41 = vsel %vm235_vm1, %v1188_v4, %v1189_v36  ;;  %v7155_v44 = vpack.i.bf16 %v9393_v27, %v9385_v29 }
 0x17b   :  { %v1717_v18 = vpack.c.bf16 %v1232_v54, %v1226_v59  ;;  %v7160_v7 = vpack.i.bf16 %v1190_v41, %v1184_v37  ;;  %v9402_v0 = vsel %vm278_vm2, %v1233_v34, %v1234_v16  ;;  %v1193_v12 = vsel %vm235_vm1, %v1191_v21, %v1192_v31 }
 0x17c   :  { %v7170_v38 = vpack.i.bf16 %v9402_v0, %v1232_v54  ;;  %v7165_v45 = vpack.i.bf16 %v1193_v12, %v1190_v41 }
 0x17d   :  { %6675 = vmatprep.mubr.msk.bf16.mxu1 %vm663_vm3, %v1717_v18  ;;  %7161 = vrot.lane.b32.xlu0 %v7160_v7, %s8721_s13 }
 0x17e   :  { %v928_v15 = vpop.f32.mrb[8].mxu0  ;;  %7156 = vrot.lane.b32.xlu1 %v7155_v44, %s8715_s9 }
 0x17f   :  { %v929_v48 = vadd.f32 %v9334_v28, %v928_v15  ;;  %v930_v9 = vpop.f32.mrb[9].mxu0 }
 0x180   :  { %v931_v5 = vpop.f32.mrb[10].mxu0 }
 0x181   :  { %v979_v52 = vmax.f32 %v929_v48, 0.0  ;;  %v932_v53 = vadd.f32 %v9334_v28, %v931_v5  ;;  %v933_v40 = vpop.f32.mrb[11].mxu0  ;;  %7171 = vrot.lane.b32.xlu0 %v7170_v38, %s8718_s22 }
 0x182   :  { %7166 = vrot.lane.b32.xlu1 %v7165_v45, %s8716_s16 }
 0x183   :  { %v1030_v57 = vrot.slane %v979_v52, 1  ;;  %v1062_v58 = vrot.slane %v979_v52, 7  ;;  %v1094_v63 = vrot.slane %v979_v52, 5  ;;  %v980_v50 = vmax.f32 %v932_v53, 0.0 }
 0x185   :  { %v9416_v51 = vsel %vm174_vm0, %v1030_v57, %v1062_v58  ;;  %v1142_v10 = vsel %vm174_vm0, %v1062_v58, %v1094_v63  ;;  %v1031_v33 = vrot.slane %v980_v50, 1  ;;  %v1063_v56 = vrot.slane %v980_v50, 7  ;;  %7176 = vrot.lane.b32.xlu0 %v7165_v45, %s8719_s23 }
 0x186   :  { %v1095_v59 = vrot.slane %v980_v50, 5  ;;  %v7185_v32 = vpack.i.bf16 %v9416_v51, %v9393_v27  ;;  %v1194_v42 = vrot.slane %v9416_v51, 1  ;;  %v1195_v37 = vrot.slane %v1142_v10, 1  ;;  %7181 = vrot.lane.b32.xlu1 %v7170_v38, %s8720_s26 }
 0x187   :  { %v9424_v14 = vsel %vm174_vm0, %v1031_v33, %v1063_v56  ;;  %v1236_v60 = vrot.slane %v9416_v51, 2  ;;  %v1237_v13 = vrot.slane %v1142_v10, 2 }
 0x188   :  { %v1143_v61 = vsel %vm174_vm0, %v1063_v56, %v1095_v59  ;;  %v1196_v30 = vsel %vm235_vm1, %v1194_v42, %v1195_v37  ;;  %v1239_v62 = vrot.slane %v9424_v14, 2  ;;  %v1197_v46 = vrot.slane %v9424_v14, 1 }
 0x189   :  { %v7195_v1 = vpack.i.bf16 %v1196_v30, %v1193_v12  ;;  %v9432_v2 = vsel %vm278_vm2, %v1236_v60, %v1237_v13  ;;  %v1240_v6 = vrot.slane %v1143_v61, 2  ;;  %7186 = vrot.lane.b32.xlu0 %v7185_v32, %s8717_s17  ;;  %v1198_v8 = vrot.slane %v1143_v61, 1 }
 0x18a   :  { %v1719_v26 = vpack.c.bf16 %v9432_v2, %v9402_v0  ;;  %v7190_v23 = vpack.i.bf16 %v9424_v14, %v9416_v51 }
 0x18b   :  { %7196 = vrot.lane.b32.xlu1 %v7195_v1, %s8721_s13  ;;  %v9440_v11 = vsel %vm278_vm2, %v1239_v62, %v1240_v6  ;;  %v936_v20 = vpop.f32.mrb[12].mxu0  ;;  %v1199_v39 = vsel %vm235_vm1, %v1197_v46, %v1198_v8 }
 0x18c   :  { %v7205_v24 = vpack.i.bf16 %v9440_v11, %v9432_v2  ;;  %v937_v22 = vadd.f32 %v9334_v28, %v936_v20  ;;  %v938_v25 = vpop.f32.mrb[13].mxu0  ;;  %v7200_v19 = vpack.i.bf16 %v1199_v39, %v1196_v30 }
 0x18d   :  { %7191 = vrot.lane.b32.xlu0 %v7190_v23, %s8715_s9  ;;  %v939_v43 = vpop.f32.mrb[14].mxu0 }
 0x18e   :  { %v981_v35 = vmax.f32 %v937_v22, 0.0  ;;  %v940_v4 = vadd.f32 %v9334_v28, %v939_v43  ;;  %v941_v55 = vpop.f32.mrb[15].mxu0 }
 0x18f   :  { %7206 = vrot.lane.b32.xlu1 %v7205_v24, %s8718_s22 }
 0x190   :  { %v1032_v36 = vrot.slane %v981_v35, 1  ;;  %v1064_v17 = vrot.slane %v981_v35, 7  ;;  %v1096_v34 = vrot.slane %v981_v35, 5  ;;  %v982_v16 = vmax.f32 %v940_v4, 0.0 }
 0x191   :  { %7201 = vrot.lane.b32.xlu0 %v7200_v19, %s8716_s16 }
 0x192   :  { %v9453_v21 = vsel %vm174_vm0, %v1032_v36, %v1064_v17  ;;  %v1144_v54 = vsel %vm174_vm0, %v1064_v17, %v1096_v34  ;;  %v1033_v41 = vrot.slane %v982_v16, 1  ;;  %v1065_v31 = vrot.slane %v982_v16, 7 }
 0x193   :  { %7211 = vrot.lane.b32.xlu1 %v7200_v19, %s8719_s23  ;;  %v1243_v18 = vrot.slane %v1144_v54, 2  ;;  %v1097_v7 = vrot.slane %v982_v16, 5  ;;  %v1200_v44 = vrot.slane %v9453_v21, 1  ;;  %v7220_v38 = vpack.i.bf16 %v9453_v21, %v9424_v14 }
 0x194   :  { %v1201_v12 = vrot.slane %v1144_v54, 1  ;;  %v1129_v15 = vsel %vm174_vm0, %v1033_v41, %v1065_v31  ;;  %v1242_v45 = vrot.slane %v9453_v21, 2 }
 0x195   :  { %v1145_v48 = vsel %vm174_vm0, %v1065_v31, %v1097_v7  ;;  %7216 = vrot.lane.b32.xlu0 %v7205_v24, %s8720_s26  ;;  %v1270_v9 = vrot.slane %v1129_v15, 1  ;;  %v1276_v5 = vrot.slane %v1129_v15, 2  ;;  %v7225_v50 = vpack.i.bf16 %v1129_v15, %v9453_v21 }
 0x196   :  { %v9466_v52 = vsel %vm235_vm1, %v1200_v44, %v1201_v12  ;;  %v1271_v53 = vrot.slane %v1145_v48, 1  ;;  %v9469_v40 = vsel %vm278_vm2, %v1242_v45, %v1243_v18  ;;  %v1277_v57 = vrot.slane %v1145_v48, 2 }
 0x197   :  { %7221 = vrot.lane.b32.xlu1 %v7220_v38, %s8717_s17  ;;  %v7230_v58 = vpack.i.bf16 %v9466_v52, %v1199_v39  ;;  %v1721_v63 = vpack.c.bf16 %v9469_v40, %v9440_v11 }
 0x198   :  { %v9476_v10 = vsel %vm235_vm1, %v1270_v9, %v1271_v53  ;;  %v9479_v33 = vsel %vm278_vm2, %v1276_v5, %v1277_v57 }
 0x199   :  { %7231 = vrot.lane.b32.xlu0 %v7230_v58, %s8721_s13  ;;  %v7235_v59 = vpack.i.bf16 %v9476_v10, %v9466_v52  ;;  %v7240_v32 = vpack.i.bf16 %v9479_v33, %v9469_v40  ;;  %v1723_v42 = vpack.c.bf16 %v9469_v40, %v9479_v33 }
 0x19a   :  { %v944_v56 = vpop.f32.mrb[16].mxu0 }
 0x19b   :  { %v945_v37 = vadd.f32 %v9334_v28, %v944_v56  ;;  %v946_v60 = vpop.f32.mrb[17].mxu0  ;;  %7226 = vrot.lane.b32.xlu1 %v7225_v50, %s8715_s9 }
 0x19c   :  { %v947_v13 = vpop.f32.mrb[18].mxu0 }
 0x19d   :  { %v983_v61 = vmax.f32 %v945_v37, 0.0  ;;  %v948_v30 = vadd.f32 %v9334_v28, %v947_v13  ;;  %v949_v62 = vpop.f32.mrb[19].mxu0  ;;  %7236 = vrot.lane.b32.xlu0 %v7235_v59, %s8719_s23 }
 0x19f   :  { %v1035_v1 = vrot.slane %v983_v61, 1  ;;  %v1067_v6 = vrot.slane %v983_v61, 7  ;;  %v1099_v46 = vrot.slane %v983_v61, 5  ;;  %v984_v8 = vmax.f32 %v948_v30, 0.0  ;;  %7241 = vrot.lane.b32.xlu1 %v7240_v32, %s8720_s26 }
 0x1a1   :  { %v1147_v20 = vsel %vm174_vm0, %v1067_v6, %v1099_v46  ;;  %v1034_v23 = vrot.slane %v984_v8, 1  ;;  %v1066_v24 = vrot.slane %v984_v8, 7  ;;  %v1098_v39 = vrot.slane %v984_v8, 5 }
 0x1a2   :  { %v9495_v22 = vsel %vm174_vm0, %v1035_v1, %v1067_v6  ;;  %v1207_v25 = vrot.slane %v1147_v20, 1  ;;  %v1249_v19 = vrot.slane %v1147_v20, 2 }
 0x1a3   :  { %v9498_v43 = vsel %vm174_vm0, %v1034_v23, %v1066_v24  ;;  %v1146_v35 = vsel %vm174_vm0, %v1066_v24, %v1098_v39  ;;  %v952_v4 = vpop.f32.mrb[20].mxu0  ;;  %v1206_v55 = vrot.slane %v9495_v22, 1  ;;  %v1248_v36 = vrot.slane %v9495_v22, 2 }
 0x1a4   :  { %v953_v17 = vadd.f32 %v9334_v28, %v952_v4  ;;  %v954_v34 = vpop.f32.mrb[21].mxu0  ;;  %v7245_v16 = vpack.i.bf16 %v9498_v43, %v1129_v15  ;;  %v1203_v54 = vrot.slane %v9498_v43, 1  ;;  %v1204_v41 = vrot.slane %v1146_v35, 1 }
 0x1a5   :  { %v955_v31 = vpop.f32.mrb[22].mxu0  ;;  %v7250_v18 = vpack.i.bf16 %v9498_v43, %v9495_v22  ;;  %v1245_v7 = vrot.slane %v9498_v43, 2  ;;  %v1246_v44 = vrot.slane %v1146_v35, 2  ;;  %v1208_v38 = vsel %vm235_vm1, %v1206_v55, %v1207_v25 }
 0x1a6   :  { %v985_v12 = vmax.f32 %v953_v17, 0.0  ;;  %v956_v45 = vadd.f32 %v9334_v28, %v955_v31  ;;  %v957_v48 = vpop.f32.mrb[23].mxu0  ;;  %7246 = vrot.lane.b32.xlu0 %v7245_v16, %s8717_s17  ;;  %v1205_v15 = vsel %vm235_vm1, %v1203_v54, %v1204_v41  ;;  %v9514_v9 = vsel %vm278_vm2, %v1248_v36, %v1249_v19 }
 0x1a7   :  { %v7255_v5 = vpack.i.bf16 %v1205_v15, %v9466_v52  ;;  %v7265_v53 = vpack.i.bf16 %v1205_v15, %v9476_v10  ;;  %v9519_v57 = vsel %vm278_vm2, %v1245_v7, %v1246_v44  ;;  %v7270_v58 = vpack.i.bf16 %v1205_v15, %v1208_v38 }
 0x1a8   :  { %v1036_v50 = vrot.slane %v985_v12, 1  ;;  %v1068_v56 = vrot.slane %v985_v12, 7  ;;  %v1100_v59 = vrot.slane %v985_v12, 5  ;;  %v986_v32 = vmax.f32 %v956_v45, 0.0 }
 0x1a9   :  { %7256 = vrot.lane.b32.xlu1 %v7255_v5, %s8716_s16  ;;  %v7260_v37 = vpack.i.bf16 %v9519_v57, %v9469_v40  ;;  %v7275_v60 = vpack.i.bf16 %v9519_v57, %v9514_v9 }
 0x1aa   :  { %v9527_v52 = vsel %vm174_vm0, %v1036_v50, %v1068_v56  ;;  %v1148_v10 = vsel %vm174_vm0, %v1068_v56, %v1100_v59  ;;  %v1037_v13 = vrot.slane %v986_v32, 1  ;;  %v1069_v61 = vrot.slane %v986_v32, 7  ;;  %7251 = vrot.lane.b32.xlu0 %v7250_v18, %s8715_s9 }
 0x1ab   :  { %v1101_v30 = vrot.slane %v986_v32, 5  ;;  %v1209_v62 = vrot.slane %v9527_v52, 1  ;;  %v1210_v1 = vrot.slane %v1148_v10, 1  ;;  %v1251_v6 = vrot.slane %v9527_v52, 2 }
 0x1ac   :  { %v9534_v46 = vsel %vm174_vm0, %v1037_v13, %v1069_v61  ;;  %v1252_v8 = vrot.slane %v1148_v10, 2 }
 0x1ad   :  { %v1149_v20 = vsel %vm174_vm0, %v1069_v61, %v1101_v30  ;;  %7266 = vrot.lane.b32.xlu1 %v7265_v53, %s8721_s13  ;;  %v1211_v23 = vsel %vm235_vm1, %v1209_v62, %v1210_v1  ;;  %v1212_v39 = vrot.slane %v9534_v46, 1  ;;  %v1254_v4 = vrot.slane %v9534_v46, 2 }
 0x1ae   :  { %7261 = vrot.lane.b32.xlu0 %v7260_v37, %s8718_s22  ;;  %v7290_v24 = vpack.i.bf16 %v1211_v23, %v1208_v38  ;;  %v1213_v25 = vrot.slane %v1149_v20, 1  ;;  %v9542_v19 = vsel %vm278_vm2, %v1251_v6, %v1252_v8  ;;  %v1255_v55 = vrot.slane %v1149_v20, 2 }
 0x1af   :  { %v7295_v35 = vpack.i.bf16 %v9542_v19, %v9514_v9  ;;  %v1725_v36 = vpack.c.bf16 %v9542_v19, %v9519_v57  ;;  %v7280_v45 = vpack.i.bf16 %v9534_v46, %v9527_v52 }
 0x1b0   :  { %v960_v17 = vpop.f32.mrb[24].mxu0  ;;  %v9550_v34 = vsel %vm235_vm1, %v1212_v39, %v1213_v25  ;;  %v9556_v31 = vsel %vm278_vm2, %v1254_v4, %v1255_v55 }
 0x1b1   :  { %v961_v16 = vadd.f32 %v9334_v28, %v960_v17  ;;  %v962_v54 = vpop.f32.mrb[25].mxu0  ;;  %7271 = vrot.lane.b32.xlu1 %v7270_v58, %s8719_s23  ;;  %v7300_v41 = vpack.i.bf16 %v9550_v34, %v1211_v23  ;;  %v7310_v7 = vpack.i.bf16 %v9556_v31, %v9542_v19 }
 0x1b2   :  { %v963_v18 = vpop.f32.mrb[26].mxu0  ;;  %7276 = vrot.lane.b32.xlu0 %v7275_v60, %s8720_s26 }
 0x1b3   :  { %v987_v44 = vmax.f32 %v961_v16, 0.0  ;;  %v964_v38 = vadd.f32 %v9334_v28, %v963_v18  ;;  %v965_v12 = vpop.f32.mrb[27].mxu0 }
 0x1b5   :  { %v1038_v48 = vrot.slane %v987_v44, 1  ;;  %v1070_v15 = vrot.slane %v987_v44, 7  ;;  %v1102_v9 = vrot.slane %v987_v44, 5  ;;  %v988_v5 = vmax.f32 %v964_v38, 0.0  ;;  %7281 = vrot.lane.b32.xlu1 %v7280_v45, %s8717_s17 }
 0x1b6   :  { %7291 = vrot.lane.b32.xlu0 %v7290_v24, %s8716_s16 }
 0x1b7   :  { %v9567_v53 = vsel %vm174_vm0, %v1038_v48, %v1070_v15  ;;  %v1150_v58 = vsel %vm174_vm0, %v1070_v15, %v1102_v9  ;;  %v1039_v50 = vrot.slane %v988_v5, 1  ;;  %v1071_v56 = vrot.slane %v988_v5, 7 }
 0x1b8   :  { %v1103_v59 = vrot.slane %v988_v5, 5  ;;  %v1257_v32 = vrot.slane %v9567_v53, 2  ;;  %v1258_v37 = vrot.slane %v1150_v58, 2  ;;  %v1215_v60 = vrot.slane %v9567_v53, 1 }
 0x1b9   :  { %v9573_v10 = vsel %vm174_vm0, %v1039_v50, %v1071_v56  ;;  %7286 = vrot.lane.b32.xlu1 %v7280_v45, %s8715_s9  ;;  %v1216_v13 = vrot.slane %v1150_v58, 1 }
 0x1ba   :  { %v1151_v61 = vsel %vm174_vm0, %v1071_v56, %v1103_v59  ;;  %7301 = vrot.lane.b32.xlu0 %v7300_v41, %s8721_s13  ;;  %v9579_v30 = vsel %vm278_vm2, %v1257_v32, %v1258_v37  ;;  %v1218_v8 = vrot.slane %v9573_v10, 1  ;;  %v1260_v24 = vrot.slane %v9573_v10, 2 }
 0x1bb   :  { %v1261_v62 = vrot.slane %v1151_v61, 2  ;;  %v7330_v1 = vpack.i.bf16 %v9579_v30, %v9556_v31  ;;  %v1217_v6 = vsel %vm235_vm1, %v1215_v60, %v1216_v13  ;;  %v1219_v20 = vrot.slane %v1151_v61, 1 }
 0x1bc   :  { %v7325_v23 = vpack.i.bf16 %v1217_v6, %v9550_v34  ;;  %v1727_v39 = vpack.c.bf16 %v9579_v30, %v9556_v31 }
 0x1bd   :  { %v968_v25 = vpop.f32.mrb[28].mxu0  ;;  %7296 = vrot.lane.b32.xlu1 %v7295_v35, %s8718_s22  ;;  %v1220_v17 = vsel %vm235_vm1, %v1218_v8, %v1219_v20  ;;  %v9594_v16 = vsel %vm278_vm2, %v1260_v24, %v1261_v62  ;;  %v7315_v35 = vpack.i.bf16 %v9573_v10, %v9567_v53 }
 0x1be   :  { %v969_v4 = vadd.f32 %v9334_v28, %v968_v25  ;;  %v970_v55 = vpop.f32.mrb[29].mxu0  ;;  %7306 = vrot.lane.b32.xlu0 %v7300_v41, %s8719_s23  ;;  %v7335_v34 = vpack.i.bf16 %v1220_v17, %v1217_v6  ;;  %v7345_v18 = vpack.i.bf16 %v9594_v16, %v9579_v30 }
 0x1bf   :  { %v971_v54 = vpop.f32.mrb[30].mxu0 }
 0x1c0   :  { %v989_v44 = vmax.f32 %v969_v4, 0.0  ;;  %v972_v38 = vadd.f32 %v9334_v28, %v971_v54  ;;  %v973_v12 = vpop.f32.mrb[31].mxu0 }
 0x1c1   :  { %7311 = vrot.lane.b32.xlu1 %v7310_v7, %s8720_s26 }
 0x1c2   :  { %v1040_v41 = vrot.slane %v989_v44, 1  ;;  %v1072_v45 = vrot.slane %v989_v44, 7  ;;  %v1104_v48 = vrot.slane %v989_v44, 5  ;;  %v990_v15 = vmax.f32 %v972_v38, 0.0  ;;  %7316 = vrot.lane.b32.xlu0 %v7315_v35, %s8717_s17 }
 0x1c4   :  { %v1041_v9 = vrot.slane %v990_v15, 1  ;;  %v1073_v5 = vrot.slane %v990_v15, 7  ;;  %v1105_v58 = vrot.slane %v990_v15, 5  ;;  %v9604_v50 = vsel %vm174_vm0, %v1040_v41, %v1072_v45 }
 0x1c5   :  { %7331 = vrot.lane.b32.xlu1 %v7330_v1, %s8718_s22  ;;  %v1263_v28 = vrot.slane %v9604_v50, 2  ;;  %v1152_v56 = vsel %vm174_vm0, %v1072_v45, %v1104_v48  ;;  %v1221_v7 = vrot.slane %v9604_v50, 1 }
 0x1c6   :  { %v1137_v59 = vsel %vm174_vm0, %v1041_v9, %v1073_v5  ;;  %v1153_v32 = vsel %vm174_vm0, %v1073_v5, %v1105_v58  ;;  %7321 = vrot.lane.b32.xlu0 %v7315_v35, %s8715_s9  ;;  %v1222_v37 = vrot.slane %v1152_v56, 1  ;;  %v1264_v60 = vrot.slane %v1152_v56, 2 }
 0x1c7   :  { %v1274_v13 = vrot.slane %v1153_v32, 1  ;;  %v1280_v61 = vrot.slane %v1153_v32, 2  ;;  %v1273_v62 = vrot.slane %v1137_v59, 1  ;;  %v1279_v8 = vrot.slane %v1137_v59, 2 }
 0x1c8   :  { %v1223_v6 = vsel %vm235_vm1, %v1221_v7, %v1222_v37  ;;  %v9615_v1 = vsel %vm278_vm2, %v1263_v28, %v1264_v60 }
 0x1c9   :  { %7336 = vrot.lane.b32.xlu1 %v7335_v34, %s8721_s13  ;;  %v1275_v20 = vsel %vm235_vm1, %v1273_v62, %v1274_v13  ;;  %v7355_v24 = vpack.i.bf16 %v1223_v6, %v1220_v17  ;;  %v7360_v25 = vpack.i.bf16 %v9615_v1, %v9594_v16  ;;  %v1729_v4 = vpack.c.bf16 %v9615_v1, %v9594_v16 }
 0x1ca   :  { %7326 = vrot.lane.b32.xlu0 %v7325_v23, %s8716_s16  ;;  %v7365_v55 = vpack.i.bf16 %v1275_v20, %v1223_v6  ;;  %v9625_v54 = vsel %vm278_vm2, %v1279_v8, %v1280_v61  ;;  %v7350_v23 = vpack.i.bf16 %v1137_v59, %v9604_v50 }
 0x1cb   :  { %v7370_v44 = vpack.i.bf16 %v9625_v54, %v9615_v1  ;;  %v1731_v38 = vpack.c.bf16 %v9615_v1, %v9625_v54 }
 0x1cd   :  { %7341 = vrot.lane.b32.xlu1 %v7335_v34, %s8719_s23 }
 0x1ce   :  { %7346 = vrot.lane.b32.xlu0 %v7345_v18, %s8720_s26 }
 0x1d1   :  { %1548 = vrot.lane.b32.xlu1 %v9604_v50, %s8717_s17 }
 0x1d2   :  { %1590 = vrot.lane.b32.xlu0 %v1223_v6, %s8721_s13 }
 0x1d5   :  { %7351 = vrot.lane.b32.xlu1 %v7350_v23, %s8715_s9 }
 0x1d6   :  { %7361 = vrot.lane.b32.xlu0 %v7360_v25, %s8718_s22 }
 0x1d9   :  { %7356 = vrot.lane.b32.xlu1 %v7355_v24, %s8716_s16 }
 0x1da   :  { %7366 = vrot.lane.b32.xlu0 %v7365_v55, %s8719_s23 }
 0x1dd   :  { %7371 = vrot.lane.b32.xlu1 %v7370_v44, %s8720_s26 }
 0x1de   :  { %1550 = vrot.lane.b32.xlu0 %v1137_v59, %s8717_s17 }
 0x1e0   :  { %v7127_v17 = vpop.permute.xlu0 %7126 }
 0x1e1   :  { %1592 = vrot.lane.b32.xlu1 %v1275_v20, %s8721_s13  ;;  %v7129_v28 = vunpack.i.h.bf16 %v7127_v17  ;;  %v7128_v56 = vunpack.i.l.bf16 %v7127_v17 }
 0x1e3   :  { %v7137_v34 = vpop.permute.xlu1 %7136 }
 0x1e4   :  { %v7132_v18 = vpop.permute.xlu0 %7131  ;;  %v7139_v41 = vunpack.i.h.bf16 %v7137_v34  ;;  %v7138_v45 = vunpack.i.l.bf16 %v7137_v34 }
 0x1e5   :  { %v7134_v12 = vunpack.i.h.bf16 %v7132_v18  ;;  %v7133_v35 = vunpack.i.l.bf16 %v7132_v18 }
 0x1e7   :  { %v1609_v48 = vsel %vm663_vm3, %v9352_v47, %v7134_v12  ;;  %v1608_v15 = vsel %vm663_vm3, %v9355_v49, %v7133_v35  ;;  %v7142_v9 = vpop.permute.xlu1 %7141 }
 0x1e8   :  { %v1623_v5 = vsel %vm678_vm4, %v1609_v48, %v7139_v41  ;;  %v1622_v58 = vsel %vm678_vm4, %v1608_v15, %v7138_v45  ;;  %v7144_v7 = vunpack.i.h.bf16 %v7142_v9  ;;  %v7143_v59 = vunpack.i.l.bf16 %v7142_v9  ;;  %v7147_v32 = vpop.permute.xlu0 %7146 }
 0x1e9   :  { %v1636_v37 = vsel %vm693_vm5, %v1622_v58, %v7128_v56  ;;  %v1637_v60 = vsel %vm693_vm5, %v1623_v5, %v7129_v28  ;;  %v7149_v61 = vunpack.i.h.bf16 %v7147_v32  ;;  %v7148_v47 = vunpack.i.l.bf16 %v7147_v32 }
 0x1ea   :  { %v1652_v62 = vsel %vm710_vm6, %v1636_v37, %v7143_v59  ;;  %v1653_v49 = vsel %vm710_vm6, %v1637_v60, %v7144_v7 }
 0x1eb   :  { %v7152_v13 = vpop.permute.xlu1 %7151  ;;  %v1668_v24 = vsel %vm727_vm7, %v1652_v62, %v7148_v47  ;;  %v1669_v25 = vsel %vm727_vm7, %v1653_v49, %v7149_v61 }
 0x1ec   :  { %v7154_v6 = vunpack.i.h.bf16 %v7152_v13  ;;  %v7153_v8 = vunpack.i.l.bf16 %v7152_v13 }
 0x1ee   :  { %v1684_v17 = vsel %vm744_vm8, %v1668_v24, %v7153_v8  ;;  %v1685_v34 = vsel %vm744_vm8, %v1669_v25, %v7154_v6 }
 0x1ef   :  { %v7162_v20 = vpop.permute.xlu0 %7161 }
 0x1f0   :  { %v7164_v55 = vunpack.i.h.bf16 %v7162_v20  ;;  %v7163_v44 = vunpack.i.l.bf16 %v7162_v20  ;;  %v7157_v23 = vpop.permute.xlu1 %7156 }
 0x1f1   :  { %v7158_v48 = vunpack.i.l.bf16 %v7157_v23  ;;  %v7159_v5 = vunpack.i.h.bf16 %v7157_v23 }
 0x1f2   :  { %v1700_v18 = vsel %vm761_vm9, %v1684_v17, %v7163_v44  ;;  %v1701_v12 = vsel %vm761_vm9, %v1685_v34, %v7164_v55 }
 0x1f3   :  { %v7172_v35 = vpop.permute.xlu0 %7171  ;;  %v1716_v41 = vpack.c.bf16 %v1701_v12, %v1700_v18  ;;  %v1638_v60 = vsel %vm693_vm5, %v1622_v58, %v7158_v48 }
 0x1f4   :  { %v7167_v45 = vpop.permute.xlu1 %7166  ;;  %v7173_v9 = vunpack.i.l.bf16 %v7172_v35  ;;  %v7174_v48 = vunpack.i.h.bf16 %v7172_v35 }
 0x1f5   :  { %v7168_v15 = vunpack.i.l.bf16 %v7167_v45  ;;  %1849 = vmatmul.mubr.bf16.vlgmr.msra.gmra.mrb[0].mxu1 %v1716_v41  ;;  %v7169_v25 = vunpack.i.h.bf16 %v7167_v45 }
 0x1f6   :  { %6676 = vmatprep.mubr.msk.bf16.mxu1 %vm663_vm3, %v1719_v26 }
 0x1f7   :  { %v1610_v28 = vsel %vm663_vm3, %v9385_v29, %v7168_v15  ;;  %v7177_v56 = vpop.permute.xlu0 %7176  ;;  %v1611_v12 = vsel %vm663_vm3, %v9393_v27, %v7169_v25 }
 0x1f8   :  { %v1624_v7 = vsel %vm678_vm4, %v1610_v28, %v7173_v9  ;;  %v7179_v59 = vunpack.i.h.bf16 %v7177_v56  ;;  %v7178_v32 = vunpack.i.l.bf16 %v7177_v56  ;;  %v7182_v37 = vpop.permute.xlu1 %7181 }
 0x1f9   :  { %v1639_v13 = vsel %vm693_vm5, %v1624_v7, %v7159_v5  ;;  %v7184_v61 = vunpack.i.h.bf16 %v7182_v37  ;;  %v7183_v47 = vunpack.i.l.bf16 %v7182_v37  ;;  %v1625_v5 = vsel %vm678_vm4, %v1611_v12, %v7174_v48 }
 0x1fa   :  { %v1654_v0 = vsel %vm710_vm6, %v1638_v60, %v7178_v32  ;;  %v1655_v2 = vsel %vm710_vm6, %v1639_v13, %v7179_v59 }
 0x1fb   :  { %v7187_v26 = vpop.permute.xlu0 %7186  ;;  %v1670_v6 = vsel %vm727_vm7, %v1654_v0, %v7183_v47  ;;  %v1671_v8 = vsel %vm727_vm7, %v1655_v2, %v7184_v61 }
 0x1fc   :  { %v7189_v62 = vunpack.i.h.bf16 %v7187_v26  ;;  %v7188_v49 = vunpack.i.l.bf16 %v7187_v26 }
 0x1fd   :  { %v7197_v29 = vpop.permute.xlu1 %7196 }
 0x1fe   :  { %v7199_v20 = vunpack.i.h.bf16 %v7197_v29  ;;  %v7198_v24 = vunpack.i.l.bf16 %v7197_v29  ;;  %v1686_v58 = vsel %vm744_vm8, %v1670_v6, %v7188_v49  ;;  %v1687_v55 = vsel %vm744_vm8, %v1671_v8, %v7189_v62 }
 0x1ff   :  { %v7192_v44 = vpop.permute.xlu0 %7191 }
 0x200   :  { %v1702_v23 = vsel %vm761_vm9, %v1686_v58, %v7198_v24  ;;  %v1703_v17 = vsel %vm761_vm9, %v1687_v55, %v7199_v20  ;;  %v7193_v41 = vunpack.i.l.bf16 %v7192_v44  ;;  %v7194_v59 = vunpack.i.h.bf16 %v7192_v44 }
 0x201   :  { %v7207_v34 = vpop.permute.xlu1 %7206  ;;  %v1718_v18 = vpack.c.bf16 %v1703_v17, %v1702_v23 }
 0x202   :  { %v7208_v28 = vunpack.i.l.bf16 %v7207_v34  ;;  %v1640_v32 = vsel %vm693_vm5, %v1625_v5, %v7193_v41 }
 0x203   :  { %1857 = vmatmul.mubr.bf16.gmra.mrb[4].mxu1 %v1718_v18  ;;  %v7202_v15 = vpop.permute.xlu0 %7201 }
 0x204   :  { %6677 = vmatprep.mubr.msk.bf16.mxu1 %vm663_vm3, %v1721_v63  ;;  %v7203_v45 = vunpack.i.l.bf16 %v7202_v15  ;;  %v7204_v17 = vunpack.i.h.bf16 %v7202_v15 }
 0x205   :  { %v7212_v9 = vpop.permute.xlu1 %7211 }
 0x206   :  { %v7214_v56 = vunpack.i.h.bf16 %v7212_v9  ;;  %v7213_v7 = vunpack.i.l.bf16 %v7212_v9  ;;  %v1612_v27 = vsel %vm663_vm3, %v9416_v51, %v7203_v45  ;;  %v1613_v41 = vsel %vm663_vm3, %v9424_v14, %v7204_v17 }
 0x207   :  { %v1626_v35 = vsel %vm678_vm4, %v1612_v27, %v7208_v28  ;;  %v7217_v11 = vpop.permute.xlu0 %7216  ;;  %v7209_v9 = vunpack.i.h.bf16 %v7207_v34 }
 0x208   :  { %v1656_v37 = vsel %vm710_vm6, %v1640_v32, %v7213_v7  ;;  %v1641_v63 = vsel %vm693_vm5, %v1626_v35, %v7194_v59  ;;  %v7219_v60 = vunpack.i.h.bf16 %v7217_v11  ;;  %v7218_v13 = vunpack.i.l.bf16 %v7217_v11 }
 0x209   :  { %v7222_v61 = vpop.permute.xlu1 %7221  ;;  %v1657_v47 = vsel %vm710_vm6, %v1641_v63, %v7214_v56  ;;  %v1627_v40 = vsel %vm678_vm4, %v1613_v41, %v7209_v9 }
 0x20a   :  { %v7224_v0 = vunpack.i.h.bf16 %v7222_v61  ;;  %v7223_v2 = vunpack.i.l.bf16 %v7222_v61  ;;  %v1672_v26 = vsel %vm727_vm7, %v1656_v37, %v7218_v13  ;;  %v1673_v62 = vsel %vm727_vm7, %v1657_v47, %v7219_v60 }
 0x20b   :  { %v7232_v49 = vpop.permute.xlu0 %7231 }
 0x20c   :  { %v1688_v51 = vsel %vm744_vm8, %v1672_v26, %v7223_v2  ;;  %v1689_v29 = vsel %vm744_vm8, %v1673_v62, %v7224_v0  ;;  %v7234_v6 = vunpack.i.h.bf16 %v7232_v49  ;;  %v7233_v8 = vunpack.i.l.bf16 %v7232_v49 }
 0x20d   :  { %v7227_v58 = vpop.permute.xlu1 %7226 }
 0x20e   :  { %v1704_v20 = vsel %vm761_vm9, %v1688_v51, %v7233_v8  ;;  %v1705_v24 = vsel %vm761_vm9, %v1689_v29, %v7234_v6  ;;  %v7228_v48 = vunpack.i.l.bf16 %v7227_v58  ;;  %v7229_v56 = vunpack.i.h.bf16 %v7227_v58 }
 0x20f   :  { %v1720_v25 = vpack.c.bf16 %v1705_v24, %v1704_v20  ;;  %v7237_v55 = vpop.permute.xlu0 %7236 }
 0x210   :  { %v7238_v33 = vunpack.i.l.bf16 %v7237_v55  ;;  %v1642_v7 = vsel %vm693_vm5, %v1627_v40, %v7228_v48  ;;  %v7239_v32 = vunpack.i.h.bf16 %v7237_v55 }
 0x211   :  { %1865 = vmatmul.mubr.bf16.gmra.mrb[8].mxu1 %v1720_v25  ;;  %v7242_v44 = vpop.permute.xlu1 %7241 }
 0x212   :  { %6678 = vmatprep.mubr.msk.bf16.mxu1 %vm663_vm3, %v1723_v42  ;;  %v7243_v15 = vunpack.i.l.bf16 %v7242_v44  ;;  %v7244_v37 = vunpack.i.h.bf16 %v7242_v44  ;;  %v1658_v61 = vsel %vm710_vm6, %v1642_v7, %v7238_v33 }
 0x218   :  { %v9701_v23 = vpop.permute.xlu0 %7246 }
 0x219   :  { %v7248_v14 = vunpack.i.l.bf16 %v9701_v23  ;;  %v7249_v48 = vunpack.i.h.bf16 %v9701_v23 }
 0x21b   :  { %v7257_v18 = vpop.permute.xlu1 %7256 }
 0x21c   :  { %v9703_v12 = vpop.permute.xlu0 %7251  ;;  %v7258_v45 = vunpack.i.l.bf16 %v7257_v18  ;;  %v7259_v27 = vunpack.i.h.bf16 %v7257_v18 }
 0x21d   :  { %v7253_v25 = vunpack.i.l.bf16 %v9703_v12  ;;  %v7254_v9 = vunpack.i.h.bf16 %v9703_v12 }
 0x21e   :  { %v1614_v59 = vsel %vm663_vm3, %v9453_v21, %v7258_v45  ;;  %v1674_v21 = vsel %vm727_vm7, %v1658_v61, %v7243_v15  ;;  %v1615_v26 = vsel %vm663_vm3, %v9498_v43, %v7259_v27 }
 0x21f   :  { %v9707_v5 = vpop.permute.xlu1 %7266  ;;  %v1690_v49 = vsel %vm744_vm8, %v1674_v21, %v7248_v14 }
 0x220   :  { %v7262_v28 = vpop.permute.xlu0 %7261  ;;  %v7268_v11 = vunpack.i.l.bf16 %v9707_v5 }
 0x221   :  { %v7263_v42 = vunpack.i.l.bf16 %v7262_v28  ;;  %v7264_v63 = vunpack.i.h.bf16 %v7262_v28 }
 0x222   :  { %v1706_v20 = vsel %vm761_vm9, %v1690_v49, %v7268_v11 }
 0x223   :  { %v1628_v34 = vsel %vm678_vm4, %v1614_v59, %v7263_v42  ;;  %v7272_v35 = vpop.permute.xlu1 %7271  ;;  %v1629_v29 = vsel %vm678_vm4, %v1615_v26, %v7264_v63  ;;  %v7269_v63 = vunpack.i.h.bf16 %v9707_v5 }
 0x224   :  { %v1643_v60 = vsel %vm693_vm5, %v1628_v34, %v7229_v56  ;;  %v7277_v13 = vpop.permute.xlu0 %7276  ;;  %v7273_v55 = vunpack.i.l.bf16 %v7272_v35  ;;  %v1644_v44 = vsel %vm693_vm5, %v1629_v29, %v7253_v25  ;;  %v7274_v28 = vunpack.i.h.bf16 %v7272_v35 }
 0x225   :  { %v1659_v47 = vsel %vm710_vm6, %v1643_v60, %v7239_v32  ;;  %v7279_v56 = vunpack.i.h.bf16 %v7277_v13 }
 0x226   :  { %v1675_v2 = vsel %vm727_vm7, %v1659_v47, %v7244_v37 }
 0x227   :  { %v9723_v62 = vpop.permute.xlu1 %7281  ;;  %v1691_v51 = vsel %vm744_vm8, %v1675_v2, %v7224_v0  ;;  %v7278_v0 = vunpack.i.l.bf16 %v7277_v13 }
 0x228   :  { %v7292_v8 = vpop.permute.xlu0 %7291  ;;  %v1707_v24 = vsel %vm761_vm9, %v1691_v51, %v7234_v6  ;;  %v1660_v6 = vsel %vm710_vm6, %v1644_v44, %v7273_v55  ;;  %v7283_v12 = vunpack.i.l.bf16 %v9723_v62  ;;  %v7284_v25 = vunpack.i.h.bf16 %v9723_v62 }
 0x229   :  { %v1722_v58 = vpack.c.bf16 %v1707_v24, %v1706_v20  ;;  %v7294_v18 = vunpack.i.h.bf16 %v7292_v8  ;;  %v7293_v41 = vunpack.i.l.bf16 %v7292_v8  ;;  %v1676_v7 = vsel %vm727_vm7, %v1660_v6, %v7278_v0 }
 0x22b   :  { %v7287_v43 = vpop.permute.xlu1 %7286  ;;  %1873 = vmatmul.mubr.bf16.gmra.mrb[12].mxu1 %v1722_v58  ;;  %v1617_v57 = vsel %vm663_vm3, %v9527_v52, %v7294_v18  ;;  %v1616_v19 = vsel %vm663_vm3, %v9495_v22, %v7293_v41  ;;  %v1692_v22 = vsel %vm744_vm8, %v1676_v7, %v7249_v48 }
 0x22c   :  { %v9732_v17 = vpop.permute.xlu0 %7301  ;;  %6679 = vmatprep.mubr.msk.bf16.mxu1 %vm663_vm3, %v1725_v36  ;;  %v7289_v36 = vunpack.i.h.bf16 %v7287_v43  ;;  %v7288_v15 = vunpack.i.l.bf16 %v7287_v43  ;;  %v1708_v51 = vsel %vm761_vm9, %v1692_v22, %v7269_v63 }
 0x22d   :  { %v7303_v60 = vunpack.i.l.bf16 %v9732_v17  ;;  %v7304_v43 = vunpack.i.h.bf16 %v9732_v17 }
 0x22e   :  { %v1646_v61 = vsel %vm693_vm5, %v1629_v29, %v7288_v15 }
 0x22f   :  { %v7297_v45 = vpop.permute.xlu1 %7296 }
 0x230   :  { %v7299_v40 = vunpack.i.h.bf16 %v7297_v45  ;;  %v7298_v33 = vunpack.i.l.bf16 %v7297_v45  ;;  %v7307_v42 = vpop.permute.xlu0 %7306 }
 0x231   :  { %v7309_v14 = vunpack.i.h.bf16 %v7307_v42  ;;  %v7308_v27 = vunpack.i.l.bf16 %v7307_v42 }
 0x232   :  { %v1630_v23 = vsel %vm678_vm4, %v1616_v19, %v7298_v33  ;;  %v1631_v59 = vsel %vm678_vm4, %v1617_v57, %v7299_v40 }
 0x233   :  { %v1645_v32 = vsel %vm693_vm5, %v1630_v23, %v7254_v9  ;;  %v7312_v34 = vpop.permute.xlu1 %7311  ;;  %v1647_v35 = vsel %vm693_vm5, %v1631_v59, %v7289_v36  ;;  %v1662_v2 = vsel %vm710_vm6, %v1646_v61, %v7308_v27 }
 0x234   :  { %v7313_v37 = vunpack.i.l.bf16 %v7312_v34  ;;  %v7317_v52 = vpop.permute.xlu0 %7316  ;;  %v1661_v11 = vsel %vm710_vm6, %v1645_v32, %v7274_v28  ;;  %v7314_v47 = vunpack.i.h.bf16 %v7312_v34  ;;  %v1663_v26 = vsel %vm710_vm6, %v1647_v35, %v7309_v14 }
 0x235   :  { %v1677_v13 = vsel %vm727_vm7, %v1661_v11, %v7279_v56  ;;  %v7318_v58 = vunpack.i.l.bf16 %v7317_v52 }
 0x236   :  { %v1693_v21 = vsel %vm744_vm8, %v1677_v13, %v7283_v12  ;;  %v1678_v5 = vsel %vm727_vm7, %v1662_v2, %v7313_v37  ;;  %v1679_v29 = vsel %vm727_vm7, %v1663_v26, %v7314_v47  ;;  %v7319_v12 = vunpack.i.h.bf16 %v7317_v52 }
 0x237   :  { %v7332_v49 = vpop.permute.xlu1 %7331  ;;  %v1709_v8 = vsel %vm761_vm9, %v1693_v21, %v7303_v60  ;;  %v1694_v44 = vsel %vm744_vm8, %v1678_v5, %v7284_v25  ;;  %v1695_v62 = vsel %vm744_vm8, %v1679_v29, %v7318_v58 }
 0x238   :  { %v7322_v20 = vpop.permute.xlu0 %7321  ;;  %v1724_v24 = vpack.c.bf16 %v1709_v8, %v1708_v51  ;;  %v7334_v41 = vunpack.i.h.bf16 %v7332_v49  ;;  %v7333_v45 = vunpack.i.l.bf16 %v7332_v49  ;;  %v1710_v28 = vsel %vm761_vm9, %v1694_v44, %v7304_v43 }
 0x239   :  { %v7324_v9 = vunpack.i.h.bf16 %v7322_v20  ;;  %v7323_v31 = vunpack.i.l.bf16 %v7322_v20 }
 0x23a   :  { %1881 = vmatmul.mubr.bf16.gmra.mrb[16].mxu1 %v1724_v24 }
 0x23b   :  { %v7337_v55 = vpop.permute.xlu1 %7336  ;;  %6680 = vmatprep.mubr.msk.bf16.mxu1 %vm663_vm3, %v1727_v39 }
 0x23c   :  { %v7338_v0 = vunpack.i.l.bf16 %v7337_v55  ;;  %v7327_v18 = vpop.permute.xlu0 %7326  ;;  %v7339_v32 = vunpack.i.h.bf16 %v7337_v55 }
 0x23d   :  { %v7329_v6 = vunpack.i.h.bf16 %v7327_v18  ;;  %v7328_v48 = vunpack.i.l.bf16 %v7327_v18 }
 0x23e   :  { %v1711_v40 = vsel %vm761_vm9, %v1695_v62, %v7338_v0 }
 0x23f   :  { %v1619_v30 = vsel %vm663_vm3, %v9567_v53, %v7329_v6  ;;  %v1618_v39 = vsel %vm663_vm3, %v9534_v46, %v7328_v48  ;;  %v7342_v17 = vpop.permute.xlu1 %7341  ;;  %v1726_v33 = vpack.c.bf16 %v1711_v40, %v1710_v28  ;;  %v8655_v28 = vld [vmem:[%s12914_s1 + $0x58] sm:$0xff]   ;;  %v8656_v40 = vld [vmem:[%s12914_s1 + $0x60] sm:$0xff]  }
 0x240   :  { %v1633_v42 = vsel %vm678_vm4, %v1619_v30, %v7334_v41  ;;  %v1632_v56 = vsel %vm678_vm4, %v1618_v39, %v7333_v45  ;;  %v7344_v7 = vunpack.i.h.bf16 %v7342_v17  ;;  %v7343_v57 = vunpack.i.l.bf16 %v7342_v17  ;;  %v7347_v19 = vpop.permute.xlu0 %7346  ;;  %v8653_v45 = vld [vmem:[%s12914_s1 + $0x48] sm:$0xff]  }
 0x241   :  { %v1648_v36 = vsel %vm693_vm5, %v1632_v56, %v7323_v31  ;;  %v7349_v15 = vunpack.i.h.bf16 %v7347_v19  ;;  %v7348_v23 = vunpack.i.l.bf16 %v7347_v19  ;;  %v1649_v59 = vsel %vm693_vm5, %v1633_v42, %v7324_v9  ;;  %2757 = vmatpush1.bf16.msra.mxu0 %v8653_v45  ;;  %v8654_v9 = vld [vmem:[%s12914_s1 + $0x50] sm:$0xff]   ;;  %v9833_v31 = vld [vmem:[%s12917_s4] ss:$0 sm:$0xff]  ;;  %v8657_v30 = vld [vmem:[%s12914_s1 + $0x68] sm:$0xff]  }
 0x242   :  { %v1664_v53 = vsel %vm710_vm6, %v1648_v36, %v7343_v57  ;;  %1889 = vmatmul.mubr.bf16.gmra.mrb[20].mxu1 %v1726_v33  ;;  %v1665_v46 = vsel %vm710_vm6, %v1649_v59, %v7344_v7  ;;  %2758 = vmatprep.subr.bf16.mxu0 %v12921_v3  ;;  %v8698_v56 = vld [vmem:[%s12913_s0] sm:$0xff]  ;;  %v8699_v59 = vld [vmem:[%s12913_s0 + $0x8] sm:$0xff] }
 0x243   :  { %v1680_v14 = vsel %vm727_vm7, %v1664_v53, %v7348_v23  ;;  %v1549_v27 = vpop.permute.xlu1 %1548  ;;  %v1681_v34 = vsel %vm727_vm7, %v1665_v46, %v7349_v15  ;;  %6681 = vmatprep.mubr.msk.bf16.mxu1 %vm663_vm3, %v1729_v4  ;;  %v8658_v53 = vld [vmem:[%s12914_s1 + $0x70] sm:$0xff]  }
 0x244   :  { %v1697_v35 = vsel %vm744_vm8, %v1681_v34, %v1549_v27  ;;  %v1591_v37 = vpop.permute.xlu0 %1590  ;;  %v1696_v52 = vsel %vm744_vm8, %v1680_v14, %v7319_v12 }
 0x245   :  { %v1713_v11 = vsel %vm761_vm9, %v1697_v35, %v1591_v37  ;;  %v1712_v22 = vsel %vm761_vm9, %v1696_v52, %v7339_v32  ;;  %2759 = vmatpush1.bf16.msra.mxu0 %v8654_v9 }
 0x246   :  { %v1728_v13 = vpack.c.bf16 %v1713_v11, %v1712_v22  ;;  %2760 = vmatprep.subr.bf16.mxu0 %v12921_v3 }
 0x247   :  { %v7352_v63 = vpop.permute.xlu1 %7351 }
 0x248   :  { %v7362_v60 = vpop.permute.xlu0 %7361  ;;  %v7354_v26 = vunpack.i.h.bf16 %v7352_v63  ;;  %v7353_v49 = vunpack.i.l.bf16 %v7352_v63 }
 0x249   :  { %v7364_v21 = vunpack.i.h.bf16 %v7362_v60  ;;  %v7363_v2 = vunpack.i.l.bf16 %v7362_v60  ;;  %2761 = vmatpush1.bf16.msra.mxu0 %v8655_v28  ;;  %v8659_v60 = vld [vmem:[%s12914_s1 + $0x78] sm:$0xff]  }
 0x24a   :  { %1897 = vmatmul.mubr.bf16.gmra.mrb[24].mxu1 %v1728_v13  ;;  %2762 = vmatprep.subr.bf16.mxu0 %v12921_v3 }
 0x24b   :  { %v7357_v61 = vpop.permute.xlu1 %7356  ;;  %6682 = vmatprep.mubr.msk.bf16.mxu1 %vm663_vm3, %v1731_v38 }
 0x24c   :  { %v7359_v16 = vunpack.i.h.bf16 %v7357_v61  ;;  %v7358_v4 = vunpack.i.l.bf16 %v7357_v61  ;;  %v7367_v47 = vpop.permute.xlu0 %7366 }
 0x24d   :  { %v7369_v1 = vunpack.i.h.bf16 %v7367_v47  ;;  %v7368_v54 = vunpack.i.l.bf16 %v7367_v47  ;;  %2763 = vmatpush1.bf16.msra.mxu0 %v8656_v40 }
 0x24e   :  { %v1621_v51 = vsel %vm663_vm3, %v9604_v50, %v7359_v16  ;;  %v1620_v8 = vsel %vm663_vm3, %v9573_v10, %v7358_v4  ;;  %2764 = vmatprep.subr.bf16.mxu0 %v12921_v3 }
 0x24f   :  { %v1634_v5 = vsel %vm678_vm4, %v1620_v8, %v7363_v2  ;;  %v1635_v20 = vsel %vm678_vm4, %v1621_v51, %v7364_v21  ;;  %v7372_v38 = vpop.permute.xlu1 %7371 }
 0x250   :  { %v1651_v24 = vsel %vm693_vm5, %v1635_v20, %v7354_v26  ;;  %v7374_v25 = vunpack.i.h.bf16 %v7372_v38  ;;  %v7373_v58 = vunpack.i.l.bf16 %v7372_v38  ;;  %v1650_v29 = vsel %vm693_vm5, %v1634_v5, %v7353_v49  ;;  %v1551_v10 = vpop.permute.xlu0 %1550  ;;  %v8660_v5 = vld [vmem:[%s12914_s1 + $0x80] sm:$0xff]  }
 0x251   :  { %v1667_v55 = vsel %vm710_vm6, %v1651_v24, %v7369_v1  ;;  %v1666_v50 = vsel %vm710_vm6, %v1650_v29, %v7368_v54  ;;  %2765 = vmatpush1.bf16.msra.mxu0 %v8657_v30  ;;  %v8700_v24 = vld [vmem:[%s12913_s0 + $0x10] sm:$0xff] }
 0x252   :  { %v1683_v44 = vsel %vm727_vm7, %v1667_v55, %v7374_v25  ;;  %v1682_v43 = vsel %vm727_vm7, %v1666_v50, %v7373_v58  ;;  %2766 = vmatprep.subr.bf16.mxu0 %v12921_v3 }
 0x253   :  { %v1698_v0 = vsel %vm744_vm8, %v1682_v43, %v1551_v10  ;;  %v1593_v18 = vpop.permute.xlu1 %1592  ;;  %v1699_v41 = vsel %vm744_vm8, %v1683_v44, %v1549_v27  ;;  %v8661_v44 = vld [vmem:[%s12914_s1 + $0x88] sm:$0xff]  }
 0x254   :  { %v1714_v6 = vsel %vm761_vm9, %v1698_v0, %v1593_v18  ;;  %v1715_v48 = vsel %vm761_vm9, %v1699_v41, %v1591_v37  ;;  %v8701_v18 = vld [vmem:[%s12913_s0 + $0x18] sm:$0xff] }
 0x255   :  { %v1730_v62 = vpack.c.bf16 %v1715_v48, %v1714_v6  ;;  %2767 = vmatpush1.bf16.msra.mxu0 %v8658_v53 }
 0x256   :  { %2768 = vmatprep.subr.bf16.mxu0 %v12921_v3 }
 0x257   :  { %1905 = vmatmul.mubr.bf16.gmra.mrb[28].mxu1 %v1730_v62 }
 0x259   :  { %2769 = vmatpush1.bf16.msra.mxu0 %v8659_v60  ;;  %v8702_v60 = vld [vmem:[%s12913_s0 + $0x20] sm:$0xff] }
 0x25a   :  { %2770 = vmatprep.subr.bf16.mxu0 %v12921_v3 }
 0x25d   :  { %2771 = vmatpush1.bf16.msra.mxu0 %v8660_v5 }
 0x25e   :  { %2772 = vmatprep.subr.bf16.mxu0 %v12921_v3 }
 0x261   :  { %2773 = vmatpush1.bf16.msra.mxu0 %v8661_v44 }
 0x262   :  { %4636 = vmatprep.subr.bf16.mxu0 %v12921_v3 }
 0x2c8   :  { %v1850_v39 = vpop.f32.mrb[0].mxu1 }
 0x2c9   :  { %v1851_v17 = vadd.f32 %v9833_v31, %v1850_v39  ;;  %v1852_v33 = vpop.f32.mrb[1].mxu1 }
 0x2ca   :  { %v1853_v42 = vpop.f32.mrb[2].mxu1 }
 0x2cb   :  { %v9843_v7 = vadd.f32 %v8698_v56, %v1851_v17  ;;  %v1854_v57 = vadd.f32 %v9833_v31, %v1853_v42  ;;  %v1855_v19 = vpop.f32.mrb[3].mxu1 }
 0x2cd   :  { %v1967_v36 = vrot.slane %v9843_v7, 1  ;;  %v1999_v15 = vrot.slane %v9843_v7, 7  ;;  %v2031_v23 = vrot.slane %v9843_v7, 5  ;;  %v9852_v12 = vadd.f32 %v8699_v59, %v1854_v57 }
 0x2cf   :  { %v1966_v46 = vrot.slane %v9852_v12, 1  ;;  %v1998_v32 = vrot.slane %v9852_v12, 7  ;;  %v2030_v14 = vrot.slane %v9852_v12, 5  ;;  %v9861_v27 = vsel %vm174_vm0, %v1967_v36, %v1999_v15 }
 0x2d0   :  { %v2079_v34 = vsel %vm174_vm0, %v1999_v15, %v2031_v23  ;;  %v2167_v35 = vrot.slane %v9861_v27, 2  ;;  %v2125_v37 = vrot.slane %v9861_v27, 1 }
 0x2d1   :  { %v2078_v52 = vsel %vm174_vm0, %v1998_v32, %v2030_v14  ;;  %v9868_v11 = vsel %vm174_vm0, %v1966_v46, %v1998_v32  ;;  %v2168_v22 = vrot.slane %v2079_v34, 2  ;;  %v2126_v63 = vrot.slane %v2079_v34, 1 }
 0x2d2   :  { %v7375_v13 = vpack.i.bf16 %v9868_v11, %v9861_v27  ;;  %v2164_v61 = vrot.slane %v9868_v11, 2  ;;  %v2165_v16 = vrot.slane %v2078_v52, 2  ;;  %v2122_v4 = vrot.slane %v9868_v11, 1 }
 0x2d3   :  { %v2123_v47 = vrot.slane %v2078_v52, 1  ;;  %v2169_v2 = vsel %vm278_vm2, %v2167_v35, %v2168_v22  ;;  %v2127_v8 = vsel %vm235_vm1, %v2125_v37, %v2126_v63 }
 0x2d4   :  { %7376 = vrot.lane.b32.xlu0 %v7375_v13, %s8715_s9  ;;  %v2166_v21 = vsel %vm278_vm2, %v2164_v61, %v2165_v16 }
 0x2d5   :  { %v7385_v49 = vpack.i.bf16 %v2169_v2, %v2166_v21  ;;  %v2124_v51 = vsel %vm235_vm1, %v2122_v4, %v2123_v47  ;;  %v7395_v50 = vpack.i.bf16 %v2166_v21, %v2169_v2  ;;  %v8703_v2 = vld [vmem:[%s12913_s0 + $0x28] sm:$0xff] }
 0x2d6   :  { %v1858_v26 = vpop.f32.mrb[4].mxu1  ;;  %v7380_v54 = vpack.i.bf16 %v2127_v8, %v2124_v51  ;;  %v7390_v55 = vpack.i.bf16 %v2124_v51, %v2127_v8 }
 0x2d7   :  { %v1859_v20 = vadd.f32 %v9833_v31, %v1858_v26  ;;  %v1860_v1 = vpop.f32.mrb[5].mxu1  ;;  %7386 = vrot.lane.b32.xlu1 %v7385_v49, %s8718_s22 }
 0x2d8   :  { %v1861_v38 = vpop.f32.mrb[6].mxu1  ;;  %7381 = vrot.lane.b32.xlu0 %v7380_v54, %s8716_s16 }
 0x2d9   :  { %v9892_v25 = vadd.f32 %v8700_v24, %v1859_v20  ;;  %v1862_v58 = vadd.f32 %v9833_v31, %v1861_v38  ;;  %v1863_v29 = vpop.f32.mrb[7].mxu1 }
 0x2db   :  { %v1968_v10 = vrot.slane %v9892_v25, 1  ;;  %v2000_v43 = vrot.slane %v9892_v25, 7  ;;  %v2032_v0 = vrot.slane %v9892_v25, 5  ;;  %v9906_v41 = vadd.f32 %v8701_v18, %v1862_v58  ;;  %7391 = vrot.lane.b32.xlu1 %v7390_v55, %s8719_s23 }
 0x2dc   :  { %7396 = vrot.lane.b32.xlu0 %v7395_v50, %s8720_s26 }
 0x2dd   :  { %v2080_v6 = vsel %vm174_vm0, %v2000_v43, %v2032_v0  ;;  %v1969_v48 = vrot.slane %v9906_v41, 1  ;;  %v2001_v62 = vrot.slane %v9906_v41, 7  ;;  %v2033_v45 = vrot.slane %v9906_v41, 5 }
 0x2de   :  { %v9915_v9 = vsel %vm174_vm0, %v1968_v10, %v2000_v43  ;;  %v2171_v28 = vrot.slane %v2080_v6, 2  ;;  %v2129_v40 = vrot.slane %v2080_v6, 1 }
 0x2df   :  { %v2081_v30 = vsel %vm174_vm0, %v2001_v62, %v2033_v45  ;;  %v7400_v39 = vpack.i.bf16 %v9915_v9, %v9868_v11  ;;  %v2170_v17 = vrot.slane %v9915_v9, 2  ;;  %v2128_v33 = vrot.slane %v9915_v9, 1 }
 0x2e0   :  { %v9924_v42 = vsel %vm174_vm0, %v1969_v48, %v2001_v62  ;;  %v2174_v56 = vrot.slane %v2081_v30, 2  ;;  %v2132_v57 = vrot.slane %v2081_v30, 1 }
 0x2e1   :  { %7401 = vrot.lane.b32.xlu1 %v7400_v39, %s8717_s17  ;;  %v2172_v19 = vsel %vm278_vm2, %v2170_v17, %v2171_v28  ;;  %v2130_v36 = vsel %vm235_vm1, %v2128_v33, %v2129_v40  ;;  %v2173_v15 = vrot.slane %v9924_v42, 2  ;;  %v2131_v53 = vrot.slane %v9924_v42, 1 }
 0x2e2   :  { %v2657_v23 = vpack.c.bf16 %v2172_v19, %v2166_v21  ;;  %v7410_v59 = vpack.i.bf16 %v2130_v36, %v2124_v51  ;;  %v7405_v46 = vpack.i.bf16 %v9924_v42, %v9915_v9 }
 0x2e3   :  { %v9934_v32 = vsel %vm278_vm2, %v2173_v15, %v2174_v56  ;;  %v2133_v14 = vsel %vm235_vm1, %v2131_v53, %v2132_v57  ;;  %v8704_v57 = vld [vmem:[%s12913_s0 + $0x30] sm:$0xff] }
 0x2e4   :  { %6712 = vmatprep.mubr.msk.bf16.mxu0 %vm663_vm3, %v2657_v23  ;;  %7411 = vrot.lane.b32.xlu0 %v7410_v59, %s8721_s13  ;;  %v1866_v34 = vpop.f32.mrb[8].mxu1  ;;  %v7420_v52 = vpack.i.bf16 %v9934_v32, %v2172_v19  ;;  %v7415_v63 = vpack.i.bf16 %v2133_v14, %v2130_v36 }
 0x2e5   :  { %7406 = vrot.lane.b32.xlu1 %v7405_v46, %s8715_s9  ;;  %v1867_v35 = vadd.f32 %v9833_v31, %v1866_v34  ;;  %v1868_v37 = vpop.f32.mrb[9].mxu1  ;;  %v8705_v46 = vld [vmem:[%s12913_s0 + $0x38] sm:$0xff] }
 0x2e6   :  { %v1869_v22 = vpop.f32.mrb[10].mxu1 }
 0x2e7   :  { %v9945_v13 = vadd.f32 %v8702_v60, %v1867_v35  ;;  %v1870_v61 = vadd.f32 %v9833_v31, %v1869_v22  ;;  %v1871_v16 = vpop.f32.mrb[11].mxu1 }
 0x2e8   :  { %7421 = vrot.lane.b32.xlu0 %v7420_v52, %s8718_s22 }
 0x2e9   :  { %7416 = vrot.lane.b32.xlu1 %v7415_v63, %s8716_s16  ;;  %v1970_v4 = vrot.slane %v9945_v13, 1  ;;  %v2002_v47 = vrot.slane %v9945_v13, 7  ;;  %v2034_v21 = vrot.slane %v9945_v13, 5  ;;  %v9956_v26 = vadd.f32 %v8703_v2, %v1870_v61 }
 0x2eb   :  { %v2082_v49 = vsel %vm174_vm0, %v2002_v47, %v2034_v21  ;;  %v1971_v51 = vrot.slane %v9956_v26, 1  ;;  %v2003_v8 = vrot.slane %v9956_v26, 7  ;;  %v2035_v5 = vrot.slane %v9956_v26, 5 }
 0x2ec   :  { %7426 = vrot.lane.b32.xlu0 %v7415_v63, %s8719_s23  ;;  %v9965_v20 = vsel %vm174_vm0, %v1970_v4, %v2002_v47  ;;  %v2135_v1 = vrot.slane %v2082_v49, 1  ;;  %v2177_v54 = vrot.slane %v2082_v49, 2 }
 0x2ed   :  { %7431 = vrot.lane.b32.xlu1 %v7420_v52, %s8720_s26  ;;  %v2083_v38 = vsel %vm174_vm0, %v2003_v8, %v2035_v5  ;;  %v7435_v24 = vpack.i.bf16 %v9965_v20, %v9924_v42  ;;  %v2134_v58 = vrot.slane %v9965_v20, 1  ;;  %v9972_v29 = vsel %vm174_vm0, %v1971_v51, %v2003_v8 }
 0x2ee   :  { %v2176_v55 = vrot.slane %v9965_v20, 2  ;;  %v2179_v50 = vrot.slane %v9972_v29, 2  ;;  %v2180_v44 = vrot.slane %v2083_v38, 2  ;;  %v2137_v43 = vrot.slane %v9972_v29, 1 }
 0x2ef   :  { %v2136_v10 = vsel %vm235_vm1, %v2134_v58, %v2135_v1  ;;  %v2138_v0 = vrot.slane %v2083_v38, 1  ;;  %v7440_v48 = vpack.i.bf16 %v9972_v29, %v9965_v20 }
 0x2f0   :  { %7436 = vrot.lane.b32.xlu0 %v7435_v24, %s8717_s17  ;;  %v7445_v18 = vpack.i.bf16 %v2136_v10, %v2133_v14  ;;  %v9980_v6 = vsel %vm278_vm2, %v2176_v55, %v2177_v54  ;;  %v9985_v62 = vsel %vm278_vm2, %v2179_v50, %v2180_v44 }
 0x2f1   :  { %v2659_v45 = vpack.c.bf16 %v9980_v6, %v9934_v32  ;;  %v2139_v28 = vsel %vm235_vm1, %v2137_v43, %v2138_v0  ;;  %v7455_v40 = vpack.i.bf16 %v9985_v62, %v9980_v6 }
 0x2f2   :  { %7446 = vrot.lane.b32.xlu1 %v7445_v18, %s8721_s13  ;;  %v7450_v30 = vpack.i.bf16 %v2139_v28, %v2136_v10 }
 0x2f4   :  { %7441 = vrot.lane.b32.xlu0 %v7440_v48, %s8715_s9 }
 0x2f6   :  { %7456 = vrot.lane.b32.xlu1 %v7455_v40, %s8718_s22 }
 0x2f8   :  { %7451 = vrot.lane.b32.xlu0 %v7450_v30, %s8716_s16 }
 0x2fa   :  { %7461 = vrot.lane.b32.xlu1 %v7450_v30, %s8719_s23 }
 0x2fc   :  { %7466 = vrot.lane.b32.xlu0 %v7455_v40, %s8720_s26 }
 0x2fe   :  { %v1874_v39 = vpop.f32.mrb[12].mxu1 }
 0x2ff   :  { %v1875_v17 = vadd.f32 %v9833_v31, %v1874_v39  ;;  %v1876_v33 = vpop.f32.mrb[13].mxu1 }
 0x300   :  { %v1877_v56 = vpop.f32.mrb[14].mxu1 }
 0x301   :  { %v10002_v19 = vadd.f32 %v8704_v57, %v1875_v17  ;;  %v1878_v36 = vadd.f32 %v9833_v31, %v1877_v56  ;;  %v1879_v15 = vpop.f32.mrb[15].mxu1  ;;  %v8707_v17 = vld [vmem:[%s12913_s0 + $0x48] sm:$0xff] }
 0x303   :  { %v1972_v23 = vrot.slane %v10002_v19, 1  ;;  %v2004_v59 = vrot.slane %v10002_v19, 7  ;;  %v2036_v53 = vrot.slane %v10002_v19, 5  ;;  %v10011_v14 = vadd.f32 %v8705_v46, %v1878_v36 }
 0x305   :  { %v2084_v34 = vsel %vm174_vm0, %v2004_v59, %v2036_v53  ;;  %v1973_v35 = vrot.slane %v10011_v14, 1  ;;  %v2005_v37 = vrot.slane %v10011_v14, 7  ;;  %v2037_v52 = vrot.slane %v10011_v14, 5 }
 0x306   :  { %v10018_v22 = vsel %vm174_vm0, %v1972_v23, %v2004_v59  ;;  %v2141_v63 = vrot.slane %v2084_v34, 1  ;;  %v2183_v60 = vrot.slane %v2084_v34, 2 }
 0x307   :  { %v7470_v61 = vpack.i.bf16 %v10018_v22, %v9972_v29  ;;  %v2140_v16 = vrot.slane %v10018_v22, 1  ;;  %v2069_v4 = vsel %vm174_vm0, %v1973_v35, %v2005_v37  ;;  %v2085_v47 = vsel %vm174_vm0, %v2005_v37, %v2037_v52 }
 0x308   :  { %v2210_v21 = vrot.slane %v2069_v4, 1  ;;  %v2211_v2 = vrot.slane %v2085_v47, 1  ;;  %v2182_v49 = vrot.slane %v10018_v22, 2  ;;  %v2216_v8 = vrot.slane %v2069_v4, 2 }
 0x309   :  { %7471 = vrot.lane.b32.xlu1 %v7470_v61, %s8717_s17  ;;  %v10028_v51 = vsel %vm235_vm1, %v2140_v16, %v2141_v63  ;;  %v2217_v5 = vrot.slane %v2085_v47, 2  ;;  %v7475_v38 = vpack.i.bf16 %v2069_v4, %v10018_v22  ;;  %v8708_v47 = vld [vmem:[%s12913_s0 + $0x50] sm:$0xff] }
 0x30a   :  { %v7480_v1 = vpack.i.bf16 %v10028_v51, %v2139_v28  ;;  %v10032_v54 = vsel %vm278_vm2, %v2182_v49, %v2183_v60  ;;  %v10036_v24 = vsel %vm235_vm1, %v2210_v21, %v2211_v2  ;;  %v8706_v28 = vld [vmem:[%s12913_s0 + $0x40] sm:$0xff] }
 0x30b   :  { %v10039_v58 = vsel %vm278_vm2, %v2216_v8, %v2217_v5  ;;  %v2661_v55 = vpack.c.bf16 %v10032_v54, %v9985_v62  ;;  %v7485_v0 = vpack.i.bf16 %v10036_v24, %v10028_v51 }
 0x30c   :  { %7481 = vrot.lane.b32.xlu0 %v7480_v1, %s8721_s13  ;;  %v7490_v48 = vpack.i.bf16 %v10039_v58, %v10032_v54 }
 0x30d   :  { %7476 = vrot.lane.b32.xlu1 %v7475_v38, %s8715_s9  ;;  %v1882_v44 = vpop.f32.mrb[16].mxu1 }
 0x30e   :  { %v1883_v10 = vadd.f32 %v9833_v31, %v1882_v44  ;;  %v1884_v43 = vpop.f32.mrb[17].mxu1 }
 0x30f   :  { %v1885_v18 = vpop.f32.mrb[18].mxu1  ;;  %v8709_v43 = vld [vmem:[%s12913_s0 + $0x58] sm:$0xff] }
 0x310   :  { %v10055_v40 = vadd.f32 %v8706_v28, %v1883_v10  ;;  %v1886_v30 = vadd.f32 %v9833_v31, %v1885_v18  ;;  %7486 = vrot.lane.b32.xlu0 %v7485_v0, %s8719_s23  ;;  %v1887_v39 = vpop.f32.mrb[19].mxu1 }
 0x311   :  { %7491 = vrot.lane.b32.xlu1 %v7490_v48, %s8720_s26 }
 0x312   :  { %v10063_v33 = vadd.f32 %v8707_v17, %v1886_v30  ;;  %v1975_v56 = vrot.slane %v10055_v40, 1  ;;  %v2007_v57 = vrot.slane %v10055_v40, 7  ;;  %v2039_v59 = vrot.slane %v10055_v40, 5 }
 0x314   :  { %v1974_v36 = vrot.slane %v10063_v33, 1  ;;  %v2006_v15 = vrot.slane %v10063_v33, 7  ;;  %v2038_v23 = vrot.slane %v10063_v33, 5  ;;  %v10079_v16 = vsel %vm174_vm0, %v1975_v56, %v2007_v57 }
 0x315   :  { %v1890_v53 = vpop.f32.mrb[20].mxu1  ;;  %v2087_v1 = vsel %vm174_vm0, %v2007_v57, %v2039_v59  ;;  %v2146_v28 = vrot.slane %v10079_v16, 1  ;;  %v2188_v30 = vrot.slane %v10079_v16, 2 }
 0x316   :  { %v2086_v46 = vsel %vm174_vm0, %v2006_v15, %v2038_v23  ;;  %v1891_v34 = vadd.f32 %v9833_v31, %v1890_v53  ;;  %v1892_v35 = vpop.f32.mrb[21].mxu1  ;;  %v10074_v37 = vsel %vm174_vm0, %v1974_v36, %v2006_v15  ;;  %v2147_v15 = vrot.slane %v2087_v1, 1 }
 0x317   :  { %v1893_v52 = vpop.f32.mrb[22].mxu1  ;;  %v7495_v63 = vpack.i.bf16 %v10074_v37, %v2069_v4  ;;  %v2143_v60 = vrot.slane %v10074_v37, 1  ;;  %v2144_v61 = vrot.slane %v2086_v46, 1  ;;  %v2185_v8 = vrot.slane %v10074_v37, 2 }
 0x318   :  { %v10084_v21 = vadd.f32 %v8708_v47, %v1891_v34  ;;  %v1894_v2 = vadd.f32 %v9833_v31, %v1893_v52  ;;  %v1895_v49 = vpop.f32.mrb[23].mxu1  ;;  %v2186_v5 = vrot.slane %v2086_v46, 2  ;;  %v7500_v48 = vpack.i.bf16 %v10074_v37, %v10079_v16 }
 0x319   :  { %7496 = vrot.lane.b32.xlu0 %v7495_v63, %s8717_s17  ;;  %v2145_v4 = vsel %vm235_vm1, %v2143_v60, %v2144_v61  ;;  %v2189_v23 = vrot.slane %v2087_v1, 2  ;;  %v8710_v60 = vld [vmem:[%s12913_s0 + $0x60] sm:$0xff] }
 0x31a   :  { %v1976_v38 = vrot.slane %v10084_v21, 1  ;;  %v2008_v44 = vrot.slane %v10084_v21, 7  ;;  %v2040_v10 = vrot.slane %v10084_v21, 5  ;;  %v10097_v0 = vadd.f32 %v8709_v43, %v1894_v2 }
 0x31b   :  { %v7505_v18 = vpack.i.bf16 %v2145_v4, %v10028_v51  ;;  %v10108_v57 = vsel %vm278_vm2, %v2185_v8, %v2186_v5  ;;  %v7515_v35 = vpack.i.bf16 %v2145_v4, %v10036_v24  ;;  %v2148_v5 = vsel %vm235_vm1, %v2146_v28, %v2147_v15  ;;  %v8711_v28 = vld [vmem:[%s12913_s0 + $0x68] sm:$0xff] }
 0x31c   :  { %v2088_v39 = vsel %vm174_vm0, %v2008_v44, %v2040_v10  ;;  %v1977_v17 = vrot.slane %v10097_v0, 1  ;;  %v2009_v56 = vrot.slane %v10097_v0, 7  ;;  %v2041_v36 = vrot.slane %v10097_v0, 5 }
 0x31d   :  { %7506 = vrot.lane.b32.xlu1 %v7505_v18, %s8716_s16  ;;  %v1898_v51 = vpop.f32.mrb[24].mxu1  ;;  %7501 = vrot.lane.b32.xlu0 %v7500_v48, %s8715_s9  ;;  %v10114_v59 = vsel %vm174_vm0, %v1976_v38, %v2008_v44  ;;  %v7510_v52 = vpack.i.bf16 %v10108_v57, %v10032_v54  ;;  %v2150_v63 = vrot.slane %v2088_v39, 1  ;;  %v2190_v1 = vsel %vm278_vm2, %v2188_v30, %v2189_v23 }
 0x31e   :  { %v1899_v53 = vadd.f32 %v9833_v31, %v1898_v51  ;;  %v1900_v46 = vpop.f32.mrb[25].mxu1  ;;  %v10127_v49 = vsel %vm174_vm0, %v1977_v17, %v2009_v56  ;;  %v2149_v8 = vrot.slane %v10114_v59, 1  ;;  %v2089_v24 = vsel %vm174_vm0, %v2009_v56, %v2041_v36 }
 0x31f   :  { %v1901_v34 = vpop.f32.mrb[26].mxu1  ;;  %v2191_v38 = vrot.slane %v10114_v59, 2  ;;  %v2192_v18 = vrot.slane %v2088_v39, 2  ;;  %v7520_v48 = vpack.i.bf16 %v2145_v4, %v2148_v5  ;;  %v7525_v17 = vpack.i.bf16 %v10108_v57, %v2190_v1 }
 0x320   :  { %v10123_v61 = vadd.f32 %v8710_v60, %v1899_v53  ;;  %v1902_v47 = vadd.f32 %v9833_v31, %v1901_v34  ;;  %v1903_v2 = vpop.f32.mrb[27].mxu1  ;;  %v2152_v56 = vrot.slane %v10127_v49, 1  ;;  %v2151_v51 = vsel %vm235_vm1, %v2149_v8, %v2150_v63 }
 0x321   :  { %7516 = vrot.lane.b32.xlu1 %v7515_v35, %s8721_s13  ;;  %7511 = vrot.lane.b32.xlu0 %v7510_v52, %s8718_s22  ;;  %v2153_v15 = vrot.slane %v2089_v24, 1  ;;  %v2194_v4 = vrot.slane %v10127_v49, 2  ;;  %v2195_v39 = vrot.slane %v2089_v24, 2  ;;  %v10155_v53 = vsel %vm278_vm2, %v2191_v38, %v2192_v18 }
 0x322   :  { %12932 = vst [vmem:[#allocation2_spill] sm:$0xff] %v10123_v61  ;;  %v1978_v44 = vrot.slane %v10123_v61, 1  ;;  %v2010_v10 = vrot.slane %v10123_v61, 7  ;;  %v2042_v43 = vrot.slane %v10123_v61, 5  ;;  %v10147_v30 = vadd.f32 %v8711_v28, %v1902_v47 }
 0x323   :  { %v7530_v34 = vpack.i.bf16 %v10127_v49, %v10114_v59  ;;  %v7540_v35 = vpack.i.bf16 %v2151_v51, %v2148_v5  ;;  %v10166_v47 = vsel %vm235_vm1, %v2152_v56, %v2153_v15  ;;  %v10172_v8 = vsel %vm278_vm2, %v2194_v4, %v2195_v39  ;;  %v8712_v56 = vld [vmem:[%s12913_s0 + $0x70] sm:$0xff] }
 0x324   :  { %v10142_v36 = vsel %vm174_vm0, %v2010_v10, %v2042_v43  ;;  %12933 = vst [vmem:[#allocation3_spill] sm:$0xff] %v10147_v30  ;;  %v10158_v46 = vsel %vm174_vm0, %v1978_v44, %v2010_v10  ;;  %v2011_v63 = vrot.slane %v10147_v30, 7  ;;  %v2043_v60 = vrot.slane %v10147_v30, 5 }
 0x325   :  { %7521 = vrot.lane.b32.xlu1 %v7520_v48, %s8719_s23  ;;  %7526 = vrot.lane.b32.xlu0 %v7525_v17, %s8720_s26  ;;  %v2198_v23 = vrot.slane %v10142_v36, 2  ;;  %v2197_v52 = vrot.slane %v10158_v46, 2  ;;  %v1979_v2 = vrot.slane %v10147_v30, 1  ;;  %v7550_v18 = vpack.i.bf16 %v10166_v47, %v2151_v51 }
 0x326   :  { %v2091_v48 = vsel %vm174_vm0, %v2011_v63, %v2043_v60  ;;  %v7545_v51 = vpack.i.bf16 %v10155_v53, %v2190_v1 }
 0x327   :  { %v10175_v24 = vsel %vm278_vm2, %v2197_v52, %v2198_v23  ;;  %v10193_v39 = vsel %vm174_vm0, %v1979_v2, %v2011_v63  ;;  %v2159_v44 = vrot.slane %v2091_v48, 1 }
 0x328   :  { %v2200_v60 = vrot.slane %v10193_v39, 2  ;;  %v2158_v3 = vrot.slane %v10193_v39, 1 }
 0x329   :  { %7531 = vrot.lane.b32.xlu1 %v7530_v34, %s8717_s17  ;;  %7541 = vrot.lane.b32.xlu0 %v7540_v35, %s8716_s16  ;;  %v8713_v35 = vld [vmem:[%s12913_s0 + $0x78] sm:$0xff] }
 0x32a   :  { %v1906_v38 = vpop.f32.mrb[28].mxu1 }
 0x32b   :  { %v1907_v10 = vadd.f32 %v9833_v31, %v1906_v38  ;;  %v1908_v43 = vpop.f32.mrb[29].mxu1  ;;  %v2201_v38 = vrot.slane %v2091_v48, 2 }
 0x32c   :  { %v1909_v17 = vpop.f32.mrb[30].mxu1  ;;  %v7560_v43 = vpack.i.bf16 %v10172_v8, %v10155_v53 }
 0x32d   :  { %v10187_v28 = vadd.f32 %v8712_v56, %v1907_v10  ;;  %v1910_v15 = vadd.f32 %v9833_v31, %v1909_v17  ;;  %7536 = vrot.lane.b32.xlu1 %v7530_v34, %s8715_s9  ;;  %v1911_v4 = vpop.f32.mrb[31].mxu1  ;;  %7551 = vrot.lane.b32.xlu0 %v7550_v18, %s8721_s13  ;;  %v7565_v17 = vpack.i.bf16 %v10193_v39, %v10158_v46 }
 0x32f   :  { %12934 = vst [vmem:[#allocation4_spill] sm:$0xff] %v10187_v28  ;;  %v2044_v23 = vrot.slane %v10187_v28, 5  ;;  %v10200_v52 = vadd.f32 %v8713_v35, %v1910_v15  ;;  %v1980_v31 = vrot.slane %v10187_v28, 1  ;;  %v2012_v34 = vrot.slane %v10187_v28, 7 }
 0x331   :  { %12935 = vst [vmem:[#allocation5_spill] sm:$0xff] %v10200_v52  ;;  %v1981_v63 = vrot.slane %v10200_v52, 1  ;;  %v2013_v2 = vrot.slane %v10200_v52, 7  ;;  %v2045_v1 = vrot.slane %v10200_v52, 5  ;;  %7546 = vrot.lane.b32.xlu1 %v7545_v51, %s8718_s22  ;;  %7556 = vrot.lane.b32.xlu0 %v7550_v18, %s8719_s23  ;;  %v10211_v10 = vsel %vm174_vm0, %v1980_v31, %v2012_v34 }
 0x332   :  { %v2203_v56 = vrot.slane %v10211_v10, 2  ;;  %v2092_v15 = vsel %vm174_vm0, %v2012_v34, %v2044_v23  ;;  %v2155_v51 = vrot.slane %v10158_v46, 1  ;;  %v2156_v31 = vrot.slane %v10142_v36, 1 }
 0x333   :  { %v10220_v4 = vsel %vm174_vm0, %v1981_v63, %v2013_v2  ;;  %v2093_v18 = vsel %vm174_vm0, %v2013_v2, %v2045_v1  ;;  %v2204_v35 = vrot.slane %v2092_v15, 2  ;;  %v10230_v23 = vsel %vm278_vm2, %v2200_v60, %v2201_v38 }
 0x334   :  { %v2219_v5 = vrot.slane %v10220_v4, 2  ;;  %v2220_v63 = vrot.slane %v2093_v18, 2  ;;  %v7580_v36 = vpack.i.bf16 %v10175_v24, %v10172_v8  ;;  %v2157_v1 = vsel %vm235_vm1, %v2155_v51, %v2156_v31 }
 0x335   :  { %7561 = vrot.lane.b32.xlu1 %v7560_v43, %s8720_s26  ;;  %7566 = vrot.lane.b32.xlu0 %v7565_v17, %s8717_s17  ;;  %v10233_v34 = vsel %vm278_vm2, %v2203_v56, %v2204_v35  ;;  %v2160_v43 = vsel %vm235_vm1, %v2158_v3, %v2159_v44  ;;  %v7575_v56 = vpack.i.bf16 %v2157_v1, %v10166_v47  ;;  %v2161_v51 = vrot.slane %v10211_v10, 1 }
 0x336   :  { %v10240_v48 = vsel %vm278_vm2, %v2219_v5, %v2220_v63  ;;  %v7585_v38 = vpack.i.bf16 %v2160_v43, %v2157_v1  ;;  %v7595_v5 = vpack.i.bf16 %v10230_v23, %v10175_v24  ;;  %v2162_v3 = vrot.slane %v2092_v15, 1 }
 0x337   :  { %v2214_v35 = vrot.slane %v2093_v18, 1  ;;  %v7600_v31 = vpack.i.bf16 %v10220_v4, %v10211_v10  ;;  %v7610_v15 = vpack.i.bf16 %v10233_v34, %v10230_v23 }
 0x338   :  { %v2163_v44 = vsel %vm235_vm1, %v2161_v51, %v2162_v3 }
 0x339   :  { %7581 = vrot.lane.b32.xlu1 %v7580_v36, %s8718_s22  ;;  %7571 = vrot.lane.b32.xlu0 %v7565_v17, %s8715_s9  ;;  %v2213_v17 = vrot.slane %v10220_v4, 1  ;;  %v7605_v1 = vpack.i.bf16 %v2163_v44, %v2160_v43 }
 0x33b   :  { %v2215_v63 = vsel %vm235_vm1, %v2213_v17, %v2214_v35 }
 0x33c   :  { %v7615_v18 = vpack.i.bf16 %v2215_v63, %v2163_v44 }
 0x33d   :  { %7586 = vrot.lane.b32.xlu1 %v7585_v38, %s8721_s13  ;;  %7576 = vrot.lane.b32.xlu0 %v7575_v56, %s8716_s16 }
 0x341   :  { %7591 = vrot.lane.b32.xlu1 %v7585_v38, %s8719_s23  ;;  %7596 = vrot.lane.b32.xlu0 %v7595_v5, %s8720_s26 }
 0x345   :  { %2488 = vrot.lane.b32.xlu1 %v10211_v10, %s8717_s17  ;;  %2530 = vrot.lane.b32.xlu0 %v2163_v44, %s8721_s13 }
 0x346   :  { %v7377_v47 = vpop.permute.xlu0 %7376 }
 0x347   :  { %v7379_v43 = vunpack.i.h.bf16 %v7377_v47  ;;  %v7378_v44 = vunpack.i.l.bf16 %v7377_v47 }
 0x349   :  { %7601 = vrot.lane.b32.xlu1 %v7600_v31, %s8715_s9  ;;  %7611 = vrot.lane.b32.xlu0 %v7610_v15, %s8718_s22  ;;  %v7387_v36 = vpop.permute.xlu1 %7386  ;;  %v7620_v31 = vpack.i.bf16 %v10240_v48, %v10233_v34 }
 0x34a   :  { %v7382_v38 = vpop.permute.xlu0 %7381  ;;  %v7389_v51 = vunpack.i.h.bf16 %v7387_v36  ;;  %v7388_v3 = vunpack.i.l.bf16 %v7387_v36 }
 0x34b   :  { %v7384_v56 = vunpack.i.h.bf16 %v7382_v38  ;;  %v7383_v5 = vunpack.i.l.bf16 %v7382_v38 }
 0x34d   :  { %7606 = vrot.lane.b32.xlu1 %v7605_v1, %s8716_s16  ;;  %7616 = vrot.lane.b32.xlu0 %v7615_v18, %s8719_s23  ;;  %v2549_v60 = vsel %vm663_vm3, %v9861_v27, %v7384_v56  ;;  %v2548_v17 = vsel %vm663_vm3, %v9868_v11, %v7383_v5  ;;  %v7392_v35 = vpop.permute.xlu1 %7391 }
 0x34e   :  { %v2563_v15 = vsel %vm678_vm4, %v2549_v60, %v7389_v51  ;;  %v2562_v36 = vsel %vm678_vm4, %v2548_v17, %v7388_v3  ;;  %v7394_v38 = vunpack.i.h.bf16 %v7392_v35  ;;  %v7393_v1 = vunpack.i.l.bf16 %v7392_v35  ;;  %v7397_v2 = vpop.permute.xlu0 %7396 }
 0x34f   :  { %v2576_v18 = vsel %vm693_vm5, %v2562_v36, %v7378_v44  ;;  %v2577_v27 = vsel %vm693_vm5, %v2563_v15, %v7379_v43  ;;  %v7399_v11 = vunpack.i.h.bf16 %v7397_v2  ;;  %v7398_v56 = vunpack.i.l.bf16 %v7397_v2 }
 0x350   :  { %v2592_v47 = vsel %vm710_vm6, %v2576_v18, %v7393_v1  ;;  %v2593_v60 = vsel %vm710_vm6, %v2577_v27, %v7394_v38 }
 0x351   :  { %7621 = vrot.lane.b32.xlu1 %v7620_v31, %s8720_s26  ;;  %2490 = vrot.lane.b32.xlu0 %v10220_v4, %s8717_s17  ;;  %v2608_v35 = vsel %vm727_vm7, %v2592_v47, %v7398_v56  ;;  %v2609_v43 = vsel %vm727_vm7, %v2593_v60, %v7399_v11 }
 0x353   :  { %v7402_v5 = vpop.permute.xlu1 %7401 }
 0x354   :  { %v7404_v51 = vunpack.i.h.bf16 %v7402_v5  ;;  %v7403_v3 = vunpack.i.l.bf16 %v7402_v5 }
 0x355   :  { %2532 = vrot.lane.b32.xlu1 %v2215_v63, %s8721_s13 }
 0x356   :  { %v7412_v17 = vpop.permute.xlu0 %7411  ;;  %v2624_v4 = vsel %vm744_vm8, %v2608_v35, %v7403_v3  ;;  %v2625_v2 = vsel %vm744_vm8, %v2609_v43, %v7404_v51 }
 0x357   :  { %v7414_v31 = vunpack.i.h.bf16 %v7412_v17  ;;  %v7413_v44 = vunpack.i.l.bf16 %v7412_v17  ;;  %v7407_v15 = vpop.permute.xlu1 %7406 }
 0x358   :  { %v7408_v63 = vunpack.i.l.bf16 %v7407_v15  ;;  %v7409_v11 = vunpack.i.h.bf16 %v7407_v15 }
 0x359   :  { %v2640_v1 = vsel %vm761_vm9, %v2624_v4, %v7413_v44  ;;  %v2641_v38 = vsel %vm761_vm9, %v2625_v2, %v7414_v31 }
 0x35a   :  { %v2656_v18 = vpack.c.bf16 %v2641_v38, %v2640_v1  ;;  %v7422_v27 = vpop.permute.xlu0 %7421  ;;  %v2578_v43 = vsel %vm693_vm5, %v2562_v36, %v7408_v63 }
 0x35b   :  { %v7417_v5 = vpop.permute.xlu1 %7416  ;;  %v7423_v56 = vunpack.i.l.bf16 %v7422_v27 }
 0x35c   :  { %v7418_v50 = vunpack.i.l.bf16 %v7417_v5  ;;  %2789 = vmatmul.mubr.bf16.vlgmr.msra.gmra.mrb[32].mxu0 %v2656_v18 }
 0x35d   :  { %6713 = vmatprep.mubr.msk.bf16.mxu0 %vm663_vm3, %v2659_v45 }
 0x35e   :  { %v2550_v47 = vsel %vm663_vm3, %v9915_v9, %v7418_v50  ;;  %v7427_v60 = vpop.permute.xlu0 %7426 }
 0x35f   :  { %v2564_v51 = vsel %vm678_vm4, %v2550_v47, %v7423_v56  ;;  %v7429_v3 = vunpack.i.h.bf16 %v7427_v60  ;;  %v7428_v17 = vunpack.i.l.bf16 %v7427_v60  ;;  %v7432_v35 = vpop.permute.xlu1 %7431 }
 0x360   :  { %v2579_v31 = vsel %vm693_vm5, %v2564_v51, %v7409_v11  ;;  %v7434_v44 = vunpack.i.h.bf16 %v7432_v35  ;;  %v7433_v4 = vunpack.i.l.bf16 %v7432_v35 }
 0x361   :  { %v2594_v32 = vsel %vm710_vm6, %v2578_v43, %v7428_v17  ;;  %v2595_v6 = vsel %vm710_vm6, %v2579_v31, %v7429_v3  ;;  %v7419_v31 = vunpack.i.h.bf16 %v7417_v5 }
 0x362   :  { %v7437_v45 = vpop.permute.xlu0 %7436  ;;  %v2610_v9 = vsel %vm727_vm7, %v2594_v32, %v7433_v4  ;;  %v2611_v50 = vsel %vm727_vm7, %v2595_v6, %v7434_v44 }
 0x363   :  { %v7439_v15 = vunpack.i.h.bf16 %v7437_v45  ;;  %v7438_v2 = vunpack.i.l.bf16 %v7437_v45  ;;  %v2551_v45 = vsel %vm663_vm3, %v9924_v42, %v7419_v31 }
 0x364   :  { %v7447_v1 = vpop.permute.xlu1 %7446 }
 0x365   :  { %v2626_v38 = vsel %vm744_vm8, %v2610_v9, %v7438_v2  ;;  %v2627_v36 = vsel %vm744_vm8, %v2611_v50, %v7439_v15  ;;  %v7449_v18 = vunpack.i.h.bf16 %v7447_v1  ;;  %v7448_v63 = vunpack.i.l.bf16 %v7447_v1 }
 0x366   :  { %v7442_v56 = vpop.permute.xlu0 %7441  ;;  %v7424_v2 = vunpack.i.h.bf16 %v7422_v27 }
 0x367   :  { %v2642_v11 = vsel %vm761_vm9, %v2626_v38, %v7448_v63  ;;  %v2643_v47 = vsel %vm761_vm9, %v2627_v36, %v7449_v18  ;;  %v7444_v4 = vunpack.i.h.bf16 %v7442_v56  ;;  %v7443_v15 = vunpack.i.l.bf16 %v7442_v56 }
 0x368   :  { %v2658_v60 = vpack.c.bf16 %v2643_v47, %v2642_v11  ;;  %v7457_v17 = vpop.permute.xlu1 %7456 }
 0x369   :  { %v7458_v43 = vunpack.i.l.bf16 %v7457_v17 }
 0x36a   :  { %2797 = vmatmul.mubr.bf16.gmra.mrb[36].mxu0 %v2658_v60  ;;  %v7452_v51 = vpop.permute.xlu0 %7451 }
 0x36b   :  { %6714 = vmatprep.mubr.msk.bf16.mxu0 %vm663_vm3, %v2661_v55  ;;  %v7453_v3 = vunpack.i.l.bf16 %v7452_v51 }
 0x36c   :  { %v7462_v32 = vpop.permute.xlu1 %7461 }
 0x36d   :  { %v2552_v35 = vsel %vm663_vm3, %v9965_v20, %v7453_v3  ;;  %v7464_v55 = vunpack.i.h.bf16 %v7462_v32  ;;  %v7463_v9 = vunpack.i.l.bf16 %v7462_v32  ;;  %v2565_v20 = vsel %vm678_vm4, %v2551_v45, %v7424_v2 }
 0x36e   :  { %v2566_v44 = vsel %vm678_vm4, %v2552_v35, %v7458_v43  ;;  %v7467_v6 = vpop.permute.xlu0 %7466  ;;  %v2580_v63 = vsel %vm693_vm5, %v2565_v20, %v7443_v15  ;;  %v12936_v32 = vpack.c.bf16 %v10032_v54, %v10039_v58 }
 0x36f   :  { %v2581_v62 = vsel %vm693_vm5, %v2566_v44, %v7444_v4  ;;  %v7469_v50 = vunpack.i.h.bf16 %v7467_v6  ;;  %v7468_v1 = vunpack.i.l.bf16 %v7467_v6  ;;  %v2596_v11 = vsel %vm710_vm6, %v2580_v63, %v7463_v9 }
 0x370   :  { %v2597_v5 = vsel %vm710_vm6, %v2581_v62, %v7464_v55  ;;  %v7454_v62 = vunpack.i.h.bf16 %v7452_v51 }
 0x371   :  { %v2612_v56 = vsel %vm727_vm7, %v2596_v11, %v7468_v1  ;;  %v2613_v27 = vsel %vm727_vm7, %v2597_v5, %v7469_v50  ;;  %v7459_v5 = vunpack.i.h.bf16 %v7457_v17 }
 0x372   :  { %v2553_v50 = vsel %vm663_vm3, %v9972_v29, %v7454_v62 }
 0x373   :  { %v2567_v51 = vsel %vm678_vm4, %v2553_v50, %v7459_v5 }
 0x37b   :  { %v7472_v38 = vpop.permute.xlu1 %7471 }
 0x37c   :  { %v7474_v36 = vunpack.i.h.bf16 %v7472_v38  ;;  %v7473_v18 = vunpack.i.l.bf16 %v7472_v38 }
 0x37e   :  { %v7482_v42 = vpop.permute.xlu0 %7481  ;;  %v2628_v3 = vsel %vm744_vm8, %v2612_v56, %v7473_v18  ;;  %v2629_v35 = vsel %vm744_vm8, %v2613_v27, %v7474_v36 }
 0x37f   :  { %v7484_v47 = vunpack.i.h.bf16 %v7482_v42  ;;  %v7483_v60 = vunpack.i.l.bf16 %v7482_v42  ;;  %v7477_v4 = vpop.permute.xlu1 %7476 }
 0x380   :  { %v7478_v1 = vunpack.i.l.bf16 %v7477_v4  ;;  %v7479_v18 = vunpack.i.h.bf16 %v7477_v4 }
 0x381   :  { %v2644_v43 = vsel %vm761_vm9, %v2628_v3, %v7483_v60  ;;  %v2645_v31 = vsel %vm761_vm9, %v2629_v35, %v7484_v47 }
 0x382   :  { %v2660_v44 = vpack.c.bf16 %v2645_v31, %v2644_v43  ;;  %v7487_v6 = vpop.permute.xlu0 %7486  ;;  %v2582_v42 = vsel %vm693_vm5, %v2567_v51, %v7478_v1 }
 0x383   :  { %v7492_v45 = vpop.permute.xlu1 %7491  ;;  %v7488_v54 = vunpack.i.l.bf16 %v7487_v6  ;;  %v7489_v56 = vunpack.i.h.bf16 %v7487_v6 }
 0x384   :  { %2805 = vmatmul.mubr.bf16.gmra.mrb[40].mxu0 %v2660_v44  ;;  %v7493_v27 = vunpack.i.l.bf16 %v7492_v45  ;;  %v7494_v35 = vunpack.i.h.bf16 %v7492_v45 }
 0x385   :  { %6715 = vmatprep.mubr.msk.bf16.mxu0 %vm663_vm3, %v12936_v32  ;;  %v2598_v17 = vsel %vm710_vm6, %v2582_v42, %v7488_v54 }
 0x386   :  { %v2614_v6 = vsel %vm727_vm7, %v2598_v17, %v7493_v27 }
 0x38b   :  { %v10333_v15 = vpop.permute.xlu0 %7496 }
 0x38c   :  { %v7498_v43 = vunpack.i.l.bf16 %v10333_v15 }
 0x38e   :  { %v2630_v1 = vsel %vm744_vm8, %v2614_v6, %v7498_v43 }
 0x38f   :  { %v7507_v2 = vpop.permute.xlu1 %7506  ;;  %v10335_v55 = vpop.permute.xlu0 %7501 }
 0x390   :  { %v7508_v9 = vunpack.i.l.bf16 %v7507_v2  ;;  %v7509_v31 = vunpack.i.h.bf16 %v7507_v2  ;;  %v7504_v43 = vunpack.i.h.bf16 %v10335_v55 }
 0x392   :  { %v2554_v63 = vsel %vm663_vm3, %v10018_v22, %v7508_v9  ;;  %v2555_v45 = vsel %vm663_vm3, %v10074_v37, %v7509_v31  ;;  %v12937_v37 = vpack.c.bf16 %v10155_v53, %v10108_v57 }
 0x393   :  { %v10339_v38 = vpop.permute.xlu1 %7516  ;;  %v7512_v20 = vpop.permute.xlu0 %7511 }
 0x394   :  { %v7513_v58 = vunpack.i.l.bf16 %v7512_v20  ;;  %v7518_v22 = vunpack.i.l.bf16 %v10339_v38  ;;  %v7514_v4 = vunpack.i.h.bf16 %v7512_v20 }
 0x396   :  { %v2568_v11 = vsel %vm678_vm4, %v2554_v63, %v7513_v58  ;;  %v2646_v2 = vsel %vm761_vm9, %v2630_v1, %v7518_v22  ;;  %v2569_v20 = vsel %vm678_vm4, %v2555_v45, %v7514_v4  ;;  %v7503_v58 = vunpack.i.l.bf16 %v10335_v55 }
 0x397   :  { %v2583_v29 = vsel %vm693_vm5, %v2568_v11, %v7479_v18  ;;  %v7522_v60 = vpop.permute.xlu1 %7521  ;;  %v7527_v3 = vpop.permute.xlu0 %7526 }
 0x398   :  { %v2599_v44 = vsel %vm710_vm6, %v2583_v29, %v7489_v56  ;;  %v7523_v51 = vunpack.i.l.bf16 %v7522_v60  ;;  %v7524_v31 = vunpack.i.h.bf16 %v7522_v60  ;;  %v7529_v45 = vunpack.i.h.bf16 %v7527_v3 }
 0x399   :  { %v2615_v32 = vsel %vm727_vm7, %v2599_v44, %v7494_v35 }
 0x39a   :  { %v2631_v50 = vsel %vm744_vm8, %v2615_v32, %v7474_v36  ;;  %v2584_v36 = vsel %vm693_vm5, %v2569_v20, %v7503_v58 }
 0x39b   :  { %v10353_v62 = vpop.permute.xlu1 %7531  ;;  %v7542_v9 = vpop.permute.xlu0 %7541  ;;  %v2647_v5 = vsel %vm761_vm9, %v2631_v50, %v7484_v47  ;;  %v7528_v47 = vunpack.i.l.bf16 %v7527_v3  ;;  %v2600_v29 = vsel %vm710_vm6, %v2584_v36, %v7523_v51 }
 0x39c   :  { %v2662_v54 = vpack.c.bf16 %v2647_v5, %v2646_v2  ;;  %v7544_v11 = vunpack.i.h.bf16 %v7542_v9  ;;  %v7543_v42 = vunpack.i.l.bf16 %v7542_v9  ;;  %v7519_v5 = vunpack.i.h.bf16 %v10339_v38 }
 0x39d   :  { %v2616_v6 = vsel %vm727_vm7, %v2600_v29, %v7528_v47 }
 0x39e   :  { %2813 = vmatmul.mubr.bf16.gmra.mrb[44].mxu0 %v2662_v54  ;;  %v2557_v22 = vsel %vm663_vm3, %v10114_v59, %v7544_v11  ;;  %v2556_v44 = vsel %vm663_vm3, %v10079_v16, %v7543_v42  ;;  %v7499_v59 = vunpack.i.h.bf16 %v10333_v15  ;;  %v7533_v54 = vunpack.i.l.bf16 %v10353_v62 }
 0x39f   :  { %v7537_v18 = vpop.permute.xlu1 %7536  ;;  %v10363_v63 = vpop.permute.xlu0 %7551  ;;  %6716 = vmatprep.mubr.msk.bf16.mxu0 %vm663_vm3, %v12937_v37 }
 0x3a0   :  { %v7539_v4 = vunpack.i.h.bf16 %v7537_v18  ;;  %v7538_v57 = vunpack.i.l.bf16 %v7537_v18  ;;  %v2632_v11 = vsel %vm744_vm8, %v2616_v6, %v7499_v59  ;;  %v7553_v42 = vunpack.i.l.bf16 %v10363_v63 }
 0x3a1   :  { %v2648_v29 = vsel %vm761_vm9, %v2632_v11, %v7519_v5 }
 0x3a2   :  { %v2586_v18 = vsel %vm693_vm5, %v2569_v20, %v7538_v57 }
 0x3a3   :  { %v7547_v56 = vpop.permute.xlu1 %7546  ;;  %v7557_v27 = vpop.permute.xlu0 %7556 }
 0x3a4   :  { %v7549_v17 = vunpack.i.h.bf16 %v7547_v56  ;;  %v7548_v35 = vunpack.i.l.bf16 %v7547_v56  ;;  %v7559_v50 = vunpack.i.h.bf16 %v7557_v27  ;;  %v7558_v1 = vunpack.i.l.bf16 %v7557_v27 }
 0x3a5   :  { %v7534_v27 = vunpack.i.h.bf16 %v10353_v62 }
 0x3a6   :  { %v2570_v53 = vsel %vm678_vm4, %v2556_v44, %v7548_v35  ;;  %v2571_v32 = vsel %vm678_vm4, %v2557_v22, %v7549_v17  ;;  %v2602_v15 = vsel %vm710_vm6, %v2586_v18, %v7558_v1 }
 0x3a7   :  { %v2585_v9 = vsel %vm693_vm5, %v2570_v53, %v7504_v43  ;;  %v7562_v55 = vpop.permute.xlu1 %7561  ;;  %v10380_v60 = vpop.permute.xlu0 %7566  ;;  %v2587_v16 = vsel %vm693_vm5, %v2571_v32, %v7539_v4  ;;  %v7554_v4 = vunpack.i.h.bf16 %v10363_v63 }
 0x3a8   :  { %v7563_v2 = vunpack.i.l.bf16 %v7562_v55  ;;  %v2601_v58 = vsel %vm710_vm6, %v2585_v9, %v7524_v31  ;;  %v7564_v51 = vunpack.i.h.bf16 %v7562_v55  ;;  %v2603_v3 = vsel %vm710_vm6, %v2587_v16, %v7559_v50 }
 0x3a9   :  { %v2617_v36 = vsel %vm727_vm7, %v2601_v58, %v7529_v45  ;;  %v7568_v20 = vunpack.i.l.bf16 %v10380_v60  ;;  %v12938_v50 = vpack.c.bf16 %v10175_v24, %v10172_v8  ;;  %v7569_v11 = vunpack.i.h.bf16 %v10380_v60 }
 0x3aa   :  { %v2633_v38 = vsel %vm744_vm8, %v2617_v36, %v7533_v54  ;;  %v2618_v56 = vsel %vm727_vm7, %v2602_v15, %v7563_v2  ;;  %v2619_v35 = vsel %vm727_vm7, %v2603_v3, %v7564_v51 }
 0x3ab   :  { %v7582_v37 = vpop.permute.xlu1 %7581  ;;  %v7572_v47 = vpop.permute.xlu0 %7571  ;;  %v2649_v17 = vsel %vm761_vm9, %v2633_v38, %v7553_v42  ;;  %v2634_v44 = vsel %vm744_vm8, %v2618_v56, %v7534_v27  ;;  %v2635_v1 = vsel %vm744_vm8, %v2619_v35, %v7568_v20 }
 0x3ac   :  { %v2664_v43 = vpack.c.bf16 %v2649_v17, %v2648_v29  ;;  %v7584_v62 = vunpack.i.h.bf16 %v7582_v37  ;;  %v7583_v6 = vunpack.i.l.bf16 %v7582_v37  ;;  %v7573_v9 = vunpack.i.l.bf16 %v7572_v47 }
 0x3ad   :  { %v2650_v59 = vsel %vm761_vm9, %v2634_v44, %v7554_v4  ;;  %v7574_v16 = vunpack.i.h.bf16 %v7572_v47  ;;  %v12939_v29 = vpack.c.bf16 %v10233_v34, %v10230_v23 }
 0x3ae   :  { %2821 = vmatmul.mubr.bf16.gmra.mrb[48].mxu0 %v2664_v43 }
 0x3af   :  { %v7587_v31 = vpop.permute.xlu1 %7586  ;;  %v7577_v22 = vpop.permute.xlu0 %7576  ;;  %6717 = vmatprep.mubr.msk.bf16.mxu0 %vm663_vm3, %v12938_v50 }
 0x3b0   :  { %v7588_v57 = vunpack.i.l.bf16 %v7587_v31  ;;  %v7579_v53 = vunpack.i.h.bf16 %v7577_v22  ;;  %v7578_v32 = vunpack.i.l.bf16 %v7577_v22  ;;  %v7589_v20 = vunpack.i.h.bf16 %v7587_v31 }
 0x3b1   :  { %v12940_v31 = vpack.c.bf16 %v10233_v34, %v10240_v48 }
 0x3b2   :  { %v2559_v55 = vsel %vm663_vm3, %v10158_v46, %v7579_v53  ;;  %v2558_v63 = vsel %vm663_vm3, %v10127_v49, %v7578_v32  ;;  %v2651_v45 = vsel %vm761_vm9, %v2635_v1, %v7588_v57 }
 0x3b3   :  { %v2573_v2 = vsel %vm678_vm4, %v2559_v55, %v7584_v62  ;;  %v2572_v5 = vsel %vm678_vm4, %v2558_v63, %v7583_v6  ;;  %v7592_v8 = vpop.permute.xlu1 %7591  ;;  %v7597_v24 = vpop.permute.xlu0 %7596  ;;  %v2666_v54 = vpack.c.bf16 %v2651_v45, %v2650_v59 }
 0x3b4   :  { %v7594_v58 = vunpack.i.h.bf16 %v7592_v8  ;;  %v7593_v18 = vunpack.i.l.bf16 %v7592_v8  ;;  %v2588_v51 = vsel %vm693_vm5, %v2572_v5, %v7573_v9  ;;  %v7599_v46 = vunpack.i.h.bf16 %v7597_v24 }
 0x3b5   :  { %v7598_v36 = vunpack.i.l.bf16 %v7597_v24  ;;  %v2589_v49 = vsel %vm693_vm5, %v2573_v2, %v7574_v16 }
 0x3b6   :  { %v2604_v42 = vsel %vm710_vm6, %v2588_v51, %v7593_v18  ;;  %v2605_v15 = vsel %vm710_vm6, %v2589_v49, %v7594_v58  ;;  %2829 = vmatmul.mubr.bf16.gmra.mrb[52].mxu0 %v2666_v54  ;;  %v8662_v49 = vld [vmem:[%s12915_s3 + $0x48] sm:$0xff]  }
 0x3b7   :  { %v2620_v3 = vsel %vm727_vm7, %v2604_v42, %v7598_v36  ;;  %v2489_v37 = vpop.permute.xlu1 %2488  ;;  %v2621_v47 = vsel %vm727_vm7, %v2605_v15, %v7599_v46  ;;  %v2531_v38 = vpop.permute.xlu0 %2530  ;;  %6718 = vmatprep.mubr.msk.bf16.mxu0 %vm663_vm3, %v12939_v29  ;;  %3697 = vmatpush1.bf16.msra.mxu1 %v8662_v49  ;;  %v8663_v42 = vld [vmem:[%s12915_s3 + $0x50] sm:$0xff]   ;;  %v8664_v15 = vld [vmem:[%s12915_s3 + $0x58] sm:$0xff]  }
 0x3b8   :  { %v2637_v56 = vsel %vm744_vm8, %v2621_v47, %v2489_v37  ;;  %v2636_v27 = vsel %vm744_vm8, %v2620_v3, %v7569_v11  ;;  %v12941_v11 = vmov 0   ;;  %v10464_v3 = vld [vmem:[%s12916_s2 + $0x1] ss:$0 sm:$0xff] }
 0x3b9   :  { %v2653_v60 = vsel %vm761_vm9, %v2637_v56, %v2531_v38  ;;  %v2652_v43 = vsel %vm761_vm9, %v2636_v27, %v7589_v20  ;;  %3698 = vmatprep.subr.bf16.mxu1 %v12941_v11 }
 0x3ba   :  { %v2668_v22 = vpack.c.bf16 %v2653_v60, %v2652_v43 }
 0x3bb   :  { %v7602_v17 = vpop.permute.xlu1 %7601  ;;  %v7612_v35 = vpop.permute.xlu0 %7611  ;;  %3699 = vmatpush1.bf16.msra.mxu1 %v8663_v42 }
 0x3bc   :  { %v7614_v32 = vunpack.i.h.bf16 %v7612_v35  ;;  %v7613_v62 = vunpack.i.l.bf16 %v7612_v35  ;;  %v7604_v23 = vunpack.i.h.bf16 %v7602_v17  ;;  %v7603_v6 = vunpack.i.l.bf16 %v7602_v17  ;;  %3700 = vmatprep.subr.bf16.mxu1 %v12941_v11  ;;  %v8666_v17 = vld [vmem:[%s12915_s3 + $0x68] sm:$0xff]  }
 0x3be   :  { %2837 = vmatmul.mubr.bf16.gmra.mrb[56].mxu0 %v2668_v22 }
 0x3bf   :  { %v7607_v44 = vpop.permute.xlu1 %7606  ;;  %v7617_v53 = vpop.permute.xlu0 %7616  ;;  %6719 = vmatprep.mubr.msk.bf16.mxu0 %vm663_vm3, %v12940_v31  ;;  %3701 = vmatpush1.bf16.msra.mxu1 %v8664_v15 }
 0x3c0   :  { %v7609_v4 = vunpack.i.h.bf16 %v7607_v44  ;;  %v7608_v57 = vunpack.i.l.bf16 %v7607_v44  ;;  %v7619_v63 = vunpack.i.h.bf16 %v7617_v53  ;;  %v7618_v59 = vunpack.i.l.bf16 %v7617_v53  ;;  %3702 = vmatprep.subr.bf16.mxu1 %v12941_v11 }
 0x3c2   :  { %v2561_v9 = vsel %vm663_vm3, %v10211_v10, %v7609_v4  ;;  %v2560_v50 = vsel %vm663_vm3, %v10193_v39, %v7608_v57 }
 0x3c3   :  { %v2574_v1 = vsel %vm678_vm4, %v2560_v50, %v7613_v62  ;;  %v2575_v55 = vsel %vm678_vm4, %v2561_v9, %v7614_v32  ;;  %v7622_v45 = vpop.permute.xlu1 %7621  ;;  %v2491_v39 = vpop.permute.xlu0 %2490  ;;  %v8667_v62 = vld [vmem:[%s12915_s3 + $0x70] sm:$0xff]  }
 0x3c4   :  { %v2591_v16 = vsel %vm693_vm5, %v2575_v55, %v7604_v23  ;;  %v7624_v34 = vunpack.i.h.bf16 %v7622_v45  ;;  %v7623_v48 = vunpack.i.l.bf16 %v7622_v45  ;;  %v2590_v2 = vsel %vm693_vm5, %v2574_v1, %v7603_v6 }
 0x3c5   :  { %v2607_v5 = vsel %vm710_vm6, %v2591_v16, %v7619_v63  ;;  %v2606_v10 = vsel %vm710_vm6, %v2590_v2, %v7618_v59 }
 0x3c6   :  { %v2623_v8 = vsel %vm727_vm7, %v2607_v5, %v7624_v34  ;;  %v2622_v24 = vsel %vm727_vm7, %v2606_v10, %v7623_v48  ;;  %v8668_v48 = vld [vmem:[%s12915_s3 + $0x78] sm:$0xff]  }
 0x3c7   :  { %v2638_v54 = vsel %vm744_vm8, %v2622_v24, %v2491_v39  ;;  %v2533_v58 = vpop.permute.xlu1 %2532  ;;  %v2639_v18 = vsel %vm744_vm8, %v2623_v8, %v2489_v37  ;;  %v8665_v37 = vld [vmem:[%s12915_s3 + $0x60] sm:$0xff]  }
 0x3c8   :  { %v2654_v51 = vsel %vm761_vm9, %v2638_v54, %v2533_v58  ;;  %v2655_v46 = vsel %vm761_vm9, %v2639_v18, %v2531_v38  ;;  %3703 = vmatpush1.bf16.msra.mxu1 %v8665_v37 }
 0x3c9   :  { %v2670_v36 = vpack.c.bf16 %v2655_v46, %v2654_v51  ;;  %3704 = vmatprep.subr.bf16.mxu1 %v12941_v11  ;;  %v8669_v51 = vld [vmem:[%s12915_s3 + $0x80] sm:$0xff]  }
 0x3cb   :  { %2845 = vmatmul.mubr.bf16.gmra.mrb[60].mxu0 %v2670_v36 }
 0x3cc   :  { %3705 = vmatpush1.bf16.msra.mxu1 %v8666_v17 }
 0x3cd   :  { %3706 = vmatprep.subr.bf16.mxu1 %v12941_v11 }
 0x3d0   :  { %3707 = vmatpush1.bf16.msra.mxu1 %v8667_v62 }
 0x3d1   :  { %3708 = vmatprep.subr.bf16.mxu1 %v12941_v11 }
 0x3d4   :  { %3709 = vmatpush1.bf16.msra.mxu1 %v8668_v48 }
 0x3d5   :  { %3710 = vmatprep.subr.bf16.mxu1 %v12941_v11 }
 0x3d8   :  { %3711 = vmatpush1.bf16.msra.mxu1 %v8669_v51 }
 0x3d9   :  { %3712 = vmatprep.subr.bf16.mxu1 %v12941_v11 }
 0x42f   :  { %v2790_v47 = vpop.f32.mrb[32].mxu0 }
 0x430   :  { %v2791_v38 = vadd.f32 %v10464_v3, %v2790_v47  ;;  %v2792_v56 = vpop.f32.mrb[33].mxu0  ;;  %v8670_v47 = vld [vmem:[%s12915_s3 + $0x88] sm:$0xff]  }
 0x431   :  { %v2793_v27 = vpop.f32.mrb[34].mxu0  ;;  %3713 = vmatpush1.bf16.msra.mxu1 %v8670_v47 }
 0x432   :  { %v2853_v20 = vmax.f32 %v2791_v38, 0.0  ;;  %v2794_v29 = vadd.f32 %v10464_v3, %v2793_v27  ;;  %v2795_v60 = vpop.f32.mrb[35].mxu0  ;;  %5576 = vmatprep.subr.bf16.mxu1 %v12941_v11 }
 0x434   :  { %v2907_v35 = vrot.slane %v2853_v20, 1  ;;  %v2939_v43 = vrot.slane %v2853_v20, 7  ;;  %v2971_v22 = vrot.slane %v2853_v20, 5  ;;  %v2854_v44 = vmax.f32 %v2794_v29, 0.0 }
 0x436   :  { %v10477_v4 = vsel %vm174_vm0, %v2907_v35, %v2939_v43  ;;  %v3019_v57 = vsel %vm174_vm0, %v2939_v43, %v2971_v22  ;;  %v2906_v53 = vrot.slane %v2854_v44, 1  ;;  %v2938_v32 = vrot.slane %v2854_v44, 7 }
 0x437   :  { %v3066_v31 = vrot.slane %v3019_v57, 1  ;;  %v2970_v23 = vrot.slane %v2854_v44, 5  ;;  %v3108_v6 = vrot.slane %v3019_v57, 2  ;;  %v3107_v50 = vrot.slane %v10477_v4, 2 }
 0x438   :  { %v10485_v9 = vsel %vm174_vm0, %v2906_v53, %v2938_v32  ;;  %v3065_v1 = vrot.slane %v10477_v4, 1 }
 0x439   :  { %v3018_v55 = vsel %vm174_vm0, %v2938_v32, %v2970_v23  ;;  %v7625_v63 = vpack.i.bf16 %v10485_v9, %v10477_v4  ;;  %v3104_v59 = vrot.slane %v10485_v9, 2  ;;  %v3062_v34 = vrot.slane %v10485_v9, 1 }
 0x43a   :  { %v3063_v45 = vrot.slane %v3018_v55, 1  ;;  %v3105_v16 = vrot.slane %v3018_v55, 2  ;;  %v3109_v5 = vsel %vm278_vm2, %v3107_v50, %v3108_v6  ;;  %v3067_v8 = vsel %vm235_vm1, %v3065_v1, %v3066_v31 }
 0x43b   :  { %7626 = vrot.lane.b32.xlu0 %v7625_v63, %s8715_s9 }
 0x43c   :  { %v3106_v2 = vsel %vm278_vm2, %v3104_v59, %v3105_v16  ;;  %v3064_v10 = vsel %vm235_vm1, %v3062_v34, %v3063_v45 }
 0x43d   :  { %v7635_v39 = vpack.i.bf16 %v3109_v5, %v3106_v2  ;;  %v7630_v24 = vpack.i.bf16 %v3067_v8, %v3064_v10  ;;  %v7640_v54 = vpack.i.bf16 %v3064_v10, %v3067_v8  ;;  %v7645_v58 = vpack.i.bf16 %v3106_v2, %v3109_v5  ;;  %v2798_v18 = vpop.f32.mrb[36].mxu0 }
 0x43e   :  { %v2799_v46 = vadd.f32 %v10464_v3, %v2798_v18  ;;  %v2800_v36 = vpop.f32.mrb[37].mxu0 }
 0x43f   :  { %7636 = vrot.lane.b32.xlu1 %v7635_v39, %s8718_s22  ;;  %7631 = vrot.lane.b32.xlu0 %v7630_v24, %s8716_s16  ;;  %v2801_v49 = vpop.f32.mrb[38].mxu0 }
 0x440   :  { %v2855_v42 = vmax.f32 %v2799_v46, 0.0  ;;  %v2802_v15 = vadd.f32 %v10464_v3, %v2801_v49  ;;  %v2803_v37 = vpop.f32.mrb[39].mxu0 }
 0x442   :  { %v2908_v38 = vrot.slane %v2855_v42, 1  ;;  %v2940_v56 = vrot.slane %v2855_v42, 7  ;;  %v2972_v27 = vrot.slane %v2855_v42, 5  ;;  %v2856_v20 = vmax.f32 %v2802_v15, 0.0 }
 0x443   :  { %7641 = vrot.lane.b32.xlu1 %v7640_v54, %s8719_s23  ;;  %7646 = vrot.lane.b32.xlu0 %v7645_v58, %s8720_s26 }
 0x444   :  { %v10518_v29 = vsel %vm174_vm0, %v2908_v38, %v2940_v56  ;;  %v3020_v60 = vsel %vm174_vm0, %v2940_v56, %v2972_v27  ;;  %v2909_v17 = vrot.slane %v2856_v20, 1  ;;  %v2941_v35 = vrot.slane %v2856_v20, 7 }
 0x445   :  { %v3069_v43 = vrot.slane %v3020_v60, 1  ;;  %v3111_v22 = vrot.slane %v3020_v60, 2  ;;  %v2973_v44 = vrot.slane %v2856_v20, 5  ;;  %v7650_v57 = vpack.i.bf16 %v10518_v29, %v10485_v9 }
 0x446   :  { %v10524_v53 = vsel %vm174_vm0, %v2909_v17, %v2941_v35  ;;  %v3110_v32 = vrot.slane %v10518_v29, 2  ;;  %v3068_v62 = vrot.slane %v10518_v29, 1 }
 0x447   :  { %v3021_v31 = vsel %vm174_vm0, %v2941_v35, %v2973_v44  ;;  %7651 = vrot.lane.b32.xlu1 %v7650_v57, %s8717_s17  ;;  %v3113_v23 = vrot.slane %v10524_v53, 2  ;;  %v3071_v6 = vrot.slane %v10524_v53, 1  ;;  %v7655_v16 = vpack.i.bf16 %v10524_v53, %v10518_v29 }
 0x448   :  { %v3072_v50 = vrot.slane %v3021_v31, 1  ;;  %v3114_v1 = vrot.slane %v3021_v31, 2  ;;  %v3112_v55 = vsel %vm278_vm2, %v3110_v32, %v3111_v22  ;;  %v3070_v63 = vsel %vm235_vm1, %v3068_v62, %v3069_v43 }
 0x449   :  { %v3597_v59 = vpack.c.bf16 %v3112_v55, %v3106_v2  ;;  %v7660_v45 = vpack.i.bf16 %v3070_v63, %v3064_v10 }
 0x44a   :  { %v10538_v34 = vsel %vm278_vm2, %v3113_v23, %v3114_v1  ;;  %v3073_v48 = vsel %vm235_vm1, %v3071_v6, %v3072_v50 }
 0x44b   :  { %6749 = vmatprep.mubr.msk.bf16.mxu1 %vm663_vm3, %v3597_v59  ;;  %7661 = vrot.lane.b32.xlu0 %v7660_v45, %s8721_s13  ;;  %v7670_v5 = vpack.i.bf16 %v10538_v34, %v3112_v55  ;;  %v7665_v8 = vpack.i.bf16 %v3073_v48, %v3070_v63 }
 0x44c   :  { %7656 = vrot.lane.b32.xlu1 %v7655_v16, %s8715_s9 }
 0x44f   :  { %7671 = vrot.lane.b32.xlu0 %v7670_v5, %s8718_s22 }
 0x450   :  { %7666 = vrot.lane.b32.xlu1 %v7665_v8, %s8716_s16 }
 0x453   :  { %7676 = vrot.lane.b32.xlu0 %v7665_v8, %s8719_s23 }
 0x454   :  { %7681 = vrot.lane.b32.xlu1 %v7670_v5, %s8720_s26 }
 0x457   :  { %v2806_v2 = vpop.f32.mrb[40].mxu0 }
 0x458   :  { %v2807_v10 = vadd.f32 %v10464_v3, %v2806_v2  ;;  %v2808_v39 = vpop.f32.mrb[41].mxu0 }
 0x459   :  { %v2809_v24 = vpop.f32.mrb[42].mxu0 }
 0x45a   :  { %v2857_v54 = vmax.f32 %v2807_v10, 0.0  ;;  %v2810_v58 = vadd.f32 %v10464_v3, %v2809_v24  ;;  %v2811_v18 = vpop.f32.mrb[43].mxu0 }
 0x45c   :  { %v2910_v51 = vrot.slane %v2857_v54, 1  ;;  %v2942_v46 = vrot.slane %v2857_v54, 7  ;;  %v2974_v36 = vrot.slane %v2857_v54, 5  ;;  %v2858_v49 = vmax.f32 %v2810_v58, 0.0 }
 0x45e   :  { %v10552_v42 = vsel %vm174_vm0, %v2910_v51, %v2942_v46  ;;  %v3022_v15 = vsel %vm174_vm0, %v2942_v46, %v2974_v36  ;;  %v2911_v37 = vrot.slane %v2858_v49, 1  ;;  %v2943_v47 = vrot.slane %v2858_v49, 7 }
 0x45f   :  { %v3075_v38 = vrot.slane %v3022_v15, 1  ;;  %v3117_v56 = vrot.slane %v3022_v15, 2  ;;  %v2975_v27 = vrot.slane %v2858_v49, 5  ;;  %v7685_v20 = vpack.i.bf16 %v10552_v42, %v10524_v53 }
 0x460   :  { %v10558_v60 = vsel %vm174_vm0, %v2911_v37, %v2943_v47  ;;  %v3074_v17 = vrot.slane %v10552_v42, 1  ;;  %v3116_v35 = vrot.slane %v10552_v42, 2 }
 0x461   :  { %v3023_v43 = vsel %vm174_vm0, %v2943_v47, %v2975_v27  ;;  %7686 = vrot.lane.b32.xlu0 %v7685_v20, %s8717_s17  ;;  %v3119_v22 = vrot.slane %v10558_v60, 2  ;;  %v3077_v44 = vrot.slane %v10558_v60, 1  ;;  %v7690_v6 = vpack.i.bf16 %v10558_v60, %v10552_v42 }
 0x462   :  { %v3078_v57 = vrot.slane %v3023_v43, 1  ;;  %v3120_v32 = vrot.slane %v3023_v43, 2  ;;  %v3076_v62 = vsel %vm235_vm1, %v3074_v17, %v3075_v38  ;;  %v10568_v31 = vsel %vm278_vm2, %v3116_v35, %v3117_v56 }
 0x463   :  { %v7695_v23 = vpack.i.bf16 %v3076_v62, %v3073_v48 }
 0x464   :  { %v10575_v1 = vsel %vm278_vm2, %v3119_v22, %v3120_v32  ;;  %v3079_v55 = vsel %vm235_vm1, %v3077_v44, %v3078_v57 }
 0x465   :  { %7696 = vrot.lane.b32.xlu1 %v7695_v23, %s8721_s13  ;;  %7691 = vrot.lane.b32.xlu0 %v7690_v6, %s8715_s9  ;;  %v7705_v63 = vpack.i.bf16 %v10575_v1, %v10568_v31  ;;  %v7700_v59 = vpack.i.bf16 %v3079_v55, %v3076_v62 }
 0x469   :  { %7706 = vrot.lane.b32.xlu1 %v7705_v63, %s8718_s22  ;;  %7701 = vrot.lane.b32.xlu0 %v7700_v59, %s8716_s16 }
 0x46d   :  { %7711 = vrot.lane.b32.xlu1 %v7700_v59, %s8719_s23  ;;  %7716 = vrot.lane.b32.xlu0 %v7705_v63, %s8720_s26 }
 0x471   :  { %v2814_v45 = vpop.f32.mrb[44].mxu0 }
 0x472   :  { %v2815_v16 = vadd.f32 %v10464_v3, %v2814_v45  ;;  %v2816_v48 = vpop.f32.mrb[45].mxu0 }
 0x473   :  { %v2817_v5 = vpop.f32.mrb[46].mxu0 }
 0x474   :  { %v2859_v8 = vmax.f32 %v2815_v16, 0.0  ;;  %v2818_v2 = vadd.f32 %v10464_v3, %v2817_v5  ;;  %v2819_v10 = vpop.f32.mrb[47].mxu0 }
 0x476   :  { %v2912_v39 = vrot.slane %v2859_v8, 1  ;;  %v2944_v24 = vrot.slane %v2859_v8, 7  ;;  %v2976_v54 = vrot.slane %v2859_v8, 5  ;;  %v2860_v58 = vmax.f32 %v2818_v2, 0.0 }
 0x478   :  { %v10589_v18 = vsel %vm174_vm0, %v2912_v39, %v2944_v24  ;;  %v3024_v51 = vsel %vm174_vm0, %v2944_v24, %v2976_v54  ;;  %v2913_v46 = vrot.slane %v2860_v58, 1  ;;  %v2945_v36 = vrot.slane %v2860_v58, 7 }
 0x479   :  { %v3081_v49 = vrot.slane %v3024_v51, 1  ;;  %v3123_v15 = vrot.slane %v3024_v51, 2  ;;  %v2977_v37 = vrot.slane %v2860_v58, 5  ;;  %v7720_v47 = vpack.i.bf16 %v10589_v18, %v10558_v60 }
 0x47a   :  { %v3009_v38 = vsel %vm174_vm0, %v2913_v46, %v2945_v36  ;;  %v3080_v56 = vrot.slane %v10589_v18, 1  ;;  %v3122_v27 = vrot.slane %v10589_v18, 2 }
 0x47b   :  { %v3025_v20 = vsel %vm174_vm0, %v2945_v36, %v2977_v37  ;;  %7721 = vrot.lane.b32.xlu1 %v7720_v47, %s8717_s17  ;;  %v3150_v17 = vrot.slane %v3009_v38, 1  ;;  %v3156_v35 = vrot.slane %v3009_v38, 2  ;;  %v7725_v62 = vpack.i.bf16 %v3009_v38, %v10589_v18 }
 0x47c   :  { %v3151_v43 = vrot.slane %v3025_v20, 1  ;;  %v3157_v22 = vrot.slane %v3025_v20, 2  ;;  %v10600_v44 = vsel %vm235_vm1, %v3080_v56, %v3081_v49  ;;  %v10603_v57 = vsel %vm278_vm2, %v3122_v27, %v3123_v15 }
 0x47d   :  { %v7730_v32 = vpack.i.bf16 %v10600_v44, %v3079_v55 }
 0x47e   :  { %v10610_v6 = vsel %vm235_vm1, %v3150_v17, %v3151_v43  ;;  %v10613_v63 = vsel %vm278_vm2, %v3156_v35, %v3157_v22 }
 0x47f   :  { %7731 = vrot.lane.b32.xlu0 %v7730_v32, %s8721_s13  ;;  %7726 = vrot.lane.b32.xlu1 %v7725_v62, %s8715_s9  ;;  %v7735_v59 = vpack.i.bf16 %v10610_v6, %v10600_v44  ;;  %v7740_v55 = vpack.i.bf16 %v10613_v63, %v10603_v57 }
 0x481   :  { %v2822_v16 = vpop.f32.mrb[48].mxu0 }
 0x482   :  { %v2823_v48 = vadd.f32 %v10464_v3, %v2822_v16  ;;  %v2824_v5 = vpop.f32.mrb[49].mxu0 }
 0x483   :  { %v2825_v8 = vpop.f32.mrb[50].mxu0  ;;  %7736 = vrot.lane.b32.xlu0 %v7735_v59, %s8719_s23  ;;  %7741 = vrot.lane.b32.xlu1 %v7740_v55, %s8720_s26 }
 0x484   :  { %v2861_v2 = vmax.f32 %v2823_v48, 0.0  ;;  %v2826_v10 = vadd.f32 %v10464_v3, %v2825_v8  ;;  %v2827_v39 = vpop.f32.mrb[51].mxu0 }
 0x486   :  { %v2915_v24 = vrot.slane %v2861_v2, 1  ;;  %v2947_v54 = vrot.slane %v2861_v2, 7  ;;  %v2979_v58 = vrot.slane %v2861_v2, 5  ;;  %v2862_v51 = vmax.f32 %v2826_v10, 0.0 }
 0x488   :  { %v10628_v46 = vsel %vm174_vm0, %v2915_v24, %v2947_v54  ;;  %v3027_v36 = vsel %vm174_vm0, %v2947_v54, %v2979_v58  ;;  %v2914_v49 = vrot.slane %v2862_v51, 1  ;;  %v2946_v15 = vrot.slane %v2862_v51, 7 }
 0x489   :  { %v3087_v37 = vrot.slane %v3027_v36, 1  ;;  %v2978_v47 = vrot.slane %v2862_v51, 5  ;;  %v2830_v56 = vpop.f32.mrb[52].mxu0  ;;  %v3129_v27 = vrot.slane %v3027_v36, 2  ;;  %v3086_v43 = vrot.slane %v10628_v46, 1 }
 0x48a   :  { %v10632_v20 = vsel %vm174_vm0, %v2914_v49, %v2946_v15  ;;  %v2831_v17 = vadd.f32 %v10464_v3, %v2830_v56  ;;  %v2832_v35 = vpop.f32.mrb[53].mxu0  ;;  %v3128_v55 = vrot.slane %v10628_v46, 2 }
 0x48b   :  { %v3026_v22 = vsel %vm174_vm0, %v2946_v15, %v2978_v47  ;;  %v2833_v32 = vpop.f32.mrb[54].mxu0  ;;  %v7745_v62 = vpack.i.bf16 %v10632_v20, %v3009_v38  ;;  %v3083_v59 = vrot.slane %v10632_v20, 1  ;;  %v3125_v10 = vrot.slane %v10632_v20, 2 }
 0x48c   :  { %v3084_v16 = vrot.slane %v3026_v22, 1  ;;  %v3126_v48 = vrot.slane %v3026_v22, 2  ;;  %v2863_v5 = vmax.f32 %v2831_v17, 0.0  ;;  %v2834_v8 = vadd.f32 %v10464_v3, %v2833_v32  ;;  %v2835_v2 = vpop.f32.mrb[55].mxu0 }
 0x48d   :  { %7746 = vrot.lane.b32.xlu0 %v7745_v62, %s8717_s17  ;;  %v7750_v51 = vpack.i.bf16 %v10632_v20, %v10628_v46  ;;  %v3088_v49 = vsel %vm235_vm1, %v3086_v43, %v3087_v37  ;;  %v10652_v17 = vsel %vm278_vm2, %v3128_v55, %v3129_v27 }
 0x48e   :  { %v2916_v39 = vrot.slane %v2863_v5, 1  ;;  %v2948_v24 = vrot.slane %v2863_v5, 7  ;;  %v2980_v54 = vrot.slane %v2863_v5, 5  ;;  %v2864_v58 = vmax.f32 %v2834_v8, 0.0 }
 0x48f   :  { %v3085_v38 = vsel %vm235_vm1, %v3083_v59, %v3084_v16  ;;  %v10647_v36 = vsel %vm278_vm2, %v3125_v10, %v3126_v48 }
 0x490   :  { %v3028_v15 = vsel %vm174_vm0, %v2948_v24, %v2980_v54  ;;  %v2917_v47 = vrot.slane %v2864_v58, 1  ;;  %v2949_v56 = vrot.slane %v2864_v58, 7  ;;  %v10655_v35 = vsel %vm174_vm0, %v2916_v39, %v2948_v24 }
 0x491   :  { %v3090_v22 = vrot.slane %v3028_v15, 1  ;;  %v2981_v32 = vrot.slane %v2864_v58, 5  ;;  %v7755_v62 = vpack.i.bf16 %v3085_v38, %v10600_v44  ;;  %v2838_v59 = vpop.f32.mrb[56].mxu0  ;;  %7751 = vrot.lane.b32.xlu0 %v7750_v51, %s8715_s9  ;;  %v7765_v48 = vpack.i.bf16 %v3085_v38, %v10610_v6 }
 0x492   :  { %v10660_v16 = vsel %vm174_vm0, %v2917_v47, %v2949_v56  ;;  %v2839_v37 = vadd.f32 %v10464_v3, %v2838_v59  ;;  %v2840_v43 = vpop.f32.mrb[57].mxu0  ;;  %v7760_v27 = vpack.i.bf16 %v10647_v36, %v10603_v57  ;;  %v3132_v55 = vrot.slane %v3028_v15, 2 }
 0x493   :  { %v3029_v5 = vsel %vm174_vm0, %v2949_v56, %v2981_v32  ;;  %7756 = vrot.lane.b32.xlu1 %v7755_v62, %s8716_s16  ;;  %v2841_v44 = vpop.f32.mrb[58].mxu0  ;;  %v7770_v8 = vpack.i.bf16 %v3085_v38, %v3088_v49  ;;  %v7775_v2 = vpack.i.bf16 %v10647_v36, %v10652_v17  ;;  %v3089_v6 = vrot.slane %v10655_v35, 1 }
 0x494   :  { %v3093_v10 = vrot.slane %v3029_v5, 1  ;;  %v2865_v39 = vmax.f32 %v2839_v37, 0.0  ;;  %v2842_v24 = vadd.f32 %v10464_v3, %v2841_v44  ;;  %v2843_v54 = vpop.f32.mrb[59].mxu0  ;;  %v3135_v58 = vrot.slane %v3029_v5, 2 }
 0x495   :  { %7761 = vrot.lane.b32.xlu0 %v7760_v27, %s8718_s22  ;;  %v3092_v51 = vrot.slane %v10660_v16, 1  ;;  %v3131_v15 = vrot.slane %v10655_v35, 2  ;;  %v3091_v62 = vsel %vm235_vm1, %v3089_v6, %v3090_v22  ;;  %v3134_v43 = vrot.slane %v10660_v16, 2 }
 0x496   :  { %v2918_v47 = vrot.slane %v2865_v39, 1  ;;  %v2950_v56 = vrot.slane %v2865_v39, 7  ;;  %v2982_v38 = vrot.slane %v2865_v39, 5  ;;  %v2866_v32 = vmax.f32 %v2842_v24, 0.0 }
 0x497   :  { %7766 = vrot.lane.b32.xlu1 %v7765_v48, %s8721_s13  ;;  %v10678_v59 = vsel %vm235_vm1, %v3092_v51, %v3093_v10  ;;  %v10681_v37 = vsel %vm278_vm2, %v3131_v15, %v3132_v55  ;;  %v7780_v22 = vpack.i.bf16 %v10660_v16, %v10655_v35  ;;  %v7790_v48 = vpack.i.bf16 %v3091_v62, %v3088_v49 }
 0x498   :  { %v10685_v27 = vsel %vm174_vm0, %v2918_v47, %v2950_v56  ;;  %v3030_v5 = vsel %vm174_vm0, %v2950_v56, %v2982_v38  ;;  %v2919_v44 = vrot.slane %v2866_v32, 1  ;;  %v2951_v39 = vrot.slane %v2866_v32, 7 }
 0x499   :  { %v3138_v24 = vrot.slane %v3030_v5, 2  ;;  %v2983_v54 = vrot.slane %v2866_v32, 5  ;;  %7776 = vrot.lane.b32.xlu0 %v7775_v2, %s8720_s26  ;;  %v7800_v10 = vpack.i.bf16 %v10678_v59, %v3091_v62  ;;  %v7795_v6 = vpack.i.bf16 %v10681_v37, %v10652_v17 }
 0x49a   :  { %v10692_v55 = vsel %vm174_vm0, %v2919_v44, %v2951_v39  ;;  %v3096_v51 = vrot.slane %v3030_v5, 1  ;;  %v10700_v47 = vsel %vm278_vm2, %v3134_v43, %v3135_v58  ;;  %v3137_v2 = vrot.slane %v10685_v27, 2 }
 0x49b   :  { %v3031_v15 = vsel %vm174_vm0, %v2951_v39, %v2983_v54  ;;  %7771 = vrot.lane.b32.xlu1 %v7770_v8, %s8719_s23  ;;  %v7810_v32 = vpack.i.bf16 %v10700_v47, %v10681_v37  ;;  %v3095_v8 = vrot.slane %v10685_v27, 1  ;;  %v3098_v58 = vrot.slane %v10692_v55, 1 }
 0x49c   :  { %v3099_v56 = vrot.slane %v3031_v15, 1  ;;  %v3141_v49 = vrot.slane %v3031_v15, 2  ;;  %v10708_v5 = vsel %vm278_vm2, %v3137_v2, %v3138_v24  ;;  %v3140_v39 = vrot.slane %v10692_v55, 2 }
 0x49d   :  { %7791 = vrot.lane.b32.xlu0 %v7790_v48, %s8716_s16  ;;  %v7830_v44 = vpack.i.bf16 %v10708_v5, %v10700_v47 }
 0x49e   :  { %v2846_v38 = vpop.f32.mrb[60].mxu0  ;;  %v10728_v54 = vsel %vm278_vm2, %v3140_v39, %v3141_v49 }
 0x49f   :  { %v2847_v17 = vadd.f32 %v10464_v3, %v2846_v38  ;;  %v2848_v62 = vpop.f32.mrb[61].mxu0  ;;  %7781 = vrot.lane.b32.xlu1 %v7780_v22, %s8717_s17  ;;  %v3097_v38 = vsel %vm235_vm1, %v3095_v8, %v3096_v51 }
 0x4a0   :  { %v2849_v43 = vpop.f32.mrb[62].mxu0  ;;  %v10723_v62 = vsel %vm235_vm1, %v3098_v58, %v3099_v56  ;;  %v7825_v23 = vpack.i.bf16 %v3097_v38, %v10678_v59 }
 0x4a1   :  { %v2867_v24 = vmax.f32 %v2847_v17, 0.0  ;;  %v2850_v15 = vadd.f32 %v10464_v3, %v2849_v43  ;;  %v2851_v2 = vpop.f32.mrb[63].mxu0  ;;  %v7835_v45 = vpack.i.bf16 %v10723_v62, %v3097_v38  ;;  %7801 = vrot.lane.b32.xlu0 %v7800_v10, %s8721_s13  ;;  %v7845_v3 = vpack.i.bf16 %v10728_v54, %v10708_v5 }
 0x4a3   :  { %v2920_v50 = vrot.slane %v2867_v24, 1  ;;  %v2952_v48 = vrot.slane %v2867_v24, 7  ;;  %v2984_v52 = vrot.slane %v2867_v24, 5  ;;  %v2868_v28 = vmax.f32 %v2850_v15, 0.0  ;;  %7786 = vrot.lane.b32.xlu1 %v7780_v22, %s8715_s9 }
 0x4a5   :  { %v2921_v51 = vrot.slane %v2868_v28, 1  ;;  %v2953_v17 = vrot.slane %v2868_v28, 7  ;;  %v2985_v56 = vrot.slane %v2868_v28, 5  ;;  %v10735_v8 = vsel %vm174_vm0, %v2920_v50, %v2952_v48  ;;  %7806 = vrot.lane.b32.xlu0 %v7800_v10, %s8719_s23 }
 0x4a6   :  { %v3143_v59 = vrot.slane %v10735_v8, 2  ;;  %v3032_v49 = vsel %vm174_vm0, %v2952_v48, %v2984_v52  ;;  %v3101_v58 = vrot.slane %v10735_v8, 1  ;;  %v7815_v52 = vpack.i.bf16 %v10692_v55, %v10685_v27 }
 0x4a7   :  { %v10741_v43 = vsel %vm174_vm0, %v2921_v51, %v2953_v17  ;;  %v3033_v39 = vsel %vm174_vm0, %v2953_v17, %v2985_v56  ;;  %v3102_v24 = vrot.slane %v3032_v49, 1  ;;  %v3144_v28 = vrot.slane %v3032_v49, 2  ;;  %7796 = vrot.lane.b32.xlu1 %v7795_v6, %s8718_s22 }
 0x4a8   :  { %v3154_v15 = vrot.slane %v3033_v39, 1  ;;  %v3160_v22 = vrot.slane %v3033_v39, 2  ;;  %v3153_v50 = vrot.slane %v10741_v43, 1  ;;  %v3159_v38 = vrot.slane %v10741_v43, 2 }
 0x4a9   :  { %v10750_v48 = vsel %vm235_vm1, %v3101_v58, %v3102_v24  ;;  %v10753_v2 = vsel %vm278_vm2, %v3143_v59, %v3144_v28  ;;  %7816 = vrot.lane.b32.xlu0 %v7815_v52, %s8717_s17 }
 0x4aa   :  { %v10757_v10 = vsel %vm235_vm1, %v3153_v50, %v3154_v15  ;;  %v7855_v51 = vpack.i.bf16 %v10750_v48, %v10723_v62  ;;  %v7860_v6 = vpack.i.bf16 %v10753_v2, %v10728_v54  ;;  %v10769_v59 = vsel %vm278_vm2, %v3159_v38, %v3160_v22 }
 0x4ab   :  { %v7865_v56 = vpack.i.bf16 %v10757_v10, %v10750_v48  ;;  %v7870_v49 = vpack.i.bf16 %v10769_v59, %v10753_v2  ;;  %7811 = vrot.lane.b32.xlu1 %v7810_v32, %s8720_s26 }
 0x4ad   :  { %v7627_v58 = vpop.permute.xlu0 %7626  ;;  %7821 = vrot.lane.b32.xlu0 %v7815_v52, %s8715_s9 }
 0x4ae   :  { %v7629_v17 = vunpack.i.h.bf16 %v7627_v58  ;;  %v7628_v30 = vunpack.i.l.bf16 %v7627_v58 }
 0x4af   :  { %7831 = vrot.lane.b32.xlu1 %v7830_v44, %s8718_s22 }
 0x4b1   :  { %v7637_v39 = vpop.permute.xlu1 %7636  ;;  %v7632_v24 = vpop.permute.xlu0 %7631  ;;  %7826 = vrot.lane.b32.xlu0 %v7825_v23, %s8716_s16 }
 0x4b2   :  { %v7634_v28 = vunpack.i.h.bf16 %v7632_v24  ;;  %v7633_v15 = vunpack.i.l.bf16 %v7632_v24  ;;  %v7639_v22 = vunpack.i.h.bf16 %v7637_v39  ;;  %v7638_v50 = vunpack.i.l.bf16 %v7637_v39 }
 0x4b3   :  { %7836 = vrot.lane.b32.xlu1 %v7835_v45, %s8721_s13 }
 0x4b4   :  { %v3489_v38 = vsel %vm663_vm3, %v10477_v4, %v7634_v28  ;;  %v3488_v62 = vsel %vm663_vm3, %v10485_v9, %v7633_v15 }
 0x4b5   :  { %v7642_v32 = vpop.permute.xlu1 %7641  ;;  %v3503_v52 = vsel %vm678_vm4, %v3489_v38, %v7639_v22  ;;  %v3502_v44 = vsel %vm678_vm4, %v3488_v62, %v7638_v50  ;;  %7846 = vrot.lane.b32.xlu0 %v7845_v3, %s8720_s26  ;;  %v7647_v39 = vpop.permute.xlu0 %7646 }
 0x4b6   :  { %v7644_v23 = vunpack.i.h.bf16 %v7642_v32  ;;  %v7643_v24 = vunpack.i.l.bf16 %v7642_v32  ;;  %v3516_v4 = vsel %vm693_vm5, %v3502_v44, %v7628_v30  ;;  %v3517_v9 = vsel %vm693_vm5, %v3503_v52, %v7629_v17 }
 0x4b7   :  { %7841 = vrot.lane.b32.xlu1 %v7835_v45, %s8719_s23  ;;  %v7649_v15 = vunpack.i.h.bf16 %v7647_v39  ;;  %v7648_v61 = vunpack.i.l.bf16 %v7647_v39  ;;  %v7850_v30 = vpack.i.bf16 %v10741_v43, %v10735_v8 }
 0x4b8   :  { %v3532_v62 = vsel %vm710_vm6, %v3516_v4, %v7643_v24  ;;  %v3533_v58 = vsel %vm710_vm6, %v3517_v9, %v7644_v23 }
 0x4b9   :  { %v7652_v28 = vpop.permute.xlu1 %7651  ;;  %3470 = vrot.lane.b32.xlu0 %v10750_v48, %s8721_s13  ;;  %v3548_v17 = vsel %vm727_vm7, %v3532_v62, %v7648_v61  ;;  %v3549_v50 = vsel %vm727_vm7, %v3533_v58, %v7649_v15 }
 0x4ba   :  { %v7654_v3 = vunpack.i.h.bf16 %v7652_v28  ;;  %v7653_v22 = vunpack.i.l.bf16 %v7652_v28 }
 0x4bb   :  { %3428 = vrot.lane.b32.xlu1 %v10735_v8, %s8717_s17 }
 0x4bc   :  { %v3564_v52 = vsel %vm744_vm8, %v3548_v17, %v7653_v22  ;;  %v3565_v23 = vsel %vm744_vm8, %v3549_v50, %v7654_v3 }
 0x4bd   :  { %v7662_v45 = vpop.permute.xlu0 %7661  ;;  %7861 = vrot.lane.b32.xlu0 %v7860_v6, %s8718_s22  ;;  %v12942_v6 = vpack.c.bf16 %v10568_v31, %v10538_v34 }
 0x4be   :  { %v7664_v38 = vunpack.i.h.bf16 %v7662_v45  ;;  %v7663_v32 = vunpack.i.l.bf16 %v7662_v45  ;;  %v7657_v48 = vpop.permute.xlu1 %7656 }
 0x4bf   :  { %7851 = vrot.lane.b32.xlu1 %v7850_v30, %s8715_s9  ;;  %v7659_v34 = vunpack.i.h.bf16 %v7657_v48  ;;  %v7658_v31 = vunpack.i.l.bf16 %v7657_v48 }
 0x4c0   :  { %v3580_v24 = vsel %vm761_vm9, %v3564_v52, %v7663_v32  ;;  %v3581_v39 = vsel %vm761_vm9, %v3565_v23, %v7664_v38 }
 0x4c1   :  { %v3596_v4 = vpack.c.bf16 %v3581_v39, %v3580_v24  ;;  %7866 = vrot.lane.b32.xlu0 %v7865_v56, %s8719_s23  ;;  %v7672_v9 = vpop.permute.xlu0 %7671 }
 0x4c2   :  { %v7667_v61 = vpop.permute.xlu1 %7666  ;;  %v7673_v56 = vunpack.i.l.bf16 %v7672_v9 }
 0x4c3   :  { %3729 = vmatmul.mubr.bf16.vlgmr.msra.gmra.mrb[32].mxu1 %v3596_v4  ;;  %7856 = vrot.lane.b32.xlu1 %v7855_v51, %s8716_s16  ;;  %v7668_v28 = vunpack.i.l.bf16 %v7667_v61 }
 0x4c4   :  { %6750 = vmatprep.mubr.msk.bf16.mxu1 %vm663_vm3, %v12942_v6 }
 0x4c5   :  { %3430 = vrot.lane.b32.xlu0 %v10741_v43, %s8717_s17  ;;  %v3490_v15 = vsel %vm663_vm3, %v10518_v29, %v7668_v28  ;;  %v7677_v51 = vpop.permute.xlu0 %7676 }
 0x4c6   :  { %v3504_v62 = vsel %vm678_vm4, %v3490_v15, %v7673_v56  ;;  %v7679_v58 = vunpack.i.h.bf16 %v7677_v51  ;;  %v7678_v3 = vunpack.i.l.bf16 %v7677_v51  ;;  %v7682_v22 = vpop.permute.xlu1 %7681  ;;  %v12943_v56 = vpack.c.bf16 %v10603_v57, %v10575_v1 }
 0x4c7   :  { %7871 = vrot.lane.b32.xlu1 %v7870_v49, %s8720_s26  ;;  %v3519_v43 = vsel %vm693_vm5, %v3504_v62, %v7659_v34  ;;  %v3518_v49 = vsel %vm693_vm5, %v3502_v44, %v7658_v31  ;;  %v7684_v30 = vunpack.i.h.bf16 %v7682_v22  ;;  %v7683_v17 = vunpack.i.l.bf16 %v7682_v22 }
 0x4c8   :  { %v3534_v29 = vsel %vm710_vm6, %v3518_v49, %v7678_v3  ;;  %v3535_v50 = vsel %vm710_vm6, %v3519_v43, %v7679_v58  ;;  %v7669_v31 = vunpack.i.h.bf16 %v7667_v61 }
 0x4c9   :  { %v3550_v52 = vsel %vm727_vm7, %v3534_v29, %v7683_v17  ;;  %v3551_v48 = vsel %vm727_vm7, %v3535_v50, %v7684_v30  ;;  %v7674_v17 = vunpack.i.h.bf16 %v7672_v9 }
 0x4cb   :  { %3472 = vrot.lane.b32.xlu1 %v10757_v10, %s8721_s13 }
 0x4d3   :  { %v7687_v45 = vpop.permute.xlu0 %7686 }
 0x4d4   :  { %v7689_v10 = vunpack.i.h.bf16 %v7687_v45  ;;  %v7688_v38 = vunpack.i.l.bf16 %v7687_v45  ;;  %v3491_v45 = vsel %vm663_vm3, %v10524_v53, %v7669_v31 }
 0x4d5   :  { %v3505_v61 = vsel %vm678_vm4, %v3491_v45, %v7674_v17 }
 0x4d6   :  { %v3566_v39 = vsel %vm744_vm8, %v3550_v52, %v7688_v38  ;;  %v3567_v4 = vsel %vm744_vm8, %v3551_v48, %v7689_v10 }
 0x4d7   :  { %v7697_v32 = vpop.permute.xlu1 %7696  ;;  %v7692_v28 = vpop.permute.xlu0 %7691 }
 0x4d8   :  { %v7699_v23 = vunpack.i.h.bf16 %v7697_v32  ;;  %v7698_v24 = vunpack.i.l.bf16 %v7697_v32  ;;  %v7694_v49 = vunpack.i.h.bf16 %v7692_v28  ;;  %v7693_v30 = vunpack.i.l.bf16 %v7692_v28 }
 0x4da   :  { %v3582_v44 = vsel %vm761_vm9, %v3566_v39, %v7698_v24  ;;  %v3583_v6 = vsel %vm761_vm9, %v3567_v4, %v7699_v23 }
 0x4db   :  { %v3598_v15 = vpack.c.bf16 %v3583_v6, %v3582_v44  ;;  %v7702_v51 = vpop.permute.xlu0 %7701  ;;  %v7707_v62 = vpop.permute.xlu1 %7706 }
 0x4dc   :  { %v7703_v34 = vunpack.i.l.bf16 %v7702_v51  ;;  %v7708_v3 = vunpack.i.l.bf16 %v7707_v62  ;;  %v7704_v45 = vunpack.i.h.bf16 %v7702_v51 }
 0x4dd   :  { %3737 = vmatmul.mubr.bf16.gmra.mrb[36].mxu1 %v3598_v15 }
 0x4de   :  { %6751 = vmatprep.mubr.msk.bf16.mxu1 %vm663_vm3, %v12943_v56  ;;  %v3492_v58 = vsel %vm663_vm3, %v10552_v42, %v7703_v34  ;;  %v3520_v42 = vsel %vm693_vm5, %v3505_v61, %v7693_v30  ;;  %v3493_v17 = vsel %vm663_vm3, %v10558_v60, %v7704_v45 }
 0x4df   :  { %v7712_v22 = vpop.permute.xlu1 %7711  ;;  %v3506_v43 = vsel %vm678_vm4, %v3492_v58, %v7708_v3  ;;  %v7717_v50 = vpop.permute.xlu0 %7716  ;;  %v12944_v58 = vpack.c.bf16 %v10603_v57, %v10613_v63 }
 0x4e0   :  { %v7714_v1 = vunpack.i.h.bf16 %v7712_v22  ;;  %v7713_v29 = vunpack.i.l.bf16 %v7712_v22  ;;  %v3521_v10 = vsel %vm693_vm5, %v3506_v43, %v7694_v49  ;;  %v7719_v32 = vunpack.i.h.bf16 %v7717_v50 }
 0x4e1   :  { %v7718_v52 = vunpack.i.l.bf16 %v7717_v50  ;;  %v7709_v50 = vunpack.i.h.bf16 %v7707_v62 }
 0x4e2   :  { %v3536_v48 = vsel %vm710_vm6, %v3520_v42, %v7713_v29  ;;  %v3537_v23 = vsel %vm710_vm6, %v3521_v10, %v7714_v1 }
 0x4e3   :  { %v3552_v9 = vsel %vm727_vm7, %v3536_v48, %v7718_v52  ;;  %v3553_v4 = vsel %vm727_vm7, %v3537_v23, %v7719_v32  ;;  %v3507_v57 = vsel %vm678_vm4, %v3493_v17, %v7709_v50 }
 0x4ed   :  { %v7722_v38 = vpop.permute.xlu1 %7721 }
 0x4ee   :  { %v7724_v53 = vunpack.i.h.bf16 %v7722_v38  ;;  %v7723_v24 = vunpack.i.l.bf16 %v7722_v38 }
 0x4f0   :  { %v3568_v28 = vsel %vm744_vm8, %v3552_v9, %v7723_v24  ;;  %v3569_v15 = vsel %vm744_vm8, %v3553_v4, %v7724_v53 }
 0x4f1   :  { %v7732_v39 = vpop.permute.xlu0 %7731  ;;  %v7727_v3 = vpop.permute.xlu1 %7726 }
 0x4f2   :  { %v7734_v44 = vunpack.i.h.bf16 %v7732_v39  ;;  %v7733_v6 = vunpack.i.l.bf16 %v7732_v39  ;;  %v7728_v1 = vunpack.i.l.bf16 %v7727_v3  ;;  %v7729_v42 = vunpack.i.h.bf16 %v7727_v3 }
 0x4f4   :  { %v3584_v56 = vsel %vm761_vm9, %v3568_v28, %v7733_v6  ;;  %v3585_v34 = vsel %vm761_vm9, %v3569_v15, %v7734_v44  ;;  %v3522_v32 = vsel %vm693_vm5, %v3507_v57, %v7728_v1 }
 0x4f5   :  { %v3600_v31 = vpack.c.bf16 %v3585_v34, %v3584_v56  ;;  %v7737_v22 = vpop.permute.xlu0 %7736  ;;  %v7742_v49 = vpop.permute.xlu1 %7741 }
 0x4f6   :  { %v7738_v10 = vunpack.i.l.bf16 %v7737_v22  ;;  %v7743_v52 = vunpack.i.l.bf16 %v7742_v49  ;;  %v7739_v23 = vunpack.i.h.bf16 %v7737_v22  ;;  %v7744_v39 = vunpack.i.h.bf16 %v7742_v49 }
 0x4f7   :  { %3745 = vmatmul.mubr.bf16.gmra.mrb[40].mxu1 %v3600_v31 }
 0x4f8   :  { %6752 = vmatprep.mubr.msk.bf16.mxu1 %vm663_vm3, %v12944_v58  ;;  %v3538_v60 = vsel %vm710_vm6, %v3522_v32, %v7738_v10 }
 0x4f9   :  { %v3554_v15 = vsel %vm727_vm7, %v3538_v60, %v7743_v52 }
 0x4ff   :  { %v10854_v43 = vpop.permute.xlu0 %7746 }
 0x500   :  { %v7748_v62 = vunpack.i.l.bf16 %v10854_v43 }
 0x502   :  { %v3570_v58 = vsel %vm744_vm8, %v3554_v15, %v7748_v62 }
 0x503   :  { %v10856_v30 = vpop.permute.xlu0 %7751 }
 0x504   :  { %v7753_v10 = vunpack.i.l.bf16 %v10856_v30  ;;  %v7754_v60 = vunpack.i.h.bf16 %v10856_v30 }
 0x505   :  { %v7757_v29 = vpop.permute.xlu1 %7756 }
 0x506   :  { %v7758_v61 = vunpack.i.l.bf16 %v7757_v29 }
 0x507   :  { %v7762_v38 = vpop.permute.xlu0 %7761 }
 0x508   :  { %v7763_v63 = vunpack.i.l.bf16 %v7762_v38  ;;  %v3494_v51 = vsel %vm663_vm3, %v10589_v18, %v7758_v61  ;;  %v7759_v18 = vunpack.i.h.bf16 %v7757_v29  ;;  %v7764_v31 = vunpack.i.h.bf16 %v7762_v38 }
 0x509   :  { %v10864_v48 = vpop.permute.xlu1 %7766 }
 0x50a   :  { %v3508_v24 = vsel %vm678_vm4, %v3494_v51, %v7763_v63  ;;  %v7768_v9 = vunpack.i.l.bf16 %v10864_v48  ;;  %v3495_v1 = vsel %vm663_vm3, %v10632_v20, %v7759_v18 }
 0x50b   :  { %v3523_v4 = vsel %vm693_vm5, %v3508_v24, %v7729_v42  ;;  %v7777_v6 = vpop.permute.xlu0 %7776  ;;  %v3509_v29 = vsel %vm678_vm4, %v3495_v1, %v7764_v31  ;;  %v7769_v1 = vunpack.i.h.bf16 %v10864_v48 }
 0x50c   :  { %v3539_v28 = vsel %vm710_vm6, %v3523_v4, %v7739_v23  ;;  %v3586_v45 = vsel %vm761_vm9, %v3570_v58, %v7768_v9  ;;  %v7778_v63 = vunpack.i.l.bf16 %v7777_v6  ;;  %v7749_v23 = vunpack.i.h.bf16 %v10854_v43 }
 0x50d   :  { %v7772_v56 = vpop.permute.xlu1 %7771  ;;  %v3555_v34 = vsel %vm727_vm7, %v3539_v28, %v7744_v39  ;;  %v7779_v30 = vunpack.i.h.bf16 %v7777_v6 }
 0x50e   :  { %v3571_v3 = vsel %vm744_vm8, %v3555_v34, %v7724_v53  ;;  %v12945_v53 = vpack.c.bf16 %v10681_v37, %v10647_v36  ;;  %v7773_v38 = vunpack.i.l.bf16 %v7772_v56  ;;  %v7774_v36 = vunpack.i.h.bf16 %v7772_v56 }
 0x50f   :  { %v7792_v22 = vpop.permute.xlu0 %7791  ;;  %v3587_v49 = vsel %vm761_vm9, %v3571_v3, %v7734_v44  ;;  %v3524_v44 = vsel %vm693_vm5, %v3509_v29, %v7753_v10 }
 0x510   :  { %v3602_v17 = vpack.c.bf16 %v3587_v49, %v3586_v45  ;;  %v7794_v20 = vunpack.i.h.bf16 %v7792_v22  ;;  %v7793_v42 = vunpack.i.l.bf16 %v7792_v22  ;;  %v3540_v52 = vsel %vm710_vm6, %v3524_v44, %v7773_v38 }
 0x511   :  { %v10880_v50 = vpop.permute.xlu1 %7781  ;;  %v3556_v37 = vsel %vm727_vm7, %v3540_v52, %v7778_v63 }
 0x512   :  { %3753 = vmatmul.mubr.bf16.gmra.mrb[44].mxu1 %v3602_v17  ;;  %v3497_v39 = vsel %vm663_vm3, %v10655_v35, %v7794_v20  ;;  %v3496_v9 = vsel %vm663_vm3, %v10628_v46, %v7793_v42  ;;  %v7783_v46 = vunpack.i.l.bf16 %v10880_v50  ;;  %v3572_v17 = vsel %vm744_vm8, %v3556_v37, %v7749_v23 }
 0x513   :  { %v10884_v61 = vpop.permute.xlu0 %7801  ;;  %6753 = vmatprep.mubr.msk.bf16.mxu1 %vm663_vm3, %v12945_v53  ;;  %v3588_v42 = vsel %vm761_vm9, %v3572_v17, %v7769_v1  ;;  %v7784_v48 = vunpack.i.h.bf16 %v10880_v50  ;;  %v12946_v50 = vpack.c.bf16 %v10708_v5, %v10700_v47 }
 0x514   :  { %v7803_v10 = vunpack.i.l.bf16 %v10884_v61 }
 0x515   :  { %v7787_v57 = vpop.permute.xlu1 %7786 }
 0x516   :  { %v7789_v28 = vunpack.i.h.bf16 %v7787_v57  ;;  %v7788_v15 = vunpack.i.l.bf16 %v7787_v57 }
 0x517   :  { %v7807_v32 = vpop.permute.xlu0 %7806 }
 0x518   :  { %v7809_v56 = vunpack.i.h.bf16 %v7807_v32  ;;  %v7808_v31 = vunpack.i.l.bf16 %v7807_v32  ;;  %v3526_v6 = vsel %vm693_vm5, %v3509_v29, %v7788_v15 }
 0x519   :  { %v7797_v51 = vpop.permute.xlu1 %7796 }
 0x51a   :  { %v7799_v62 = vunpack.i.h.bf16 %v7797_v51  ;;  %v7798_v24 = vunpack.i.l.bf16 %v7797_v51  ;;  %v3542_v38 = vsel %vm710_vm6, %v3526_v6, %v7808_v31 }
 0x51b   :  { %v10899_v4 = vpop.permute.xlu0 %7816 }
 0x51c   :  { %v3510_v18 = vsel %vm678_vm4, %v3496_v9, %v7798_v24  ;;  %v3511_v43 = vsel %vm678_vm4, %v3497_v39, %v7799_v62  ;;  %v7818_v29 = vunpack.i.l.bf16 %v10899_v4  ;;  %v7804_v24 = vunpack.i.h.bf16 %v10884_v61 }
 0x51d   :  { %v3525_v34 = vsel %vm693_vm5, %v3510_v18, %v7754_v60  ;;  %v7812_v58 = vpop.permute.xlu1 %7811  ;;  %v3527_v3 = vsel %vm693_vm5, %v3511_v43, %v7789_v28  ;;  %v7819_v17 = vunpack.i.h.bf16 %v10899_v4 }
 0x51e   :  { %v7813_v35 = vunpack.i.l.bf16 %v7812_v58  ;;  %v3541_v22 = vsel %vm710_vm6, %v3525_v34, %v7774_v36  ;;  %v7814_v53 = vunpack.i.h.bf16 %v7812_v58  ;;  %v3543_v44 = vsel %vm710_vm6, %v3527_v3, %v7809_v56 }
 0x51f   :  { %v7822_v45 = vpop.permute.xlu0 %7821  ;;  %v3557_v49 = vsel %vm727_vm7, %v3541_v22, %v7779_v30 }
 0x520   :  { %v3573_v63 = vsel %vm744_vm8, %v3557_v49, %v7783_v46  ;;  %v3558_v20 = vsel %vm727_vm7, %v3542_v38, %v7813_v35  ;;  %v3559_v23 = vsel %vm727_vm7, %v3543_v44, %v7814_v53  ;;  %v7823_v28 = vunpack.i.l.bf16 %v7822_v45 }
 0x521   :  { %v7832_v57 = vpop.permute.xlu1 %7831  ;;  %v3589_v32 = vsel %vm761_vm9, %v3573_v63, %v7803_v10  ;;  %v3574_v9 = vsel %vm744_vm8, %v3558_v20, %v7784_v48  ;;  %v7824_v61 = vunpack.i.h.bf16 %v7822_v45  ;;  %v3575_v31 = vsel %vm744_vm8, %v3559_v23, %v7818_v29 }
 0x522   :  { %v3604_v52 = vpack.c.bf16 %v3589_v32, %v3588_v42  ;;  %v7834_v36 = vunpack.i.h.bf16 %v7832_v57  ;;  %v7833_v37 = vunpack.i.l.bf16 %v7832_v57  ;;  %v3590_v47 = vsel %vm761_vm9, %v3574_v9, %v7804_v24 }
 0x523   :  { %v7827_v51 = vpop.permute.xlu0 %7826  ;;  %v12947_v63 = vpack.c.bf16 %v10753_v2, %v10728_v54 }
 0x524   :  { %v7829_v60 = vunpack.i.h.bf16 %v7827_v51  ;;  %v7828_v62 = vunpack.i.l.bf16 %v7827_v51  ;;  %3761 = vmatmul.mubr.bf16.gmra.mrb[48].mxu1 %v3604_v52 }
 0x525   :  { %v7837_v39 = vpop.permute.xlu1 %7836  ;;  %6754 = vmatprep.mubr.msk.bf16.mxu1 %vm663_vm3, %v12946_v50 }
 0x526   :  { %v7838_v15 = vunpack.i.l.bf16 %v7837_v39  ;;  %v3499_v18 = vsel %vm663_vm3, %v10685_v27, %v7829_v60  ;;  %v3498_v43 = vsel %vm663_vm3, %v10660_v16, %v7828_v62  ;;  %v7839_v44 = vunpack.i.h.bf16 %v7837_v39 }
 0x527   :  { %v3513_v30 = vsel %vm678_vm4, %v3499_v18, %v7834_v36  ;;  %v3512_v34 = vsel %vm678_vm4, %v3498_v43, %v7833_v37  ;;  %v7847_v56 = vpop.permute.xlu0 %7846  ;;  %v12948_v60 = vpack.c.bf16 %v10753_v2, %v10769_v59 }
 0x528   :  { %v3528_v58 = vsel %vm693_vm5, %v3512_v34, %v7823_v28  ;;  %v3591_v5 = vsel %vm761_vm9, %v3575_v31, %v7838_v15  ;;  %v7849_v35 = vunpack.i.h.bf16 %v7847_v56  ;;  %v7848_v27 = vunpack.i.l.bf16 %v7847_v56 }
 0x529   :  { %v7842_v3 = vpop.permute.xlu1 %7841  ;;  %v3606_v22 = vpack.c.bf16 %v3591_v5, %v3590_v47  ;;  %v3529_v16 = vsel %vm693_vm5, %v3513_v30, %v7824_v61 }
 0x52a   :  { %v7844_v46 = vunpack.i.h.bf16 %v7842_v3  ;;  %v7843_v45 = vunpack.i.l.bf16 %v7842_v3 }
 0x52b   :  { %v3471_v49 = vpop.permute.xlu0 %3470 }
 0x52c   :  { %v3544_v1 = vsel %vm710_vm6, %v3528_v58, %v7843_v45  ;;  %v3545_v6 = vsel %vm710_vm6, %v3529_v16, %v7844_v46  ;;  %3769 = vmatmul.mubr.bf16.gmra.mrb[52].mxu1 %v3606_v22  ;;  %v10974_v22 = vld [vmem:[%s12917_s4 + $0x1] ss:$0 sm:$0xff] }
 0x52d   :  { %v3560_v10 = vsel %vm727_vm7, %v3544_v1, %v7848_v27  ;;  %v3429_v53 = vpop.permute.xlu1 %3428  ;;  %v3561_v38 = vsel %vm727_vm7, %v3545_v6, %v7849_v35  ;;  %6755 = vmatprep.mubr.msk.bf16.mxu1 %vm663_vm3, %v12947_v63 }
 0x52e   :  { %v3577_v57 = vsel %vm744_vm8, %v3561_v38, %v3429_v53  ;;  %v3576_v4 = vsel %vm744_vm8, %v3560_v10, %v7819_v17 }
 0x52f   :  { %v3593_v20 = vsel %vm761_vm9, %v3577_v57, %v3471_v49  ;;  %v7862_v42 = vpop.permute.xlu0 %7861  ;;  %v3592_v32 = vsel %vm761_vm9, %v3576_v4, %v7839_v44 }
 0x530   :  { %v3608_v29 = vpack.c.bf16 %v3593_v20, %v3592_v32  ;;  %v7864_v62 = vunpack.i.h.bf16 %v7862_v42  ;;  %v7863_v24 = vunpack.i.l.bf16 %v7862_v42 }
 0x531   :  { %v7852_v48 = vpop.permute.xlu1 %7851 }
 0x532   :  { %v7854_v36 = vunpack.i.h.bf16 %v7852_v48  ;;  %v7853_v37 = vunpack.i.l.bf16 %v7852_v48 }
 0x533   :  { %v7867_v54 = vpop.permute.xlu0 %7866 }
 0x534   :  { %3777 = vmatmul.mubr.bf16.gmra.mrb[56].mxu1 %v3608_v29  ;;  %v7869_v50 = vunpack.i.h.bf16 %v7867_v54  ;;  %v7868_v18 = vunpack.i.l.bf16 %v7867_v54 }
 0x535   :  { %v7857_v52 = vpop.permute.xlu1 %7856  ;;  %6756 = vmatprep.mubr.msk.bf16.mxu1 %vm663_vm3, %v12948_v60 }
 0x536   :  { %v7859_v51 = vunpack.i.h.bf16 %v7857_v52  ;;  %v7858_v23 = vunpack.i.l.bf16 %v7857_v52 }
 0x538   :  { %v3501_v39 = vsel %vm663_vm3, %v10735_v8, %v7859_v51  ;;  %v3500_v9 = vsel %vm663_vm3, %v10692_v55, %v7858_v23  ;;  %v3431_v55 = vpop.permute.xlu0 %3430 }
 0x539   :  { %v3514_v28 = vsel %vm678_vm4, %v3500_v9, %v7863_v24  ;;  %v3515_v15 = vsel %vm678_vm4, %v3501_v39, %v7864_v62  ;;  %v7872_v2 = vpop.permute.xlu1 %7871 }
 0x53a   :  { %v3531_v59 = vsel %vm693_vm5, %v3515_v15, %v7854_v36  ;;  %v7874_v43 = vunpack.i.h.bf16 %v7872_v2  ;;  %v7873_v61 = vunpack.i.l.bf16 %v7872_v2  ;;  %v3530_v30 = vsel %vm693_vm5, %v3514_v28, %v7853_v37  ;;  %v8673_v36 = vld [vmem:[%s12914_s1 + $0xa0] sm:$0xff]   ;;  %v8674_v2 = vld [vmem:[%s12914_s1 + $0xa8] sm:$0xff]  }
 0x53b   :  { %v3547_v34 = vsel %vm710_vm6, %v3531_v59, %v7869_v50  ;;  %v3546_v8 = vsel %vm710_vm6, %v3530_v30, %v7868_v18  ;;  %v8676_v30 = vld [vmem:[%s12914_s1 + $0xb8] sm:$0xff]  }
 0x53c   :  { %v3563_v56 = vsel %vm727_vm7, %v3547_v34, %v7874_v43  ;;  %v3562_v31 = vsel %vm727_vm7, %v3546_v8, %v7873_v61  ;;  %v8675_v61 = vld [vmem:[%s12914_s1 + $0xb0] sm:$0xff]  }
 0x53d   :  { %v3578_v58 = vsel %vm744_vm8, %v3562_v31, %v3431_v55  ;;  %v3473_v47 = vpop.permute.xlu1 %3472  ;;  %v3579_v5 = vsel %vm744_vm8, %v3563_v56, %v3429_v53  ;;  %v8677_v55 = vld [vmem:[%s12914_s1 + $0xc0] sm:$0xff]  }
 0x53e   :  { %v3594_v3 = vsel %vm761_vm9, %v3578_v58, %v3473_v47  ;;  %v3595_v35 = vsel %vm761_vm9, %v3579_v5, %v3471_v49  ;;  %v8671_v49 = vld [vmem:[%s12914_s1 + $0x90] sm:$0xff]  }
 0x53f   :  { %v3610_v27 = vpack.c.bf16 %v3595_v35, %v3594_v3  ;;  %4637 = vmatpush1.bf16.msra.mxu0 %v8671_v49 }
 0x540   :  { %4638 = vmatprep.subr.bf16.mxu0 %v12941_v11 }
 0x541   :  { %3785 = vmatmul.mubr.bf16.gmra.mrb[60].mxu1 %v3610_v27 }
 0x596   :  { %v3730_v16 = vpop.f32.mrb[32].mxu1 }
 0x597   :  { %v3731_v46 = vadd.f32 %v10974_v22, %v3730_v16  ;;  %v3732_v45 = vpop.f32.mrb[33].mxu1 }
 0x598   :  { %v3733_v17 = vpop.f32.mrb[34].mxu1 }
 0x599   :  { %v10978_v1 = vadd.f32 %v3731_v46, %v9843_v7  ;;  %v3734_v6 = vadd.f32 %v10974_v22, %v3733_v17  ;;  %v3735_v10 = vpop.f32.mrb[35].mxu1  ;;  %v8678_v46 = vld [vmem:[%s12914_s1 + $0xc8] sm:$0xff]  }
 0x59b   :  { %v3847_v53 = vrot.slane %v10978_v1, 1  ;;  %v3879_v38 = vrot.slane %v10978_v1, 7  ;;  %v3911_v44 = vrot.slane %v10978_v1, 5  ;;  %v10988_v57 = vadd.f32 %v3734_v6, %v9852_v12  ;;  %v8672_v12 = vld [vmem:[%s12914_s1 + $0x98] sm:$0xff]  }
 0x59c   :  { %4639 = vmatpush1.bf16.msra.mxu0 %v8672_v12 }
 0x59d   :  { %v3846_v7 = vrot.slane %v10988_v57, 1  ;;  %v3878_v63 = vrot.slane %v10988_v57, 7  ;;  %v3910_v4 = vrot.slane %v10988_v57, 5  ;;  %v10994_v20 = vsel %vm174_vm0, %v3847_v53, %v3879_v38  ;;  %4640 = vmatprep.subr.bf16.mxu0 %v12941_v11 }
 0x59e   :  { %v3959_v42 = vsel %vm174_vm0, %v3879_v38, %v3911_v44  ;;  %v4047_v32 = vrot.slane %v10994_v20, 2  ;;  %v4005_v48 = vrot.slane %v10994_v20, 1 }
 0x59f   :  { %v3958_v29 = vsel %vm174_vm0, %v3878_v63, %v3910_v4  ;;  %v11005_v52 = vsel %vm174_vm0, %v3846_v7, %v3878_v63  ;;  %v4048_v51 = vrot.slane %v3959_v42, 2  ;;  %v4006_v23 = vrot.slane %v3959_v42, 1  ;;  %v8679_v63 = vld [vmem:[%s12914_s1 + $0xd0] sm:$0xff]  }
 0x5a0   :  { %v7875_v60 = vpack.i.bf16 %v11005_v52, %v10994_v20  ;;  %v4044_v54 = vrot.slane %v11005_v52, 2  ;;  %v4045_v62 = vrot.slane %v3958_v29, 2  ;;  %v4002_v24 = vrot.slane %v11005_v52, 1  ;;  %4641 = vmatpush1.bf16.msra.mxu0 %v8673_v36 }
 0x5a1   :  { %v4003_v37 = vrot.slane %v3958_v29, 1  ;;  %v4049_v9 = vsel %vm278_vm2, %v4047_v32, %v4048_v51  ;;  %v4007_v50 = vsel %vm235_vm1, %v4005_v48, %v4006_v23  ;;  %4642 = vmatprep.subr.bf16.mxu0 %v12941_v11 }
 0x5a2   :  { %7876 = vrot.lane.b32.xlu0 %v7875_v60, %s8715_s9  ;;  %v11017_v39 = vsel %vm278_vm2, %v4044_v54, %v4045_v62 }
 0x5a3   :  { %v7885_v28 = vpack.i.bf16 %v4049_v9, %v11017_v39  ;;  %v11022_v15 = vsel %vm235_vm1, %v4002_v24, %v4003_v37  ;;  %v7895_v43 = vpack.i.bf16 %v11017_v39, %v4049_v9 }
 0x5a4   :  { %v7880_v18 = vpack.i.bf16 %v4007_v50, %v11022_v15  ;;  %v7890_v59 = vpack.i.bf16 %v11022_v15, %v4007_v50  ;;  %4643 = vmatpush1.bf16.msra.mxu0 %v8674_v2 }
 0x5a5   :  { %7886 = vrot.lane.b32.xlu1 %v7885_v28, %s8718_s22  ;;  %4644 = vmatprep.subr.bf16.mxu0 %v12941_v11 }
 0x5a6   :  { %7881 = vrot.lane.b32.xlu0 %v7880_v18, %s8716_s16 }
 0x5a8   :  { %4645 = vmatpush1.bf16.msra.mxu0 %v8675_v61 }
 0x5a9   :  { %7891 = vrot.lane.b32.xlu1 %v7890_v59, %s8719_s23  ;;  %4646 = vmatprep.subr.bf16.mxu0 %v12941_v11 }
 0x5aa   :  { %7896 = vrot.lane.b32.xlu0 %v7895_v43, %s8720_s26 }
 0x5ac   :  { %4647 = vmatpush1.bf16.msra.mxu0 %v8676_v30 }
 0x5ad   :  { %4648 = vmatprep.subr.bf16.mxu0 %v12941_v11 }
 0x5b0   :  { %v3738_v34 = vpop.f32.mrb[36].mxu1  ;;  %4649 = vmatpush1.bf16.msra.mxu0 %v8677_v55 }
 0x5b1   :  { %v3739_v8 = vadd.f32 %v10974_v22, %v3738_v34  ;;  %v3740_v56 = vpop.f32.mrb[37].mxu1  ;;  %4650 = vmatprep.subr.bf16.mxu0 %v12941_v11 }
 0x5b2   :  { %v3741_v31 = vpop.f32.mrb[38].mxu1 }
 0x5b3   :  { %v11050_v58 = vadd.f32 %v3739_v8, %v9892_v25  ;;  %v3742_v47 = vadd.f32 %v10974_v22, %v3741_v31  ;;  %v3743_v5 = vpop.f32.mrb[39].mxu1 }
 0x5b4   :  { %4651 = vmatpush1.bf16.msra.mxu0 %v8678_v46 }
 0x5b5   :  { %v3848_v3 = vrot.slane %v11050_v58, 1  ;;  %v3880_v35 = vrot.slane %v11050_v58, 7  ;;  %v3912_v27 = vrot.slane %v11050_v58, 5  ;;  %v11057_v16 = vadd.f32 %v3742_v47, %v9906_v41  ;;  %4652 = vmatprep.subr.bf16.mxu0 %v12941_v11 }
 0x5b7   :  { %v3960_v25 = vsel %vm174_vm0, %v3880_v35, %v3912_v27  ;;  %v3849_v45 = vrot.slane %v11057_v16, 1  ;;  %v3881_v17 = vrot.slane %v11057_v16, 7  ;;  %v3913_v6 = vrot.slane %v11057_v16, 5 }
 0x5b8   :  { %v11068_v10 = vsel %vm174_vm0, %v3848_v3, %v3880_v35  ;;  %v4051_v41 = vrot.slane %v3960_v25, 2  ;;  %v4009_v49 = vrot.slane %v3960_v25, 1  ;;  %4653 = vmatpush1.bf16.msra.mxu0 %v8679_v63 }
 0x5b9   :  { %v3961_v53 = vsel %vm174_vm0, %v3881_v17, %v3913_v6  ;;  %v7900_v38 = vpack.i.bf16 %v11068_v10, %v11005_v52  ;;  %v4050_v44 = vrot.slane %v11068_v10, 2  ;;  %v4008_v7 = vrot.slane %v11068_v10, 1  ;;  %6514 = vmatprep.subr.bf16.mxu0 %v12941_v11 }
 0x5ba   :  { %v11079_v4 = vsel %vm174_vm0, %v3849_v45, %v3881_v17  ;;  %v4054_v42 = vrot.slane %v3961_v53, 2  ;;  %v4012_v32 = vrot.slane %v3961_v53, 1 }
 0x5bb   :  { %7901 = vrot.lane.b32.xlu1 %v7900_v38, %s8717_s17  ;;  %v4052_v48 = vsel %vm278_vm2, %v4050_v44, %v4051_v41  ;;  %v4010_v12 = vsel %vm235_vm1, %v4008_v7, %v4009_v49  ;;  %v4053_v29 = vrot.slane %v11079_v4, 2  ;;  %v4011_v60 = vrot.slane %v11079_v4, 1 }
 0x5bc   :  { %v4537_v51 = vpack.c.bf16 %v4052_v48, %v11017_v39  ;;  %v7910_v23 = vpack.i.bf16 %v4010_v12, %v11022_v15  ;;  %v7905_v54 = vpack.i.bf16 %v11079_v4, %v11068_v10 }
 0x5bd   :  { %v11092_v62 = vsel %vm278_vm2, %v4053_v29, %v4054_v42  ;;  %v4013_v24 = vsel %vm235_vm1, %v4011_v60, %v4012_v32 }
 0x5be   :  { %6786 = vmatprep.mubr.msk.bf16.mxu0 %vm663_vm3, %v4537_v51  ;;  %7911 = vrot.lane.b32.xlu0 %v7910_v23, %s8721_s13  ;;  %v7920_v36 = vpack.i.bf16 %v11092_v62, %v4052_v48  ;;  %v7915_v37 = vpack.i.bf16 %v4013_v24, %v4010_v12 }
 0x5bf   :  { %7906 = vrot.lane.b32.xlu1 %v7905_v54, %s8715_s9 }
 0x5c2   :  { %7921 = vrot.lane.b32.xlu0 %v7920_v36, %s8718_s22 }
 0x5c3   :  { %7916 = vrot.lane.b32.xlu1 %v7915_v37, %s8716_s16 }
 0x5c6   :  { %7926 = vrot.lane.b32.xlu0 %v7915_v37, %s8719_s23 }
 0x5c7   :  { %7931 = vrot.lane.b32.xlu1 %v7920_v36, %s8720_s26 }
 0x5ca   :  { %v3746_v39 = vpop.f32.mrb[40].mxu1 }
 0x5cb   :  { %v3747_v9 = vadd.f32 %v10974_v22, %v3746_v39  ;;  %v3748_v28 = vpop.f32.mrb[41].mxu1 }
 0x5cc   :  { %v3749_v15 = vpop.f32.mrb[42].mxu1 }
 0x5cd   :  { %v11106_v50 = vadd.f32 %v3747_v9, %v9945_v13  ;;  %v3750_v18 = vadd.f32 %v10974_v22, %v3749_v15  ;;  %v3751_v2 = vpop.f32.mrb[43].mxu1 }
 0x5cf   :  { %v3850_v59 = vrot.slane %v11106_v50, 1  ;;  %v3882_v43 = vrot.slane %v11106_v50, 7  ;;  %v3914_v61 = vrot.slane %v11106_v50, 5  ;;  %v11113_v30 = vadd.f32 %v3750_v18, %v9956_v26 }
 0x5d1   :  { %v3962_v34 = vsel %vm174_vm0, %v3882_v43, %v3914_v61  ;;  %v3851_v8 = vrot.slane %v11113_v30, 1  ;;  %v3883_v56 = vrot.slane %v11113_v30, 7  ;;  %v3915_v13 = vrot.slane %v11113_v30, 5 }
 0x5d2   :  { %v11120_v55 = vsel %vm174_vm0, %v3850_v59, %v3882_v43  ;;  %v4015_v31 = vrot.slane %v3962_v34, 1  ;;  %v4057_v47 = vrot.slane %v3962_v34, 2 }
 0x5d3   :  { %v3963_v5 = vsel %vm174_vm0, %v3883_v56, %v3915_v13  ;;  %v7935_v3 = vpack.i.bf16 %v11120_v55, %v11079_v4  ;;  %v4014_v26 = vrot.slane %v11120_v55, 1  ;;  %v11127_v35 = vsel %vm174_vm0, %v3851_v8, %v3883_v56 }
 0x5d4   :  { %v4056_v27 = vrot.slane %v11120_v55, 2  ;;  %v4059_v46 = vrot.slane %v11127_v35, 2  ;;  %v4060_v25 = vrot.slane %v3963_v5, 2  ;;  %v4017_v17 = vrot.slane %v11127_v35, 1 }
 0x5d5   :  { %7936 = vrot.lane.b32.xlu0 %v7935_v3, %s8717_s17  ;;  %v4016_v45 = vsel %vm235_vm1, %v4014_v26, %v4015_v31  ;;  %v4018_v6 = vrot.slane %v3963_v5, 1  ;;  %v7940_v53 = vpack.i.bf16 %v11127_v35, %v11120_v55 }
 0x5d6   :  { %v7945_v41 = vpack.i.bf16 %v4016_v45, %v4013_v24  ;;  %v11135_v49 = vsel %vm278_vm2, %v4056_v27, %v4057_v47  ;;  %v11140_v38 = vsel %vm278_vm2, %v4059_v46, %v4060_v25 }
 0x5d7   :  { %v4019_v7 = vsel %vm235_vm1, %v4017_v17, %v4018_v6  ;;  %v7955_v63 = vpack.i.bf16 %v11140_v38, %v11135_v49 }
 0x5d8   :  { %7946 = vrot.lane.b32.xlu1 %v7945_v41, %s8721_s13  ;;  %v7950_v42 = vpack.i.bf16 %v4019_v7, %v4016_v45 }
 0x5d9   :  { %7941 = vrot.lane.b32.xlu0 %v7940_v53, %s8715_s9 }
 0x5dc   :  { %7956 = vrot.lane.b32.xlu1 %v7955_v63, %s8718_s22 }
 0x5dd   :  { %7951 = vrot.lane.b32.xlu0 %v7950_v42, %s8716_s16 }
 0x5e0   :  { %7961 = vrot.lane.b32.xlu1 %v7950_v42, %s8719_s23 }
 0x5e1   :  { %7966 = vrot.lane.b32.xlu0 %v7955_v63, %s8720_s26 }
 0x5e5   :  { %v3754_v32 = vpop.f32.mrb[44].mxu1 }
 0x5e6   :  { %v3755_v48 = vadd.f32 %v10974_v22, %v3754_v32  ;;  %v3756_v12 = vpop.f32.mrb[45].mxu1 }
 0x5e7   :  { %v3757_v29 = vpop.f32.mrb[46].mxu1 }
 0x5e8   :  { %v11155_v51 = vadd.f32 %v3755_v48, %v10002_v19  ;;  %v3758_v23 = vadd.f32 %v10974_v22, %v3757_v29  ;;  %v3759_v60 = vpop.f32.mrb[47].mxu1 }
 0x5ea   :  { %v3852_v54 = vrot.slane %v11155_v51, 1  ;;  %v3884_v24 = vrot.slane %v11155_v51, 7  ;;  %v3916_v36 = vrot.slane %v11155_v51, 5  ;;  %v11162_v37 = vadd.f32 %v3758_v23, %v10011_v14 }
 0x5ec   :  { %v3964_v39 = vsel %vm174_vm0, %v3884_v24, %v3916_v36  ;;  %v3853_v9 = vrot.slane %v11162_v37, 1  ;;  %v3885_v28 = vrot.slane %v11162_v37, 7  ;;  %v3917_v19 = vrot.slane %v11162_v37, 5 }
 0x5ed   :  { %v11169_v15 = vsel %vm174_vm0, %v3852_v54, %v3884_v24  ;;  %v4021_v18 = vrot.slane %v3964_v39, 1  ;;  %v4063_v2 = vrot.slane %v3964_v39, 2 }
 0x5ee   :  { %v7970_v59 = vpack.i.bf16 %v11169_v15, %v11127_v35  ;;  %v4020_v43 = vrot.slane %v11169_v15, 1  ;;  %v3949_v14 = vsel %vm174_vm0, %v3853_v9, %v3885_v28  ;;  %v3965_v61 = vsel %vm174_vm0, %v3885_v28, %v3917_v19 }
 0x5ef   :  { %v4090_v34 = vrot.slane %v3949_v14, 1  ;;  %v4091_v8 = vrot.slane %v3965_v61, 1  ;;  %v4062_v56 = vrot.slane %v11169_v15, 2  ;;  %v4096_v31 = vrot.slane %v3949_v14, 2 }
 0x5f0   :  { %7971 = vrot.lane.b32.xlu1 %v7970_v59, %s8717_s17  ;;  %v11179_v13 = vsel %vm235_vm1, %v4020_v43, %v4021_v18  ;;  %v4097_v47 = vrot.slane %v3965_v61, 2  ;;  %v7975_v26 = vpack.i.bf16 %v3949_v14, %v11169_v15 }
 0x5f1   :  { %v7980_v5 = vpack.i.bf16 %v11179_v13, %v4019_v7  ;;  %v11183_v3 = vsel %vm278_vm2, %v4062_v56, %v4063_v2  ;;  %v11187_v27 = vsel %vm235_vm1, %v4090_v34, %v4091_v8 }
 0x5f2   :  { %v11190_v46 = vsel %vm278_vm2, %v4096_v31, %v4097_v47  ;;  %v7985_v17 = vpack.i.bf16 %v11187_v27, %v11179_v13 }
 0x5f3   :  { %7981 = vrot.lane.b32.xlu0 %v7980_v5, %s8721_s13  ;;  %v7990_v6 = vpack.i.bf16 %v11190_v46, %v11183_v3 }
 0x5f4   :  { %7976 = vrot.lane.b32.xlu1 %v7975_v26, %s8715_s9 }
 0x5f7   :  { %7986 = vrot.lane.b32.xlu0 %v7985_v17, %s8719_s23  ;;  %v3762_v41 = vpop.f32.mrb[48].mxu1 }
 0x5f8   :  { %7991 = vrot.lane.b32.xlu1 %v7990_v6, %s8720_s26  ;;  %v3763_v53 = vadd.f32 %v10974_v22, %v3762_v41  ;;  %v3764_v7 = vpop.f32.mrb[49].mxu1 }
 0x5f9   :  { %v3765_v63 = vpop.f32.mrb[50].mxu1 }
 0x5fa   :  { %v11206_v42 = vadd.f32 %v3763_v53, %v10055_v40  ;;  %v3766_v32 = vadd.f32 %v10974_v22, %v3765_v63  ;;  %v3767_v48 = vpop.f32.mrb[51].mxu1 }
 0x5fc   :  { %v11210_v12 = vadd.f32 %v3766_v32, %v10063_v33  ;;  %v3855_v29 = vrot.slane %v11206_v42, 1  ;;  %v3887_v23 = vrot.slane %v11206_v42, 7  ;;  %v3919_v36 = vrot.slane %v11206_v42, 5 }
 0x5fe   :  { %v3854_v60 = vrot.slane %v11210_v12, 1  ;;  %v3886_v54 = vrot.slane %v11210_v12, 7  ;;  %v3918_v24 = vrot.slane %v11210_v12, 5  ;;  %v11226_v43 = vsel %vm174_vm0, %v3855_v29, %v3887_v23 }
 0x5ff   :  { %v3770_v40 = vpop.f32.mrb[52].mxu1  ;;  %v4026_v53 = vrot.slane %v11226_v43, 1  ;;  %v4068_v7 = vrot.slane %v11226_v43, 2 }
 0x600   :  { %v3966_v39 = vsel %vm174_vm0, %v3886_v54, %v3918_v24  ;;  %v3771_v9 = vadd.f32 %v10974_v22, %v3770_v40  ;;  %v3772_v28 = vpop.f32.mrb[53].mxu1  ;;  %v11221_v33 = vsel %vm174_vm0, %v3854_v60, %v3886_v54 }
 0x601   :  { %v3773_v19 = vpop.f32.mrb[54].mxu1  ;;  %v7995_v18 = vpack.i.bf16 %v11221_v33, %v3949_v14  ;;  %v4023_v2 = vrot.slane %v11221_v33, 1  ;;  %v4024_v59 = vrot.slane %v3966_v39, 1  ;;  %v4065_v56 = vrot.slane %v11221_v33, 2  ;;  %v12950_v28 = vld [vmem:[#allocation2_spill] sm:$0xff] }
 0x602   :  { %v11229_v61 = vadd.f32 %v3771_v9, %v10084_v21  ;;  %v3774_v34 = vadd.f32 %v10974_v22, %v3773_v19  ;;  %v3775_v8 = vpop.f32.mrb[55].mxu1  ;;  %v4066_v31 = vrot.slane %v3966_v39, 2  ;;  %v3967_v14 = vsel %vm174_vm0, %v3887_v23, %v3919_v36 }
 0x603   :  { %7996 = vrot.lane.b32.xlu0 %v7995_v18, %s8717_s17  ;;  %v4025_v47 = vsel %vm235_vm1, %v4023_v2, %v4024_v59  ;;  %v8000_v41 = vpack.i.bf16 %v11221_v33, %v11226_v43  ;;  %v4027_v48 = vrot.slane %v3967_v14, 1  ;;  %v4069_v29 = vrot.slane %v3967_v14, 2 }
 0x604   :  { %v3856_v5 = vrot.slane %v11229_v61, 1  ;;  %v3888_v26 = vrot.slane %v11229_v61, 7  ;;  %v3920_v17 = vrot.slane %v11229_v61, 5  ;;  %v11240_v21 = vadd.f32 %v3774_v34, %v10097_v0 }
 0x605   :  { %v8005_v6 = vpack.i.bf16 %v4025_v47, %v11179_v13  ;;  %v11249_v32 = vsel %vm278_vm2, %v4065_v56, %v4066_v31  ;;  %v8015_v39 = vpack.i.bf16 %v4025_v47, %v11187_v27  ;;  %v4028_v2 = vsel %vm235_vm1, %v4026_v53, %v4027_v48 }
 0x606   :  { %12949 = vst [vmem:[#allocation6_spill] sm:$0xff] %v11240_v21  ;;  %v3968_v63 = vsel %vm174_vm0, %v3888_v26, %v3920_v17  ;;  %v3857_v23 = vrot.slane %v11240_v21, 1  ;;  %v3889_v0 = vrot.slane %v11240_v21, 7  ;;  %v3921_v13 = vrot.slane %v11240_v21, 5 }
 0x607   :  { %8006 = vrot.lane.b32.xlu1 %v8005_v6, %s8716_s16  ;;  %v3778_v60 = vpop.f32.mrb[56].mxu1  ;;  %8001 = vrot.lane.b32.xlu0 %v8000_v41, %s8715_s9  ;;  %v11257_v54 = vsel %vm174_vm0, %v3856_v5, %v3888_v26  ;;  %v8010_v9 = vpack.i.bf16 %v11249_v32, %v11183_v3  ;;  %v4030_v34 = vrot.slane %v3968_v63, 1  ;;  %v4070_v27 = vsel %vm278_vm2, %v4068_v7, %v4069_v29 }
 0x608   :  { %v3779_v24 = vadd.f32 %v10974_v22, %v3778_v60  ;;  %v3780_v36 = vpop.f32.mrb[57].mxu1  ;;  %v4029_v59 = vrot.slane %v11257_v54, 1  ;;  %v3969_v8 = vsel %vm174_vm0, %v3889_v0, %v3921_v13  ;;  %v11273_v56 = vsel %vm174_vm0, %v3857_v23, %v3889_v0  ;;  %v12952_v0 = vld [vmem:[#allocation3_spill] sm:$0xff] }
 0x609   :  { %v3781_v40 = vpop.f32.mrb[58].mxu1  ;;  %v8020_v17 = vpack.i.bf16 %v4025_v47, %v4028_v2  ;;  %v8025_v6 = vpack.i.bf16 %v11249_v32, %v4070_v27  ;;  %v4032_v53 = vrot.slane %v11273_v56, 1  ;;  %v4033_v48 = vrot.slane %v3969_v8, 1 }
 0x60a   :  { %v11264_v19 = vadd.f32 %v3779_v24, %v12950_v28  ;;  %v3783_v18 = vpop.f32.mrb[59].mxu1  ;;  %v3782_v26 = vadd.f32 %v10974_v22, %v3781_v40  ;;  %v4031_v41 = vsel %vm235_vm1, %v4029_v59, %v4030_v34  ;;  %v4071_v29 = vrot.slane %v11257_v54, 2 }
 0x60b   :  { %8016 = vrot.lane.b32.xlu1 %v8015_v39, %s8721_s13  ;;  %8011 = vrot.lane.b32.xlu0 %v8010_v9, %s8718_s22  ;;  %v4072_v23 = vrot.slane %v3968_v63, 2  ;;  %v8030_v60 = vpack.i.bf16 %v11273_v56, %v11257_v54  ;;  %v8040_v24 = vpack.i.bf16 %v4031_v41, %v4028_v2  ;;  %v11297_v36 = vsel %vm235_vm1, %v4032_v53, %v4033_v48 }
 0x60c   :  { %12951 = vst [vmem:[#allocation2_spill] sm:$0xff] %v11264_v19  ;;  %v3858_v31 = vrot.slane %v11264_v19, 1  ;;  %v3890_v14 = vrot.slane %v11264_v19, 7  ;;  %v3922_v5 = vrot.slane %v11264_v19, 5  ;;  %v11289_v13 = vadd.f32 %v3782_v26, %v12952_v0 }
 0x60d   :  { %v11306_v28 = vsel %vm278_vm2, %v4071_v29, %v4072_v23  ;;  %v4074_v18 = vrot.slane %v11273_v56, 2  ;;  %v4075_v2 = vrot.slane %v3969_v8, 2 }
 0x60e   :  { %v11283_v7 = vsel %vm174_vm0, %v3890_v14, %v3922_v5  ;;  %12953 = vst [vmem:[#allocation3_spill] sm:$0xff] %v11289_v13  ;;  %v11292_v47 = vsel %vm174_vm0, %v3858_v31, %v3890_v14  ;;  %v3859_v59 = vrot.slane %v11289_v13, 1  ;;  %v3891_v34 = vrot.slane %v11289_v13, 7 }
 0x60f   :  { %8021 = vrot.lane.b32.xlu1 %v8020_v17, %s8719_s23  ;;  %8026 = vrot.lane.b32.xlu0 %v8025_v6, %s8720_s26  ;;  %v4077_v40 = vrot.slane %v11292_v47, 2  ;;  %v4078_v39 = vrot.slane %v11283_v7, 2  ;;  %v3923_v31 = vrot.slane %v11289_v13, 5  ;;  %v8050_v17 = vpack.i.bf16 %v11297_v36, %v4031_v41  ;;  %v12954_v6 = vld [vmem:[#allocation4_spill] sm:$0xff] }
 0x610   :  { %v8045_v23 = vpack.i.bf16 %v11306_v28, %v4070_v27  ;;  %v11325_v0 = vsel %vm278_vm2, %v4074_v18, %v4075_v2 }
 0x611   :  { %v11319_v8 = vsel %vm278_vm2, %v4077_v40, %v4078_v39  ;;  %v11334_v40 = vsel %vm174_vm0, %v3859_v59, %v3891_v34  ;;  %v8060_v59 = vpack.i.bf16 %v11325_v0, %v11306_v28 }
 0x612   :  { %v4080_v25 = vrot.slane %v11334_v40, 2 }
 0x613   :  { %8031 = vrot.lane.b32.xlu1 %v8030_v60, %s8717_s17  ;;  %8041 = vrot.lane.b32.xlu0 %v8040_v24, %s8716_s16  ;;  %v3971_v24 = vsel %vm174_vm0, %v3891_v34, %v3923_v31  ;;  %v8065_v34 = vpack.i.bf16 %v11334_v40, %v11292_v47 }
 0x614   :  { %v3786_v63 = vpop.f32.mrb[60].mxu1  ;;  %v11303_v9 = vpop.permute.xlu0 %7876  ;;  %v4081_v44 = vrot.slane %v3971_v24, 2 }
 0x615   :  { %v3787_v14 = vadd.f32 %v10974_v22, %v3786_v63  ;;  %v3788_v5 = vpop.f32.mrb[61].mxu1  ;;  %v12956_v63 = vld [vmem:[#allocation5_spill] sm:$0xff] }
 0x616   :  { %v3789_v26 = vpop.f32.mrb[62].mxu1  ;;  %v11381_v19 = vsel %vm278_vm2, %v4080_v25, %v4081_v44  ;;  %v7879_v25 = vunpack.i.h.bf16 %v11303_v9 }
 0x617   :  { %v11315_v53 = vadd.f32 %v3787_v14, %v12954_v6  ;;  %v3790_v48 = vadd.f32 %v10974_v22, %v3789_v26  ;;  %v3791_v29 = vpop.f32.mrb[63].mxu1  ;;  %8036 = vrot.lane.b32.xlu1 %v8030_v60, %s8715_s9  ;;  %8051 = vrot.lane.b32.xlu0 %v8050_v17, %s8721_s13  ;;  %v4035_v26 = vrot.slane %v11292_v47, 1 }
 0x618   :  { %v7882_v39 = vpop.permute.xlu0 %7881  ;;  %v4038_v29 = vrot.slane %v11334_v40, 1 }
 0x619   :  { %12955 = vst [vmem:[#allocation4_spill] sm:$0xff] %v11315_v53  ;;  %v11331_v22 = vadd.f32 %v3790_v48, %v12956_v63  ;;  %v3924_v60 = vrot.slane %v11315_v53, 5  ;;  %v3860_v14 = vrot.slane %v11315_v53, 1  ;;  %v3892_v27 = vrot.slane %v11315_v53, 7 }
 0x61a   :  { %v7884_v6 = vunpack.i.h.bf16 %v7882_v39  ;;  %v4036_v48 = vrot.slane %v11283_v7, 1  ;;  %v4039_v63 = vrot.slane %v3971_v24, 1  ;;  %v7883_v41 = vunpack.i.l.bf16 %v7882_v39 }
 0x61b   :  { %12957 = vst [vmem:[#allocation5_spill] sm:$0xff] %v11331_v22  ;;  %v3861_v2 = vrot.slane %v11331_v22, 1  ;;  %v3893_v31 = vrot.slane %v11331_v22, 7  ;;  %v3925_v5 = vrot.slane %v11331_v22, 5  ;;  %8046 = vrot.lane.b32.xlu1 %v8045_v23, %s8718_s22  ;;  %8056 = vrot.lane.b32.xlu0 %v8050_v17, %s8719_s23  ;;  %v7887_v23 = vpop.permute.xlu1 %7886  ;;  %v11357_v17 = vsel %vm174_vm0, %v3860_v14, %v3892_v27 }
 0x61c   :  { %v3972_v45 = vsel %vm174_vm0, %v3892_v27, %v3924_v60  ;;  %v4083_v22 = vrot.slane %v11357_v17, 2  ;;  %v8080_v39 = vpack.i.bf16 %v11319_v8, %v11325_v0  ;;  %v4037_v14 = vsel %vm235_vm1, %v4035_v26, %v4036_v48 }
 0x61d   :  { %v11354_v18 = vsel %vm174_vm0, %v3861_v2, %v3893_v31  ;;  %v11363_v7 = vsel %vm174_vm0, %v3893_v31, %v3925_v5  ;;  %v4084_v2 = vrot.slane %v3972_v45, 2  ;;  %v4429_v24 = vsel %vm663_vm3, %v10994_v20, %v7884_v6 }
 0x61e   :  { %v4099_v60 = vrot.slane %v11354_v18, 2  ;;  %v4100_v27 = vrot.slane %v11363_v7, 2  ;;  %v4428_v31 = vsel %vm663_vm3, %v11005_v52, %v7883_v41  ;;  %v4040_v5 = vsel %vm235_vm1, %v4038_v29, %v4039_v63 }
 0x61f   :  { %8061 = vrot.lane.b32.xlu1 %v8060_v59, %s8720_s26  ;;  %8066 = vrot.lane.b32.xlu0 %v8065_v34, %s8717_s17  ;;  %v11378_v59 = vsel %vm278_vm2, %v4083_v22, %v4084_v2  ;;  %v7889_v53 = vunpack.i.h.bf16 %v7887_v23  ;;  %v7888_v13 = vunpack.i.l.bf16 %v7887_v23  ;;  %v7892_v48 = vpop.permute.xlu1 %7891  ;;  %v7878_v22 = vunpack.i.l.bf16 %v11303_v9  ;;  %v7897_v23 = vpop.permute.xlu0 %7896 }
 0x620   :  { %v11384_v26 = vsel %vm278_vm2, %v4099_v60, %v4100_v27  ;;  %v4549_v20 = vpack.c.bf16 %v11378_v59, %v11381_v19  ;;  %v8085_v6 = vpack.i.bf16 %v4040_v5, %v4037_v14  ;;  %v8075_v29 = vpack.i.bf16 %v4037_v14, %v11297_v36 }
 0x621   :  { %v4443_v52 = vsel %vm678_vm4, %v4429_v24, %v7889_v53  ;;  %v11392_v41 = vsel %vm678_vm4, %v4428_v31, %v7888_v13  ;;  %v4551_v44 = vpack.c.bf16 %v11378_v59, %v11384_v26  ;;  %v7894_v63 = vunpack.i.h.bf16 %v7892_v48 }
 0x622   :  { %v4456_v2 = vsel %vm693_vm5, %v11392_v41, %v7878_v22  ;;  %v4457_v53 = vsel %vm693_vm5, %v4443_v52, %v7879_v25  ;;  %v7899_v13 = vunpack.i.h.bf16 %v7897_v23  ;;  %v8095_v9 = vpack.i.bf16 %v11381_v19, %v11319_v8 }
 0x623   :  { %8081 = vrot.lane.b32.xlu1 %v8080_v39, %s8718_s22  ;;  %8071 = vrot.lane.b32.xlu0 %v8065_v34, %s8715_s9  ;;  %v7893_v34 = vunpack.i.l.bf16 %v7892_v48  ;;  %v7898_v39 = vunpack.i.l.bf16 %v7897_v23  ;;  %v4473_v36 = vsel %vm710_vm6, %v4457_v53, %v7894_v63  ;;  %v4041_v27 = vrot.slane %v11357_v17, 1 }
 0x624   :  { %v4042_v24 = vrot.slane %v3972_v45, 1  ;;  %v4489_v25 = vsel %vm727_vm7, %v4473_v36, %v7899_v13  ;;  %v4093_v22 = vrot.slane %v11354_v18, 1  ;;  %v4094_v63 = vrot.slane %v11363_v7, 1 }
 0x625   :  { %v4472_v60 = vsel %vm710_vm6, %v4456_v2, %v7893_v34 }
 0x626   :  { %v4488_v52 = vsel %vm727_vm7, %v4472_v60, %v7898_v39  ;;  %v4043_v34 = vsel %vm235_vm1, %v4041_v27, %v4042_v24  ;;  %v8110_v60 = vpack.i.bf16 %v11378_v59, %v11381_v19  ;;  %v4095_v36 = vsel %vm235_vm1, %v4093_v22, %v4094_v63 }
 0x627   :  { %8086 = vrot.lane.b32.xlu1 %v8085_v6, %s8721_s13  ;;  %8076 = vrot.lane.b32.xlu0 %v8075_v29, %s8716_s16  ;;  %v8105_v27 = vpack.i.bf16 %v4043_v34, %v4040_v5  ;;  %v12958_v24 = vpack.c.bf16 %v11135_v49, %v11092_v62 }
 0x62b   :  { %8091 = vrot.lane.b32.xlu1 %v8085_v6, %s8719_s23  ;;  %8096 = vrot.lane.b32.xlu0 %v8095_v9, %s8720_s26  ;;  %v8100_v9 = vpack.i.bf16 %v11354_v18, %v11357_v17 }
 0x62d   :  { %v7902_v14 = vpop.permute.xlu1 %7901 }
 0x62e   :  { %v7904_v31 = vunpack.i.h.bf16 %v7902_v14  ;;  %v7903_v48 = vunpack.i.l.bf16 %v7902_v14  ;;  %v8115_v14 = vpack.i.bf16 %v4095_v36, %v4043_v34 }
 0x62f   :  { %4368 = vrot.lane.b32.xlu1 %v11357_v17, %s8717_s17  ;;  %4410 = vrot.lane.b32.xlu0 %v4043_v34, %s8721_s13 }
 0x630   :  { %v7912_v29 = vpop.permute.xlu0 %7911  ;;  %v4504_v45 = vsel %vm744_vm8, %v4488_v52, %v7903_v48  ;;  %v4505_v6 = vsel %vm744_vm8, %v4489_v25, %v7904_v31  ;;  %v8120_v48 = vpack.i.bf16 %v11384_v26, %v11378_v59 }
 0x631   :  { %v7914_v23 = vunpack.i.h.bf16 %v7912_v29  ;;  %v7913_v2 = vunpack.i.l.bf16 %v7912_v29  ;;  %v7907_v7 = vpop.permute.xlu1 %7906 }
 0x632   :  { %v7909_v29 = vunpack.i.h.bf16 %v7907_v7  ;;  %v7908_v34 = vunpack.i.l.bf16 %v7907_v7 }
 0x633   :  { %v4520_v53 = vsel %vm761_vm9, %v4504_v45, %v7913_v2  ;;  %v4521_v13 = vsel %vm761_vm9, %v4505_v6, %v7914_v23  ;;  %8101 = vrot.lane.b32.xlu1 %v8100_v9, %s8715_s9  ;;  %8111 = vrot.lane.b32.xlu0 %v8110_v60, %s8718_s22 }
 0x634   :  { %v4536_v39 = vpack.c.bf16 %v4521_v13, %v4520_v53  ;;  %v7922_v52 = vpop.permute.xlu0 %7921  ;;  %v4458_v6 = vsel %vm693_vm5, %v11392_v41, %v7908_v34 }
 0x635   :  { %v7917_v31 = vpop.permute.xlu1 %7916  ;;  %v7923_v49 = vunpack.i.l.bf16 %v7922_v52 }
 0x636   :  { %4669 = vmatmul.mubr.bf16.vlgmr.msra.gmra.mrb[64].mxu0 %v4536_v39  ;;  %v7918_v25 = vunpack.i.l.bf16 %v7917_v31 }
 0x637   :  { %6787 = vmatprep.mubr.msk.bf16.mxu0 %vm663_vm3, %v12958_v24  ;;  %8106 = vrot.lane.b32.xlu1 %v8105_v27, %s8716_s16 }
 0x638   :  { %8116 = vrot.lane.b32.xlu0 %v8115_v14, %s8719_s23  ;;  %v4430_v62 = vsel %vm663_vm3, %v11068_v10, %v7918_v25  ;;  %v7927_v5 = vpop.permute.xlu0 %7926 }
 0x639   :  { %v4444_v22 = vsel %vm678_vm4, %v4430_v62, %v7923_v49  ;;  %v7929_v63 = vunpack.i.h.bf16 %v7927_v5  ;;  %v7928_v23 = vunpack.i.l.bf16 %v7927_v5  ;;  %v7932_v2 = vpop.permute.xlu1 %7931 }
 0x63a   :  { %v4459_v45 = vsel %vm693_vm5, %v4444_v22, %v7909_v29  ;;  %v7933_v53 = vunpack.i.l.bf16 %v7932_v2  ;;  %v12959_v22 = vpack.c.bf16 %v11183_v3, %v11140_v38 }
 0x63b   :  { %8121 = vrot.lane.b32.xlu1 %v8120_v48, %s8720_s26  ;;  %v4474_v10 = vsel %vm710_vm6, %v4458_v6, %v7928_v23  ;;  %v4475_v39 = vsel %vm710_vm6, %v4459_v45, %v7929_v63  ;;  %v7919_v23 = vunpack.i.h.bf16 %v7917_v31 }
 0x63c   :  { %4370 = vrot.lane.b32.xlu0 %v11354_v18, %s8717_s17  ;;  %v7934_v18 = vunpack.i.h.bf16 %v7932_v2  ;;  %v4490_v7 = vsel %vm727_vm7, %v4474_v10, %v7933_v53 }
 0x63d   :  { %v4431_v53 = vsel %vm663_vm3, %v11079_v4, %v7919_v23 }
 0x63e   :  { %v4491_v14 = vsel %vm727_vm7, %v4475_v39, %v7934_v18  ;;  %v7924_v39 = vunpack.i.h.bf16 %v7922_v52 }
 0x63f   :  { %4412 = vrot.lane.b32.xlu1 %v4095_v36, %s8721_s13 }
 0x640   :  { %v4445_v31 = vsel %vm678_vm4, %v4431_v53, %v7924_v39 }
 0x647   :  { %v7937_v13 = vpop.permute.xlu0 %7936 }
 0x648   :  { %v7939_v9 = vunpack.i.h.bf16 %v7937_v13  ;;  %v7938_v60 = vunpack.i.l.bf16 %v7937_v13 }
 0x64a   :  { %v7947_v36 = vpop.permute.xlu1 %7946  ;;  %v4506_v48 = vsel %vm744_vm8, %v4490_v7, %v7938_v60  ;;  %v4507_v41 = vsel %vm744_vm8, %v4491_v14, %v7939_v9 }
 0x64b   :  { %v7949_v27 = vunpack.i.h.bf16 %v7947_v36  ;;  %v7948_v24 = vunpack.i.l.bf16 %v7947_v36  ;;  %v7942_v25 = vpop.permute.xlu0 %7941 }
 0x64c   :  { %v7944_v13 = vunpack.i.h.bf16 %v7942_v25  ;;  %v7943_v10 = vunpack.i.l.bf16 %v7942_v25 }
 0x64d   :  { %v4522_v62 = vsel %vm761_vm9, %v4506_v48, %v7948_v24  ;;  %v4523_v49 = vsel %vm761_vm9, %v4507_v41, %v7949_v27 }
 0x64e   :  { %v4538_v5 = vpack.c.bf16 %v4523_v49, %v4522_v62  ;;  %v7957_v34 = vpop.permute.xlu1 %7956  ;;  %v4460_v7 = vsel %vm693_vm5, %v4445_v31, %v7943_v10 }
 0x64f   :  { %v7952_v29 = vpop.permute.xlu0 %7951  ;;  %v7958_v45 = vunpack.i.l.bf16 %v7957_v34 }
 0x650   :  { %4677 = vmatmul.mubr.bf16.gmra.mrb[68].mxu0 %v4538_v5  ;;  %v7953_v63 = vunpack.i.l.bf16 %v7952_v29  ;;  %v7954_v39 = vunpack.i.h.bf16 %v7952_v29 }
 0x651   :  { %6788 = vmatprep.mubr.msk.bf16.mxu0 %vm663_vm3, %v12959_v22 }
 0x652   :  { %v4432_v2 = vsel %vm663_vm3, %v11120_v55, %v7953_v63  ;;  %v7962_v6 = vpop.permute.xlu1 %7961 }
 0x653   :  { %v4446_v18 = vsel %vm678_vm4, %v4432_v2, %v7958_v45  ;;  %v7964_v38 = vunpack.i.h.bf16 %v7962_v6  ;;  %v7963_v9 = vunpack.i.l.bf16 %v7962_v6  ;;  %v7967_v60 = vpop.permute.xlu0 %7966  ;;  %v12960_v6 = vpack.c.bf16 %v11183_v3, %v11190_v46 }
 0x654   :  { %v4461_v36 = vsel %vm693_vm5, %v4446_v18, %v7944_v13  ;;  %v7969_v55 = vunpack.i.h.bf16 %v7967_v60  ;;  %v7968_v14 = vunpack.i.l.bf16 %v7967_v60  ;;  %v7959_v3 = vunpack.i.h.bf16 %v7957_v34 }
 0x655   :  { %v4476_v24 = vsel %vm710_vm6, %v4460_v7, %v7963_v9  ;;  %v4477_v48 = vsel %vm710_vm6, %v4461_v36, %v7964_v38  ;;  %v4433_v36 = vsel %vm663_vm3, %v11127_v35, %v7954_v39 }
 0x656   :  { %v4492_v52 = vsel %vm727_vm7, %v4476_v24, %v7968_v14  ;;  %v4493_v62 = vsel %vm727_vm7, %v4477_v48, %v7969_v55  ;;  %v4447_v29 = vsel %vm678_vm4, %v4433_v36, %v7959_v3 }
 0x662   :  { %v7972_v27 = vpop.permute.xlu1 %7971 }
 0x663   :  { %v7974_v4 = vunpack.i.h.bf16 %v7972_v27  ;;  %v7973_v41 = vunpack.i.l.bf16 %v7972_v27 }
 0x665   :  { %v7982_v25 = vpop.permute.xlu0 %7981  ;;  %v4508_v22 = vsel %vm744_vm8, %v4492_v52, %v7973_v41  ;;  %v4509_v63 = vsel %vm744_vm8, %v4493_v62, %v7974_v4 }
 0x666   :  { %v7984_v49 = vunpack.i.h.bf16 %v7982_v25  ;;  %v7983_v5 = vunpack.i.l.bf16 %v7982_v25  ;;  %v7977_v18 = vpop.permute.xlu1 %7976 }
 0x667   :  { %v7978_v31 = vunpack.i.l.bf16 %v7977_v18  ;;  %v7979_v27 = vunpack.i.h.bf16 %v7977_v18 }
 0x668   :  { %v4524_v23 = vsel %vm761_vm9, %v4508_v22, %v7983_v5  ;;  %v4525_v2 = vsel %vm761_vm9, %v4509_v63, %v7984_v49 }
 0x669   :  { %v4540_v45 = vpack.c.bf16 %v4525_v2, %v4524_v23  ;;  %v7987_v53 = vpop.permute.xlu0 %7986  ;;  %v4462_v41 = vsel %vm693_vm5, %v4447_v29, %v7978_v31 }
 0x66a   :  { %v7992_v13 = vpop.permute.xlu1 %7991  ;;  %v7988_v46 = vunpack.i.l.bf16 %v7987_v53  ;;  %v7989_v25 = vunpack.i.h.bf16 %v7987_v53 }
 0x66b   :  { %4685 = vmatmul.mubr.bf16.gmra.mrb[72].mxu0 %v4540_v45  ;;  %v7993_v52 = vunpack.i.l.bf16 %v7992_v13  ;;  %v7994_v22 = vunpack.i.h.bf16 %v7992_v13 }
 0x66c   :  { %6789 = vmatprep.mubr.msk.bf16.mxu0 %vm663_vm3, %v12960_v6  ;;  %v4478_v34 = vsel %vm710_vm6, %v4462_v41, %v7988_v46 }
 0x66d   :  { %v4494_v18 = vsel %vm727_vm7, %v4478_v34, %v7993_v52 }
 0x675   :  { %v11480_v10 = vpop.permute.xlu0 %7996 }
 0x676   :  { %v7998_v63 = vunpack.i.l.bf16 %v11480_v10 }
 0x678   :  { %v4510_v36 = vsel %vm744_vm8, %v4494_v18, %v7998_v63 }
 0x679   :  { %v8007_v38 = vpop.permute.xlu1 %8006  ;;  %v11482_v9 = vpop.permute.xlu0 %8001 }
 0x67a   :  { %v8008_v60 = vunpack.i.l.bf16 %v8007_v38  ;;  %v8009_v23 = vunpack.i.h.bf16 %v8007_v38  ;;  %v8003_v46 = vunpack.i.l.bf16 %v11482_v9 }
 0x67c   :  { %v4434_v24 = vsel %vm663_vm3, %v11169_v15, %v8008_v60  ;;  %v4435_v13 = vsel %vm663_vm3, %v11221_v33, %v8009_v23  ;;  %v12961_v33 = vpack.c.bf16 %v11306_v28, %v11249_v32 }
 0x67d   :  { %v11486_v7 = vpop.permute.xlu1 %8016  ;;  %v8012_v55 = vpop.permute.xlu0 %8011 }
 0x67e   :  { %v8013_v14 = vunpack.i.l.bf16 %v8012_v55  ;;  %v8018_v15 = vunpack.i.l.bf16 %v11486_v7  ;;  %v8014_v45 = vunpack.i.h.bf16 %v8012_v55 }
 0x680   :  { %v4448_v48 = vsel %vm678_vm4, %v4434_v24, %v8013_v14  ;;  %v4526_v38 = vsel %vm761_vm9, %v4510_v36, %v8018_v15  ;;  %v4449_v55 = vsel %vm678_vm4, %v4435_v13, %v8014_v45 }
 0x681   :  { %v4463_v35 = vsel %vm693_vm5, %v4448_v48, %v7979_v27  ;;  %v8022_v62 = vpop.permute.xlu1 %8021  ;;  %v8027_v5 = vpop.permute.xlu0 %8026 }
 0x682   :  { %v4479_v2 = vsel %vm710_vm6, %v4463_v35, %v7989_v25  ;;  %v8023_v24 = vunpack.i.l.bf16 %v8022_v62  ;;  %v8024_v63 = vunpack.i.h.bf16 %v8022_v62  ;;  %v8029_v36 = vunpack.i.h.bf16 %v8027_v5 }
 0x683   :  { %v4495_v6 = vsel %vm727_vm7, %v4479_v2, %v7994_v22  ;;  %v8004_v22 = vunpack.i.h.bf16 %v11482_v9 }
 0x684   :  { %v4511_v60 = vsel %vm744_vm8, %v4495_v6, %v7974_v4  ;;  %v4464_v4 = vsel %vm693_vm5, %v4449_v55, %v8003_v46 }
 0x685   :  { %v11500_v53 = vpop.permute.xlu1 %8031  ;;  %v8042_v39 = vpop.permute.xlu0 %8041  ;;  %v4527_v31 = vsel %vm761_vm9, %v4511_v60, %v7984_v49  ;;  %v8028_v49 = vunpack.i.l.bf16 %v8027_v5  ;;  %v4480_v52 = vsel %vm710_vm6, %v4464_v4, %v8023_v24 }
 0x686   :  { %v4542_v3 = vpack.c.bf16 %v4527_v31, %v4526_v38  ;;  %v8044_v29 = vunpack.i.h.bf16 %v8042_v39  ;;  %v8043_v48 = vunpack.i.l.bf16 %v8042_v39  ;;  %v8019_v38 = vunpack.i.h.bf16 %v11486_v7 }
 0x687   :  { %v4496_v6 = vsel %vm727_vm7, %v4480_v52, %v8028_v49  ;;  %v8033_v31 = vunpack.i.l.bf16 %v11500_v53 }
 0x688   :  { %4693 = vmatmul.mubr.bf16.gmra.mrb[76].mxu0 %v4542_v3  ;;  %v4437_v23 = vsel %vm663_vm3, %v11257_v54, %v8044_v29  ;;  %v4436_v15 = vsel %vm663_vm3, %v11226_v43, %v8043_v48  ;;  %v7999_v54 = vunpack.i.h.bf16 %v11480_v10 }
 0x689   :  { %v8037_v14 = vpop.permute.xlu1 %8036  ;;  %v11510_v27 = vpop.permute.xlu0 %8051  ;;  %6790 = vmatprep.mubr.msk.bf16.mxu0 %vm663_vm3, %v12961_v33 }
 0x68a   :  { %v8039_v2 = vunpack.i.h.bf16 %v8037_v14  ;;  %v8038_v32 = vunpack.i.l.bf16 %v8037_v14  ;;  %v4512_v4 = vsel %vm744_vm8, %v4496_v6, %v7999_v54  ;;  %v8053_v29 = vunpack.i.l.bf16 %v11510_v27 }
 0x68c   :  { %v4466_v46 = vsel %vm693_vm5, %v4449_v55, %v8038_v32 }
 0x68d   :  { %v8047_v41 = vpop.permute.xlu1 %8046  ;;  %v8057_v25 = vpop.permute.xlu0 %8056 }
 0x68e   :  { %v8049_v35 = vunpack.i.h.bf16 %v8047_v41  ;;  %v8048_v34 = vunpack.i.l.bf16 %v8047_v41  ;;  %v8059_v39 = vunpack.i.h.bf16 %v8057_v25  ;;  %v8058_v60 = vunpack.i.l.bf16 %v8057_v25 }
 0x68f   :  { %v8034_v41 = vunpack.i.h.bf16 %v11500_v53  ;;  %v4528_v25 = vsel %vm761_vm9, %v4512_v4, %v8019_v38 }
 0x690   :  { %v4450_v28 = vsel %vm678_vm4, %v4436_v15, %v8048_v34  ;;  %v4451_v45 = vsel %vm678_vm4, %v4437_v23, %v8049_v35  ;;  %v4482_v10 = vsel %vm710_vm6, %v4466_v46, %v8058_v60  ;;  %v8054_v15 = vunpack.i.h.bf16 %v11510_v27 }
 0x691   :  { %v4465_v18 = vsel %vm693_vm5, %v4450_v28, %v8004_v22  ;;  %v8062_v9 = vpop.permute.xlu1 %8061  ;;  %v11527_v62 = vpop.permute.xlu0 %8066  ;;  %v4467_v43 = vsel %vm693_vm5, %v4451_v45, %v8039_v2 }
 0x692   :  { %v8063_v13 = vunpack.i.l.bf16 %v8062_v9  ;;  %v4481_v3 = vsel %vm710_vm6, %v4465_v18, %v8024_v63  ;;  %v8064_v14 = vunpack.i.h.bf16 %v8062_v9  ;;  %v4483_v5 = vsel %vm710_vm6, %v4467_v43, %v8059_v39 }
 0x693   :  { %v4497_v24 = vsel %vm727_vm7, %v4481_v3, %v8029_v36  ;;  %v8068_v55 = vunpack.i.l.bf16 %v11527_v62  ;;  %v12962_v18 = vpack.c.bf16 %v11319_v8, %v11325_v0 }
 0x694   :  { %v4513_v7 = vsel %vm744_vm8, %v4497_v24, %v8033_v31  ;;  %v4498_v49 = vsel %vm727_vm7, %v4482_v10, %v8063_v13  ;;  %v4499_v35 = vsel %vm727_vm7, %v4483_v5, %v8064_v14  ;;  %v8069_v24 = vunpack.i.h.bf16 %v11527_v62 }
 0x695   :  { %v8082_v48 = vpop.permute.xlu1 %8081  ;;  %v8072_v33 = vpop.permute.xlu0 %8071  ;;  %v4529_v52 = vsel %vm761_vm9, %v4513_v7, %v8053_v29  ;;  %v4514_v23 = vsel %vm744_vm8, %v4498_v49, %v8034_v41  ;;  %v4515_v39 = vsel %vm744_vm8, %v4499_v35, %v8068_v55 }
 0x696   :  { %v4544_v34 = vpack.c.bf16 %v4529_v52, %v4528_v25  ;;  %v8084_v53 = vunpack.i.h.bf16 %v8082_v48  ;;  %v8083_v45 = vunpack.i.l.bf16 %v8082_v48  ;;  %v8073_v6 = vunpack.i.l.bf16 %v8072_v33 }
 0x697   :  { %v4530_v9 = vsel %vm761_vm9, %v4514_v23, %v8054_v15  ;;  %v8074_v36 = vunpack.i.h.bf16 %v8072_v33 }
 0x698   :  { %4701 = vmatmul.mubr.bf16.gmra.mrb[80].mxu0 %v4544_v34 }
 0x699   :  { %v8087_v22 = vpop.permute.xlu1 %8086  ;;  %v8077_v63 = vpop.permute.xlu0 %8076  ;;  %6791 = vmatprep.mubr.msk.bf16.mxu0 %vm663_vm3, %v12962_v18 }
 0x69a   :  { %v8088_v2 = vunpack.i.l.bf16 %v8087_v22  ;;  %v8079_v32 = vunpack.i.h.bf16 %v8077_v63  ;;  %v8078_v28 = vunpack.i.l.bf16 %v8077_v63  ;;  %v8089_v41 = vunpack.i.h.bf16 %v8087_v22 }
 0x69c   :  { %v4439_v60 = vsel %vm663_vm3, %v11292_v47, %v8079_v32  ;;  %v4438_v27 = vsel %vm663_vm3, %v11273_v56, %v8078_v28  ;;  %v4531_v54 = vsel %vm761_vm9, %v4515_v39, %v8088_v2 }
 0x69d   :  { %v4453_v43 = vsel %vm678_vm4, %v4439_v60, %v8084_v53  ;;  %v4452_v13 = vsel %vm678_vm4, %v4438_v27, %v8083_v45  ;;  %v8092_v8 = vpop.permute.xlu1 %8091  ;;  %v8097_v0 = vpop.permute.xlu0 %8096  ;;  %v4546_v38 = vpack.c.bf16 %v4531_v54, %v4530_v9 }
 0x69e   :  { %v8094_v31 = vunpack.i.h.bf16 %v8092_v8  ;;  %v8093_v3 = vunpack.i.l.bf16 %v8092_v8  ;;  %v4468_v46 = vsel %vm693_vm5, %v4452_v13, %v8073_v6  ;;  %v8099_v47 = vunpack.i.h.bf16 %v8097_v0 }
 0x69f   :  { %v8098_v14 = vunpack.i.l.bf16 %v8097_v0  ;;  %v4469_v56 = vsel %vm693_vm5, %v4453_v43, %v8074_v36 }
 0x6a0   :  { %v4484_v4 = vsel %vm710_vm6, %v4468_v46, %v8093_v3  ;;  %v4485_v29 = vsel %vm710_vm6, %v4469_v56, %v8094_v31  ;;  %4709 = vmatmul.mubr.bf16.gmra.mrb[84].mxu0 %v4546_v38  ;;  %v11600_v31 = vld [vmem:[%s12916_s2 + $0x2] ss:$0 sm:$0xff] }
 0x6a1   :  { %v4500_v10 = vsel %vm727_vm7, %v4484_v4, %v8098_v14  ;;  %v4369_v5 = vpop.permute.xlu1 %4368  ;;  %v4501_v48 = vsel %vm727_vm7, %v4485_v29, %v8099_v47  ;;  %v4411_v33 = vpop.permute.xlu0 %4410  ;;  %6792 = vmatprep.mubr.msk.bf16.mxu0 %vm663_vm3, %v4549_v20 }
 0x6a2   :  { %v4517_v7 = vsel %vm744_vm8, %v4501_v48, %v4369_v5  ;;  %v4516_v49 = vsel %vm744_vm8, %v4500_v10, %v8069_v24 }
 0x6a3   :  { %v4533_v62 = vsel %vm761_vm9, %v4517_v7, %v4411_v33  ;;  %v4532_v52 = vsel %vm761_vm9, %v4516_v49, %v8089_v41 }
 0x6a4   :  { %v4548_v35 = vpack.c.bf16 %v4533_v62, %v4532_v52 }
 0x6a5   :  { %v8102_v55 = vpop.permute.xlu1 %8101  ;;  %v8112_v25 = vpop.permute.xlu0 %8111 }
 0x6a6   :  { %v8114_v2 = vunpack.i.h.bf16 %v8112_v25  ;;  %v8113_v32 = vunpack.i.l.bf16 %v8112_v25  ;;  %v8104_v19 = vunpack.i.h.bf16 %v8102_v55  ;;  %v8103_v20 = vunpack.i.l.bf16 %v8102_v55 }
 0x6a8   :  { %4717 = vmatmul.mubr.bf16.gmra.mrb[88].mxu0 %v4548_v35 }
 0x6a9   :  { %v8107_v34 = vpop.permute.xlu1 %8106  ;;  %6793 = vmatprep.mubr.msk.bf16.mxu0 %vm663_vm3, %v4551_v44 }
 0x6aa   :  { %v8109_v63 = vunpack.i.h.bf16 %v8107_v34  ;;  %v8108_v23 = vunpack.i.l.bf16 %v8107_v34  ;;  %v8117_v15 = vpop.permute.xlu0 %8116 }
 0x6ab   :  { %v8119_v6 = vunpack.i.h.bf16 %v8117_v15  ;;  %v8118_v18 = vunpack.i.l.bf16 %v8117_v15 }
 0x6ac   :  { %v4441_v22 = vsel %vm663_vm3, %v11357_v17, %v8109_v63  ;;  %v4440_v28 = vsel %vm663_vm3, %v11334_v40, %v8108_v23 }
 0x6ad   :  { %v4454_v53 = vsel %vm678_vm4, %v4440_v28, %v8113_v32  ;;  %v4455_v45 = vsel %vm678_vm4, %v4441_v22, %v8114_v2  ;;  %v8122_v39 = vpop.permute.xlu1 %8121  ;;  %v8681_v22 = vld [vmem:[%s12915_s3 + $0x98] sm:$0xff]  }
 0x6ae   :  { %v4471_v60 = vsel %vm693_vm5, %v4455_v45, %v8104_v19  ;;  %v8124_v59 = vunpack.i.h.bf16 %v8122_v39  ;;  %v8123_v26 = vunpack.i.l.bf16 %v8122_v39  ;;  %v4470_v44 = vsel %vm693_vm5, %v4454_v53, %v8103_v20  ;;  %v4371_v40 = vpop.permute.xlu0 %4370 }
 0x6af   :  { %v4487_v27 = vsel %vm710_vm6, %v4471_v60, %v8119_v6  ;;  %v4486_v17 = vsel %vm710_vm6, %v4470_v44, %v8118_v18  ;;  %v8682_v18 = vld [vmem:[%s12915_s3 + $0xa0] sm:$0xff]   ;;  %v8683_v44 = vld [vmem:[%s12915_s3 + $0xa8] sm:$0xff]  }
 0x6b0   :  { %v4503_v9 = vsel %vm727_vm7, %v4487_v27, %v8124_v59  ;;  %v4502_v54 = vsel %vm727_vm7, %v4486_v17, %v8123_v26  ;;  %v8684_v27 = vld [vmem:[%s12915_s3 + $0xb0] sm:$0xff]   ;;  %v8685_v17 = vld [vmem:[%s12915_s3 + $0xb8] sm:$0xff]  }
 0x6b1   :  { %v4518_v36 = vsel %vm744_vm8, %v4502_v54, %v4371_v40  ;;  %v4413_v43 = vpop.permute.xlu1 %4412  ;;  %v4519_v13 = vsel %vm744_vm8, %v4503_v9, %v4369_v5 }
 0x6b2   :  { %v4534_v8 = vsel %vm761_vm9, %v4518_v36, %v4413_v43  ;;  %v4535_v0 = vsel %vm761_vm9, %v4519_v13, %v4411_v33  ;;  %v8680_v33 = vld [vmem:[%s12915_s3 + $0x90] sm:$0xff]   ;;  %v8686_v43 = vld [vmem:[%s12915_s3 + $0xc0] sm:$0xff]  }
 0x6b3   :  { %v4550_v38 = vpack.c.bf16 %v4535_v0, %v4534_v8  ;;  %5577 = vmatpush1.bf16.msra.mxu1 %v8680_v33 }
 0x6b4   :  { %5578 = vmatprep.subr.bf16.mxu1 %v12941_v11 }
 0x6b5   :  { %4725 = vmatmul.mubr.bf16.gmra.mrb[92].mxu0 %v4550_v38 }
 0x6b7   :  { %5579 = vmatpush1.bf16.msra.mxu1 %v8681_v22 }
 0x6b8   :  { %5580 = vmatprep.subr.bf16.mxu1 %v12941_v11 }
 0x6bb   :  { %5581 = vmatpush1.bf16.msra.mxu1 %v8682_v18 }
 0x6bc   :  { %5582 = vmatprep.subr.bf16.mxu1 %v12941_v11 }
 0x6bf   :  { %5583 = vmatpush1.bf16.msra.mxu1 %v8683_v44 }
 0x6c0   :  { %5584 = vmatprep.subr.bf16.mxu1 %v12941_v11 }
 0x6c3   :  { %5585 = vmatpush1.bf16.msra.mxu1 %v8684_v27 }
 0x6c4   :  { %5586 = vmatprep.subr.bf16.mxu1 %v12941_v11 }
 0x6c7   :  { %5587 = vmatpush1.bf16.msra.mxu1 %v8685_v17 }
 0x6c8   :  { %5588 = vmatprep.subr.bf16.mxu1 %v12941_v11 }
 0x6cb   :  { %5589 = vmatpush1.bf16.msra.mxu1 %v8686_v43 }
 0x6cc   :  { %5590 = vmatprep.subr.bf16.mxu1 %v12941_v11 }
 0x709   :  { %v4670_v3 = vpop.f32.mrb[64].mxu0 }
 0x70a   :  { %v4671_v46 = vadd.f32 %v11600_v31, %v4670_v3  ;;  %v4672_v47 = vpop.f32.mrb[65].mxu0 }
 0x70b   :  { %v4673_v14 = vpop.f32.mrb[66].mxu0 }
 0x70c   :  { %v4733_v56 = vmax.f32 %v4671_v46, 0.0  ;;  %v4674_v24 = vadd.f32 %v11600_v31, %v4673_v14  ;;  %v4675_v4 = vpop.f32.mrb[67].mxu0  ;;  %v8687_v14 = vld [vmem:[%s12915_s3 + $0xc8] sm:$0xff]  }
 0x70d   :  { %5591 = vmatpush1.bf16.msra.mxu1 %v8687_v14 }
 0x70e   :  { %v4787_v29 = vrot.slane %v4733_v56, 1  ;;  %v4819_v10 = vrot.slane %v4733_v56, 7  ;;  %v4851_v5 = vrot.slane %v4733_v56, 5  ;;  %v4734_v48 = vmax.f32 %v4674_v24, 0.0  ;;  %5592 = vmatprep.subr.bf16.mxu1 %v12941_v11 }
 0x710   :  { %v11608_v7 = vsel %vm174_vm0, %v4787_v29, %v4819_v10  ;;  %v4899_v49 = vsel %vm174_vm0, %v4819_v10, %v4851_v5  ;;  %v4786_v41 = vrot.slane %v4734_v48, 1  ;;  %v4818_v62 = vrot.slane %v4734_v48, 7 }
 0x711   :  { %v4946_v55 = vrot.slane %v4899_v49, 1  ;;  %v4850_v25 = vrot.slane %v4734_v48, 5  ;;  %v4988_v52 = vrot.slane %v4899_v49, 2  ;;  %v4987_v34 = vrot.slane %v11608_v7, 2 }
 0x712   :  { %v11612_v35 = vsel %vm174_vm0, %v4786_v41, %v4818_v62  ;;  %v4945_v63 = vrot.slane %v11608_v7, 1 }
 0x713   :  { %v4898_v23 = vsel %vm174_vm0, %v4818_v62, %v4850_v25  ;;  %v8125_v15 = vpack.i.bf16 %v11612_v35, %v11608_v7  ;;  %v4984_v2 = vrot.slane %v11612_v35, 2  ;;  %v4942_v20 = vrot.slane %v11612_v35, 1 }
 0x714   :  { %v4943_v32 = vrot.slane %v4898_v23, 1  ;;  %v4985_v19 = vrot.slane %v4898_v23, 2  ;;  %v4989_v53 = vsel %vm278_vm2, %v4987_v34, %v4988_v52  ;;  %v4947_v6 = vsel %vm235_vm1, %v4945_v63, %v4946_v55 }
 0x715   :  { %8126 = vrot.lane.b32.xlu0 %v8125_v15, %s8715_s9 }
 0x716   :  { %v11627_v28 = vsel %vm278_vm2, %v4984_v2, %v4985_v19  ;;  %v11631_v45 = vsel %vm235_vm1, %v4942_v20, %v4943_v32  ;;  %v8688_v2 = vld [vmem:[%s12915_s3 + $0xd0] sm:$0xff]  }
 0x717   :  { %v8135_v39 = vpack.i.bf16 %v4989_v53, %v11627_v28  ;;  %v8130_v60 = vpack.i.bf16 %v4947_v6, %v11631_v45  ;;  %v8140_v59 = vpack.i.bf16 %v11631_v45, %v4947_v6  ;;  %v8145_v26 = vpack.i.bf16 %v11627_v28, %v4989_v53  ;;  %5593 = vmatpush1.bf16.msra.mxu1 %v8688_v2 }
 0x718   :  { %6849 = vmatprep.subr.bf16.mxu1 %v12941_v11 }
 0x719   :  { %8136 = vrot.lane.b32.xlu1 %v8135_v39, %s8718_s22  ;;  %8131 = vrot.lane.b32.xlu0 %v8130_v60, %s8716_s16 }
 0x71d   :  { %8141 = vrot.lane.b32.xlu1 %v8140_v59, %s8719_s23  ;;  %8146 = vrot.lane.b32.xlu0 %v8145_v26, %s8720_s26 }
 0x723   :  { %v4678_v9 = vpop.f32.mrb[68].mxu0 }
 0x724   :  { %v4679_v40 = vadd.f32 %v11600_v31, %v4678_v9  ;;  %v4680_v54 = vpop.f32.mrb[69].mxu0 }
 0x725   :  { %v4681_v36 = vpop.f32.mrb[70].mxu0 }
 0x726   :  { %v4735_v13 = vmax.f32 %v4679_v40, 0.0  ;;  %v4682_v8 = vadd.f32 %v11600_v31, %v4681_v36  ;;  %v4683_v0 = vpop.f32.mrb[71].mxu0 }
 0x728   :  { %v4788_v38 = vrot.slane %v4735_v13, 1  ;;  %v4820_v3 = vrot.slane %v4735_v13, 7  ;;  %v4852_v46 = vrot.slane %v4735_v13, 5  ;;  %v4736_v47 = vmax.f32 %v4682_v8, 0.0 }
 0x72a   :  { %v11668_v56 = vsel %vm174_vm0, %v4788_v38, %v4820_v3  ;;  %v4900_v24 = vsel %vm174_vm0, %v4820_v3, %v4852_v46  ;;  %v4789_v4 = vrot.slane %v4736_v47, 1  ;;  %v4821_v29 = vrot.slane %v4736_v47, 7 }
 0x72b   :  { %v4949_v10 = vrot.slane %v4900_v24, 1  ;;  %v4991_v5 = vrot.slane %v4900_v24, 2  ;;  %v4853_v48 = vrot.slane %v4736_v47, 5  ;;  %v8150_v33 = vpack.i.bf16 %v11668_v56, %v11612_v35 }
 0x72c   :  { %v11675_v49 = vsel %vm174_vm0, %v4789_v4, %v4821_v29  ;;  %v4990_v41 = vrot.slane %v11668_v56, 2  ;;  %v4948_v62 = vrot.slane %v11668_v56, 1 }
 0x72d   :  { %v4901_v55 = vsel %vm174_vm0, %v4821_v29, %v4853_v48  ;;  %8151 = vrot.lane.b32.xlu1 %v8150_v33, %s8717_s17  ;;  %v4993_v25 = vrot.slane %v11675_v49, 2  ;;  %v4951_v52 = vrot.slane %v11675_v49, 1  ;;  %v8155_v20 = vpack.i.bf16 %v11675_v49, %v11668_v56 }
 0x72e   :  { %v4952_v34 = vrot.slane %v4901_v55, 1  ;;  %v4994_v63 = vrot.slane %v4901_v55, 2  ;;  %v4992_v23 = vsel %vm278_vm2, %v4990_v41, %v4991_v5  ;;  %v4950_v15 = vsel %vm235_vm1, %v4948_v62, %v4949_v10 }
 0x72f   :  { %v5477_v32 = vpack.c.bf16 %v4992_v23, %v11627_v28  ;;  %v8160_v19 = vpack.i.bf16 %v4950_v15, %v11631_v45 }
 0x730   :  { %v11694_v22 = vsel %vm278_vm2, %v4993_v25, %v4994_v63  ;;  %v4953_v53 = vsel %vm235_vm1, %v4951_v52, %v4952_v34 }
 0x731   :  { %6823 = vmatprep.mubr.msk.bf16.mxu1 %vm663_vm3, %v5477_v32  ;;  %8161 = vrot.lane.b32.xlu0 %v8160_v19, %s8721_s13  ;;  %v8170_v6 = vpack.i.bf16 %v11694_v22, %v4992_v23  ;;  %v8165_v18 = vpack.i.bf16 %v4953_v53, %v4950_v15 }
 0x732   :  { %8156 = vrot.lane.b32.xlu1 %v8155_v20, %s8715_s9 }
 0x735   :  { %8171 = vrot.lane.b32.xlu0 %v8170_v6, %s8718_s22 }
 0x736   :  { %8166 = vrot.lane.b32.xlu1 %v8165_v18, %s8716_s16 }
 0x739   :  { %8176 = vrot.lane.b32.xlu0 %v8165_v18, %s8719_s23 }
 0x73a   :  { %8181 = vrot.lane.b32.xlu1 %v8170_v6, %s8720_s26 }
 0x73e   :  { %v4686_v28 = vpop.f32.mrb[72].mxu0 }
 0x73f   :  { %v4687_v45 = vadd.f32 %v11600_v31, %v4686_v28  ;;  %v4688_v39 = vpop.f32.mrb[73].mxu0 }
 0x740   :  { %v4689_v60 = vpop.f32.mrb[74].mxu0 }
 0x741   :  { %v4737_v59 = vmax.f32 %v4687_v45, 0.0  ;;  %v4690_v26 = vadd.f32 %v11600_v31, %v4689_v60  ;;  %v4691_v44 = vpop.f32.mrb[75].mxu0 }
 0x743   :  { %v4790_v27 = vrot.slane %v4737_v59, 1  ;;  %v4822_v17 = vrot.slane %v4737_v59, 7  ;;  %v4854_v9 = vrot.slane %v4737_v59, 5  ;;  %v4738_v40 = vmax.f32 %v4690_v26, 0.0 }
 0x745   :  { %v11709_v54 = vsel %vm174_vm0, %v4790_v27, %v4822_v17  ;;  %v4902_v36 = vsel %vm174_vm0, %v4822_v17, %v4854_v9  ;;  %v4791_v43 = vrot.slane %v4738_v40, 1  ;;  %v4823_v13 = vrot.slane %v4738_v40, 7 }
 0x746   :  { %v4955_v8 = vrot.slane %v4902_v36, 1  ;;  %v4997_v0 = vrot.slane %v4902_v36, 2  ;;  %v4855_v38 = vrot.slane %v4738_v40, 5  ;;  %v8185_v3 = vpack.i.bf16 %v11709_v54, %v11675_v49 }
 0x747   :  { %v11715_v46 = vsel %vm174_vm0, %v4791_v43, %v4823_v13  ;;  %v4954_v47 = vrot.slane %v11709_v54, 1  ;;  %v4996_v14 = vrot.slane %v11709_v54, 2 }
 0x748   :  { %v4903_v24 = vsel %vm174_vm0, %v4823_v13, %v4855_v38  ;;  %8186 = vrot.lane.b32.xlu0 %v8185_v3, %s8717_s17  ;;  %v4999_v4 = vrot.slane %v11715_v46, 2  ;;  %v4957_v29 = vrot.slane %v11715_v46, 1  ;;  %v8190_v62 = vpack.i.bf16 %v11715_v46, %v11709_v54 }
 0x749   :  { %v4958_v10 = vrot.slane %v4903_v24, 1  ;;  %v5000_v5 = vrot.slane %v4903_v24, 2  ;;  %v4956_v48 = vsel %vm235_vm1, %v4954_v47, %v4955_v8  ;;  %v11725_v33 = vsel %vm278_vm2, %v4996_v14, %v4997_v0 }
 0x74a   :  { %v8195_v41 = vpack.i.bf16 %v4956_v48, %v4953_v53 }
 0x74b   :  { %v11732_v25 = vsel %vm278_vm2, %v4999_v4, %v5000_v5  ;;  %v4959_v52 = vsel %vm235_vm1, %v4957_v29, %v4958_v10 }
 0x74c   :  { %8196 = vrot.lane.b32.xlu1 %v8195_v41, %s8721_s13  ;;  %8191 = vrot.lane.b32.xlu0 %v8190_v62, %s8715_s9  ;;  %v8205_v34 = vpack.i.bf16 %v11732_v25, %v11725_v33  ;;  %v8200_v63 = vpack.i.bf16 %v4959_v52, %v4956_v48 }
 0x750   :  { %8206 = vrot.lane.b32.xlu1 %v8205_v34, %s8718_s22  ;;  %8201 = vrot.lane.b32.xlu0 %v8200_v63, %s8716_s16 }
 0x754   :  { %8211 = vrot.lane.b32.xlu1 %v8200_v63, %s8719_s23  ;;  %8216 = vrot.lane.b32.xlu0 %v8205_v34, %s8720_s26 }
 0x75b   :  { %v4694_v23 = vpop.f32.mrb[76].mxu0 }
 0x75c   :  { %v4695_v15 = vadd.f32 %v11600_v31, %v4694_v23  ;;  %v4696_v2 = vpop.f32.mrb[77].mxu0 }
 0x75d   :  { %v4697_v32 = vpop.f32.mrb[78].mxu0 }
 0x75e   :  { %v4739_v19 = vmax.f32 %v4695_v15, 0.0  ;;  %v4698_v20 = vadd.f32 %v11600_v31, %v4697_v32  ;;  %v4699_v53 = vpop.f32.mrb[79].mxu0 }
 0x760   :  { %v4792_v6 = vrot.slane %v4739_v19, 1  ;;  %v4824_v18 = vrot.slane %v4739_v19, 7  ;;  %v4856_v28 = vrot.slane %v4739_v19, 5  ;;  %v4740_v45 = vmax.f32 %v4698_v20, 0.0 }
 0x762   :  { %v11746_v39 = vsel %vm174_vm0, %v4792_v6, %v4824_v18  ;;  %v4904_v60 = vsel %vm174_vm0, %v4824_v18, %v4856_v28  ;;  %v4793_v59 = vrot.slane %v4740_v45, 1  ;;  %v4825_v26 = vrot.slane %v4740_v45, 7 }
 0x763   :  { %v4961_v44 = vrot.slane %v4904_v60, 1  ;;  %v5003_v27 = vrot.slane %v4904_v60, 2  ;;  %v4857_v17 = vrot.slane %v4740_v45, 5  ;;  %v8220_v9 = vpack.i.bf16 %v11746_v39, %v11715_v46 }
 0x764   :  { %v4889_v40 = vsel %vm174_vm0, %v4793_v59, %v4825_v26  ;;  %v4960_v36 = vrot.slane %v11746_v39, 1  ;;  %v5002_v43 = vrot.slane %v11746_v39, 2 }
 0x765   :  { %v4905_v13 = vsel %vm174_vm0, %v4825_v26, %v4857_v17  ;;  %8221 = vrot.lane.b32.xlu1 %v8220_v9, %s8717_s17  ;;  %v5030_v8 = vrot.slane %v4889_v40, 1  ;;  %v5036_v0 = vrot.slane %v4889_v40, 2  ;;  %v8225_v4 = vpack.i.bf16 %v4889_v40, %v11746_v39 }
 0x766   :  { %v5031_v38 = vrot.slane %v4905_v13, 1  ;;  %v5037_v3 = vrot.slane %v4905_v13, 2  ;;  %v11757_v47 = vsel %vm235_vm1, %v4960_v36, %v4961_v44  ;;  %v11760_v14 = vsel %vm278_vm2, %v5002_v43, %v5003_v27 }
 0x767   :  { %v8230_v24 = vpack.i.bf16 %v11757_v47, %v4959_v52 }
 0x768   :  { %v11767_v10 = vsel %vm235_vm1, %v5030_v8, %v5031_v38  ;;  %v11770_v5 = vsel %vm278_vm2, %v5036_v0, %v5037_v3 }
 0x769   :  { %8231 = vrot.lane.b32.xlu0 %v8230_v24, %s8721_s13  ;;  %8226 = vrot.lane.b32.xlu1 %v8225_v4, %s8715_s9  ;;  %v8235_v48 = vpack.i.bf16 %v11767_v10, %v11757_v47  ;;  %v8240_v41 = vpack.i.bf16 %v11770_v5, %v11760_v14 }
 0x76b   :  { %v4702_v52 = vpop.f32.mrb[80].mxu0 }
 0x76c   :  { %v4703_v34 = vadd.f32 %v11600_v31, %v4702_v52  ;;  %v4704_v63 = vpop.f32.mrb[81].mxu0 }
 0x76d   :  { %v4705_v23 = vpop.f32.mrb[82].mxu0  ;;  %8236 = vrot.lane.b32.xlu0 %v8235_v48, %s8719_s23  ;;  %8241 = vrot.lane.b32.xlu1 %v8240_v41, %s8720_s26 }
 0x76e   :  { %v4741_v15 = vmax.f32 %v4703_v34, 0.0  ;;  %v4706_v2 = vadd.f32 %v11600_v31, %v4705_v23  ;;  %v4707_v32 = vpop.f32.mrb[83].mxu0 }
 0x770   :  { %v4795_v19 = vrot.slane %v4741_v15, 1  ;;  %v4827_v20 = vrot.slane %v4741_v15, 7  ;;  %v4859_v53 = vrot.slane %v4741_v15, 5  ;;  %v4742_v6 = vmax.f32 %v4706_v2, 0.0 }
 0x772   :  { %v11785_v18 = vsel %vm174_vm0, %v4795_v19, %v4827_v20  ;;  %v4907_v28 = vsel %vm174_vm0, %v4827_v20, %v4859_v53  ;;  %v4794_v45 = vrot.slane %v4742_v6, 1  ;;  %v4826_v60 = vrot.slane %v4742_v6, 7 }
 0x773   :  { %v4858_v59 = vrot.slane %v4742_v6, 5  ;;  %v4710_v26 = vpop.f32.mrb[84].mxu0  ;;  %v4967_v44 = vrot.slane %v4907_v28, 1  ;;  %v4966_v0 = vrot.slane %v11785_v18, 1  ;;  %v5009_v41 = vrot.slane %v4907_v28, 2 }
 0x774   :  { %v11789_v27 = vsel %vm174_vm0, %v4794_v45, %v4826_v60  ;;  %v4711_v17 = vadd.f32 %v11600_v31, %v4710_v26  ;;  %v4712_v9 = vpop.f32.mrb[85].mxu0  ;;  %v5008_v34 = vrot.slane %v11785_v18, 2 }
 0x775   :  { %v4906_v36 = vsel %vm174_vm0, %v4826_v60, %v4858_v59  ;;  %v4713_v43 = vpop.f32.mrb[86].mxu0  ;;  %v8245_v13 = vpack.i.bf16 %v11789_v27, %v4889_v40  ;;  %v4963_v8 = vrot.slane %v11789_v27, 1  ;;  %v5005_v52 = vrot.slane %v11789_v27, 2 }
 0x776   :  { %v4964_v38 = vrot.slane %v4906_v36, 1  ;;  %v5006_v3 = vrot.slane %v4906_v36, 2  ;;  %v4743_v24 = vmax.f32 %v4711_v17, 0.0  ;;  %v4714_v4 = vadd.f32 %v11600_v31, %v4713_v43  ;;  %v4715_v48 = vpop.f32.mrb[87].mxu0 }
 0x777   :  { %8246 = vrot.lane.b32.xlu0 %v8245_v13, %s8717_s17  ;;  %v8250_v32 = vpack.i.bf16 %v11789_v27, %v11785_v18  ;;  %v4968_v28 = vsel %vm235_vm1, %v4966_v0, %v4967_v44  ;;  %v11814_v17 = vsel %vm278_vm2, %v5008_v34, %v5009_v41 }
 0x778   :  { %v4796_v63 = vrot.slane %v4743_v24, 1  ;;  %v4828_v23 = vrot.slane %v4743_v24, 7  ;;  %v4860_v40 = vrot.slane %v4743_v24, 5  ;;  %v4744_v15 = vmax.f32 %v4714_v4, 0.0 }
 0x779   :  { %v4965_v2 = vsel %vm235_vm1, %v4963_v8, %v4964_v38  ;;  %v11804_v19 = vsel %vm278_vm2, %v5005_v52, %v5006_v3 }
 0x77a   :  { %v4908_v20 = vsel %vm174_vm0, %v4828_v23, %v4860_v40  ;;  %v4797_v53 = vrot.slane %v4744_v15, 1  ;;  %v4829_v6 = vrot.slane %v4744_v15, 7  ;;  %v11809_v45 = vsel %vm174_vm0, %v4796_v63, %v4828_v23 }
 0x77b   :  { %v4861_v60 = vrot.slane %v4744_v15, 5  ;;  %v8255_v59 = vpack.i.bf16 %v4965_v2, %v11757_v47  ;;  %v4718_v26 = vpop.f32.mrb[88].mxu0  ;;  %8251 = vrot.lane.b32.xlu0 %v8250_v32, %s8715_s9  ;;  %v8265_v44 = vpack.i.bf16 %v4965_v2, %v11767_v10  ;;  %v8260_v13 = vpack.i.bf16 %v11804_v19, %v11760_v14 }
 0x77c   :  { %v11817_v9 = vsel %vm174_vm0, %v4797_v53, %v4829_v6  ;;  %v4719_v36 = vadd.f32 %v11600_v31, %v4718_v26  ;;  %v4720_v43 = vpop.f32.mrb[89].mxu0  ;;  %v4970_v8 = vrot.slane %v4908_v20, 1  ;;  %v8270_v38 = vpack.i.bf16 %v4965_v2, %v4968_v28 }
 0x77d   :  { %v4909_v47 = vsel %vm174_vm0, %v4829_v6, %v4861_v60  ;;  %8256 = vrot.lane.b32.xlu1 %v8255_v59, %s8716_s16  ;;  %v4721_v0 = vpop.f32.mrb[90].mxu0  ;;  %v8275_v3 = vpack.i.bf16 %v11804_v19, %v11814_v17  ;;  %v5012_v24 = vrot.slane %v4908_v20, 2  ;;  %v4969_v10 = vrot.slane %v11809_v45, 1 }
 0x77e   :  { %v4973_v4 = vrot.slane %v4909_v47, 1  ;;  %v4745_v48 = vmax.f32 %v4719_v36, 0.0  ;;  %v4722_v41 = vadd.f32 %v11600_v31, %v4721_v0  ;;  %v4723_v52 = vpop.f32.mrb[91].mxu0  ;;  %v4972_v34 = vrot.slane %v11817_v9, 1 }
 0x77f   :  { %8261 = vrot.lane.b32.xlu0 %v8260_v13, %s8718_s22  ;;  %v5011_v63 = vrot.slane %v11809_v45, 2  ;;  %v5015_v23 = vrot.slane %v4909_v47, 2  ;;  %v4971_v20 = vsel %vm235_vm1, %v4969_v10, %v4970_v8  ;;  %v5014_v6 = vrot.slane %v11817_v9, 2 }
 0x780   :  { %v4798_v40 = vrot.slane %v4745_v48, 1  ;;  %v4830_v15 = vrot.slane %v4745_v48, 7  ;;  %v4746_v2 = vmax.f32 %v4722_v41, 0.0  ;;  %v4862_v32 = vrot.slane %v4745_v48, 5 }
 0x781   :  { %8266 = vrot.lane.b32.xlu1 %v8265_v44, %s8721_s13  ;;  %v11835_v53 = vsel %vm235_vm1, %v4972_v34, %v4973_v4  ;;  %v11839_v60 = vsel %vm278_vm2, %v5011_v63, %v5012_v24  ;;  %v8290_v43 = vpack.i.bf16 %v4971_v20, %v4968_v28  ;;  %v11851_v0 = vsel %vm278_vm2, %v5014_v6, %v5015_v23 }
 0x782   :  { %v4799_v59 = vrot.slane %v4746_v2, 1  ;;  %v4831_v26 = vrot.slane %v4746_v2, 7  ;;  %v4863_v36 = vrot.slane %v4746_v2, 5  ;;  %v11843_v13 = vsel %vm174_vm0, %v4798_v40, %v4830_v15 }
 0x783   :  { %8276 = vrot.lane.b32.xlu0 %v8275_v3, %s8720_s26  ;;  %v8300_v44 = vpack.i.bf16 %v11835_v53, %v4971_v20  ;;  %v4910_v8 = vsel %vm174_vm0, %v4830_v15, %v4862_v32  ;;  %v8295_v47 = vpack.i.bf16 %v11839_v60, %v11814_v17  ;;  %v8280_v48 = vpack.i.bf16 %v11817_v9, %v11809_v45 }
 0x784   :  { %v11856_v28 = vsel %vm174_vm0, %v4799_v59, %v4831_v26  ;;  %v4911_v4 = vsel %vm174_vm0, %v4831_v26, %v4863_v36  ;;  %v5018_v52 = vrot.slane %v4910_v8, 2  ;;  %v5017_v34 = vrot.slane %v11843_v13, 2 }
 0x785   :  { %8271 = vrot.lane.b32.xlu1 %v8270_v38, %s8719_s23  ;;  %v4976_v63 = vrot.slane %v4910_v8, 1  ;;  %v4975_v15 = vrot.slane %v11843_v13, 1  ;;  %v4979_v2 = vrot.slane %v4911_v4, 1  ;;  %v4978_v20 = vrot.slane %v11856_v28, 1 }
 0x786   :  { %v5021_v6 = vrot.slane %v4911_v4, 2  ;;  %v5020_v26 = vrot.slane %v11856_v28, 2  ;;  %v11875_v8 = vsel %vm278_vm2, %v5017_v34, %v5018_v52 }
 0x787   :  { %8291 = vrot.lane.b32.xlu0 %v8290_v43, %s8716_s16  ;;  %v11863_v41 = vpop.permute.xlu0 %8126  ;;  %v8315_v43 = vpack.i.bf16 %v11856_v28, %v11843_v13  ;;  %v4977_v4 = vsel %vm235_vm1, %v4975_v15, %v4976_v63  ;;  %v11880_v62 = vsel %vm235_vm1, %v4978_v20, %v4979_v2  ;;  %v8330_v2 = vpack.i.bf16 %v11875_v8, %v11851_v0 }
 0x788   :  { %v4726_v24 = vpop.f32.mrb[92].mxu0  ;;  %v11885_v52 = vsel %vm278_vm2, %v5020_v26, %v5021_v6  ;;  %v8325_v20 = vpack.i.bf16 %v4977_v4, %v11835_v53 }
 0x789   :  { %v4727_v38 = vadd.f32 %v11600_v31, %v4726_v24  ;;  %v4728_v17 = vpop.f32.mrb[93].mxu0  ;;  %8281 = vrot.lane.b32.xlu1 %v8280_v48, %s8717_s17 }
 0x78a   :  { %v4729_v10 = vpop.f32.mrb[94].mxu0 }
 0x78b   :  { %v4730_v23 = vadd.f32 %v11600_v31, %v4729_v10  ;;  %v4731_v40 = vpop.f32.mrb[95].mxu0  ;;  %v4747_v32 = vmax.f32 %v4727_v38, 0.0  ;;  %8301 = vrot.lane.b32.xlu0 %v8300_v44, %s8721_s13  ;;  %v8137_v36 = vpop.permute.xlu1 %8136 }
 0x78c   :  { %v8132_v38 = vpop.permute.xlu0 %8131  ;;  %v8139_v55 = vunpack.i.h.bf16 %v8137_v36  ;;  %v8138_v3 = vunpack.i.l.bf16 %v8137_v36 }
 0x78d   :  { %v4748_v59 = vmax.f32 %v4730_v23, 0.0  ;;  %8286 = vrot.lane.b32.xlu1 %v8280_v48, %s8715_s9  ;;  %v4800_v10 = vrot.slane %v4747_v32, 1  ;;  %v4832_v23 = vrot.slane %v4747_v32, 7  ;;  %v4864_v40 = vrot.slane %v4747_v32, 5 }
 0x78e   :  { %v8134_v63 = vunpack.i.h.bf16 %v8132_v38  ;;  %v8133_v15 = vunpack.i.l.bf16 %v8132_v38  ;;  %v8335_v32 = vpack.i.bf16 %v11880_v62, %v4977_v4 }
 0x78f   :  { %v4801_v31 = vrot.slane %v4748_v59, 1  ;;  %v4833_v24 = vrot.slane %v4748_v59, 7  ;;  %v4865_v17 = vrot.slane %v4748_v59, 5  ;;  %8306 = vrot.lane.b32.xlu0 %v8300_v44, %s8719_s23  ;;  %v8345_v44 = vpack.i.bf16 %v11885_v52, %v11875_v8 }
 0x790   :  { %v11898_v6 = vsel %vm174_vm0, %v4800_v10, %v4832_v23  ;;  %v4912_v26 = vsel %vm174_vm0, %v4832_v23, %v4864_v40  ;;  %v5368_v4 = vsel %vm663_vm3, %v11612_v35, %v8133_v15  ;;  %v12963_v10 = vpack.i.bf16 %v11851_v0, %v11839_v60 }
 0x791   :  { %v4913_v29 = vsel %vm174_vm0, %v4833_v24, %v4865_v17  ;;  %v11888_v48 = vsel %vm174_vm0, %v4801_v31, %v4833_v24  ;;  %8296 = vrot.lane.b32.xlu1 %v8295_v47, %s8718_s22  ;;  %v4981_v47 = vrot.slane %v11898_v6, 1  ;;  %v4982_v36 = vrot.slane %v4912_v26, 1 }
 0x792   :  { %v5034_v34 = vrot.slane %v4913_v29, 1  ;;  %v5040_v59 = vrot.slane %v4913_v29, 2  ;;  %v5023_v29 = vrot.slane %v11898_v6, 2  ;;  %v5024_v31 = vrot.slane %v4912_v26, 2 }
 0x793   :  { %8316 = vrot.lane.b32.xlu0 %v8315_v43, %s8717_s17  ;;  %v5369_v24 = vsel %vm663_vm3, %v11608_v7, %v8134_v63  ;;  %v5033_v53 = vrot.slane %v11888_v48, 1  ;;  %v5039_v17 = vrot.slane %v11888_v48, 2  ;;  %v4983_v23 = vsel %vm235_vm1, %v4981_v47, %v4982_v36  ;;  %v8147_v7 = vpop.permute.xlu0 %8146 }
 0x794   :  { %v11918_v40 = vsel %vm278_vm2, %v5023_v29, %v5024_v31  ;;  %v8355_v26 = vpack.i.bf16 %v4983_v23, %v11880_v62  ;;  %v5383_v36 = vsel %vm678_vm4, %v5369_v24, %v8139_v55  ;;  %v5382_v31 = vsel %vm678_vm4, %v5368_v4, %v8138_v3 }
 0x795   :  { %8311 = vrot.lane.b32.xlu1 %v12963_v10, %s8720_s26  ;;  %v11923_v63 = vsel %vm235_vm1, %v5033_v53, %v5034_v34  ;;  %v8360_v35 = vpack.i.bf16 %v11918_v40, %v11885_v52  ;;  %v11929_v15 = vsel %vm278_vm2, %v5039_v17, %v5040_v59  ;;  %v8142_v10 = vpop.permute.xlu1 %8141  ;;  %v8129_v59 = vunpack.i.h.bf16 %v11863_v41 }
 0x796   :  { %v8365_v29 = vpack.i.bf16 %v11923_v63, %v4983_v23  ;;  %v8370_v47 = vpack.i.bf16 %v11929_v15, %v11918_v40  ;;  %v8128_v53 = vunpack.i.l.bf16 %v11863_v41  ;;  %v8143_v17 = vunpack.i.l.bf16 %v8142_v10 }
 0x797   :  { %8321 = vrot.lane.b32.xlu0 %v8315_v43, %s8715_s9  ;;  %v8144_v43 = vunpack.i.h.bf16 %v8142_v10  ;;  %v5397_v34 = vsel %vm693_vm5, %v5383_v36, %v8129_v59  ;;  %v8149_v21 = vunpack.i.h.bf16 %v8147_v7  ;;  %v8148_v55 = vunpack.i.l.bf16 %v8147_v7 }
 0x798   :  { %v5396_v38 = vsel %vm693_vm5, %v5382_v31, %v8128_v53 }
 0x799   :  { %8331 = vrot.lane.b32.xlu1 %v8330_v2, %s8718_s22  ;;  %v5412_v3 = vsel %vm710_vm6, %v5396_v38, %v8143_v17  ;;  %v5413_v41 = vsel %vm710_vm6, %v5397_v34, %v8144_v43 }
 0x79a   :  { %v5428_v10 = vsel %vm727_vm7, %v5412_v3, %v8148_v55  ;;  %v5429_v36 = vsel %vm727_vm7, %v5413_v41, %v8149_v21  ;;  %v8350_v21 = vpack.i.bf16 %v11888_v48, %v11898_v6 }
 0x79b   :  { %8326 = vrot.lane.b32.xlu0 %v8325_v20, %s8716_s16 }
 0x79d   :  { %8336 = vrot.lane.b32.xlu1 %v8335_v32, %s8721_s13 }
 0x79f   :  { %v8152_v62 = vpop.permute.xlu1 %8151  ;;  %8346 = vrot.lane.b32.xlu0 %v8345_v44, %s8720_s26 }
 0x7a0   :  { %v8154_v24 = vunpack.i.h.bf16 %v8152_v62  ;;  %v8153_v2 = vunpack.i.l.bf16 %v8152_v62 }
 0x7a1   :  { %8341 = vrot.lane.b32.xlu1 %v8335_v32, %s8719_s23  ;;  %v12964_v32 = vpack.c.bf16 %v11725_v33, %v11694_v22 }
 0x7a2   :  { %v5444_v7 = vsel %vm744_vm8, %v5428_v10, %v8153_v2  ;;  %v5445_v53 = vsel %vm744_vm8, %v5429_v36, %v8154_v24 }
 0x7a3   :  { %v8162_v4 = vpop.permute.xlu0 %8161  ;;  %5350 = vrot.lane.b32.xlu0 %v4983_v23, %s8721_s13 }
 0x7a4   :  { %v8164_v20 = vunpack.i.h.bf16 %v8162_v4  ;;  %v8163_v59 = vunpack.i.l.bf16 %v8162_v4  ;;  %v8157_v44 = vpop.permute.xlu1 %8156 }
 0x7a5   :  { %5308 = vrot.lane.b32.xlu1 %v11898_v6, %s8717_s17  ;;  %v8159_v3 = vunpack.i.h.bf16 %v8157_v44  ;;  %v8158_v41 = vunpack.i.l.bf16 %v8157_v44 }
 0x7a6   :  { %v5460_v38 = vsel %vm761_vm9, %v5444_v7, %v8163_v59  ;;  %v5461_v34 = vsel %vm761_vm9, %v5445_v53, %v8164_v20 }
 0x7a7   :  { %v5476_v62 = vpack.c.bf16 %v5461_v34, %v5460_v38  ;;  %8361 = vrot.lane.b32.xlu0 %v8360_v35, %s8718_s22  ;;  %v8172_v43 = vpop.permute.xlu0 %8171  ;;  %v5398_v4 = vsel %vm693_vm5, %v5382_v31, %v8158_v41 }
 0x7a8   :  { %v8167_v23 = vpop.permute.xlu1 %8166  ;;  %v8173_v55 = vunpack.i.l.bf16 %v8172_v43 }
 0x7a9   :  { %5609 = vmatmul.mubr.bf16.vlgmr.msra.gmra.mrb[64].mxu1 %v5476_v62  ;;  %8351 = vrot.lane.b32.xlu1 %v8350_v21, %s8715_s9  ;;  %v8168_v17 = vunpack.i.l.bf16 %v8167_v23 }
 0x7aa   :  { %6824 = vmatprep.mubr.msk.bf16.mxu1 %vm663_vm3, %v12964_v32 }
 0x7ab   :  { %8366 = vrot.lane.b32.xlu0 %v8365_v29, %s8719_s23  ;;  %v5370_v35 = vsel %vm663_vm3, %v11668_v56, %v8168_v17  ;;  %v8177_v22 = vpop.permute.xlu0 %8176  ;;  %v12965_v17 = vpack.c.bf16 %v11760_v14, %v11732_v25  ;;  %v8174_v25 = vunpack.i.h.bf16 %v8172_v43 }
 0x7ac   :  { %v5384_v33 = vsel %vm678_vm4, %v5370_v35, %v8173_v55  ;;  %v8179_v24 = vunpack.i.h.bf16 %v8177_v22  ;;  %v8178_v29 = vunpack.i.l.bf16 %v8177_v22  ;;  %v8182_v2 = vpop.permute.xlu1 %8181 }
 0x7ad   :  { %8356 = vrot.lane.b32.xlu1 %v8355_v26, %s8716_s16  ;;  %v5399_v26 = vsel %vm693_vm5, %v5384_v33, %v8159_v3  ;;  %v8184_v56 = vunpack.i.h.bf16 %v8182_v2  ;;  %v8183_v10 = vunpack.i.l.bf16 %v8182_v2  ;;  %v8169_v3 = vunpack.i.h.bf16 %v8167_v23 }
 0x7ae   :  { %v5415_v36 = vsel %vm710_vm6, %v5399_v26, %v8179_v24 }
 0x7af   :  { %5310 = vrot.lane.b32.xlu0 %v11888_v48, %s8717_s17  ;;  %v5431_v38 = vsel %vm727_vm7, %v5415_v36, %v8184_v56  ;;  %v5371_v26 = vsel %vm663_vm3, %v11675_v49, %v8169_v3  ;;  %v12966_v3 = vpack.c.bf16 %v11760_v14, %v11770_v5 }
 0x7b0   :  { %v5385_v23 = vsel %vm678_vm4, %v5371_v26, %v8174_v25 }
 0x7b1   :  { %8371 = vrot.lane.b32.xlu1 %v8370_v47, %s8720_s26  ;;  %v5414_v47 = vsel %vm710_vm6, %v5398_v4, %v8178_v29 }
 0x7b2   :  { %v5430_v53 = vsel %vm727_vm7, %v5414_v47, %v8183_v10 }
 0x7b5   :  { %5352 = vrot.lane.b32.xlu1 %v11923_v63, %s8721_s13 }
 0x7ba   :  { %v8187_v48 = vpop.permute.xlu0 %8186 }
 0x7bb   :  { %v8189_v20 = vunpack.i.h.bf16 %v8187_v48  ;;  %v8188_v59 = vunpack.i.l.bf16 %v8187_v48 }
 0x7bd   :  { %v5446_v44 = vsel %vm744_vm8, %v5430_v53, %v8188_v59  ;;  %v5447_v62 = vsel %vm744_vm8, %v5431_v38, %v8189_v20 }
 0x7be   :  { %v8197_v7 = vpop.permute.xlu1 %8196  ;;  %v8192_v35 = vpop.permute.xlu0 %8191 }
 0x7bf   :  { %v8199_v34 = vunpack.i.h.bf16 %v8197_v7  ;;  %v8198_v63 = vunpack.i.l.bf16 %v8197_v7  ;;  %v8194_v48 = vunpack.i.h.bf16 %v8192_v35  ;;  %v8193_v4 = vunpack.i.l.bf16 %v8192_v35 }
 0x7c1   :  { %v5462_v31 = vsel %vm761_vm9, %v5446_v44, %v8198_v63  ;;  %v5463_v21 = vsel %vm761_vm9, %v5447_v62, %v8199_v34 }
 0x7c2   :  { %v5478_v32 = vpack.c.bf16 %v5463_v21, %v5462_v31  ;;  %v8202_v55 = vpop.permute.xlu0 %8201  ;;  %v8207_v22 = vpop.permute.xlu1 %8206 }
 0x7c3   :  { %v8203_v33 = vunpack.i.l.bf16 %v8202_v55  ;;  %v8208_v24 = vunpack.i.l.bf16 %v8207_v22 }
 0x7c4   :  { %5617 = vmatmul.mubr.bf16.gmra.mrb[68].mxu1 %v5478_v32 }
 0x7c5   :  { %6825 = vmatprep.mubr.msk.bf16.mxu1 %vm663_vm3, %v12965_v17  ;;  %v5372_v41 = vsel %vm663_vm3, %v11709_v54, %v8203_v33  ;;  %v5400_v54 = vsel %vm693_vm5, %v5385_v23, %v8193_v4 }
 0x7c6   :  { %v8212_v29 = vpop.permute.xlu1 %8211  ;;  %v5386_v2 = vsel %vm678_vm4, %v5372_v41, %v8208_v24  ;;  %v8217_v47 = vpop.permute.xlu0 %8216 }
 0x7c7   :  { %v8214_v56 = vunpack.i.h.bf16 %v8212_v29  ;;  %v8213_v10 = vunpack.i.l.bf16 %v8212_v29  ;;  %v5401_v36 = vsel %vm693_vm5, %v5386_v2, %v8194_v48  ;;  %v8219_v59 = vunpack.i.h.bf16 %v8217_v47 }
 0x7c8   :  { %v8218_v7 = vunpack.i.l.bf16 %v8217_v47  ;;  %v8204_v2 = vunpack.i.h.bf16 %v8202_v55 }
 0x7c9   :  { %v5416_v53 = vsel %vm710_vm6, %v5400_v54, %v8213_v10  ;;  %v5417_v38 = vsel %vm710_vm6, %v5401_v36, %v8214_v56  ;;  %v8209_v10 = vunpack.i.h.bf16 %v8207_v22 }
 0x7ca   :  { %v5432_v43 = vsel %vm727_vm7, %v5416_v53, %v8218_v7  ;;  %v5433_v44 = vsel %vm727_vm7, %v5417_v38, %v8219_v59  ;;  %v5373_v4 = vsel %vm663_vm3, %v11715_v46, %v8204_v2 }
 0x7cb   :  { %v5387_v14 = vsel %vm678_vm4, %v5373_v4, %v8209_v10 }
 0x7d7   :  { %v8222_v20 = vpop.permute.xlu1 %8221 }
 0x7d8   :  { %v8224_v49 = vunpack.i.h.bf16 %v8222_v20  ;;  %v8223_v34 = vunpack.i.l.bf16 %v8222_v20 }
 0x7da   :  { %v5448_v21 = vsel %vm744_vm8, %v5432_v43, %v8223_v34  ;;  %v5449_v32 = vsel %vm744_vm8, %v5433_v44, %v8224_v49 }
 0x7db   :  { %v8232_v63 = vpop.permute.xlu0 %8231  ;;  %v8227_v41 = vpop.permute.xlu1 %8226 }
 0x7dc   :  { %v8234_v62 = vunpack.i.h.bf16 %v8232_v63  ;;  %v8233_v31 = vunpack.i.l.bf16 %v8232_v63  ;;  %v8228_v25 = vunpack.i.l.bf16 %v8227_v41  ;;  %v8229_v20 = vunpack.i.h.bf16 %v8227_v41 }
 0x7de   :  { %v5464_v17 = vsel %vm761_vm9, %v5448_v21, %v8233_v31  ;;  %v5465_v35 = vsel %vm761_vm9, %v5449_v32, %v8234_v62  ;;  %v5402_v54 = vsel %vm693_vm5, %v5387_v14, %v8228_v25 }
 0x7df   :  { %v5480_v33 = vpack.c.bf16 %v5465_v35, %v5464_v17  ;;  %v8237_v24 = vpop.permute.xlu0 %8236  ;;  %v8242_v26 = vpop.permute.xlu1 %8241 }
 0x7e0   :  { %v8238_v47 = vunpack.i.l.bf16 %v8237_v24  ;;  %v8243_v59 = vunpack.i.l.bf16 %v8242_v26  ;;  %v8239_v53 = vunpack.i.h.bf16 %v8237_v24  ;;  %v8244_v34 = vunpack.i.h.bf16 %v8242_v26 }
 0x7e1   :  { %5625 = vmatmul.mubr.bf16.gmra.mrb[72].mxu1 %v5480_v33 }
 0x7e2   :  { %6826 = vmatprep.mubr.msk.bf16.mxu1 %vm663_vm3, %v12966_v3  ;;  %v5418_v46 = vsel %vm710_vm6, %v5402_v54, %v8238_v47 }
 0x7e3   :  { %v5434_v21 = vsel %vm727_vm7, %v5418_v46, %v8243_v59 }
 0x7e9   :  { %v12013_v29 = vpop.permute.xlu0 %8246 }
 0x7ea   :  { %v8248_v22 = vunpack.i.l.bf16 %v12013_v29 }
 0x7ec   :  { %v5450_v35 = vsel %vm744_vm8, %v5434_v21, %v8248_v22 }
 0x7ed   :  { %v12015_v48 = vpop.permute.xlu0 %8251 }
 0x7ee   :  { %v8253_v10 = vunpack.i.l.bf16 %v12015_v48 }
 0x7ef   :  { %v8257_v56 = vpop.permute.xlu1 %8256 }
 0x7f0   :  { %v8258_v36 = vunpack.i.l.bf16 %v8257_v56 }
 0x7f1   :  { %v8262_v23 = vpop.permute.xlu0 %8261 }
 0x7f2   :  { %v8263_v5 = vunpack.i.l.bf16 %v8262_v23  ;;  %v5374_v55 = vsel %vm663_vm3, %v11746_v39, %v8258_v36  ;;  %v8259_v39 = vunpack.i.h.bf16 %v8257_v56  ;;  %v8264_v33 = vunpack.i.h.bf16 %v8262_v23 }
 0x7f3   :  { %v12023_v7 = vpop.permute.xlu1 %8266 }
 0x7f4   :  { %v5388_v38 = vsel %vm678_vm4, %v5374_v55, %v8263_v5  ;;  %v8268_v63 = vunpack.i.l.bf16 %v12023_v7  ;;  %v5375_v4 = vsel %vm663_vm3, %v11789_v27, %v8259_v39  ;;  %v8249_v55 = vunpack.i.h.bf16 %v12013_v29 }
 0x7f5   :  { %v5403_v43 = vsel %vm693_vm5, %v5388_v38, %v8229_v20  ;;  %v8277_v44 = vpop.permute.xlu0 %8276  ;;  %v5389_v56 = vsel %vm678_vm4, %v5375_v4, %v8264_v33 }
 0x7f6   :  { %v5419_v31 = vsel %vm710_vm6, %v5403_v43, %v8239_v53  ;;  %v5466_v24 = vsel %vm761_vm9, %v5450_v35, %v8268_v63  ;;  %v8278_v14 = vunpack.i.l.bf16 %v8277_v44  ;;  %v8254_v53 = vunpack.i.h.bf16 %v12015_v48 }
 0x7f7   :  { %v8272_v32 = vpop.permute.xlu1 %8271  ;;  %v5435_v17 = vsel %vm727_vm7, %v5419_v31, %v8244_v34  ;;  %v8279_v48 = vunpack.i.h.bf16 %v8277_v44 }
 0x7f8   :  { %v5451_v3 = vsel %vm744_vm8, %v5435_v17, %v8224_v49  ;;  %v12967_v49 = vpack.c.bf16 %v11839_v60, %v11804_v19  ;;  %v8273_v36 = vunpack.i.l.bf16 %v8272_v32  ;;  %v8274_v19 = vunpack.i.h.bf16 %v8272_v32 }
 0x7f9   :  { %v8292_v41 = vpop.permute.xlu0 %8291  ;;  %v5467_v2 = vsel %vm761_vm9, %v5451_v3, %v8234_v62  ;;  %v5404_v62 = vsel %vm693_vm5, %v5389_v56, %v8253_v10 }
 0x7fa   :  { %v5482_v26 = vpack.c.bf16 %v5467_v2, %v5466_v24  ;;  %v8294_v27 = vunpack.i.h.bf16 %v8292_v41  ;;  %v8293_v5 = vunpack.i.l.bf16 %v8292_v41  ;;  %v5420_v54 = vsel %vm710_vm6, %v5404_v62, %v8273_v36 }
 0x7fb   :  { %v12039_v25 = vpop.permute.xlu1 %8281  ;;  %v5436_v60 = vsel %vm727_vm7, %v5420_v54, %v8278_v14 }
 0x7fc   :  { %5633 = vmatmul.mubr.bf16.gmra.mrb[76].mxu1 %v5482_v26  ;;  %v5377_v38 = vsel %vm663_vm3, %v11809_v45, %v8294_v27  ;;  %v5376_v34 = vsel %vm663_vm3, %v11785_v18, %v8293_v5  ;;  %v8283_v18 = vunpack.i.l.bf16 %v12039_v25  ;;  %v5452_v2 = vsel %vm744_vm8, %v5436_v60, %v8249_v55 }
 0x7fd   :  { %v12043_v47 = vpop.permute.xlu0 %8301  ;;  %6827 = vmatprep.mubr.msk.bf16.mxu1 %vm663_vm3, %v12967_v49  ;;  %v8269_v26 = vunpack.i.h.bf16 %v12023_v7  ;;  %v8284_v7 = vunpack.i.h.bf16 %v12039_v25  ;;  %v12968_v25 = vpack.c.bf16 %v11875_v8, %v11851_v0 }
 0x7fe   :  { %v8303_v4 = vunpack.i.l.bf16 %v12043_v47 }
 0x7ff   :  { %v8287_v23 = vpop.permute.xlu1 %8286  ;;  %v5468_v27 = vsel %vm761_vm9, %v5452_v2, %v8269_v26 }
 0x800   :  { %v8289_v43 = vunpack.i.h.bf16 %v8287_v23  ;;  %v8288_v31 = vunpack.i.l.bf16 %v8287_v23 }
 0x801   :  { %v8307_v20 = vpop.permute.xlu0 %8306 }
 0x802   :  { %v8309_v32 = vunpack.i.h.bf16 %v8307_v20  ;;  %v8308_v17 = vunpack.i.l.bf16 %v8307_v20  ;;  %v5406_v44 = vsel %vm693_vm5, %v5389_v56, %v8288_v31 }
 0x803   :  { %v8297_v59 = vpop.permute.xlu1 %8296 }
 0x804   :  { %v8299_v46 = vunpack.i.h.bf16 %v8297_v59  ;;  %v8298_v22 = vunpack.i.l.bf16 %v8297_v59  ;;  %v5422_v49 = vsel %vm710_vm6, %v5406_v44, %v8308_v17 }
 0x805   :  { %v12058_v63 = vpop.permute.xlu0 %8316 }
 0x806   :  { %v5390_v21 = vsel %vm678_vm4, %v5376_v34, %v8298_v22  ;;  %v5391_v29 = vsel %vm678_vm4, %v5377_v38, %v8299_v46  ;;  %v8318_v56 = vunpack.i.l.bf16 %v12058_v63  ;;  %v8304_v46 = vunpack.i.h.bf16 %v12043_v47 }
 0x807   :  { %v5405_v39 = vsel %vm693_vm5, %v5390_v21, %v8254_v53  ;;  %v8312_v35 = vpop.permute.xlu1 %8311  ;;  %v5407_v45 = vsel %vm693_vm5, %v5391_v29, %v8289_v43 }
 0x808   :  { %v5421_v33 = vsel %vm710_vm6, %v5405_v39, %v8274_v19  ;;  %v8313_v3 = vunpack.i.l.bf16 %v8312_v35  ;;  %v8314_v10 = vunpack.i.h.bf16 %v8312_v35  ;;  %v5423_v36 = vsel %vm710_vm6, %v5407_v45, %v8309_v32 }
 0x809   :  { %v8322_v41 = vpop.permute.xlu0 %8321  ;;  %v5437_v24 = vsel %vm727_vm7, %v5421_v33, %v8279_v48 }
 0x80a   :  { %v5453_v23 = vsel %vm744_vm8, %v5437_v24, %v8283_v18  ;;  %v5438_v14 = vsel %vm727_vm7, %v5422_v49, %v8313_v3  ;;  %v5439_v59 = vsel %vm727_vm7, %v5423_v36, %v8314_v10  ;;  %v8323_v34 = vunpack.i.l.bf16 %v8322_v41 }
 0x80b   :  { %v8332_v62 = vpop.permute.xlu1 %8331  ;;  %v5469_v5 = vsel %vm761_vm9, %v5453_v23, %v8303_v4  ;;  %v5454_v38 = vsel %vm744_vm8, %v5438_v14, %v8284_v7  ;;  %v5455_v47 = vsel %vm744_vm8, %v5439_v59, %v8318_v56  ;;  %v8324_v29 = vunpack.i.h.bf16 %v8322_v41 }
 0x80c   :  { %v5484_v20 = vpack.c.bf16 %v5469_v5, %v5468_v27  ;;  %v8334_v22 = vunpack.i.h.bf16 %v8332_v62  ;;  %v8333_v19 = vunpack.i.l.bf16 %v8332_v62  ;;  %v5470_v0 = vsel %vm761_vm9, %v5454_v38, %v8304_v46 }
 0x80d   :  { %v8327_v54 = vpop.permute.xlu0 %8326  ;;  %v8319_v24 = vunpack.i.h.bf16 %v12058_v63  ;;  %v12969_v62 = vpack.c.bf16 %v11918_v40, %v11885_v52  ;;  %v12970_v59 = vpack.c.bf16 %v11918_v40, %v11929_v15 }
 0x80e   :  { %v8329_v55 = vunpack.i.h.bf16 %v8327_v54  ;;  %v8328_v53 = vunpack.i.l.bf16 %v8327_v54  ;;  %5641 = vmatmul.mubr.bf16.gmra.mrb[80].mxu1 %v5484_v20 }
 0x80f   :  { %v8337_v60 = vpop.permute.xlu1 %8336  ;;  %6828 = vmatprep.mubr.msk.bf16.mxu1 %vm663_vm3, %v12968_v25 }
 0x810   :  { %v8338_v43 = vunpack.i.l.bf16 %v8337_v60  ;;  %v5379_v31 = vsel %vm663_vm3, %v11843_v13, %v8329_v55  ;;  %v5378_v21 = vsel %vm663_vm3, %v11817_v9, %v8328_v53  ;;  %v8339_v49 = vunpack.i.h.bf16 %v8337_v60 }
 0x811   :  { %v5393_v48 = vsel %vm678_vm4, %v5379_v31, %v8334_v22  ;;  %v5392_v39 = vsel %vm678_vm4, %v5378_v21, %v8333_v19  ;;  %v8347_v32 = vpop.permute.xlu0 %8346 }
 0x812   :  { %v5408_v17 = vsel %vm693_vm5, %v5392_v39, %v8323_v34  ;;  %v5471_v8 = vsel %vm761_vm9, %v5455_v47, %v8338_v43  ;;  %v8349_v33 = vunpack.i.h.bf16 %v8347_v32  ;;  %v8348_v13 = vunpack.i.l.bf16 %v8347_v32 }
 0x813   :  { %v8342_v35 = vpop.permute.xlu1 %8341  ;;  %v5486_v45 = vpack.c.bf16 %v5471_v8, %v5470_v0  ;;  %v5409_v9 = vsel %vm693_vm5, %v5393_v48, %v8324_v29 }
 0x814   :  { %v8344_v3 = vunpack.i.h.bf16 %v8342_v35  ;;  %v8343_v18 = vunpack.i.l.bf16 %v8342_v35 }
 0x815   :  { %v5351_v41 = vpop.permute.xlu0 %5350 }
 0x816   :  { %v5424_v2 = vsel %vm710_vm6, %v5408_v17, %v8343_v18  ;;  %v5425_v26 = vsel %vm710_vm6, %v5409_v9, %v8344_v3  ;;  %5649 = vmatmul.mubr.bf16.gmra.mrb[84].mxu1 %v5486_v45 }
 0x817   :  { %v5440_v44 = vsel %vm727_vm7, %v5424_v2, %v8348_v13  ;;  %v5309_v4 = vpop.permute.xlu1 %5308  ;;  %v5441_v10 = vsel %vm727_vm7, %v5425_v26, %v8349_v33  ;;  %6829 = vmatprep.mubr.msk.bf16.mxu1 %vm663_vm3, %v12969_v62  ;;  %v12133_v13 = vld [vmem:[%s12917_s4 + $0x2] ss:$0 sm:$0xff] }
 0x818   :  { %v5457_v36 = vsel %vm744_vm8, %v5441_v10, %v5309_v4  ;;  %v5456_v63 = vsel %vm744_vm8, %v5440_v44, %v8319_v24 }
 0x819   :  { %v5472_v23 = vsel %vm761_vm9, %v5456_v63, %v8339_v49  ;;  %v5473_v14 = vsel %vm761_vm9, %v5457_v36, %v5351_v41  ;;  %v8362_v27 = vpop.permute.xlu0 %8361 }
 0x81a   :  { %v5488_v7 = vpack.c.bf16 %v5473_v14, %v5472_v23  ;;  %v8364_v55 = vunpack.i.h.bf16 %v8362_v27  ;;  %v8363_v53 = vunpack.i.l.bf16 %v8362_v27 }
 0x81b   :  { %v8352_v5 = vpop.permute.xlu1 %8351 }
 0x81c   :  { %v8354_v46 = vunpack.i.h.bf16 %v8352_v5  ;;  %v8353_v22 = vunpack.i.l.bf16 %v8352_v5 }
 0x81d   :  { %v8367_v52 = vpop.permute.xlu0 %8366 }
 0x81e   :  { %5657 = vmatmul.mubr.bf16.gmra.mrb[88].mxu1 %v5488_v7  ;;  %v8369_v43 = vunpack.i.h.bf16 %v8367_v52  ;;  %v8368_v25 = vunpack.i.l.bf16 %v8367_v52 }
 0x81f   :  { %v8357_v56 = vpop.permute.xlu1 %8356  ;;  %6830 = vmatprep.mubr.msk.bf16.mxu1 %vm663_vm3, %v12970_v59 }
 0x820   :  { %v8359_v20 = vunpack.i.h.bf16 %v8357_v56  ;;  %v8358_v54 = vunpack.i.l.bf16 %v8357_v56 }
 0x822   :  { %v5381_v19 = vsel %vm663_vm3, %v11898_v6, %v8359_v20  ;;  %v5380_v60 = vsel %vm663_vm3, %v11856_v28, %v8358_v54  ;;  %v5311_v28 = vpop.permute.xlu0 %5310 }
 0x823   :  { %v5394_v38 = vsel %vm678_vm4, %v5380_v60, %v8363_v53  ;;  %v5395_v34 = vsel %vm678_vm4, %v5381_v19, %v8364_v55  ;;  %v8372_v40 = vpop.permute.xlu1 %8371 }
 0x824   :  { %v5411_v15 = vsel %vm693_vm5, %v5395_v34, %v8354_v46  ;;  %v8374_v31 = vunpack.i.h.bf16 %v8372_v40  ;;  %v8373_v21 = vunpack.i.l.bf16 %v8372_v40  ;;  %v5410_v47 = vsel %vm693_vm5, %v5394_v38, %v8353_v22  ;;  %v8691_v40 = vld [vmem:[%s12918_s5 + $0x10] sm:$0xff]  }
 0x825   :  { %v5427_v29 = vsel %vm710_vm6, %v5411_v15, %v8369_v43  ;;  %v5426_v6 = vsel %vm710_vm6, %v5410_v47, %v8368_v25  ;;  %v8689_v43 = vld [vmem:[%s12918_s5] sm:$0xff]   ;;  %v8690_v25 = vld [vmem:[%s12918_s5 + $0x8] sm:$0xff]  }
 0x826   :  { %v5443_v48 = vsel %vm727_vm7, %v5427_v29, %v8374_v31  ;;  %v5442_v39 = vsel %vm727_vm7, %v5426_v6, %v8373_v21  ;;  %6515 = vmatpush1.bf16.msra.mxu0 %v8689_v43  ;;  %6858 = vmatpush1.bf16.msra.mxu1 %v8689_v43  ;;  %v8692_v31 = vld [vmem:[%s12918_s5 + $0x18] sm:$0xff]  }
 0x827   :  { %v5458_v32 = vsel %vm744_vm8, %v5442_v39, %v5311_v28  ;;  %v5353_v17 = vpop.permute.xlu1 %5352  ;;  %v5459_v0 = vsel %vm744_vm8, %v5443_v48, %v5309_v4  ;;  %6516 = vmatprep.subr.bf16.mxu0 %v12941_v11  ;;  %6850 = vmatprep.subr.bf16.mxu1 %v12941_v11  ;;  %v8693_v39 = vld [vmem:[%s12918_s5 + $0x20] sm:$0xff]  }
 0x828   :  { %v5474_v8 = vsel %vm761_vm9, %v5458_v32, %v5353_v17  ;;  %v5475_v35 = vsel %vm761_vm9, %v5459_v0, %v5351_v41 }
 0x829   :  { %v5490_v33 = vpack.c.bf16 %v5475_v35, %v5474_v8 }
 0x82a   :  { %6517 = vmatpush1.bf16.msra.mxu0 %v8690_v25  ;;  %6859 = vmatpush1.bf16.msra.mxu1 %v8690_v25 }
 0x82b   :  { %5665 = vmatmul.mubr.bf16.gmra.mrb[92].mxu1 %v5490_v33  ;;  %6518 = vmatprep.subr.bf16.mxu0 %v12941_v11 }
 0x82c   :  { %6851 = vmatprep.subr.bf16.mxu1 %v12941_v11 }
 0x82e   :  { %6519 = vmatpush1.bf16.msra.mxu0 %v8691_v40  ;;  %6860 = vmatpush1.bf16.msra.mxu1 %v8691_v40 }
 0x82f   :  { %6520 = vmatprep.subr.bf16.mxu0 %v12941_v11  ;;  %6852 = vmatprep.subr.bf16.mxu1 %v12941_v11 }
 0x832   :  { %6521 = vmatpush1.bf16.msra.mxu0 %v8692_v31  ;;  %6861 = vmatpush1.bf16.msra.mxu1 %v8692_v31 }
 0x833   :  { %6522 = vmatprep.subr.bf16.mxu0 %v12941_v11  ;;  %6853 = vmatprep.subr.bf16.mxu1 %v12941_v11 }
 0x836   :  { %6523 = vmatpush1.bf16.msra.mxu0 %v8693_v39  ;;  %6862 = vmatpush1.bf16.msra.mxu1 %v8693_v39 }
 0x837   :  { %6524 = vmatprep.subr.bf16.mxu0 %v12941_v11  ;;  %6854 = vmatprep.subr.bf16.mxu1 %v12941_v11 }
 0x87c   :  { %v5610_v45 = vpop.f32.mrb[64].mxu1 }
 0x87d   :  { %v5611_v9 = vadd.f32 %v12133_v13, %v5610_v45  ;;  %v5612_v3 = vpop.f32.mrb[65].mxu1 }
 0x87e   :  { %v5613_v18 = vpop.f32.mrb[66].mxu1 }
 0x87f   :  { %v5673_v24 = vadd.f32 %v5611_v9, %v10978_v1  ;;  %v5614_v2 = vadd.f32 %v12133_v13, %v5613_v18  ;;  %v5615_v26 = vpop.f32.mrb[67].mxu1 }
 0x881   :  { %v5725_v44 = vrot.slane %v5673_v24, 1  ;;  %v5757_v4 = vrot.slane %v5673_v24, 7  ;;  %v5789_v41 = vrot.slane %v5673_v24, 5  ;;  %v5674_v10 = vadd.f32 %v5614_v2, %v10988_v57 }
 0x883   :  { %v5837_v49 = vsel %vm174_vm0, %v5757_v4, %v5789_v41  ;;  %v5724_v36 = vrot.slane %v5674_v10, 1  ;;  %v5756_v62 = vrot.slane %v5674_v10, 7  ;;  %v5788_v63 = vrot.slane %v5674_v10, 5 }
 0x884   :  { %v5884_v23 = vrot.slane %v5837_v49, 1  ;;  %v5926_v14 = vrot.slane %v5837_v49, 2  ;;  %v12141_v27 = vsel %vm174_vm0, %v5725_v44, %v5757_v4 }
 0x885   :  { %v12144_v1 = vsel %vm174_vm0, %v5724_v36, %v5756_v62  ;;  %v5836_v5 = vsel %vm174_vm0, %v5756_v62, %v5788_v63  ;;  %v5883_v7 = vrot.slane %v12141_v27, 1  ;;  %v5925_v56 = vrot.slane %v12141_v27, 2  ;;  %v8695_v36 = vld [vmem:[%s12918_s5 + $0x30] sm:$0xff]  }
 0x886   :  { %v5881_v57 = vrot.slane %v5836_v5, 1  ;;  %v5923_v20 = vrot.slane %v5836_v5, 2  ;;  %v8375_v54 = vpack.i.bf16 %v12144_v1, %v12141_v27  ;;  %v5880_v59 = vrot.slane %v12144_v1, 1  ;;  %v8696_v5 = vld [vmem:[%s12918_s5 + $0x38] sm:$0xff]  }
 0x887   :  { %v5922_v52 = vrot.slane %v12144_v1, 2  ;;  %v5885_v53 = vsel %vm235_vm1, %v5883_v7, %v5884_v23  ;;  %v5927_v19 = vsel %vm278_vm2, %v5925_v56, %v5926_v14 }
 0x888   :  { %8376 = vrot.lane.b32.xlu0 %v8375_v54, %s8715_s9  ;;  %v12155_v55 = vsel %vm235_vm1, %v5880_v59, %v5881_v57  ;;  %v8697_v54 = vld [vmem:[%s12918_s5 + $0x40] sm:$0xff]  }
 0x889   :  { %v8380_v46 = vpack.i.bf16 %v5885_v53, %v12155_v55  ;;  %v12160_v22 = vsel %vm278_vm2, %v5922_v52, %v5923_v20  ;;  %v8390_v60 = vpack.i.bf16 %v12155_v55, %v5885_v53 }
 0x88a   :  { %v8385_v38 = vpack.i.bf16 %v5927_v19, %v12160_v22  ;;  %v8395_v34 = vpack.i.bf16 %v12160_v22, %v5927_v19 }
 0x88c   :  { %8381 = vrot.lane.b32.xlu0 %v8380_v46, %s8716_s16 }
 0x890   :  { %8386 = vrot.lane.b32.xlu0 %v8385_v38, %s8718_s22 }
 0x894   :  { %8391 = vrot.lane.b32.xlu0 %v8390_v60, %s8719_s23 }
 0x897   :  { %v5618_v15 = vpop.f32.mrb[68].mxu1 }
 0x898   :  { %v5619_v21 = vadd.f32 %v12133_v13, %v5618_v15  ;;  %v5620_v47 = vpop.f32.mrb[69].mxu1  ;;  %8396 = vrot.lane.b32.xlu0 %v8395_v34, %s8720_s26 }
 0x899   :  { %v5621_v29 = vpop.f32.mrb[70].mxu1 }
 0x89a   :  { %v5675_v6 = vadd.f32 %v5619_v21, %v11050_v58  ;;  %v5622_v48 = vadd.f32 %v12133_v13, %v5621_v29  ;;  %v5623_v28 = vpop.f32.mrb[71].mxu1 }
 0x89c   :  { %v5726_v32 = vrot.slane %v5675_v6, 1  ;;  %v5758_v17 = vrot.slane %v5675_v6, 7  ;;  %v5790_v0 = vrot.slane %v5675_v6, 5  ;;  %v5676_v8 = vadd.f32 %v5622_v48, %v11057_v16  ;;  %v8694_v16 = vld [vmem:[%s12918_s5 + $0x28] sm:$0xff]  }
 0x89d   :  { %6525 = vmatpush1.bf16.msra.mxu0 %v8694_v16  ;;  %6863 = vmatpush1.bf16.msra.mxu1 %v8694_v16 }
 0x89e   :  { %v12198_v58 = vsel %vm174_vm0, %v5726_v32, %v5758_v17  ;;  %v5838_v35 = vsel %vm174_vm0, %v5758_v17, %v5790_v0  ;;  %v5727_v33 = vrot.slane %v5676_v8, 1  ;;  %v5759_v45 = vrot.slane %v5676_v8, 7  ;;  %6526 = vmatprep.subr.bf16.mxu0 %v12941_v11  ;;  %6855 = vmatprep.subr.bf16.mxu1 %v12941_v11 }
 0x89f   :  { %v5929_v9 = vrot.slane %v5838_v35, 2  ;;  %v5791_v3 = vrot.slane %v5676_v8, 5  ;;  %v8400_v18 = vpack.i.bf16 %v12198_v58, %v12144_v1  ;;  %v5887_v24 = vrot.slane %v5838_v35, 1 }
 0x8a0   :  { %v12207_v2 = vsel %vm174_vm0, %v5727_v33, %v5759_v45  ;;  %v5928_v26 = vrot.slane %v12198_v58, 2  ;;  %v5886_v44 = vrot.slane %v12198_v58, 1 }
 0x8a1   :  { %v5839_v4 = vsel %vm174_vm0, %v5759_v45, %v5791_v3  ;;  %8401 = vrot.lane.b32.xlu0 %v8400_v18, %s8717_s17  ;;  %v8405_v49 = vpack.i.bf16 %v12207_v2, %v12198_v58  ;;  %v5889_v23 = vrot.slane %v12207_v2, 1  ;;  %6527 = vmatpush1.bf16.msra.mxu0 %v8695_v36  ;;  %v5931_v57 = vrot.slane %v12207_v2, 2 }
 0x8a2   :  { %v12216_v41 = vsel %vm278_vm2, %v5928_v26, %v5929_v9  ;;  %v5890_v62 = vrot.slane %v5839_v4, 1  ;;  %v12226_v63 = vsel %vm235_vm1, %v5886_v44, %v5887_v24  ;;  %6864 = vmatpush1.bf16.msra.mxu1 %v8695_v36  ;;  %v5932_v7 = vrot.slane %v5839_v4, 2  ;;  %6528 = vmatprep.subr.bf16.mxu0 %v12941_v11 }
 0x8a3   :  { %v6415_v10 = vpack.c.bf16 %v12216_v41, %v12160_v22  ;;  %v8410_v14 = vpack.i.bf16 %v12226_v63, %v12155_v55  ;;  %6856 = vmatprep.subr.bf16.mxu1 %v12941_v11 }
 0x8a4   :  { %v5891_v56 = vsel %vm235_vm1, %v5889_v23, %v5890_v62  ;;  %v12248_v59 = vsel %vm278_vm2, %v5931_v57, %v5932_v7 }
 0x8a5   :  { %6841 = vmatprep.mubr.msk.bf16.mxu0 %vm663_vm3, %v6415_v10  ;;  %8406 = vrot.lane.b32.xlu0 %v8405_v49, %s8715_s9  ;;  %v8415_v20 = vpack.i.bf16 %v5891_v56, %v12226_v63  ;;  %v8420_v52 = vpack.i.bf16 %v12248_v59, %v12216_v41 }
 0x8a6   :  { %6529 = vmatpush1.bf16.msra.mxu0 %v8696_v5  ;;  %6865 = vmatpush1.bf16.msra.mxu1 %v8696_v5 }
 0x8a7   :  { %6530 = vmatprep.subr.bf16.mxu0 %v12941_v11  ;;  %6857 = vmatprep.subr.bf16.mxu1 %v12941_v11 }
 0x8a9   :  { %8411 = vrot.lane.b32.xlu0 %v8410_v14, %s8721_s13 }
 0x8aa   :  { %6531 = vmatpush1.bf16.msra.mxu0 %v8697_v54  ;;  %6866 = vmatpush1.bf16.msra.mxu1 %v8697_v54 }
 0x8ad   :  { %8416 = vrot.lane.b32.xlu0 %v8415_v20, %s8719_s23 }
 0x8b1   :  { %8421 = vrot.lane.b32.xlu0 %v8420_v52, %s8720_s26 }
 0x8b4   :  { %v5626_v55 = vpop.f32.mrb[72].mxu1 }
 0x8b5   :  { %v5627_v53 = vadd.f32 %v12133_v13, %v5626_v55  ;;  %v5628_v46 = vpop.f32.mrb[73].mxu1 }
 0x8b6   :  { %v5629_v22 = vpop.f32.mrb[74].mxu1 }
 0x8b7   :  { %v5677_v19 = vadd.f32 %v5627_v53, %v11106_v50  ;;  %v5630_v60 = vadd.f32 %v12133_v13, %v5629_v22  ;;  %v5631_v38 = vpop.f32.mrb[75].mxu1 }
 0x8b9   :  { %v5728_v11 = vrot.slane %v5677_v19, 1  ;;  %v5760_v34 = vrot.slane %v5677_v19, 7  ;;  %v5792_v43 = vrot.slane %v5677_v19, 5  ;;  %v5678_v25 = vadd.f32 %v5630_v60, %v11113_v30 }
 0x8bb   :  { %v12261_v40 = vsel %vm174_vm0, %v5728_v11, %v5760_v34  ;;  %v5840_v15 = vsel %vm174_vm0, %v5760_v34, %v5792_v43  ;;  %v5729_v31 = vrot.slane %v5678_v25, 1  ;;  %v5761_v21 = vrot.slane %v5678_v25, 7 }
 0x8bc   :  { %v5893_v47 = vrot.slane %v5840_v15, 1  ;;  %v5935_v29 = vrot.slane %v5840_v15, 2  ;;  %v5793_v6 = vrot.slane %v5678_v25, 5  ;;  %v8425_v50 = vpack.i.bf16 %v12261_v40, %v12207_v2 }
 0x8bd   :  { %v12267_v48 = vsel %vm174_vm0, %v5729_v31, %v5761_v21  ;;  %v5892_v28 = vrot.slane %v12261_v40, 1  ;;  %v5934_v30 = vrot.slane %v12261_v40, 2 }
 0x8be   :  { %v5841_v39 = vsel %vm174_vm0, %v5761_v21, %v5793_v6  ;;  %8426 = vrot.lane.b32.xlu0 %v8425_v50, %s8717_s17  ;;  %v8430_v32 = vpack.i.bf16 %v12267_v48, %v12261_v40  ;;  %v5895_v17 = vrot.slane %v12267_v48, 1  ;;  %v5937_v0 = vrot.slane %v12267_v48, 2 }
 0x8bf   :  { %v5896_v8 = vrot.slane %v5841_v39, 1  ;;  %v5938_v35 = vrot.slane %v5841_v39, 2  ;;  %v5894_v33 = vsel %vm235_vm1, %v5892_v28, %v5893_v47  ;;  %v12279_v45 = vsel %vm278_vm2, %v5934_v30, %v5935_v29 }
 0x8c0   :  { %v8435_v9 = vpack.i.bf16 %v5894_v33, %v5891_v56  ;;  %v8445_v3 = vpack.i.bf16 %v12279_v45, %v12248_v59  ;;  %v6417_v18 = vpack.c.bf16 %v12279_v45, %v12248_v59 }
 0x8c1   :  { %v5897_v16 = vsel %vm235_vm1, %v5895_v17, %v5896_v8  ;;  %v12287_v24 = vsel %vm278_vm2, %v5937_v0, %v5938_v35 }
 0x8c2   :  { %8431 = vrot.lane.b32.xlu0 %v8430_v32, %s8715_s9  ;;  %v8450_v26 = vpack.i.bf16 %v5897_v16, %v5894_v33  ;;  %v8455_v44 = vpack.i.bf16 %v12287_v24, %v12279_v45 }
 0x8c6   :  { %8436 = vrot.lane.b32.xlu0 %v8435_v9, %s8721_s13 }
 0x8ca   :  { %8441 = vrot.lane.b32.xlu0 %v8435_v9, %s8716_s16 }
 0x8ce   :  { %8446 = vrot.lane.b32.xlu0 %v8445_v3, %s8718_s22 }
 0x8cf   :  { %v5634_v4 = vpop.f32.mrb[76].mxu1 }
 0x8d0   :  { %v5635_v10 = vadd.f32 %v12133_v13, %v5634_v4  ;;  %v5636_v49 = vpop.f32.mrb[77].mxu1 }
 0x8d1   :  { %v5637_v36 = vpop.f32.mrb[78].mxu1 }
 0x8d2   :  { %v5679_v62 = vadd.f32 %v5635_v10, %v11155_v51  ;;  %v5638_v23 = vadd.f32 %v12133_v13, %v5637_v36  ;;  %v5639_v14 = vpop.f32.mrb[79].mxu1  ;;  %8451 = vrot.lane.b32.xlu0 %v8450_v26, %s8719_s23 }
 0x8d4   :  { %v5730_v5 = vrot.slane %v5679_v62, 1  ;;  %v5762_v7 = vrot.slane %v5679_v62, 7  ;;  %v5794_v56 = vrot.slane %v5679_v62, 5  ;;  %v5680_v57 = vadd.f32 %v5638_v23, %v11162_v37 }
 0x8d6   :  { %v12301_v20 = vsel %vm174_vm0, %v5730_v5, %v5762_v7  ;;  %v5842_v54 = vsel %vm174_vm0, %v5762_v7, %v5794_v56  ;;  %v5731_v52 = vrot.slane %v5680_v57, 1  ;;  %v5763_v55 = vrot.slane %v5680_v57, 7  ;;  %8456 = vrot.lane.b32.xlu0 %v8455_v44, %s8720_s26 }
 0x8d7   :  { %v5899_v51 = vrot.slane %v5842_v54, 1  ;;  %v5941_v53 = vrot.slane %v5842_v54, 2  ;;  %v5795_v46 = vrot.slane %v5680_v57, 5  ;;  %v8460_v22 = vpack.i.bf16 %v12301_v20, %v12267_v48 }
 0x8d8   :  { %v5898_v19 = vrot.slane %v12301_v20, 1  ;;  %v5940_v60 = vrot.slane %v12301_v20, 2  ;;  %v12310_v37 = vsel %vm174_vm0, %v5731_v52, %v5763_v55 }
 0x8d9   :  { %v5843_v38 = vsel %vm174_vm0, %v5763_v55, %v5795_v46  ;;  %v5968_v11 = vrot.slane %v12310_v37, 1  ;;  %v5974_v34 = vrot.slane %v12310_v37, 2 }
 0x8da   :  { %v5969_v43 = vrot.slane %v5843_v38, 1  ;;  %v5975_v25 = vrot.slane %v5843_v38, 2  ;;  %8461 = vrot.lane.b32.xlu0 %v8460_v22, %s8717_s17  ;;  %v12317_v15 = vsel %vm235_vm1, %v5898_v19, %v5899_v51  ;;  %v12320_v31 = vsel %vm278_vm2, %v5940_v60, %v5941_v53 }
 0x8db   :  { %v12323_v21 = vpack.i.bf16 %v12317_v15, %v5897_v16  ;;  %v8520_v47 = vpack.i.bf16 %v12320_v31, %v12287_v24  ;;  %v6419_v29 = vpack.c.bf16 %v12320_v31, %v12287_v24 }
 0x8dc   :  { %v12330_v6 = vsel %vm235_vm1, %v5968_v11, %v5969_v43  ;;  %v12333_v50 = vsel %vm278_vm2, %v5974_v34, %v5975_v25 }
 0x8dd   :  { %v8530_v28 = vpack.i.bf16 %v12330_v6, %v12317_v15  ;;  %v8535_v30 = vpack.i.bf16 %v12333_v50, %v12320_v31  ;;  %v6421_v39 = vpack.c.bf16 %v12320_v31, %v12333_v50 }
 0x8de   :  { %8466 = vrot.lane.b32.xlu0 %v12323_v21, %s8721_s13 }
 0x8e1   :  { %v5642_v32 = vpop.f32.mrb[80].mxu1 }
 0x8e2   :  { %v5643_v17 = vadd.f32 %v12133_v13, %v5642_v32  ;;  %v5644_v0 = vpop.f32.mrb[81].mxu1 }
 0x8e3   :  { %v5645_v8 = vpop.f32.mrb[82].mxu1 }
 0x8e4   :  { %v5681_v35 = vadd.f32 %v5643_v17, %v11206_v42  ;;  %v5646_v33 = vadd.f32 %v12133_v13, %v5645_v8  ;;  %v5647_v9 = vpop.f32.mrb[83].mxu1  ;;  %v12971_v17 = vld [vmem:[#allocation6_spill] sm:$0xff] }
 0x8e6   :  { %v5733_v3 = vrot.slane %v5681_v35, 1  ;;  %v5765_v16 = vrot.slane %v5681_v35, 7  ;;  %v5797_v26 = vrot.slane %v5681_v35, 5  ;;  %v5682_v44 = vadd.f32 %v5646_v33, %v11210_v12 }
 0x8e8   :  { %v5845_v4 = vsel %vm174_vm0, %v5765_v16, %v5797_v26  ;;  %v5732_v10 = vrot.slane %v5682_v44, 1  ;;  %v5764_v49 = vrot.slane %v5682_v44, 7  ;;  %v5796_v36 = vrot.slane %v5682_v44, 5 }
 0x8e9   :  { %v5905_v62 = vrot.slane %v5845_v4, 1  ;;  %v5947_v23 = vrot.slane %v5845_v4, 2  ;;  %v5650_v14 = vpop.f32.mrb[84].mxu1  ;;  %v12349_v5 = vsel %vm174_vm0, %v5733_v3, %v5765_v16 }
 0x8ea   :  { %v12352_v42 = vsel %vm174_vm0, %v5732_v10, %v5764_v49  ;;  %v5844_v7 = vsel %vm174_vm0, %v5764_v49, %v5796_v36  ;;  %v5651_v56 = vadd.f32 %v12133_v13, %v5650_v14  ;;  %v5652_v57 = vpop.f32.mrb[85].mxu1  ;;  %v5904_v12 = vrot.slane %v12349_v5, 1 }
 0x8eb   :  { %v5902_v54 = vrot.slane %v5844_v7, 1  ;;  %v5944_v52 = vrot.slane %v5844_v7, 2  ;;  %v5653_v55 = vpop.f32.mrb[86].mxu1  ;;  %v8470_v51 = vpack.i.bf16 %v12352_v42, %v12349_v5  ;;  %v5901_v53 = vrot.slane %v12352_v42, 1 }
 0x8ec   :  { %v5683_v46 = vadd.f32 %v5651_v56, %v11229_v61  ;;  %v5654_v22 = vadd.f32 %v12133_v13, %v5653_v55  ;;  %v5655_v19 = vpop.f32.mrb[87].mxu1  ;;  %v5943_v60 = vrot.slane %v12352_v42, 2  ;;  %v5906_v11 = vsel %vm235_vm1, %v5904_v12, %v5905_v62 }
 0x8ed   :  { %8471 = vrot.lane.b32.xlu1 %v8470_v51, %s8715_s9  ;;  %v12365_v38 = vsel %vm235_vm1, %v5901_v53, %v5902_v54  ;;  %v5946_v34 = vrot.slane %v12349_v5, 2  ;;  %v12972_v51 = vld [vmem:[#allocation2_spill] sm:$0xff] }
 0x8ee   :  { %v5734_v43 = vrot.slane %v5683_v46, 1  ;;  %v5766_v25 = vrot.slane %v5683_v46, 7  ;;  %v5798_v32 = vrot.slane %v5683_v46, 5  ;;  %v5684_v0 = vadd.f32 %v5654_v22, %v12971_v17  ;;  %v12973_v17 = vld [vmem:[#allocation3_spill] sm:$0xff] }
 0x8ef   :  { %v8475_v61 = vpack.i.bf16 %v5906_v11, %v12365_v38  ;;  %v5945_v8 = vsel %vm278_vm2, %v5943_v60, %v5944_v52  ;;  %v5948_v35 = vsel %vm278_vm2, %v5946_v34, %v5947_v23  ;;  %v8485_v33 = vpack.i.bf16 %v12365_v38, %v5906_v11 }
 0x8f0   :  { %v12375_v9 = vsel %vm174_vm0, %v5734_v43, %v5766_v25  ;;  %v5846_v3 = vsel %vm174_vm0, %v5766_v25, %v5798_v32  ;;  %v5735_v16 = vrot.slane %v5684_v0, 1  ;;  %v5767_v26 = vrot.slane %v5684_v0, 7 }
 0x8f1   :  { %v5908_v44 = vrot.slane %v5846_v3, 1  ;;  %v5950_v4 = vrot.slane %v5846_v3, 2  ;;  %v5799_v10 = vrot.slane %v5684_v0, 5  ;;  %v5658_v49 = vpop.f32.mrb[88].mxu1  ;;  %8476 = vrot.lane.b32.xlu1 %v8475_v61, %s8716_s16  ;;  %v8480_v36 = vpack.i.bf16 %v5948_v35, %v5945_v8 }
 0x8f2   :  { %v12380_v62 = vsel %vm174_vm0, %v5735_v16, %v5767_v26  ;;  %v5659_v23 = vadd.f32 %v12133_v13, %v5658_v49  ;;  %v5660_v14 = vpop.f32.mrb[89].mxu1  ;;  %v5949_v7 = vrot.slane %v12375_v9, 2  ;;  %v5907_v56 = vrot.slane %v12375_v9, 1 }
 0x8f3   :  { %v5847_v57 = vsel %vm174_vm0, %v5767_v26, %v5799_v10  ;;  %v5661_v12 = vpop.f32.mrb[90].mxu1  ;;  %v8490_v54 = vpack.i.bf16 %v5945_v8, %v5948_v35  ;;  %v5910_v11 = vrot.slane %v12380_v62, 1  ;;  %v5952_v34 = vrot.slane %v12380_v62, 2 }
 0x8f4   :  { %v5911_v52 = vrot.slane %v5847_v57, 1  ;;  %v5953_v55 = vrot.slane %v5847_v57, 2  ;;  %v5685_v53 = vadd.f32 %v5659_v23, %v12972_v51  ;;  %v5662_v46 = vadd.f32 %v12133_v13, %v5661_v12  ;;  %v5663_v22 = vpop.f32.mrb[91].mxu1 }
 0x8f5   :  { %8481 = vrot.lane.b32.xlu1 %v8480_v36, %s8718_s22  ;;  %v12390_v19 = vsel %vm278_vm2, %v5949_v7, %v5950_v4  ;;  %v12393_v60 = vsel %vm235_vm1, %v5907_v56, %v5908_v44  ;;  %v8495_v51 = vpack.i.bf16 %v12375_v9, %v12352_v42 }
 0x8f6   :  { %v5736_v43 = vrot.slane %v5685_v53, 1  ;;  %v5768_v25 = vrot.slane %v5685_v53, 7  ;;  %v5800_v32 = vrot.slane %v5685_v53, 5  ;;  %v5686_v0 = vadd.f32 %v5662_v46, %v12973_v17 }
 0x8f7   :  { %v6423_v35 = vpack.c.bf16 %v12390_v19, %v5945_v8  ;;  %v8510_v3 = vpack.i.bf16 %v12393_v60, %v12226_v63  ;;  %v8505_v10 = vpack.i.bf16 %v12393_v60, %v12365_v38  ;;  %v12415_v63 = vsel %vm235_vm1, %v5910_v11, %v5911_v52 }
 0x8f8   :  { %v5848_v16 = vsel %vm174_vm0, %v5768_v25, %v5800_v32  ;;  %v5737_v26 = vrot.slane %v5686_v0, 1  ;;  %v5769_v44 = vrot.slane %v5686_v0, 7  ;;  %v5801_v4 = vrot.slane %v5686_v0, 5 }
 0x8f9   :  { %6845 = vmatprep.mubr.msk.bf16.mxu1 %vm663_vm3, %v6423_v35  ;;  %8511 = vrot.lane.b32.xlu0 %v8510_v3, %s8716_s16  ;;  %v12409_v49 = vsel %vm174_vm0, %v5736_v43, %v5768_v25  ;;  %v12418_v36 = vsel %vm278_vm2, %v5952_v34, %v5953_v55  ;;  %v5914_v23 = vrot.slane %v5848_v16, 1  ;;  %v8545_v14 = vpack.i.bf16 %v12415_v63, %v12393_v60  ;;  %v12974_v43 = vld [vmem:[#allocation4_spill] sm:$0xff] }
 0x8fa   :  { %v12398_v61 = vpop.permute.xlu0 %8376  ;;  %8486 = vrot.lane.b32.xlu1 %v8485_v33, %s8719_s23  ;;  %v12423_v7 = vsel %vm174_vm0, %v5737_v26, %v5769_v44  ;;  %v5849_v38 = vsel %vm174_vm0, %v5769_v44, %v5801_v4  ;;  %v8550_v33 = vpack.i.bf16 %v12418_v36, %v12390_v19  ;;  %v5913_v57 = vrot.slane %v12409_v49, 1 }
 0x8fb   :  { %v5956_v12 = vrot.slane %v5848_v16, 2  ;;  %v5917_v53 = vrot.slane %v5849_v38, 1  ;;  %v5916_v34 = vrot.slane %v12423_v7, 1  ;;  %v8525_v0 = vpack.i.bf16 %v12310_v37, %v12301_v20  ;;  %v12975_v16 = vld [vmem:[#allocation5_spill] sm:$0xff] }
 0x8fc   :  { %v12438_v11 = vsel %vm235_vm1, %v5913_v57, %v5914_v23  ;;  %v5959_v44 = vrot.slane %v5849_v38, 2  ;;  %v8540_v15 = vpack.i.bf16 %v12390_v19, %v12216_v41 }
 0x8fd   :  { %8516 = vrot.lane.b32.xlu0 %v12323_v21, %s8716_s16  ;;  %v5955_v21 = vrot.slane %v12409_v49, 2  ;;  %v12446_v17 = vpack.i.bf16 %v12438_v11, %v12415_v63 }
 0x8fe   :  { %v12412_v8 = vpop.permute.xlu0 %8381  ;;  %v5666_v56 = vpop.f32.mrb[92].mxu1  ;;  %8491 = vrot.lane.b32.xlu1 %v8490_v54, %s8720_s26 }
 0x8ff   :  { %v5667_v52 = vadd.f32 %v12133_v13, %v5666_v56  ;;  %v5668_v55 = vpop.f32.mrb[93].mxu1  ;;  %v12459_v23 = vsel %vm278_vm2, %v5955_v21, %v5956_v12  ;;  %v12462_v56 = vsel %vm235_vm1, %v5916_v34, %v5917_v53 }
 0x900   :  { %v5669_v46 = vpop.f32.mrb[94].mxu1  ;;  %v5958_v55 = vrot.slane %v12423_v7, 2  ;;  %v8575_v12 = vpack.i.bf16 %v12459_v23, %v12418_v36  ;;  %v8580_v53 = vpack.i.bf16 %v12462_v56, %v12438_v11 }
 0x901   :  { %v5687_v25 = vadd.f32 %v5667_v52, %v12974_v43  ;;  %v5670_v54 = vadd.f32 %v12133_v13, %v5669_v46  ;;  %v5671_v32 = vpop.f32.mrb[95].mxu1  ;;  %8521 = vrot.lane.b32.xlu0 %v8520_v47, %s8718_s22  ;;  %v8500_v13 = vpack.i.bf16 %v12380_v62, %v12375_v9 }
 0x902   :  { %v12435_v22 = vpop.permute.xlu0 %8386  ;;  %8496 = vrot.lane.b32.xlu1 %v8495_v51, %s8717_s17 }
 0x903   :  { %v5770_v35 = vrot.slane %v5687_v25, 7  ;;  %v5802_v3 = vrot.slane %v5687_v25, 5  ;;  %v5688_v26 = vadd.f32 %v5670_v54, %v12975_v16  ;;  %v5738_v4 = vrot.slane %v5687_v25, 1 }
 0x905   :  { %v5850_v47 = vsel %vm174_vm0, %v5770_v35, %v5802_v3  ;;  %v5739_v57 = vrot.slane %v5688_v26, 1  ;;  %v5771_v52 = vrot.slane %v5688_v26, 7  ;;  %v5803_v46 = vrot.slane %v5688_v26, 5  ;;  %8526 = vrot.lane.b32.xlu0 %v8525_v0, %s8715_s9 }
 0x906   :  { %v12467_v51 = vpop.permute.xlu0 %8391  ;;  %8501 = vrot.lane.b32.xlu1 %v8500_v13, %s8715_s9  ;;  %v12478_v21 = vsel %vm174_vm0, %v5738_v4, %v5770_v35  ;;  %v5920_v34 = vrot.slane %v5850_v47, 1  ;;  %v5962_v54 = vrot.slane %v5850_v47, 2  ;;  %v12484_v3 = vsel %vm278_vm2, %v5958_v55, %v5959_v44 }
 0x907   :  { %v12471_v38 = vsel %vm174_vm0, %v5739_v57, %v5771_v52  ;;  %v5851_v43 = vsel %vm174_vm0, %v5771_v52, %v5803_v46  ;;  %v8585_v35 = vpack.i.bf16 %v12484_v3, %v12459_v23  ;;  %v5919_v16 = vrot.slane %v12478_v21, 1 }
 0x908   :  { %v8625_v25 = vpack.i.bf16 %v12471_v38, %v12310_v37  ;;  %v5972_v32 = vrot.slane %v5851_v43, 1  ;;  %v5978_v0 = vrot.slane %v5851_v43, 2  ;;  %v5961_v37 = vrot.slane %v12478_v21, 2 }
 0x909   :  { %8531 = vrot.lane.b32.xlu0 %v8530_v28, %s8719_s23  ;;  %v5971_v26 = vrot.slane %v12471_v38, 1  ;;  %v5977_v13 = vrot.slane %v12471_v38, 2  ;;  %v8384_v44 = vunpack.i.h.bf16 %v12412_v8  ;;  %v8383_v4 = vunpack.i.l.bf16 %v12412_v8 }
 0x90a   :  { %8506 = vrot.lane.b32.xlu1 %v8505_v10, %s8721_s13  ;;  %v8397_v28 = vpop.permute.xlu0 %8396  ;;  %v6425_v47 = vpack.c.bf16 %v12459_v23, %v12418_v36  ;;  %v12504_v10 = vsel %vm235_vm1, %v5919_v16, %v5920_v34  ;;  %v12507_v57 = vsel %vm278_vm2, %v5961_v37, %v5962_v54  ;;  %v8379_v37 = vunpack.i.h.bf16 %v12398_v61 }
 0x90b   :  { %v12510_v52 = vsel %vm235_vm1, %v5971_v26, %v5972_v32  ;;  %v12513_v55 = vsel %vm278_vm2, %v5977_v13, %v5978_v0  ;;  %v8600_v41 = vpack.i.bf16 %v12504_v10, %v12462_v56  ;;  %v8610_v8 = vpack.i.bf16 %v12507_v57, %v12484_v3 }
 0x90c   :  { %v8615_v46 = vpack.i.bf16 %v12510_v52, %v12504_v10  ;;  %v8620_v34 = vpack.i.bf16 %v12513_v55, %v12507_v57  ;;  %v8630_v43 = vpack.i.bf16 %v12510_v52, %v12330_v6  ;;  %v8389_v32 = vunpack.i.h.bf16 %v12435_v22 }
 0x90d   :  { %8536 = vrot.lane.b32.xlu0 %v8535_v30, %s8720_s26  ;;  %v6427_v30 = vpack.c.bf16 %v12507_v57, %v12484_v3  ;;  %v8388_v0 = vunpack.i.l.bf16 %v12435_v22  ;;  %v6307_v26 = vsel %vm663_vm3, %v12141_v27, %v8384_v44  ;;  %v6306_v6 = vsel %vm663_vm3, %v12144_v1, %v8383_v4 }
 0x90e   :  { %8541 = vrot.lane.b32.xlu1 %v8540_v15, %s8718_s22  ;;  %v6321_v22 = vsel %vm678_vm4, %v6307_v26, %v8389_v32  ;;  %v8394_v15 = vunpack.i.h.bf16 %v12467_v51  ;;  %v8378_v27 = vunpack.i.l.bf16 %v12398_v61  ;;  %v8399_v44 = vunpack.i.h.bf16 %v8397_v28 }
 0x90f   :  { %v6320_v13 = vsel %vm678_vm4, %v6306_v6, %v8388_v0  ;;  %v8398_v52 = vunpack.i.l.bf16 %v8397_v28  ;;  %v6335_v63 = vsel %vm693_vm5, %v6321_v22, %v8379_v37  ;;  %v8555_v28 = vpack.i.bf16 %v12409_v49, %v12380_v62 }
 0x910   :  { %v6334_v60 = vsel %vm693_vm5, %v6320_v13, %v8378_v27  ;;  %v8590_v59 = vpack.i.bf16 %v12478_v21, %v12423_v7  ;;  %v8595_v45 = vpack.i.bf16 %v12471_v38, %v12478_v21 }
 0x911   :  { %8626 = vrot.lane.b32.xlu0 %v8625_v25, %s8717_s17  ;;  %v8393_v25 = vunpack.i.l.bf16 %v12467_v51  ;;  %v6351_v51 = vsel %vm710_vm6, %v6335_v63, %v8394_v15  ;;  %v8560_v15 = vpack.i.bf16 %v12423_v7, %v12409_v49 }
 0x912   :  { %8546 = vrot.lane.b32.xlu1 %v8545_v14, %s8719_s23 }
 0x913   :  { %v8402_v16 = vpop.permute.xlu0 %8401  ;;  %v6350_v61 = vsel %vm710_vm6, %v6334_v60, %v8393_v25 }
 0x914   :  { %v8404_v4 = vunpack.i.h.bf16 %v8402_v16  ;;  %v8403_v54 = vunpack.i.l.bf16 %v8402_v16  ;;  %v6366_v0 = vsel %vm727_vm7, %v6350_v61, %v8398_v52  ;;  %v6367_v16 = vsel %vm727_vm7, %v6351_v51, %v8399_v44 }
 0x916   :  { %8551 = vrot.lane.b32.xlu1 %v8550_v33, %s8720_s26  ;;  %v6382_v19 = vsel %vm744_vm8, %v6366_v0, %v8403_v54  ;;  %v6383_v33 = vsel %vm744_vm8, %v6367_v16, %v8404_v4 }
 0x917   :  { %v12550_v10 = vpop.permute.xlu0 %8406 }
 0x918   :  { %v8408_v1 = vunpack.i.l.bf16 %v12550_v10 }
 0x91a   :  { %v12561_v14 = vsel %vm693_vm5, %v6320_v13, %v8408_v1  ;;  %8556 = vrot.lane.b32.xlu1 %v8555_v28, %s8717_s17 }
 0x91b   :  { %v8412_v32 = vpop.permute.xlu0 %8411 }
 0x91c   :  { %v8414_v37 = vunpack.i.h.bf16 %v8412_v32  ;;  %v8413_v26 = vunpack.i.l.bf16 %v8412_v32 }
 0x91e   :  { %v6398_v6 = vsel %vm761_vm9, %v6382_v19, %v8413_v26  ;;  %v6399_v13 = vsel %vm761_vm9, %v6383_v33, %v8414_v37  ;;  %8561 = vrot.lane.b32.xlu1 %v8560_v15, %s8715_s9 }
 0x91f   :  { %v6414_v22 = vpack.c.bf16 %v6399_v13, %v6398_v6 }
 0x921   :  { %6547 = vmatmul.mubr.bf16.vlgmr.msra.gmra.mrb[96].mxu0 %v6414_v22 }
 0x922   :  { %6842 = vmatprep.mubr.msk.bf16.mxu0 %vm663_vm3, %v6417_v18  ;;  %8566 = vrot.lane.b32.xlu1 %v12446_v17, %s8721_s13  ;;  %v12603_v18 = vpop.permute.xlu0 %8416 }
 0x926   :  { %8571 = vrot.lane.b32.xlu1 %v12446_v17, %s8716_s16  ;;  %v12607_v11 = vpop.permute.xlu0 %8421 }
 0x92a   :  { %8576 = vrot.lane.b32.xlu1 %v8575_v12, %s8718_s22 }
 0x92e   :  { %8581 = vrot.lane.b32.xlu1 %v8580_v53, %s8719_s23 }
 0x930   :  { %v12610_v17 = vpop.permute.xlu0 %8426 }
 0x932   :  { %8586 = vrot.lane.b32.xlu1 %v8585_v35, %s8720_s26 }
 0x934   :  { %v12613_v56 = vpop.permute.xlu0 %8431 }
 0x936   :  { %8591 = vrot.lane.b32.xlu1 %v8590_v59, %s8717_s17 }
 0x938   :  { %v12617_v38 = vpop.permute.xlu0 %8436 }
 0x939   :  { %v8439_v23 = vunpack.i.h.bf16 %v12617_v38 }
 0x93a   :  { %8596 = vrot.lane.b32.xlu1 %v8595_v45, %s8715_s9 }
 0x93c   :  { %v12619_v12 = vpop.permute.xlu0 %8441 }
 0x93e   :  { %8601 = vrot.lane.b32.xlu1 %v8600_v41, %s8721_s13 }
 0x940   :  { %v12621_v53 = vpop.permute.xlu0 %8446 }
 0x942   :  { %8606 = vrot.lane.b32.xlu1 %v8600_v41, %s8716_s16 }
 0x944   :  { %v12623_v54 = vpop.permute.xlu0 %8451 }
 0x946   :  { %8611 = vrot.lane.b32.xlu1 %v8610_v8, %s8718_s22 }
 0x948   :  { %v12625_v25 = vpop.permute.xlu0 %8456 }
 0x94a   :  { %8616 = vrot.lane.b32.xlu1 %v8615_v46, %s8719_s23 }
 0x94c   :  { %v12627_v44 = vpop.permute.xlu0 %8461 }
 0x94e   :  { %8621 = vrot.lane.b32.xlu1 %v8620_v34, %s8720_s26 }
 0x950   :  { %v12629_v60 = vpop.permute.xlu0 %8466 }
 0x952   :  { %8631 = vrot.lane.b32.xlu1 %v8630_v43, %s8721_s13 }
 0x95f   :  { %v8472_v35 = vpop.permute.xlu1 %8471 }
 0x960   :  { %v8474_v37 = vunpack.i.h.bf16 %v8472_v35  ;;  %v8473_v26 = vunpack.i.l.bf16 %v8472_v35 }
 0x963   :  { %v8477_v41 = vpop.permute.xlu1 %8476 }
 0x964   :  { %v8479_v34 = vunpack.i.h.bf16 %v8477_v41  ;;  %v8478_v52 = vunpack.i.l.bf16 %v8477_v41 }
 0x966   :  { %v6314_v63 = vsel %vm663_vm3, %v12349_v5, %v8479_v34  ;;  %v6313_v61 = vsel %vm663_vm3, %v12352_v42, %v8478_v52 }
 0x967   :  { %v8482_v8 = vpop.permute.xlu1 %8481 }
 0x968   :  { %v8484_v43 = vunpack.i.h.bf16 %v8482_v8  ;;  %v8483_v1 = vunpack.i.l.bf16 %v8482_v8 }
 0x96a   :  { %v12636_v51 = vsel %vm678_vm4, %v6313_v61, %v8483_v1  ;;  %v6328_v28 = vsel %vm678_vm4, %v6314_v63, %v8484_v43  ;;  %v8423_v1 = vunpack.i.l.bf16 %v12607_v11  ;;  %v8428_v61 = vunpack.i.l.bf16 %v12610_v17 }
 0x96b   :  { %v12641_v22 = vpop.permute.xlu0 %8511  ;;  %v6342_v5 = vsel %vm693_vm5, %v12636_v51, %v8473_v26  ;;  %v6343_v42 = vsel %vm693_vm5, %v6328_v28, %v8474_v37  ;;  %v8419_v37 = vunpack.i.h.bf16 %v12603_v18  ;;  %v8443_v26 = vunpack.i.l.bf16 %v12619_v12 }
 0x96c   :  { %v8487_v46 = vpop.permute.xlu1 %8486  ;;  %v8513_v34 = vunpack.i.l.bf16 %v12641_v22 }
 0x96d   :  { %v8489_v32 = vunpack.i.h.bf16 %v8487_v46  ;;  %v8488_v0 = vunpack.i.l.bf16 %v8487_v46 }
 0x96f   :  { %v6358_v15 = vsel %vm710_vm6, %v6342_v5, %v8488_v0  ;;  %v6359_v59 = vsel %vm710_vm6, %v6343_v42, %v8489_v32  ;;  %v8409_v0 = vunpack.i.h.bf16 %v12550_v10  ;;  %v6308_v5 = vsel %vm663_vm3, %v12198_v58, %v8513_v34 }
 0x970   :  { %v8492_v27 = vpop.permute.xlu1 %8491  ;;  %v8424_v42 = vunpack.i.h.bf16 %v12607_v11  ;;  %v8438_v58 = vunpack.i.l.bf16 %v12617_v38  ;;  %v8458_v34 = vunpack.i.l.bf16 %v12625_v25 }
 0x971   :  { %v8494_v19 = vunpack.i.h.bf16 %v8492_v27  ;;  %v8493_v33 = vunpack.i.l.bf16 %v8492_v27  ;;  %v8418_v27 = vunpack.i.l.bf16 %v12603_v18  ;;  %v8449_v18 = vunpack.i.h.bf16 %v12621_v53 }
 0x973   :  { %v6374_v41 = vsel %vm727_vm7, %v6358_v15, %v8493_v33  ;;  %v6375_v35 = vsel %vm727_vm7, %v6359_v59, %v8494_v19  ;;  %v6352_v33 = vsel %vm710_vm6, %v12561_v14, %v8418_v27  ;;  %v8429_v14 = vunpack.i.h.bf16 %v12610_v17 }
 0x974   :  { %v8497_v4 = vpop.permute.xlu1 %8496  ;;  %v6368_v10 = vsel %vm727_vm7, %v6352_v33, %v8423_v1  ;;  %v8463_v1 = vunpack.i.l.bf16 %v12627_v44 }
 0x975   :  { %v8499_v6 = vunpack.i.h.bf16 %v8497_v4  ;;  %v8498_v13 = vunpack.i.l.bf16 %v8497_v4 }
 0x977   :  { %v6390_v52 = vsel %vm744_vm8, %v6374_v41, %v8498_v13  ;;  %v6391_v43 = vsel %vm744_vm8, %v6375_v35, %v8499_v6  ;;  %v8444_v6 = vunpack.i.h.bf16 %v12619_v12  ;;  %v8448_v13 = vunpack.i.l.bf16 %v12621_v53 }
 0x978   :  { %v12639_v16 = vpop.permute.xlu1 %8501  ;;  %v6384_v12 = vsel %vm744_vm8, %v6368_v10, %v8428_v61  ;;  %v8433_v53 = vunpack.i.l.bf16 %v12613_v56  ;;  %v6309_v41 = vsel %vm663_vm3, %v12207_v2, %v8443_v26  ;;  %v8459_v2 = vunpack.i.h.bf16 %v12625_v25 }
 0x979   :  { %v6323_v17 = vsel %vm678_vm4, %v6309_v41, %v8448_v13  ;;  %v8469_v61 = vunpack.i.h.bf16 %v12629_v60  ;;  %v8503_v10 = vunpack.i.l.bf16 %v12639_v16 }
 0x97b   :  { %v6344_v41 = vsel %vm693_vm5, %v12636_v51, %v8503_v10 }
 0x97c   :  { %v8507_v45 = vpop.permute.xlu1 %8506 }
 0x97d   :  { %v8509_v8 = vunpack.i.h.bf16 %v8507_v45  ;;  %v8508_v46 = vunpack.i.l.bf16 %v8507_v45  ;;  %v8434_v45 = vunpack.i.h.bf16 %v12613_v56  ;;  %v8453_v56 = vunpack.i.l.bf16 %v12623_v54 }
 0x97f   :  { %v6406_v4 = vsel %vm761_vm9, %v6390_v52, %v8508_v46  ;;  %v6407_v63 = vsel %vm761_vm9, %v6391_v43, %v8509_v8  ;;  %v8454_v46 = vunpack.i.h.bf16 %v12623_v54  ;;  %v6400_v52 = vsel %vm761_vm9, %v6384_v12, %v8438_v58 }
 0x980   :  { %v6422_v28 = vpack.c.bf16 %v6407_v63, %v6406_v4  ;;  %v8542_v32 = vpop.permute.xlu1 %8541  ;;  %v8464_v43 = vunpack.i.h.bf16 %v12627_v44  ;;  %v6338_v63 = vsel %vm693_vm5, %v6323_v17, %v8433_v53 }
 0x981   :  { %v8543_v19 = vunpack.i.l.bf16 %v8542_v32  ;;  %v6354_v25 = vsel %vm710_vm6, %v6338_v63, %v8453_v56  ;;  %v8544_v33 = vunpack.i.h.bf16 %v8542_v32 }
 0x982   :  { %6579 = vmatmul.mubr.bf16.vlgmr.msra.gmra.mrb[96].mxu1 %v6422_v28  ;;  %v8468_v28 = vunpack.i.l.bf16 %v12629_v60  ;;  %v6370_v26 = vsel %vm727_vm7, %v6354_v25, %v8458_v34 }
 0x983   :  { %v6322_v15 = vsel %vm678_vm4, %v6308_v5, %v8543_v19  ;;  %6846 = vmatprep.mubr.msk.bf16.mxu1 %vm663_vm3, %v6425_v47  ;;  %v6310_v47 = vsel %vm663_vm3, %v12261_v40, %v8444_v6  ;;  %v6386_v13 = vsel %vm744_vm8, %v6370_v26, %v8463_v1 }
 0x984   :  { %v6337_v59 = vsel %vm693_vm5, %v6322_v15, %v8409_v0  ;;  %v8547_v11 = vpop.permute.xlu1 %8546  ;;  %v6324_v8 = vsel %vm678_vm4, %v6310_v47, %v8449_v18 }
 0x985   :  { %v6353_v36 = vsel %vm710_vm6, %v6337_v59, %v8419_v37  ;;  %v6339_v54 = vsel %vm693_vm5, %v6324_v8, %v8434_v45  ;;  %v8514_v37 = vunpack.i.h.bf16 %v12641_v22  ;;  %v6402_v22 = vsel %vm761_vm9, %v6386_v13, %v8468_v28 }
 0x986   :  { %v6369_v35 = vsel %vm727_vm7, %v6353_v36, %v8424_v42  ;;  %v6355_v0 = vsel %vm710_vm6, %v6339_v54, %v8454_v46  ;;  %v8548_v18 = vunpack.i.l.bf16 %v8547_v11 }
 0x987   :  { %v6385_v27 = vsel %vm744_vm8, %v6369_v35, %v8429_v14  ;;  %v6371_v19 = vsel %vm727_vm7, %v6355_v0, %v8459_v2  ;;  %v6315_v32 = vsel %vm663_vm3, %v12375_v9, %v8514_v37  ;;  %v8504_v14 = vunpack.i.h.bf16 %v12639_v16 }
 0x988   :  { %v8552_v38 = vpop.permute.xlu1 %8551  ;;  %v6401_v40 = vsel %vm761_vm9, %v6385_v27, %v8439_v23  ;;  %v6387_v5 = vsel %vm744_vm8, %v6371_v19, %v8464_v43  ;;  %v6329_v24 = vsel %vm678_vm4, %v6315_v32, %v8544_v33  ;;  %v6360_v9 = vsel %vm710_vm6, %v6344_v41, %v8548_v18 }
 0x989   :  { %v6416_v4 = vpack.c.bf16 %v6401_v40, %v6400_v52  ;;  %v6403_v42 = vsel %vm761_vm9, %v6387_v5, %v8469_v61  ;;  %v8554_v12 = vunpack.i.h.bf16 %v8552_v38  ;;  %v8553_v58 = vunpack.i.l.bf16 %v8552_v38 }
 0x98a   :  { %v6418_v59 = vpack.c.bf16 %v6403_v42, %v6402_v22  ;;  %v6345_v36 = vsel %vm693_vm5, %v6329_v24, %v8504_v14 }
 0x98b   :  { %6555 = vmatmul.mubr.bf16.gmra.mrb[100].mxu0 %v6416_v4  ;;  %v6376_v16 = vsel %vm727_vm7, %v6360_v9, %v8553_v58  ;;  %v12976_v9 = vpack.c.bf16 %v12507_v57, %v12513_v55 }
 0x98c   :  { %v8557_v6 = vpop.permute.xlu1 %8556  ;;  %6843 = vmatprep.mubr.msk.bf16.mxu0 %vm663_vm3, %v6419_v29  ;;  %v8549_v29 = vunpack.i.h.bf16 %v8547_v11 }
 0x98d   :  { %v8559_v45 = vunpack.i.h.bf16 %v8557_v6  ;;  %v8558_v53 = vunpack.i.l.bf16 %v8557_v6 }
 0x98e   :  { %v6361_v23 = vsel %vm710_vm6, %v6345_v36, %v8549_v29 }
 0x98f   :  { %v6377_v11 = vsel %vm727_vm7, %v6361_v23, %v8554_v12  ;;  %v6392_v51 = vsel %vm744_vm8, %v6376_v16, %v8558_v53 }
 0x990   :  { %v8562_v15 = vpop.permute.xlu1 %8561  ;;  %v6393_v8 = vsel %vm744_vm8, %v6377_v11, %v8559_v45 }
 0x991   :  { %v8564_v19 = vunpack.i.h.bf16 %v8562_v15  ;;  %v8563_v33 = vunpack.i.l.bf16 %v8562_v15 }
 0x993   :  { %6563 = vmatmul.mubr.bf16.gmra.mrb[104].mxu0 %v6418_v59 }
 0x994   :  { %v8567_v47 = vpop.permute.xlu1 %8566  ;;  %6844 = vmatprep.mubr.msk.bf16.mxu0 %vm663_vm3, %v6421_v39  ;;  %v12744_v39 = vpop.permute.xlu0 %8516 }
 0x995   :  { %v8569_v17 = vunpack.i.h.bf16 %v8567_v47  ;;  %v8568_v35 = vunpack.i.l.bf16 %v8567_v47  ;;  %v8519_v36 = vunpack.i.h.bf16 %v12744_v39 }
 0x997   :  { %v6408_v46 = vsel %vm761_vm9, %v6392_v51, %v8568_v35  ;;  %v6409_v56 = vsel %vm761_vm9, %v6393_v8, %v8569_v17 }
 0x998   :  { %v8572_v27 = vpop.permute.xlu1 %8571  ;;  %v6424_v2 = vpack.c.bf16 %v6409_v56, %v6408_v46  ;;  %v12746_v38 = vpop.permute.xlu0 %8521  ;;  %v6312_v46 = vsel %vm663_vm3, %v12301_v20, %v8519_v36 }
 0x999   :  { %v8574_v52 = vunpack.i.h.bf16 %v8572_v27  ;;  %v8573_v40 = vunpack.i.l.bf16 %v8572_v27  ;;  %v8524_v23 = vunpack.i.h.bf16 %v12746_v38  ;;  %v8518_v27 = vunpack.i.l.bf16 %v12744_v39 }
 0x99a   :  { %6587 = vmatmul.mubr.bf16.gmra.mrb[100].mxu1 %v6424_v2 }
 0x99b   :  { %6847 = vmatprep.mubr.msk.bf16.mxu1 %vm663_vm3, %v6427_v30  ;;  %v6317_v54 = vsel %vm663_vm3, %v12409_v49, %v8574_v52  ;;  %v6316_v3 = vsel %vm663_vm3, %v12380_v62, %v8573_v40  ;;  %v6326_v57 = vsel %vm678_vm4, %v6312_v46, %v8524_v23 }
 0x99c   :  { %v8577_v31 = vpop.permute.xlu1 %8576  ;;  %v12756_v26 = vpop.permute.xlu0 %8526 }
 0x99d   :  { %v8579_v1 = vunpack.i.h.bf16 %v8577_v31  ;;  %v8578_v4 = vunpack.i.l.bf16 %v8577_v31  ;;  %v8529_v16 = vunpack.i.h.bf16 %v12756_v26  ;;  %v8523_v31 = vunpack.i.l.bf16 %v12746_v38 }
 0x99f   :  { %v6330_v30 = vsel %vm678_vm4, %v6316_v3, %v8578_v4  ;;  %v6331_v28 = vsel %vm678_vm4, %v6317_v54, %v8579_v1  ;;  %v8528_v4 = vunpack.i.l.bf16 %v12756_v26 }
 0x9a0   :  { %v8582_v50 = vpop.permute.xlu1 %8581  ;;  %v6346_v22 = vsel %vm693_vm5, %v6330_v30, %v8563_v33  ;;  %v6347_v62 = vsel %vm693_vm5, %v6331_v28, %v8564_v19  ;;  %v8532_v58 = vpop.permute.xlu0 %8531  ;;  %v6311_v28 = vsel %vm663_vm3, %v12267_v48, %v8518_v27 }
 0x9a1   :  { %v8584_v25 = vunpack.i.h.bf16 %v8582_v50  ;;  %v8583_v0 = vunpack.i.l.bf16 %v8582_v50  ;;  %v8534_v56 = vunpack.i.h.bf16 %v8532_v58  ;;  %v6341_v50 = vsel %vm693_vm5, %v6326_v57, %v8529_v16 }
 0x9a2   :  { %v6325_v26 = vsel %vm678_vm4, %v6311_v28, %v8523_v31 }
 0x9a3   :  { %v6362_v42 = vsel %vm710_vm6, %v6346_v22, %v8583_v0  ;;  %v6363_v32 = vsel %vm710_vm6, %v6347_v62, %v8584_v25  ;;  %v6357_v54 = vsel %vm710_vm6, %v6341_v50, %v8534_v56  ;;  %v6340_v48 = vsel %vm693_vm5, %v6325_v26, %v8528_v4 }
 0x9a4   :  { %v8587_v34 = vpop.permute.xlu1 %8586  ;;  %v8537_v11 = vpop.permute.xlu0 %8536 }
 0x9a5   :  { %v8589_v6 = vunpack.i.h.bf16 %v8587_v34  ;;  %v8588_v13 = vunpack.i.l.bf16 %v8587_v34  ;;  %v8539_v55 = vunpack.i.h.bf16 %v8537_v11  ;;  %v8538_v25 = vunpack.i.l.bf16 %v8537_v11 }
 0x9a7   :  { %v6378_v24 = vsel %vm727_vm7, %v6362_v42, %v8588_v13  ;;  %v6379_v29 = vsel %vm727_vm7, %v6363_v32, %v8589_v6 }
 0x9a8   :  { %v12748_v63 = vpop.permute.xlu1 %8591  ;;  %v8627_v3 = vpop.permute.xlu0 %8626 }
 0x9a9   :  { %v8594_v5 = vunpack.i.h.bf16 %v12748_v63  ;;  %v8593_v49 = vunpack.i.l.bf16 %v12748_v63 }
 0x9ab   :  { %v6394_v14 = vsel %vm744_vm8, %v6378_v24, %v8593_v49  ;;  %v6395_v12 = vsel %vm744_vm8, %v6379_v29, %v8594_v5  ;;  %v8628_v49 = vunpack.i.l.bf16 %v8627_v3  ;;  %v8629_v24 = vunpack.i.h.bf16 %v8627_v3 }
 0x9ac   :  { %v8597_v37 = vpop.permute.xlu1 %8596 }
 0x9ad   :  { %v8599_v38 = vunpack.i.h.bf16 %v8597_v37  ;;  %v8598_v30 = vunpack.i.l.bf16 %v8597_v37 }
 0x9b0   :  { %v12764_v10 = vpop.permute.xlu1 %8601 }
 0x9b1   :  { %v8604_v18 = vunpack.i.h.bf16 %v12764_v10  ;;  %v8603_v15 = vunpack.i.l.bf16 %v12764_v10 }
 0x9b3   :  { %v6410_v59 = vsel %vm761_vm9, %v6394_v14, %v8603_v15  ;;  %v6411_v45 = vsel %vm761_vm9, %v6395_v12, %v8604_v18 }
 0x9b4   :  { %v8607_v53 = vpop.permute.xlu1 %8606  ;;  %v6426_v41 = vpack.c.bf16 %v6411_v45, %v6410_v59 }
 0x9b5   :  { %v8609_v17 = vunpack.i.h.bf16 %v8607_v53  ;;  %v8608_v35 = vunpack.i.l.bf16 %v8607_v53 }
 0x9b6   :  { %6595 = vmatmul.mubr.bf16.gmra.mrb[104].mxu1 %v6426_v41 }
 0x9b7   :  { %6848 = vmatprep.mubr.msk.bf16.mxu1 %vm663_vm3, %v12976_v9  ;;  %v6319_v34 = vsel %vm663_vm3, %v12478_v21, %v8609_v17  ;;  %v6318_v52 = vsel %vm663_vm3, %v12423_v7, %v8608_v35  ;;  %v8533_v21 = vunpack.i.l.bf16 %v8532_v58  ;;  %v6373_v7 = vsel %vm727_vm7, %v6357_v54, %v8539_v55  ;;  %v12831_v9 = vld [vmem:[%s12919_s6] ss:$0 sm:$0xff] }
 0x9b8   :  { %v8612_v47 = vpop.permute.xlu1 %8611  ;;  %v6389_v15 = vsel %vm744_vm8, %v6373_v7, %v8464_v43 }
 0x9b9   :  { %v8614_v51 = vunpack.i.h.bf16 %v8612_v47  ;;  %v8613_v8 = vunpack.i.l.bf16 %v8612_v47  ;;  %v6356_v32 = vsel %vm710_vm6, %v6340_v48, %v8533_v21  ;;  %v6405_v44 = vsel %vm761_vm9, %v6389_v15, %v8469_v61 }
 0x9ba   :  { %v6372_v12 = vsel %vm727_vm7, %v6356_v32, %v8538_v25 }
 0x9bb   :  { %v6332_v40 = vsel %vm678_vm4, %v6318_v52, %v8613_v8  ;;  %v6333_v20 = vsel %vm678_vm4, %v6319_v34, %v8614_v51  ;;  %v6388_v45 = vsel %vm744_vm8, %v6372_v12, %v8628_v49 }
 0x9bc   :  { %v8617_v2 = vpop.permute.xlu1 %8616  ;;  %v6348_v19 = vsel %vm693_vm5, %v6332_v40, %v8598_v30  ;;  %v6349_v33 = vsel %vm693_vm5, %v6333_v20, %v8599_v38 }
 0x9bd   :  { %v8619_v1 = vunpack.i.h.bf16 %v8617_v2  ;;  %v8618_v39 = vunpack.i.l.bf16 %v8617_v2 }
 0x9bf   :  { %v6364_v22 = vsel %vm710_vm6, %v6348_v19, %v8618_v39  ;;  %v6365_v37 = vsel %vm710_vm6, %v6349_v33, %v8619_v1 }
 0x9c0   :  { %v8622_v0 = vpop.permute.xlu1 %8621 }
 0x9c1   :  { %v8624_v6 = vunpack.i.h.bf16 %v8622_v0  ;;  %v8623_v13 = vunpack.i.l.bf16 %v8622_v0 }
 0x9c3   :  { %v6380_v62 = vsel %vm727_vm7, %v6364_v22, %v8623_v13  ;;  %v6381_v42 = vsel %vm727_vm7, %v6365_v37, %v8624_v6 }
 0x9c4   :  { %v8632_v29 = vpop.permute.xlu1 %8631  ;;  %v6397_v14 = vsel %vm744_vm8, %v6381_v42, %v8594_v5  ;;  %v6396_v53 = vsel %vm744_vm8, %v6380_v62, %v8629_v24 }
 0x9c5   :  { %v8634_v58 = vunpack.i.h.bf16 %v8632_v29  ;;  %v8633_v59 = vunpack.i.l.bf16 %v8632_v29  ;;  %v6413_v63 = vsel %vm761_vm9, %v6397_v14, %v8604_v18 }
 0x9c7   :  { %v6404_v41 = vsel %vm761_vm9, %v6388_v45, %v8633_v59  ;;  %v6412_v43 = vsel %vm761_vm9, %v6396_v53, %v8634_v58 }
 0x9c8   :  { %v6420_v5 = vpack.c.bf16 %v6405_v44, %v6404_v41  ;;  %v6428_v36 = vpack.c.bf16 %v6413_v63, %v6412_v43 }
 0x9ca   :  { %6571 = vmatmul.mubr.bf16.gmra.mrb[108].mxu0 %v6420_v5  ;;  %6603 = vmatmul.mubr.bf16.gmra.mrb[108].mxu1 %v6428_v36 }
 0x9f4   :  { %v6548_v23 = vpop.f32.mrb[96].mxu0 }
 0x9f5   :  { %v6549_v60 = vadd.f32 %v12831_v9, %v6548_v23  ;;  %v6550_v47 = vpop.f32.mrb[97].mxu0 }
 0x9f6   :  { %v6551_v61 = vpop.f32.mrb[98].mxu0 }
 0x9f7   :  { %v6611_v16 = vmax.f32 %v6549_v60, 0.0  ;;  %v6552_v11 = vadd.f32 %v12831_v9, %v6551_v61  ;;  %v6553_v10 = vpop.f32.mrb[99].mxu0 }
 0x9f9   :  { %6627 = vst.msk [vmem:[%s12920_s7] sm:$0xff] %vm710_vm6, %v6611_v16  ;;  %v6612_v18 = vmax.f32 %v6552_v11, 0.0 }
 0x9fb   :  { %6628 = vst.msk [vmem:[%s12920_s7 + $0x8] sm:$0xff] %vm710_vm6, %v6612_v18 }
 0xa55   :  { %v6580_v17 = vpop.f32.mrb[96].mxu1 }
 0xa56   :  { %v6581_v35 = vadd.f32 %v12831_v9, %v6580_v17  ;;  %v6582_v51 = vpop.f32.mrb[97].mxu1 }
 0xa57   :  { %v6583_v8 = vpop.f32.mrb[98].mxu1 }
 0xa58   :  { %v6619_v46 = vmax.f32 %v6581_v35, 0.0  ;;  %v6584_v56 = vadd.f32 %v12831_v9, %v6583_v8  ;;  %v6585_v27 = vpop.f32.mrb[99].mxu1 }
 0xa5a   :  { %6635 = vst.msk [vmem:[%s12920_s7 + $0x40] sm:$0xff] %vm710_vm6, %v6619_v46  ;;  %v6620_v57 = vmax.f32 %v6584_v56, 0.0 }
 0xa5c   :  { %6636 = vst.msk [vmem:[%s12920_s7 + $0x48] sm:$0xff] %vm710_vm6, %v6620_v57 }
 0xa5e   :  { %v6556_v55 = vpop.f32.mrb[100].mxu0 }
 0xa5f   :  { %v6557_v2 = vadd.f32 %v12831_v9, %v6556_v55  ;;  %v6558_v31 = vpop.f32.mrb[101].mxu0 }
 0xa60   :  { %v6559_v50 = vpop.f32.mrb[102].mxu0 }
 0xa61   :  { %v6613_v34 = vmax.f32 %v6557_v2, 0.0  ;;  %v6560_v52 = vadd.f32 %v12831_v9, %v6559_v50  ;;  %v6561_v40 = vpop.f32.mrb[103].mxu0 }
 0xa63   :  { %6629 = vst.msk [vmem:[%s12920_s7 + $0x10] sm:$0xff] %vm710_vm6, %v6613_v34  ;;  %v6614_v20 = vmax.f32 %v6560_v52, 0.0 }
 0xa65   :  { %6630 = vst.msk [vmem:[%s12920_s7 + $0x18] sm:$0xff] %vm710_vm6, %v6614_v20 }
 0xa66   :  { %v6564_v1 = vpop.f32.mrb[104].mxu0 }
 0xa67   :  { %v6565_v39 = vadd.f32 %v12831_v9, %v6564_v1  ;;  %v6566_v4 = vpop.f32.mrb[105].mxu0 }
 0xa68   :  { %v6567_v54 = vpop.f32.mrb[106].mxu0 }
 0xa69   :  { %v6615_v3 = vmax.f32 %v6565_v39, 0.0  ;;  %v6568_v38 = vadd.f32 %v12831_v9, %v6567_v54  ;;  %v6569_v30 = vpop.f32.mrb[107].mxu0 }
 0xa6b   :  { %6631 = vst.msk [vmem:[%s12920_s7 + $0x20] sm:$0xff] %vm710_vm6, %v6615_v3  ;;  %v6616_v28 = vmax.f32 %v6568_v38, 0.0 }
 0xa6d   :  { %6632 = vst.msk [vmem:[%s12920_s7 + $0x28] sm:$0xff] %vm710_vm6, %v6616_v28  ;;  %v6588_v21 = vpop.f32.mrb[100].mxu1 }
 0xa6e   :  { %v6589_v25 = vadd.f32 %v12831_v9, %v6588_v21  ;;  %v6590_v7 = vpop.f32.mrb[101].mxu1 }
 0xa6f   :  { %v6591_v0 = vpop.f32.mrb[102].mxu1 }
 0xa70   :  { %v6621_v19 = vmax.f32 %v6589_v25, 0.0  ;;  %v6592_v33 = vadd.f32 %v12831_v9, %v6591_v0  ;;  %v6593_v6 = vpop.f32.mrb[103].mxu1 }
 0xa72   :  { %6637 = vst.msk [vmem:[%s12920_s7 + $0x50] sm:$0xff] %vm710_vm6, %v6621_v19  ;;  %v6622_v13 = vmax.f32 %v6592_v33, 0.0 }
 0xa74   :  { %6638 = vst.msk [vmem:[%s12920_s7 + $0x58] sm:$0xff] %vm710_vm6, %v6622_v13 }
 0xa89   :  { %v6596_v26 = vpop.f32.mrb[104].mxu1 }
 0xa8a   :  { %v6597_v49 = vadd.f32 %v12831_v9, %v6596_v26  ;;  %v6598_v22 = vpop.f32.mrb[105].mxu1 }
 0xa8b   :  { %v6599_v37 = vpop.f32.mrb[106].mxu1 }
 0xa8c   :  { %v6623_v48 = vmax.f32 %v6597_v49, 0.0  ;;  %v6600_v62 = vadd.f32 %v12831_v9, %v6599_v37  ;;  %v6601_v42 = vpop.f32.mrb[107].mxu1 }
 0xa8e   :  { %6639 = vst.msk [vmem:[%s12920_s7 + $0x60] sm:$0xff] %vm710_vm6, %v6623_v48  ;;  %v6624_v32 = vmax.f32 %v6600_v62, 0.0 }
 0xa90   :  { %6640 = vst.msk [vmem:[%s12920_s7 + $0x68] sm:$0xff] %vm710_vm6, %v6624_v32 }
 0xa9d   :  { %v6572_v24 = vpop.f32.mrb[108].mxu0  ;;  %v6604_v29 = vpop.f32.mrb[108].mxu1 }
 0xa9e   :  { %v6573_v15 = vadd.f32 %v12831_v9, %v6572_v24  ;;  %v6605_v14 = vadd.f32 %v12831_v9, %v6604_v29  ;;  %v6574_v12 = vpop.f32.mrb[109].mxu0  ;;  %v6606_v58 = vpop.f32.mrb[109].mxu1 }
 0xa9f   :  { %v6575_v59 = vpop.f32.mrb[110].mxu0  ;;  %v6607_v45 = vpop.f32.mrb[110].mxu1 }
 0xaa0   :  { %v6617_v53 = vmax.f32 %v6573_v15, 0.0  ;;  %v6625_v41 = vmax.f32 %v6605_v14, 0.0  ;;  %v6576_v44 = vadd.f32 %v12831_v9, %v6575_v59  ;;  %v6608_v43 = vadd.f32 %v12831_v9, %v6607_v45  ;;  %v6577_v63 = vpop.f32.mrb[111].mxu0  ;;  %v6609_v5 = vpop.f32.mrb[111].mxu1 }
 0xaa2   :  { %6633 = vst.msk [vmem:[%s12920_s7 + $0x30] sm:$0xff] %vm710_vm6, %v6617_v53  ;;  %6641 = vst.msk [vmem:[%s12920_s7 + $0x70] sm:$0xff] %vm710_vm6, %v6625_v41  ;;  %v6618_v36 = vmax.f32 %v6576_v44, 0.0  ;;  %v6626_v23 = vmax.f32 %v6608_v43, 0.0 }
 0xaa4   :  { %6634 = vst.msk [vmem:[%s12920_s7 + $0x38] sm:$0xff] %vm710_vm6, %v6618_v36  ;;  %6642 = vst.msk [vmem:[%s12920_s7 + $0x78] sm:$0xff] %vm710_vm6, %v6626_v23 }

</bundles_post_ra>
